<compile_context>
chip_gen: v5e
topology: v5e:2x2
jax: 0.10.0
libtpu: 0.0.40
codegen_flags: <defaults>
</compile_context>

<pallas_src>
import functools

import jax
import jax.numpy as jnp
from jax import lax
from jax.experimental import pallas as pl
from jax.experimental.pallas import tpu as pltpu


def _pick_tile(total, target, multiple=1):
    """Largest divisor of `total` that is <= target and a multiple of `multiple`."""
    best = None
    for d in range(1, total + 1):
        if total % d == 0 and d % multiple == 0 and d <= target:
            best = d
    return best if best is not None else total


def _default_vmem_limit():
    # v5e/v6e: 128 MiB VMEM per core, v7x: 64 MiB per TC.  Leave headroom.
    try:
        cap = pltpu.get_tpu_info().vmem_capacity_bytes
    except Exception:
        cap = 64 * 1024 * 1024
    return max(32 * 1024 * 1024, min(int(cap) * 3 // 4, 100 * 1024 * 1024))


# ----------------------------------------------------------------------------
# Host-side weight packing.
#
# Packed activation layouts (all "column-tap-packed": low-res column w holds the
# two up-res columns 2w and 2w+1 stacked along channels):
#   cat_s channels: [ up(dj=0) | up(dj=1) | x2(dj=0) | x2(dj=1) ]   (K = 2*Chalf+2*Ch)
#   c1_s  channels: [ conv1(q=0) | conv1(q=1) ]                      (K = 2*Cout)
#   output channels:[ conv2(q=0) | conv2(q=1) ]  -> free reshape to (.., 2W, Cout)
# For each output column parity q, a 3x3 conv needs only two packed columns
# (offsets q+a, a in {0,1}), with per-(q,dr,a) weight blocks built below.
# ----------------------------------------------------------------------------
def _pack_weights(up_w, up_b, c1_w, c1_b, c2_w, c2_b):
    Cin, Chalf = up_w.shape[0], up_w.shape[1]
    Cout, Cin_tot = c1_w.shape[0], c1_w.shape[1]
    Ch = Cin_tot - Chalf

    # Deconv: Wd[di][i, dj*Chalf + m] = up_w[i, m, di, dj]
    wd = jnp.transpose(up_w, (2, 0, 3, 1)).reshape(2, Cin, 2 * Chalf)
    wd = wd.astype(jnp.bfloat16)
    bd = jnp.tile(up_b, 2)[None, :].astype(jnp.float32)            # (1, 2*Chalf)

    # conv1 (OIHW -> HWIO), split into up-path / skip-path halves.
    w1 = jnp.transpose(c1_w, (2, 3, 1, 0))                         # (3,3,Cin_tot,Cout)
    w1u, w1x = w1[:, :, :Chalf, :], w1[:, :, Chalf:, :]
    zu = jnp.zeros((Chalf, Cout), w1.dtype)
    zx = jnp.zeros((Ch, Cout), w1.dtype)

    def cat1(u0, u1, x0, x1):
        return jnp.concatenate([u0, u1, x0, x1], axis=0)

    w1pk = []
    for q in range(2):
        for dr in range(3):
            for a in range(2):
                if q == 0 and a == 0:
                    blk = cat1(zu, w1u[dr, 0], zx, w1x[dr, 0])
                elif q == 0 and a == 1:
                    blk = cat1(w1u[dr, 1], w1u[dr, 2], w1x[dr, 1], w1x[dr, 2])
                elif q == 1 and a == 0:
                    blk = cat1(w1u[dr, 0], w1u[dr, 1], w1x[dr, 0], w1x[dr, 1])
                else:
                    blk = cat1(w1u[dr, 2], zu, w1x[dr, 2], zx)
                w1pk.append(blk)
    w1pk = jnp.stack(w1pk, axis=0).astype(jnp.bfloat16)            # (12, KC, Cout)
    b1 = c1_b[None, :].astype(jnp.float32)

    # conv2 (OIHW -> HWIO), packed over conv1's column parity.
    w2 = jnp.transpose(c2_w, (2, 3, 1, 0))                         # (3,3,Cout,Cout)
    zo = jnp.zeros((Cout, Cout), w2.dtype)
    w2pk = []
    for q in range(2):
        for dr in range(3):
            for a in range(2):
                if q == 0 and a == 0:
                    blk = jnp.concatenate([zo, w2[dr, 0]], axis=0)
                elif q == 0 and a == 1:
                    blk = jnp.concatenate([w2[dr, 1], w2[dr, 2]], axis=0)
                elif q == 1 and a == 0:
                    blk = jnp.concatenate([w2[dr, 0], w2[dr, 1]], axis=0)
                else:
                    blk = jnp.concatenate([w2[dr, 2], zo], axis=0)
                w2pk.append(blk)
    w2pk = jnp.stack(w2pk, axis=0).astype(jnp.bfloat16)            # (12, 2*Cout, Cout)
    b2 = c2_b[None, :].astype(jnp.float32)
    return wd, bd, w1pk, b1, w2pk, b2


# ----------------------------------------------------------------------------
# Fused kernel: deconv (in-VMEM) + concat + conv3x3+ReLU + conv3x3+ReLU
# over a tile of T up-resolution rows.
# ----------------------------------------------------------------------------
def _upsample_kernel(x1_top, x1_mid, x1_bot, x2_top, x2_mid, x2_bot,
                     wd_ref, bd_ref, w1_ref, b1_ref, w2_ref, b2_ref,
                     o_ref, cat_s, c1_s, *, T, Wlow, CU, C2, Cout):
    bf16 = jnp.bfloat16
    i = pl.program_id(1)
    last = pl.num_programs(1) - 1
    Hx = T // 2 + 2
    KC = CU + C2

    # ---- deconv: x1 window -> column-tap-packed up rows (row-interleaved) ----
    xwin = jnp.concatenate([x1_top[0], x1_mid[0], x1_bot[0]], axis=0)   # (Hx, Wlow, Cin)
    for di in range(2):
        z = lax.dot_general(xwin, wd_ref[di],
                            dimension_numbers=(((2,), (0,)), ((), ())),
                            preferred_element_type=jnp.float32)
        z = (z + bd_ref[...].reshape(1, 1, -1)).astype(bf16)            # (Hx, Wlow, CU)
        for hl in range(Hx):
            cat_s[2 * hl + di, 1:1 + Wlow, 0:CU] = z[hl]

    # ---- skip connection (already column-packed bf16) ----
    cat_s[0:2, 1:1 + Wlow, CU:KC] = x2_top[0]
    cat_s[2:2 + T, 1:1 + Wlow, CU:KC] = x2_mid[0]
    cat_s[2 + T:4 + T, 1:1 + Wlow, CU:KC] = x2_bot[0]

    # zero column padding (packed columns -1 and Wlow)
    zc = jnp.zeros((T + 4, 1, KC), bf16)
    cat_s[:, 0:1, :] = zc
    cat_s[:, 1 + Wlow:2 + Wlow, :] = zc

    # rows outside the image are the conv zero padding
    @pl.when(i == 0)
    def _():
        cat_s[0:2, :, :] = jnp.zeros((2, Wlow + 2, KC), bf16)

    @pl.when(i == last)
    def _():
        cat_s[T + 2:T + 4, :, :] = jnp.zeros((2, Wlow + 2, KC), bf16)

    # ---- conv1 (3x3, pad=1) + bias + ReLU, per output column parity q ----
    for q in range(2):
        acc = jnp.zeros((T + 2, Wlow, Cout), jnp.float32)
        for dr in range(3):
            for a in range(2):
                acc = acc + lax.dot_general(
                    cat_s[dr:dr + T + 2, q + a:q + a + Wlow, :],
                    w1_ref[(q * 3 + dr) * 2 + a],
                    dimension_numbers=(((2,), (0,)), ((), ())),
                    preferred_element_type=jnp.float32)
        out1 = jnp.maximum(acc + b1_ref[...].reshape(1, 1, -1), 0.0)
        c1_s[0:T + 2, 1:1 + Wlow, q * Cout:(q + 1) * Cout] = out1.astype(bf16)

    zc1 = jnp.zeros((T + 2, 1, 2 * Cout), bf16)
    c1_s[:, 0:1, :] = zc1
    c1_s[:, 1 + Wlow:2 + Wlow, :] = zc1

    # conv1 rows that fall outside the image are conv2's zero padding
    @pl.when(i == 0)
    def _():
        c1_s[0:1, :, :] = jnp.zeros((1, Wlow + 2, 2 * Cout), bf16)

    @pl.when(i == last)
    def _():
        c1_s[T + 1:T + 2, :, :] = jnp.zeros((1, Wlow + 2, 2 * Cout), bf16)

    # ---- conv2 (3x3, pad=1) + bias + ReLU, per output column parity q ----
    for q in range(2):
        acc = jnp.zeros((T, Wlow, Cout), jnp.float32)
        for dr in range(3):
            for a in range(2):
                acc = acc + lax.dot_general(
                    c1_s[dr:dr + T, q + a:q + a + Wlow, :],
                    w2_ref[(q * 3 + dr) * 2 + a],
                    dimension_numbers=(((2,), (0,)), ((), ())),
                    preferred_element_type=jnp.float32)
        out2 = jnp.maximum(acc + b2_ref[...].reshape(1, 1, -1), 0.0)
        o_ref[0, :, :, q * Cout:(q + 1) * Cout] = out2.astype(o_ref.dtype)


# ----------------------------------------------------------------------------
# UpSample.forward
# ----------------------------------------------------------------------------
def upsample_forward(x1_nchw, x2_nchw, params, tile_rows=32):
    x1 = jnp.transpose(x1_nchw, (0, 2, 3, 1)).astype(jnp.bfloat16)   # (N, H, W, Cin)
    x2 = jnp.transpose(x2_nchw, (0, 2, 3, 1)).astype(jnp.bfloat16)   # (N, 2H, 2W, Ch)

    N, H, Wlow, Cin = x1.shape
    _, Hup, Wup, Ch = x2.shape
    Chalf = params["up_w"].shape[1]
    Cout = params["c1_w"].shape[0]
    CU, C2 = 2 * Chalf, 2 * Ch
    KC = CU + C2

    # Free (contiguous) column-packing of the skip connection:
    #   x2p[n, r, w, dj*Ch + m] == x2[n, r, 2w + dj, m]
    x2p = x2.reshape(N, Hup, Wlow, C2)

    wd, bd, w1pk, b1, w2pk, b2 = _pack_weights(
        params["up_w"], params["up_b"], params["c1_w"], params["c1_b"],
        params["c2_w"], params["c2_b"])

    T = _pick_tile(Hup, tile_rows, multiple=2)
    T2 = T // 2
    n_t = Hup // T

    main_map = lambda n, i: (n, i, 0, 0)
    x1_top_map = lambda n, i: (n, jnp.maximum(i * T2 - 1, 0), 0, 0)
    x1_bot_map = lambda n, i: (n, jnp.minimum(i * T2 + T2, H - 1), 0, 0)
    x2_top_map = lambda n, i: (n, jnp.maximum(i * T2 - 1, 0), 0, 0)
    x2_bot_map = lambda n, i: (n, jnp.minimum(i * T2 + T2, Hup // 2 - 1), 0, 0)
    const3 = lambda n, i: (0, 0, 0)
    const2 = lambda n, i: (0, 0)

    macs = (N * H * Wlow * Cin * 2 * CU
            + N * Hup * Wlow * 2 * 6 * KC * Cout
            + N * Hup * Wlow * 2 * 6 * 2 * Cout * Cout)
    bytes_acc = (int(x1.size) * 2 + int(x2p.size) * 2
                 + N * Hup * Wlow * 2 * Cout * 4
                 + (int(wd.size) + int(w1pk.size) + int(w2pk.size)) * 2)
    cost = pl.CostEstimate(flops=2 * int(macs), transcendentals=0,
                           bytes_accessed=int(bytes_acc))

    kernel = functools.partial(_upsample_kernel, T=T, Wlow=Wlow, CU=CU, C2=C2,
                               Cout=Cout)
    out_packed = pl.pallas_call(
        kernel,
        out_shape=jax.ShapeDtypeStruct((N, Hup, Wlow, 2 * Cout), jnp.float32),
        grid=(N, n_t),
        in_specs=[
            pl.BlockSpec((1, 1, Wlow, Cin), x1_top_map),
            pl.BlockSpec((1, T2, Wlow, Cin), main_map),
            pl.BlockSpec((1, 1, Wlow, Cin), x1_bot_map),
            pl.BlockSpec((1, 2, Wlow, C2), x2_top_map),
            pl.BlockSpec((1, T, Wlow, C2), main_map),
            pl.BlockSpec((1, 2, Wlow, C2), x2_bot_map),
            pl.BlockSpec((2, Cin, CU), const3),
            pl.BlockSpec((1, CU), const2),
            pl.BlockSpec((12, KC, Cout), const3),
            pl.BlockSpec((1, Cout), const2),
            pl.BlockSpec((12, 2 * Cout, Cout), const3),
            pl.BlockSpec((1, Cout), const2),
        ],
        out_specs=pl.BlockSpec((1, T, Wlow, 2 * Cout), main_map),
        scratch_shapes=[
            pltpu.VMEM((T + 4, Wlow + 2, KC), jnp.bfloat16),
            pltpu.VMEM((T + 2, Wlow + 2, 2 * Cout), jnp.bfloat16),
        ],
        compiler_params=pltpu.CompilerParams(
            dimension_semantics=("parallel", "parallel"),
            vmem_limit_bytes=_default_vmem_limit()),
        cost_estimate=cost,
    )(x1, x1, x1, x2p, x2p, x2p, wd, bd, w1pk, b1, w2pk, b2)

    out = out_packed.reshape(N, Hup, Wup, Cout)   # free: undo the column packing
    return jnp.transpose(out, (0, 3, 1, 2))       # back to NCHW


# ----------------------------------------------------------------------------
# Pure-JAX reference (mirrors the kernel's bf16-operand / f32-accum numerics)
# ----------------------------------------------------------------------------
def reference_forward(x1_nchw, x2_nchw, p):
    q = lambda a: a.astype(jnp.bfloat16).astype(jnp.float32)
    x1 = jnp.transpose(x1_nchw, (0, 2, 3, 1))
    x2 = jnp.transpose(x2_nchw, (0, 2, 3, 1))
    N, H, W, Cin = x1.shape
    Chalf = Cin // 2
    wt = jnp.transpose(p["up_w"], (0, 2, 3, 1))     # (Cin, 2, 2, Chalf)
    y = jnp.einsum("nhwc,cdeo->nhdweo", q(x1), q(wt)).reshape(N, 2 * H, 2 * W, Chalf)
    y = q(y + p["up_b"])
    x = jnp.concatenate([y, q(x2)], axis=-1)

    def conv(xin, w_oihw, b):
        w = q(jnp.transpose(w_oihw, (2, 3, 1, 0)))
        out = jax.lax.conv_general_dilated(
            xin, w, (1, 1), [(1, 1), (1, 1)],
            dimension_numbers=("NHWC", "HWIO", "NHWC"))
        return jnp.maximum(out + b, 0.0)

    h = q(conv(x, p["c1_w"], p["c1_b"]))
    h = conv(h, p["c2_w"], p["c2_b"])
    return jnp.transpose(h, (0, 3, 1, 2))


if __name__ == "__main__":
    in_channels, out_channels = 8, 4
    N, H, W = 2, 12, 16     # x1 spatial; x2 is 2x larger
    key = jax.random.PRNGKey(0)
    ks = jax.random.split(key, 8)

    params = {
        # nn.ConvTranspose2d(in, in//2, k=2, s=2): weight (in, in//2, 2, 2)
        "up_w": jax.random.normal(ks[0], (in_channels, in_channels // 2, 2, 2), jnp.float32) * 0.1,
        "up_b": jax.random.normal(ks[1], (in_channels // 2,), jnp.float32) * 0.1,
        # DoubleConv: Conv2d(in, out, 3, pad=1) then Conv2d(out, out, 3, pad=1)  (OIHW)
        "c1_w": jax.random.normal(ks[2], (out_channels, in_channels, 3, 3), jnp.float32) * 0.1,
        "c1_b": jax.random.normal(ks[3], (out_channels,), jnp.float32) * 0.1,
        "c2_w": jax.random.normal(ks[4], (out_channels, out_channels, 3, 3), jnp.float32) * 0.1,
        "c2_b": jax.random.normal(ks[5], (out_channels,), jnp.float32) * 0.1,
    }

    x1 = jax.random.normal(ks[6], (N, in_channels, H, W), jnp.float32)            # NCHW
    x2 = jax.random.normal(ks[7], (N, in_channels // 2, 2 * H, 2 * W), jnp.float32)

    # tile_rows=8 -> 3 row tiles: exercises the first/middle/last halo paths.
    fwd = jax.jit(functools.partial(upsample_forward, tile_rows=8))
    out = jax.block_until_ready(fwd(x1, x2, params))

    ref = reference_forward(x1, x2, params)
    assert out.shape == (N, out_channels, 2 * H, 2 * W), out.shape
    err = float(jnp.abs(out - ref).max())
    assert jnp.allclose(out, ref, atol=1e-2, rtol=1e-2), err

    print("KERNEL_OK")
</pallas_src>

<mosaic_0001>
module attributes {stable_mosaic.version = 11 : i64} {
  func.func @_upsample_kernel(%arg0: i32, %arg1: i32, %arg2: memref<1x1x16x8xbf16, #tpu.memory_space<vmem>>, %arg3: memref<1x4x16x8xbf16, #tpu.memory_space<vmem>>, %arg4: memref<1x1x16x8xbf16, #tpu.memory_space<vmem>>, %arg5: memref<1x2x16x8xbf16, #tpu.memory_space<vmem>>, %arg6: memref<1x8x16x8xbf16, #tpu.memory_space<vmem>>, %arg7: memref<1x2x16x8xbf16, #tpu.memory_space<vmem>>, %arg8: memref<2x8x8xbf16, #tpu.memory_space<vmem>>, %arg9: memref<1x8xf32, #tpu.memory_space<vmem>>, %arg10: memref<12x16x4xbf16, #tpu.memory_space<vmem>>, %arg11: memref<1x4xf32, #tpu.memory_space<vmem>>, %arg12: memref<12x8x4xbf16, #tpu.memory_space<vmem>>, %arg13: memref<1x4xf32, #tpu.memory_space<vmem>>, %arg14: memref<1x8x16x8xf32, #tpu.memory_space<vmem>>, %arg15: memref<12x18x16xbf16, #tpu.memory_space<vmem>>, %arg16: memref<10x18x8xbf16, #tpu.memory_space<vmem>>) attributes {dimension_semantics = [#tpu.dimension_semantics<parallel>, #tpu.dimension_semantics<parallel>], iteration_bounds = array<i64: 2, 3>, scalar_prefetch = 0 : i64, scratch_operands = 2 : i64, tpu.core_type = #tpu.core_type<tc>, window_params = [{transform_indices = @transform_0, window_bounds = array<i64: 1, 1, 16, 8>}, {transform_indices = @transform_1, window_bounds = array<i64: 1, 4, 16, 8>}, {transform_indices = @transform_2, window_bounds = array<i64: 1, 1, 16, 8>}, {transform_indices = @transform_3, window_bounds = array<i64: 1, 2, 16, 8>}, {transform_indices = @transform_4, window_bounds = array<i64: 1, 8, 16, 8>}, {transform_indices = @transform_5, window_bounds = array<i64: 1, 2, 16, 8>}, {pipeline_mode = #tpu.pipeline_mode<synchronous>, transform_indices = @transform_6, window_bounds = array<i64: 2, 8, 8>}, {pipeline_mode = #tpu.pipeline_mode<synchronous>, transform_indices = @transform_7, window_bounds = array<i64: 1, 8>}, {pipeline_mode = #tpu.pipeline_mode<synchronous>, transform_indices = @transform_8, window_bounds = array<i64: 12, 16, 4>}, {pipeline_mode = #tpu.pipeline_mode<synchronous>, transform_indices = @transform_9, window_bounds = array<i64: 1, 4>}, {pipeline_mode = #tpu.pipeline_mode<synchronous>, transform_indices = @transform_10, window_bounds = array<i64: 12, 8, 4>}, {pipeline_mode = #tpu.pipeline_mode<synchronous>, transform_indices = @transform_11, window_bounds = array<i64: 1, 4>}, {transform_indices = @transform_12, window_bounds = array<i64: 1, 8, 16, 8>}]} {
    %c0 = arith.constant 0 : index
    %c0_0 = arith.constant 0 : index
    %c0_1 = arith.constant 0 : index
    %c0_2 = arith.constant 0 : index
    %0 = vector.load %arg2[%c0, %c0_0, %c0_1, %c0_2] : memref<1x1x16x8xbf16, #tpu.memory_space<vmem>>, vector<1x1x16x8xbf16>
    %1 = vector.shape_cast %0 : vector<1x1x16x8xbf16> to vector<1x16x8xbf16>
    %c0_3 = arith.constant 0 : index
    %c0_4 = arith.constant 0 : index
    %c0_5 = arith.constant 0 : index
    %c0_6 = arith.constant 0 : index
    %2 = vector.load %arg3[%c0_3, %c0_4, %c0_5, %c0_6] : memref<1x4x16x8xbf16, #tpu.memory_space<vmem>>, vector<1x4x16x8xbf16>
    %3 = vector.shape_cast %2 : vector<1x4x16x8xbf16> to vector<4x16x8xbf16>
    %c0_7 = arith.constant 0 : index
    %c0_8 = arith.constant 0 : index
    %c0_9 = arith.constant 0 : index
    %c0_10 = arith.constant 0 : index
    %4 = vector.load %arg4[%c0_7, %c0_8, %c0_9, %c0_10] : memref<1x1x16x8xbf16, #tpu.memory_space<vmem>>, vector<1x1x16x8xbf16>
    %5 = vector.shape_cast %4 : vector<1x1x16x8xbf16> to vector<1x16x8xbf16>
    %6 = tpu.concatenate %1, %3, %5 in 0 : vector<1x16x8xbf16>, vector<4x16x8xbf16>, vector<1x16x8xbf16> -> vector<6x16x8xbf16>
    %c0_11 = arith.constant 0 : index
    %c0_12 = arith.constant 0 : index
    %c0_13 = arith.constant 0 : index
    %7 = vector.load %arg8[%c0_11, %c0_12, %c0_13] : memref<2x8x8xbf16, #tpu.memory_space<vmem>>, vector<1x8x8xbf16>
    %8 = vector.shape_cast %7 : vector<1x8x8xbf16> to vector<8x8xbf16>
    %cst = arith.constant dense<0.000000e+00> : vector<6x16x8xf32>
    %9 = tpu.matmul %6, %8, %cst {dimension_numbers = #tpu.dot_dimension_numbers<[2], [0], [0, 1], [1], [0, 0, 0, 1, 1, 1], [], []>} : vector<6x16x8xbf16>, vector<8x8xbf16>, vector<6x16x8xf32> -> vector<6x16x8xf32>
    %c0_14 = arith.constant 0 : index
    %c0_15 = arith.constant 0 : index
    %10 = vector.load %arg9[%c0_14, %c0_15] : memref<1x8xf32, #tpu.memory_space<vmem>>, vector<1x8xf32>
    %11 = vector.shape_cast %10 : vector<1x8xf32> to vector<1x1x8xf32>
    %12 = vector.broadcast %11 : vector<1x1x8xf32> to vector<6x16x8xf32>
    %13 = arith.addf %9, %12 : vector<6x16x8xf32>
    %14 = arith.truncf %13 : vector<6x16x8xf32> to vector<6x16x8xbf16>
    %15 = vector.extract_strided_slice %14 {offsets = [0, 0, 0], sizes = [1, 16, 8], strides = [1, 1, 1]} : vector<6x16x8xbf16> to vector<1x16x8xbf16>
    %16 = vector.shape_cast %15 : vector<1x16x8xbf16> to vector<16x8xbf16>
    %c0_16 = arith.constant 0 : index
    %c1 = arith.constant 1 : index
    %c0_17 = arith.constant 0 : index
    %17 = vector.load %arg15[%c0_16, %c1, %c0_17] : memref<12x18x16xbf16, #tpu.memory_space<vmem>>, vector<1x16x8xbf16>
    %18 = vector.shape_cast %17 : vector<1x16x8xbf16> to vector<16x8xbf16>
    %19 = vector.shape_cast %16 : vector<16x8xbf16> to vector<1x16x8xbf16>
    tpu.vector_store %arg15[%c0_16, %c1, %c0_17], %19 {strides = array<i32>} : memref<12x18x16xbf16, #tpu.memory_space<vmem>>, vector<1x16x8xbf16>,
    %20 = vector.extract_strided_slice %14 {offsets = [1, 0, 0], sizes = [1, 16, 8], strides = [1, 1, 1]} : vector<6x16x8xbf16> to vector<1x16x8xbf16>
    %21 = vector.shape_cast %20 : vector<1x16x8xbf16> to vector<16x8xbf16>
    %c2 = arith.constant 2 : index
    %c1_18 = arith.constant 1 : index
    %c0_19 = arith.constant 0 : index
    %22 = vector.load %arg15[%c2, %c1_18, %c0_19] : memref<12x18x16xbf16, #tpu.memory_space<vmem>>, vector<1x16x8xbf16>
    %23 = vector.shape_cast %22 : vector<1x16x8xbf16> to vector<16x8xbf16>
    %24 = vector.shape_cast %21 : vector<16x8xbf16> to vector<1x16x8xbf16>
    tpu.vector_store %arg15[%c2, %c1_18, %c0_19], %24 {strides = array<i32>} : memref<12x18x16xbf16, #tpu.memory_space<vmem>>, vector<1x16x8xbf16>,
    %25 = vector.extract_strided_slice %14 {offsets = [2, 0, 0], sizes = [1, 16, 8], strides = [1, 1, 1]} : vector<6x16x8xbf16> to vector<1x16x8xbf16>
    %26 = vector.shape_cast %25 : vector<1x16x8xbf16> to vector<16x8xbf16>
    %c4 = arith.constant 4 : index
    %c1_20 = arith.constant 1 : index
    %c0_21 = arith.constant 0 : index
    %27 = vector.load %arg15[%c4, %c1_20, %c0_21] : memref<12x18x16xbf16, #tpu.memory_space<vmem>>, vector<1x16x8xbf16>
    %28 = vector.shape_cast %27 : vector<1x16x8xbf16> to vector<16x8xbf16>
    %29 = vector.shape_cast %26 : vector<16x8xbf16> to vector<1x16x8xbf16>
    tpu.vector_store %arg15[%c4, %c1_20, %c0_21], %29 {strides = array<i32>} : memref<12x18x16xbf16, #tpu.memory_space<vmem>>, vector<1x16x8xbf16>,
    %30 = vector.extract_strided_slice %14 {offsets = [3, 0, 0], sizes = [1, 16, 8], strides = [1, 1, 1]} : vector<6x16x8xbf16> to vector<1x16x8xbf16>
    %31 = vector.shape_cast %30 : vector<1x16x8xbf16> to vector<16x8xbf16>
    %c6 = arith.constant 6 : index
    %c1_22 = arith.constant 1 : index
    %c0_23 = arith.constant 0 : index
    %32 = vector.load %arg15[%c6, %c1_22, %c0_23] : memref<12x18x16xbf16, #tpu.memory_space<vmem>>, vector<1x16x8xbf16>
    %33 = vector.shape_cast %32 : vector<1x16x8xbf16> to vector<16x8xbf16>
    %34 = vector.shape_cast %31 : vector<16x8xbf16> to vector<1x16x8xbf16>
    tpu.vector_store %arg15[%c6, %c1_22, %c0_23], %34 {strides = array<i32>} : memref<12x18x16xbf16, #tpu.memory_space<vmem>>, vector<1x16x8xbf16>,
    %35 = vector.extract_strided_slice %14 {offsets = [4, 0, 0], sizes = [1, 16, 8], strides = [1, 1, 1]} : vector<6x16x8xbf16> to vector<1x16x8xbf16>
    %36 = vector.shape_cast %35 : vector<1x16x8xbf16> to vector<16x8xbf16>
    %c8 = arith.constant 8 : index
    %c1_24 = arith.constant 1 : index
    %c0_25 = arith.constant 0 : index
    %37 = vector.load %arg15[%c8, %c1_24, %c0_25] : memref<12x18x16xbf16, #tpu.memory_space<vmem>>, vector<1x16x8xbf16>
    %38 = vector.shape_cast %37 : vector<1x16x8xbf16> to vector<16x8xbf16>
    %39 = vector.shape_cast %36 : vector<16x8xbf16> to vector<1x16x8xbf16>
    tpu.vector_store %arg15[%c8, %c1_24, %c0_25], %39 {strides = array<i32>} : memref<12x18x16xbf16, #tpu.memory_space<vmem>>, vector<1x16x8xbf16>,
    %40 = vector.extract_strided_slice %14 {offsets = [5, 0, 0], sizes = [1, 16, 8], strides = [1, 1, 1]} : vector<6x16x8xbf16> to vector<1x16x8xbf16>
    %41 = vector.shape_cast %40 : vector<1x16x8xbf16> to vector<16x8xbf16>
    %c10 = arith.constant 10 : index
    %c1_26 = arith.constant 1 : index
    %c0_27 = arith.constant 0 : index
    %42 = vector.load %arg15[%c10, %c1_26, %c0_27] : memref<12x18x16xbf16, #tpu.memory_space<vmem>>, vector<1x16x8xbf16>
    %43 = vector.shape_cast %42 : vector<1x16x8xbf16> to vector<16x8xbf16>
    %44 = vector.shape_cast %41 : vector<16x8xbf16> to vector<1x16x8xbf16>
    tpu.vector_store %arg15[%c10, %c1_26, %c0_27], %44 {strides = array<i32>} : memref<12x18x16xbf16, #tpu.memory_space<vmem>>, vector<1x16x8xbf16>,
    %c1_28 = arith.constant 1 : index
    %c0_29 = arith.constant 0 : index
    %c0_30 = arith.constant 0 : index
    %45 = vector.load %arg8[%c1_28, %c0_29, %c0_30] : memref<2x8x8xbf16, #tpu.memory_space<vmem>>, vector<1x8x8xbf16>
    %46 = vector.shape_cast %45 : vector<1x8x8xbf16> to vector<8x8xbf16>
    %cst_31 = arith.constant dense<0.000000e+00> : vector<6x16x8xf32>
    %47 = tpu.matmul %6, %46, %cst_31 {dimension_numbers = #tpu.dot_dimension_numbers<[2], [0], [0, 1], [1], [0, 0, 0, 1, 1, 1], [], []>} : vector<6x16x8xbf16>, vector<8x8xbf16>, vector<6x16x8xf32> -> vector<6x16x8xf32>
    %c0_32 = arith.constant 0 : index
    %c0_33 = arith.constant 0 : index
    %48 = vector.load %arg9[%c0_32, %c0_33] : memref<1x8xf32, #tpu.memory_space<vmem>>, vector<1x8xf32>
    %49 = vector.shape_cast %48 : vector<1x8xf32> to vector<1x1x8xf32>
    %50 = vector.broadcast %49 : vector<1x1x8xf32> to vector<6x16x8xf32>
    %51 = arith.addf %47, %50 : vector<6x16x8xf32>
    %52 = arith.truncf %51 : vector<6x16x8xf32> to vector<6x16x8xbf16>
    %53 = vector.extract_strided_slice %52 {offsets = [0, 0, 0], sizes = [1, 16, 8], strides = [1, 1, 1]} : vector<6x16x8xbf16> to vector<1x16x8xbf16>
    %54 = vector.shape_cast %53 : vector<1x16x8xbf16> to vector<16x8xbf16>
    %c1_34 = arith.constant 1 : index
    %c1_35 = arith.constant 1 : index
    %c0_36 = arith.constant 0 : index
    %55 = vector.load %arg15[%c1_34, %c1_35, %c0_36] : memref<12x18x16xbf16, #tpu.memory_space<vmem>>, vector<1x16x8xbf16>
    %56 = vector.shape_cast %55 : vector<1x16x8xbf16> to vector<16x8xbf16>
    %57 = vector.shape_cast %54 : vector<16x8xbf16> to vector<1x16x8xbf16>
    tpu.vector_store %arg15[%c1_34, %c1_35, %c0_36], %57 {strides = array<i32>} : memref<12x18x16xbf16, #tpu.memory_space<vmem>>, vector<1x16x8xbf16>,
    %58 = vector.extract_strided_slice %52 {offsets = [1, 0, 0], sizes = [1, 16, 8], strides = [1, 1, 1]} : vector<6x16x8xbf16> to vector<1x16x8xbf16>
    %59 = vector.shape_cast %58 : vector<1x16x8xbf16> to vector<16x8xbf16>
    %c3 = arith.constant 3 : index
    %c1_37 = arith.constant 1 : index
    %c0_38 = arith.constant 0 : index
    %60 = vector.load %arg15[%c3, %c1_37, %c0_38] : memref<12x18x16xbf16, #tpu.memory_space<vmem>>, vector<1x16x8xbf16>
    %61 = vector.shape_cast %60 : vector<1x16x8xbf16> to vector<16x8xbf16>
    %62 = vector.shape_cast %59 : vector<16x8xbf16> to vector<1x16x8xbf16>
    tpu.vector_store %arg15[%c3, %c1_37, %c0_38], %62 {strides = array<i32>} : memref<12x18x16xbf16, #tpu.memory_space<vmem>>, vector<1x16x8xbf16>,
    %63 = vector.extract_strided_slice %52 {offsets = [2, 0, 0], sizes = [1, 16, 8], strides = [1, 1, 1]} : vector<6x16x8xbf16> to vector<1x16x8xbf16>
    %64 = vector.shape_cast %63 : vector<1x16x8xbf16> to vector<16x8xbf16>
    %c5 = arith.constant 5 : index
    %c1_39 = arith.constant 1 : index
    %c0_40 = arith.constant 0 : index
    %65 = vector.load %arg15[%c5, %c1_39, %c0_40] : memref<12x18x16xbf16, #tpu.memory_space<vmem>>, vector<1x16x8xbf16>
    %66 = vector.shape_cast %65 : vector<1x16x8xbf16> to vector<16x8xbf16>
    %67 = vector.shape_cast %64 : vector<16x8xbf16> to vector<1x16x8xbf16>
    tpu.vector_store %arg15[%c5, %c1_39, %c0_40], %67 {strides = array<i32>} : memref<12x18x16xbf16, #tpu.memory_space<vmem>>, vector<1x16x8xbf16>,
    %68 = vector.extract_strided_slice %52 {offsets = [3, 0, 0], sizes = [1, 16, 8], strides = [1, 1, 1]} : vector<6x16x8xbf16> to vector<1x16x8xbf16>
    %69 = vector.shape_cast %68 : vector<1x16x8xbf16> to vector<16x8xbf16>
    %c7 = arith.constant 7 : index
    %c1_41 = arith.constant 1 : index
    %c0_42 = arith.constant 0 : index
    %70 = vector.load %arg15[%c7, %c1_41, %c0_42] : memref<12x18x16xbf16, #tpu.memory_space<vmem>>, vector<1x16x8xbf16>
    %71 = vector.shape_cast %70 : vector<1x16x8xbf16> to vector<16x8xbf16>
    %72 = vector.shape_cast %69 : vector<16x8xbf16> to vector<1x16x8xbf16>
    tpu.vector_store %arg15[%c7, %c1_41, %c0_42], %72 {strides = array<i32>} : memref<12x18x16xbf16, #tpu.memory_space<vmem>>, vector<1x16x8xbf16>,
    %73 = vector.extract_strided_slice %52 {offsets = [4, 0, 0], sizes = [1, 16, 8], strides = [1, 1, 1]} : vector<6x16x8xbf16> to vector<1x16x8xbf16>
    %74 = vector.shape_cast %73 : vector<1x16x8xbf16> to vector<16x8xbf16>
    %c9 = arith.constant 9 : index
    %c1_43 = arith.constant 1 : index
    %c0_44 = arith.constant 0 : index
    %75 = vector.load %arg15[%c9, %c1_43, %c0_44] : memref<12x18x16xbf16, #tpu.memory_space<vmem>>, vector<1x16x8xbf16>
    %76 = vector.shape_cast %75 : vector<1x16x8xbf16> to vector<16x8xbf16>
    %77 = vector.shape_cast %74 : vector<16x8xbf16> to vector<1x16x8xbf16>
    tpu.vector_store %arg15[%c9, %c1_43, %c0_44], %77 {strides = array<i32>} : memref<12x18x16xbf16, #tpu.memory_space<vmem>>, vector<1x16x8xbf16>,
    %78 = vector.extract_strided_slice %52 {offsets = [5, 0, 0], sizes = [1, 16, 8], strides = [1, 1, 1]} : vector<6x16x8xbf16> to vector<1x16x8xbf16>
    %79 = vector.shape_cast %78 : vector<1x16x8xbf16> to vector<16x8xbf16>
    %c11 = arith.constant 11 : index
    %c1_45 = arith.constant 1 : index
    %c0_46 = arith.constant 0 : index
    %80 = vector.load %arg15[%c11, %c1_45, %c0_46] : memref<12x18x16xbf16, #tpu.memory_space<vmem>>, vector<1x16x8xbf16>
    %81 = vector.shape_cast %80 : vector<1x16x8xbf16> to vector<16x8xbf16>
    %82 = vector.shape_cast %79 : vector<16x8xbf16> to vector<1x16x8xbf16>
    tpu.vector_store %arg15[%c11, %c1_45, %c0_46], %82 {strides = array<i32>} : memref<12x18x16xbf16, #tpu.memory_space<vmem>>, vector<1x16x8xbf16>,
    %c0_47 = arith.constant 0 : index
    %c0_48 = arith.constant 0 : index
    %c0_49 = arith.constant 0 : index
    %c0_50 = arith.constant 0 : index
    %83 = vector.load %arg5[%c0_47, %c0_48, %c0_49, %c0_50] : memref<1x2x16x8xbf16, #tpu.memory_space<vmem>>, vector<1x2x16x8xbf16>
    %84 = vector.shape_cast %83 : vector<1x2x16x8xbf16> to vector<2x16x8xbf16>
    %c0_51 = arith.constant 0 : index
    %c1_52 = arith.constant 1 : index
    %c8_53 = arith.constant 8 : index
    %85 = vector.load %arg15[%c0_51, %c1_52, %c8_53] : memref<12x18x16xbf16, #tpu.memory_space<vmem>>, vector<2x16x8xbf16>
    tpu.vector_store %arg15[%c0_51, %c1_52, %c8_53], %84 {strides = array<i32>} : memref<12x18x16xbf16, #tpu.memory_space<vmem>>, vector<2x16x8xbf16>,
    %c0_54 = arith.constant 0 : index
    %c0_55 = arith.constant 0 : index
    %c0_56 = arith.constant 0 : index
    %c0_57 = arith.constant 0 : index
    %86 = vector.load %arg6[%c0_54, %c0_55, %c0_56, %c0_57] : memref<1x8x16x8xbf16, #tpu.memory_space<vmem>>, vector<1x8x16x8xbf16>
    %87 = vector.shape_cast %86 : vector<1x8x16x8xbf16> to vector<8x16x8xbf16>
    %c2_58 = arith.constant 2 : index
    %c1_59 = arith.constant 1 : index
    %c8_60 = arith.constant 8 : index
    %88 = vector.load %arg15[%c2_58, %c1_59, %c8_60] : memref<12x18x16xbf16, #tpu.memory_space<vmem>>, vector<8x16x8xbf16>
    tpu.vector_store %arg15[%c2_58, %c1_59, %c8_60], %87 {strides = array<i32>} : memref<12x18x16xbf16, #tpu.memory_space<vmem>>, vector<8x16x8xbf16>,
    %c0_61 = arith.constant 0 : index
    %c0_62 = arith.constant 0 : index
    %c0_63 = arith.constant 0 : index
    %c0_64 = arith.constant 0 : index
    %89 = vector.load %arg7[%c0_61, %c0_62, %c0_63, %c0_64] : memref<1x2x16x8xbf16, #tpu.memory_space<vmem>>, vector<1x2x16x8xbf16>
    %90 = vector.shape_cast %89 : vector<1x2x16x8xbf16> to vector<2x16x8xbf16>
    %c10_65 = arith.constant 10 : index
    %c1_66 = arith.constant 1 : index
    %c8_67 = arith.constant 8 : index
    %91 = vector.load %arg15[%c10_65, %c1_66, %c8_67] : memref<12x18x16xbf16, #tpu.memory_space<vmem>>, vector<2x16x8xbf16>
    tpu.vector_store %arg15[%c10_65, %c1_66, %c8_67], %90 {strides = array<i32>} : memref<12x18x16xbf16, #tpu.memory_space<vmem>>, vector<2x16x8xbf16>,
    %cst_68 = arith.constant 0.000000e+00 : bf16
    %92 = vector.broadcast %cst_68 : bf16 to vector<12x1x16xbf16>
    %c0_69 = arith.constant 0 : index
    %c0_70 = arith.constant 0 : index
    %c0_71 = arith.constant 0 : index
    %93 = vector.load %arg15[%c0_69, %c0_70, %c0_71] : memref<12x18x16xbf16, #tpu.memory_space<vmem>>, vector<12x1x16xbf16>
    tpu.vector_store %arg15[%c0_69, %c0_70, %c0_71], %92 {strides = array<i32>} : memref<12x18x16xbf16, #tpu.memory_space<vmem>>, vector<12x1x16xbf16>,
    %c0_72 = arith.constant 0 : index
    %c17 = arith.constant 17 : index
    %c0_73 = arith.constant 0 : index
    %94 = vector.load %arg15[%c0_72, %c17, %c0_73] : memref<12x18x16xbf16, #tpu.memory_space<vmem>>, vector<12x1x16xbf16>
    tpu.vector_store %arg15[%c0_72, %c17, %c0_73], %92 {strides = array<i32>} : memref<12x18x16xbf16, #tpu.memory_space<vmem>>, vector<12x1x16xbf16>,
    %c0_i32 = arith.constant 0 : i32
    %95 = arith.cmpi eq, %arg1, %c0_i32 : i32
    %96 = arith.extui %95 : i1 to i32
    %c0_i32_74 = arith.constant 0 : i32
    %97 = arith.cmpi ne, %96, %c0_i32_74 : i32
    scf.if %97 {
      %cst_285 = arith.constant 0.000000e+00 : bf16
      %268 = vector.broadcast %cst_285 : bf16 to vector<2x18x16xbf16>
      %c0_286 = arith.constant 0 : index
      %c0_287 = arith.constant 0 : index
      %c0_288 = arith.constant 0 : index
      %269 = vector.load %arg15[%c0_286, %c0_287, %c0_288] : memref<12x18x16xbf16, #tpu.memory_space<vmem>>, vector<2x18x16xbf16>
      tpu.vector_store %arg15[%c0_286, %c0_287, %c0_288], %268 {strides = array<i32>} : memref<12x18x16xbf16, #tpu.memory_space<vmem>>, vector<2x18x16xbf16>,
    } else {
    }
    %c2_i32 = arith.constant 2 : i32
    %98 = arith.cmpi eq, %arg1, %c2_i32 : i32
    %99 = arith.extui %98 : i1 to i32
    %c0_i32_75 = arith.constant 0 : i32
    %100 = arith.cmpi ne, %99, %c0_i32_75 : i32
    scf.if %100 {
      %cst_285 = arith.constant 0.000000e+00 : bf16
      %268 = vector.broadcast %cst_285 : bf16 to vector<2x18x16xbf16>
      %c10_286 = arith.constant 10 : index
      %c0_287 = arith.constant 0 : index
      %c0_288 = arith.constant 0 : index
      %269 = vector.load %arg15[%c10_286, %c0_287, %c0_288] : memref<12x18x16xbf16, #tpu.memory_space<vmem>>, vector<2x18x16xbf16>
      tpu.vector_store %arg15[%c10_286, %c0_287, %c0_288], %268 {strides = array<i32>} : memref<12x18x16xbf16, #tpu.memory_space<vmem>>, vector<2x18x16xbf16>,
    } else {
    }
    %cst_76 = arith.constant 0.000000e+00 : f32
    %101 = vector.broadcast %cst_76 : f32 to vector<10x16x4xf32>
    %c0_77 = arith.constant 0 : index
    %c0_78 = arith.constant 0 : index
    %c0_79 = arith.constant 0 : index
    %102 = vector.load %arg15[%c0_77, %c0_78, %c0_79] : memref<12x18x16xbf16, #tpu.memory_space<vmem>>, vector<10x16x16xbf16>
    %c0_80 = arith.constant 0 : index
    %c0_81 = arith.constant 0 : index
    %c0_82 = arith.constant 0 : index
    %103 = vector.load %arg10[%c0_80, %c0_81, %c0_82] : memref<12x16x4xbf16, #tpu.memory_space<vmem>>, vector<1x16x4xbf16>
    %104 = vector.shape_cast %103 : vector<1x16x4xbf16> to vector<16x4xbf16>
    %cst_83 = arith.constant dense<0.000000e+00> : vector<10x16x4xf32>
    %105 = tpu.matmul %102, %104, %cst_83 {dimension_numbers = #tpu.dot_dimension_numbers<[2], [0], [0, 1], [1], [0, 0, 0, 1, 1, 1], [], []>} : vector<10x16x16xbf16>, vector<16x4xbf16>, vector<10x16x4xf32> -> vector<10x16x4xf32>
    %106 = arith.addf %101, %105 : vector<10x16x4xf32>
    %c0_84 = arith.constant 0 : index
    %c1_85 = arith.constant 1 : index
    %c0_86 = arith.constant 0 : index
    %107 = vector.load %arg15[%c0_84, %c1_85, %c0_86] : memref<12x18x16xbf16, #tpu.memory_space<vmem>>, vector<10x16x16xbf16>
    %c1_87 = arith.constant 1 : index
    %c0_88 = arith.constant 0 : index
    %c0_89 = arith.constant 0 : index
    %108 = vector.load %arg10[%c1_87, %c0_88, %c0_89] : memref<12x16x4xbf16, #tpu.memory_space<vmem>>, vector<1x16x4xbf16>
    %109 = vector.shape_cast %108 : vector<1x16x4xbf16> to vector<16x4xbf16>
    %cst_90 = arith.constant dense<0.000000e+00> : vector<10x16x4xf32>
    %110 = tpu.matmul %107, %109, %cst_90 {dimension_numbers = #tpu.dot_dimension_numbers<[2], [0], [0, 1], [1], [0, 0, 0, 1, 1, 1], [], []>} : vector<10x16x16xbf16>, vector<16x4xbf16>, vector<10x16x4xf32> -> vector<10x16x4xf32>
    %111 = arith.addf %106, %110 : vector<10x16x4xf32>
    %c1_91 = arith.constant 1 : index
    %c0_92 = arith.constant 0 : index
    %c0_93 = arith.constant 0 : index
    %112 = vector.load %arg15[%c1_91, %c0_92, %c0_93] : memref<12x18x16xbf16, #tpu.memory_space<vmem>>, vector<10x16x16xbf16>
    %c2_94 = arith.constant 2 : index
    %c0_95 = arith.constant 0 : index
    %c0_96 = arith.constant 0 : index
    %113 = vector.load %arg10[%c2_94, %c0_95, %c0_96] : memref<12x16x4xbf16, #tpu.memory_space<vmem>>, vector<1x16x4xbf16>
    %114 = vector.shape_cast %113 : vector<1x16x4xbf16> to vector<16x4xbf16>
    %cst_97 = arith.constant dense<0.000000e+00> : vector<10x16x4xf32>
    %115 = tpu.matmul %112, %114, %cst_97 {dimension_numbers = #tpu.dot_dimension_numbers<[2], [0], [0, 1], [1], [0, 0, 0, 1, 1, 1], [], []>} : vector<10x16x16xbf16>, vector<16x4xbf16>, vector<10x16x4xf32> -> vector<10x16x4xf32>
    %116 = arith.addf %111, %115 : vector<10x16x4xf32>
    %c1_98 = arith.constant 1 : index
    %c1_99 = arith.constant 1 : index
    %c0_100 = arith.constant 0 : index
    %117 = vector.load %arg15[%c1_98, %c1_99, %c0_100] : memref<12x18x16xbf16, #tpu.memory_space<vmem>>, vector<10x16x16xbf16>
    %c3_101 = arith.constant 3 : index
    %c0_102 = arith.constant 0 : index
    %c0_103 = arith.constant 0 : index
    %118 = vector.load %arg10[%c3_101, %c0_102, %c0_103] : memref<12x16x4xbf16, #tpu.memory_space<vmem>>, vector<1x16x4xbf16>
    %119 = vector.shape_cast %118 : vector<1x16x4xbf16> to vector<16x4xbf16>
    %cst_104 = arith.constant dense<0.000000e+00> : vector<10x16x4xf32>
    %120 = tpu.matmul %117, %119, %cst_104 {dimension_numbers = #tpu.dot_dimension_numbers<[2], [0], [0, 1], [1], [0, 0, 0, 1, 1, 1], [], []>} : vector<10x16x16xbf16>, vector<16x4xbf16>, vector<10x16x4xf32> -> vector<10x16x4xf32>
    %121 = arith.addf %116, %120 : vector<10x16x4xf32>
    %c2_105 = arith.constant 2 : index
    %c0_106 = arith.constant 0 : index
    %c0_107 = arith.constant 0 : index
    %122 = vector.load %arg15[%c2_105, %c0_106, %c0_107] : memref<12x18x16xbf16, #tpu.memory_space<vmem>>, vector<10x16x16xbf16>
    %c4_108 = arith.constant 4 : index
    %c0_109 = arith.constant 0 : index
    %c0_110 = arith.constant 0 : index
    %123 = vector.load %arg10[%c4_108, %c0_109, %c0_110] : memref<12x16x4xbf16, #tpu.memory_space<vmem>>, vector<1x16x4xbf16>
    %124 = vector.shape_cast %123 : vector<1x16x4xbf16> to vector<16x4xbf16>
    %cst_111 = arith.constant dense<0.000000e+00> : vector<10x16x4xf32>
    %125 = tpu.matmul %122, %124, %cst_111 {dimension_numbers = #tpu.dot_dimension_numbers<[2], [0], [0, 1], [1], [0, 0, 0, 1, 1, 1], [], []>} : vector<10x16x16xbf16>, vector<16x4xbf16>, vector<10x16x4xf32> -> vector<10x16x4xf32>
    %126 = arith.addf %121, %125 : vector<10x16x4xf32>
    %c2_112 = arith.constant 2 : index
    %c1_113 = arith.constant 1 : index
    %c0_114 = arith.constant 0 : index
    %127 = vector.load %arg15[%c2_112, %c1_113, %c0_114] : memref<12x18x16xbf16, #tpu.memory_space<vmem>>, vector<10x16x16xbf16>
    %c5_115 = arith.constant 5 : index
    %c0_116 = arith.constant 0 : index
    %c0_117 = arith.constant 0 : index
    %128 = vector.load %arg10[%c5_115, %c0_116, %c0_117] : memref<12x16x4xbf16, #tpu.memory_space<vmem>>, vector<1x16x4xbf16>
    %129 = vector.shape_cast %128 : vector<1x16x4xbf16> to vector<16x4xbf16>
    %cst_118 = arith.constant dense<0.000000e+00> : vector<10x16x4xf32>
    %130 = tpu.matmul %127, %129, %cst_118 {dimension_numbers = #tpu.dot_dimension_numbers<[2], [0], [0, 1], [1], [0, 0, 0, 1, 1, 1], [], []>} : vector<10x16x16xbf16>, vector<16x4xbf16>, vector<10x16x4xf32> -> vector<10x16x4xf32>
    %131 = arith.addf %126, %130 : vector<10x16x4xf32>
    %c0_119 = arith.constant 0 : index
    %c0_120 = arith.constant 0 : index
    %132 = vector.load %arg11[%c0_119, %c0_120] : memref<1x4xf32, #tpu.memory_space<vmem>>, vector<1x4xf32>
    %133 = vector.shape_cast %132 : vector<1x4xf32> to vector<1x1x4xf32>
    %134 = vector.broadcast %133 : vector<1x1x4xf32> to vector<10x16x4xf32>
    %135 = arith.addf %131, %134 : vector<10x16x4xf32>
    %cst_121 = arith.constant 0.000000e+00 : f32
    %136 = vector.broadcast %cst_121 : f32 to vector<10x16x4xf32>
    %137 = arith.maximumf %135, %136 : vector<10x16x4xf32>
    %138 = arith.truncf %137 : vector<10x16x4xf32> to vector<10x16x4xbf16>
    %c0_122 = arith.constant 0 : index
    %c1_123 = arith.constant 1 : index
    %c0_124 = arith.constant 0 : index
    %139 = vector.load %arg16[%c0_122, %c1_123, %c0_124] : memref<10x18x8xbf16, #tpu.memory_space<vmem>>, vector<10x16x4xbf16>
    tpu.vector_store %arg16[%c0_122, %c1_123, %c0_124], %138 {strides = array<i32>} : memref<10x18x8xbf16, #tpu.memory_space<vmem>>, vector<10x16x4xbf16>,
    %cst_125 = arith.constant 0.000000e+00 : f32
    %140 = vector.broadcast %cst_125 : f32 to vector<10x16x4xf32>
    %c0_126 = arith.constant 0 : index
    %c1_127 = arith.constant 1 : index
    %c0_128 = arith.constant 0 : index
    %141 = vector.load %arg15[%c0_126, %c1_127, %c0_128] : memref<12x18x16xbf16, #tpu.memory_space<vmem>>, vector<10x16x16xbf16>
    %c6_129 = arith.constant 6 : index
    %c0_130 = arith.constant 0 : index
    %c0_131 = arith.constant 0 : index
    %142 = vector.load %arg10[%c6_129, %c0_130, %c0_131] : memref<12x16x4xbf16, #tpu.memory_space<vmem>>, vector<1x16x4xbf16>
    %143 = vector.shape_cast %142 : vector<1x16x4xbf16> to vector<16x4xbf16>
    %cst_132 = arith.constant dense<0.000000e+00> : vector<10x16x4xf32>
    %144 = tpu.matmul %141, %143, %cst_132 {dimension_numbers = #tpu.dot_dimension_numbers<[2], [0], [0, 1], [1], [0, 0, 0, 1, 1, 1], [], []>} : vector<10x16x16xbf16>, vector<16x4xbf16>, vector<10x16x4xf32> -> vector<10x16x4xf32>
    %145 = arith.addf %140, %144 : vector<10x16x4xf32>
    %c0_133 = arith.constant 0 : index
    %c2_134 = arith.constant 2 : index
    %c0_135 = arith.constant 0 : index
    %146 = vector.load %arg15[%c0_133, %c2_134, %c0_135] : memref<12x18x16xbf16, #tpu.memory_space<vmem>>, vector<10x16x16xbf16>
    %c7_136 = arith.constant 7 : index
    %c0_137 = arith.constant 0 : index
    %c0_138 = arith.constant 0 : index
    %147 = vector.load %arg10[%c7_136, %c0_137, %c0_138] : memref<12x16x4xbf16, #tpu.memory_space<vmem>>, vector<1x16x4xbf16>
    %148 = vector.shape_cast %147 : vector<1x16x4xbf16> to vector<16x4xbf16>
    %cst_139 = arith.constant dense<0.000000e+00> : vector<10x16x4xf32>
    %149 = tpu.matmul %146, %148, %cst_139 {dimension_numbers = #tpu.dot_dimension_numbers<[2], [0], [0, 1], [1], [0, 0, 0, 1, 1, 1], [], []>} : vector<10x16x16xbf16>, vector<16x4xbf16>, vector<10x16x4xf32> -> vector<10x16x4xf32>
    %150 = arith.addf %145, %149 : vector<10x16x4xf32>
    %c1_140 = arith.constant 1 : index
    %c1_141 = arith.constant 1 : index
    %c0_142 = arith.constant 0 : index
    %151 = vector.load %arg15[%c1_140, %c1_141, %c0_142] : memref<12x18x16xbf16, #tpu.memory_space<vmem>>, vector<10x16x16xbf16>
    %c8_143 = arith.constant 8 : index
    %c0_144 = arith.constant 0 : index
    %c0_145 = arith.constant 0 : index
    %152 = vector.load %arg10[%c8_143, %c0_144, %c0_145] : memref<12x16x4xbf16, #tpu.memory_space<vmem>>, vector<1x16x4xbf16>
    %153 = vector.shape_cast %152 : vector<1x16x4xbf16> to vector<16x4xbf16>
    %cst_146 = arith.constant dense<0.000000e+00> : vector<10x16x4xf32>
    %154 = tpu.matmul %151, %153, %cst_146 {dimension_numbers = #tpu.dot_dimension_numbers<[2], [0], [0, 1], [1], [0, 0, 0, 1, 1, 1], [], []>} : vector<10x16x16xbf16>, vector<16x4xbf16>, vector<10x16x4xf32> -> vector<10x16x4xf32>
    %155 = arith.addf %150, %154 : vector<10x16x4xf32>
    %c1_147 = arith.constant 1 : index
    %c2_148 = arith.constant 2 : index
    %c0_149 = arith.constant 0 : index
    %156 = vector.load %arg15[%c1_147, %c2_148, %c0_149] : memref<12x18x16xbf16, #tpu.memory_space<vmem>>, vector<10x16x16xbf16>
    %c9_150 = arith.constant 9 : index
    %c0_151 = arith.constant 0 : index
    %c0_152 = arith.constant 0 : index
    %157 = vector.load %arg10[%c9_150, %c0_151, %c0_152] : memref<12x16x4xbf16, #tpu.memory_space<vmem>>, vector<1x16x4xbf16>
    %158 = vector.shape_cast %157 : vector<1x16x4xbf16> to vector<16x4xbf16>
    %cst_153 = arith.constant dense<0.000000e+00> : vector<10x16x4xf32>
    %159 = tpu.matmul %156, %158, %cst_153 {dimension_numbers = #tpu.dot_dimension_numbers<[2], [0], [0, 1], [1], [0, 0, 0, 1, 1, 1], [], []>} : vector<10x16x16xbf16>, vector<16x4xbf16>, vector<10x16x4xf32> -> vector<10x16x4xf32>
    %160 = arith.addf %155, %159 : vector<10x16x4xf32>
    %c2_154 = arith.constant 2 : index
    %c1_155 = arith.constant 1 : index
    %c0_156 = arith.constant 0 : index
    %161 = vector.load %arg15[%c2_154, %c1_155, %c0_156] : memref<12x18x16xbf16, #tpu.memory_space<vmem>>, vector<10x16x16xbf16>
    %c10_157 = arith.constant 10 : index
    %c0_158 = arith.constant 0 : index
    %c0_159 = arith.constant 0 : index
    %162 = vector.load %arg10[%c10_157, %c0_158, %c0_159] : memref<12x16x4xbf16, #tpu.memory_space<vmem>>, vector<1x16x4xbf16>
    %163 = vector.shape_cast %162 : vector<1x16x4xbf16> to vector<16x4xbf16>
    %cst_160 = arith.constant dense<0.000000e+00> : vector<10x16x4xf32>
    %164 = tpu.matmul %161, %163, %cst_160 {dimension_numbers = #tpu.dot_dimension_numbers<[2], [0], [0, 1], [1], [0, 0, 0, 1, 1, 1], [], []>} : vector<10x16x16xbf16>, vector<16x4xbf16>, vector<10x16x4xf32> -> vector<10x16x4xf32>
    %165 = arith.addf %160, %164 : vector<10x16x4xf32>
    %c2_161 = arith.constant 2 : index
    %c2_162 = arith.constant 2 : index
    %c0_163 = arith.constant 0 : index
    %166 = vector.load %arg15[%c2_161, %c2_162, %c0_163] : memref<12x18x16xbf16, #tpu.memory_space<vmem>>, vector<10x16x16xbf16>
    %c11_164 = arith.constant 11 : index
    %c0_165 = arith.constant 0 : index
    %c0_166 = arith.constant 0 : index
    %167 = vector.load %arg10[%c11_164, %c0_165, %c0_166] : memref<12x16x4xbf16, #tpu.memory_space<vmem>>, vector<1x16x4xbf16>
    %168 = vector.shape_cast %167 : vector<1x16x4xbf16> to vector<16x4xbf16>
    %cst_167 = arith.constant dense<0.000000e+00> : vector<10x16x4xf32>
    %169 = tpu.matmul %166, %168, %cst_167 {dimension_numbers = #tpu.dot_dimension_numbers<[2], [0], [0, 1], [1], [0, 0, 0, 1, 1, 1], [], []>} : vector<10x16x16xbf16>, vector<16x4xbf16>, vector<10x16x4xf32> -> vector<10x16x4xf32>
    %170 = arith.addf %165, %169 : vector<10x16x4xf32>
    %c0_168 = arith.constant 0 : index
    %c0_169 = arith.constant 0 : index
    %171 = vector.load %arg11[%c0_168, %c0_169] : memref<1x4xf32, #tpu.memory_space<vmem>>, vector<1x4xf32>
    %172 = vector.shape_cast %171 : vector<1x4xf32> to vector<1x1x4xf32>
    %173 = vector.broadcast %172 : vector<1x1x4xf32> to vector<10x16x4xf32>
    %174 = arith.addf %170, %173 : vector<10x16x4xf32>
    %cst_170 = arith.constant 0.000000e+00 : f32
    %175 = vector.broadcast %cst_170 : f32 to vector<10x16x4xf32>
    %176 = arith.maximumf %174, %175 : vector<10x16x4xf32>
    %177 = arith.truncf %176 : vector<10x16x4xf32> to vector<10x16x4xbf16>
    %c0_171 = arith.constant 0 : index
    %c1_172 = arith.constant 1 : index
    %c4_173 = arith.constant 4 : index
    %178 = vector.load %arg16[%c0_171, %c1_172, %c4_173] : memref<10x18x8xbf16, #tpu.memory_space<vmem>>, vector<10x16x4xbf16>
    tpu.vector_store %arg16[%c0_171, %c1_172, %c4_173], %177 {strides = array<i32>} : memref<10x18x8xbf16, #tpu.memory_space<vmem>>, vector<10x16x4xbf16>,
    %cst_174 = arith.constant 0.000000e+00 : bf16
    %179 = vector.broadcast %cst_174 : bf16 to vector<10x1x8xbf16>
    %c0_175 = arith.constant 0 : index
    %c0_176 = arith.constant 0 : index
    %c0_177 = arith.constant 0 : index
    %180 = vector.load %arg16[%c0_175, %c0_176, %c0_177] : memref<10x18x8xbf16, #tpu.memory_space<vmem>>, vector<10x1x8xbf16>
    tpu.vector_store %arg16[%c0_175, %c0_176, %c0_177], %179 {strides = array<i32>} : memref<10x18x8xbf16, #tpu.memory_space<vmem>>, vector<10x1x8xbf16>,
    %c0_178 = arith.constant 0 : index
    %c17_179 = arith.constant 17 : index
    %c0_180 = arith.constant 0 : index
    %181 = vector.load %arg16[%c0_178, %c17_179, %c0_180] : memref<10x18x8xbf16, #tpu.memory_space<vmem>>, vector<10x1x8xbf16>
    tpu.vector_store %arg16[%c0_178, %c17_179, %c0_180], %179 {strides = array<i32>} : memref<10x18x8xbf16, #tpu.memory_space<vmem>>, vector<10x1x8xbf16>,
    %c0_i32_181 = arith.constant 0 : i32
    %182 = arith.cmpi eq, %arg1, %c0_i32_181 : i32
    %183 = arith.extui %182 : i1 to i32
    %c0_i32_182 = arith.constant 0 : i32
    %184 = arith.cmpi ne, %183, %c0_i32_182 : i32
    scf.if %184 {
      %cst_285 = arith.constant 0.000000e+00 : bf16
      %268 = vector.broadcast %cst_285 : bf16 to vector<1x18x8xbf16>
      %c0_286 = arith.constant 0 : index
      %c0_287 = arith.constant 0 : index
      %c0_288 = arith.constant 0 : index
      %269 = vector.load %arg16[%c0_286, %c0_287, %c0_288] : memref<10x18x8xbf16, #tpu.memory_space<vmem>>, vector<1x18x8xbf16>
      tpu.vector_store %arg16[%c0_286, %c0_287, %c0_288], %268 {strides = array<i32>} : memref<10x18x8xbf16, #tpu.memory_space<vmem>>, vector<1x18x8xbf16>,
    } else {
    }
    %c2_i32_183 = arith.constant 2 : i32
    %185 = arith.cmpi eq, %arg1, %c2_i32_183 : i32
    %186 = arith.extui %185 : i1 to i32
    %c0_i32_184 = arith.constant 0 : i32
    %187 = arith.cmpi ne, %186, %c0_i32_184 : i32
    scf.if %187 {
      %cst_285 = arith.constant 0.000000e+00 : bf16
      %268 = vector.broadcast %cst_285 : bf16 to vector<1x18x8xbf16>
      %c9_286 = arith.constant 9 : index
      %c0_287 = arith.constant 0 : index
      %c0_288 = arith.constant 0 : index
      %269 = vector.load %arg16[%c9_286, %c0_287, %c0_288] : memref<10x18x8xbf16, #tpu.memory_space<vmem>>, vector<1x18x8xbf16>
      tpu.vector_store %arg16[%c9_286, %c0_287, %c0_288], %268 {strides = array<i32>} : memref<10x18x8xbf16, #tpu.memory_space<vmem>>, vector<1x18x8xbf16>,
    } else {
    }
    %cst_185 = arith.constant 0.000000e+00 : f32
    %188 = vector.broadcast %cst_185 : f32 to vector<8x16x4xf32>
    %c0_186 = arith.constant 0 : index
    %c0_187 = arith.constant 0 : index
    %c0_188 = arith.constant 0 : index
    %189 = vector.load %arg16[%c0_186, %c0_187, %c0_188] : memref<10x18x8xbf16, #tpu.memory_space<vmem>>, vector<8x16x8xbf16>
    %c0_189 = arith.constant 0 : index
    %c0_190 = arith.constant 0 : index
    %c0_191 = arith.constant 0 : index
    %190 = vector.load %arg12[%c0_189, %c0_190, %c0_191] : memref<12x8x4xbf16, #tpu.memory_space<vmem>>, vector<1x8x4xbf16>
    %191 = vector.shape_cast %190 : vector<1x8x4xbf16> to vector<8x4xbf16>
    %cst_192 = arith.constant dense<0.000000e+00> : vector<8x16x4xf32>
    %192 = tpu.matmul %189, %191, %cst_192 {dimension_numbers = #tpu.dot_dimension_numbers<[2], [0], [0, 1], [1], [0, 0, 0, 1, 1, 1], [], []>} : vector<8x16x8xbf16>, vector<8x4xbf16>, vector<8x16x4xf32> -> vector<8x16x4xf32>
    %193 = arith.addf %188, %192 : vector<8x16x4xf32>
    %c0_193 = arith.constant 0 : index
    %c1_194 = arith.constant 1 : index
    %c0_195 = arith.constant 0 : index
    %194 = vector.load %arg16[%c0_193, %c1_194, %c0_195] : memref<10x18x8xbf16, #tpu.memory_space<vmem>>, vector<8x16x8xbf16>
    %c1_196 = arith.constant 1 : index
    %c0_197 = arith.constant 0 : index
    %c0_198 = arith.constant 0 : index
    %195 = vector.load %arg12[%c1_196, %c0_197, %c0_198] : memref<12x8x4xbf16, #tpu.memory_space<vmem>>, vector<1x8x4xbf16>
    %196 = vector.shape_cast %195 : vector<1x8x4xbf16> to vector<8x4xbf16>
    %cst_199 = arith.constant dense<0.000000e+00> : vector<8x16x4xf32>
    %197 = tpu.matmul %194, %196, %cst_199 {dimension_numbers = #tpu.dot_dimension_numbers<[2], [0], [0, 1], [1], [0, 0, 0, 1, 1, 1], [], []>} : vector<8x16x8xbf16>, vector<8x4xbf16>, vector<8x16x4xf32> -> vector<8x16x4xf32>
    %198 = arith.addf %193, %197 : vector<8x16x4xf32>
    %c1_200 = arith.constant 1 : index
    %c0_201 = arith.constant 0 : index
    %c0_202 = arith.constant 0 : index
    %199 = vector.load %arg16[%c1_200, %c0_201, %c0_202] : memref<10x18x8xbf16, #tpu.memory_space<vmem>>, vector<8x16x8xbf16>
    %c2_203 = arith.constant 2 : index
    %c0_204 = arith.constant 0 : index
    %c0_205 = arith.constant 0 : index
    %200 = vector.load %arg12[%c2_203, %c0_204, %c0_205] : memref<12x8x4xbf16, #tpu.memory_space<vmem>>, vector<1x8x4xbf16>
    %201 = vector.shape_cast %200 : vector<1x8x4xbf16> to vector<8x4xbf16>
    %cst_206 = arith.constant dense<0.000000e+00> : vector<8x16x4xf32>
    %202 = tpu.matmul %199, %201, %cst_206 {dimension_numbers = #tpu.dot_dimension_numbers<[2], [0], [0, 1], [1], [0, 0, 0, 1, 1, 1], [], []>} : vector<8x16x8xbf16>, vector<8x4xbf16>, vector<8x16x4xf32> -> vector<8x16x4xf32>
    %203 = arith.addf %198, %202 : vector<8x16x4xf32>
    %c1_207 = arith.constant 1 : index
    %c1_208 = arith.constant 1 : index
    %c0_209 = arith.constant 0 : index
    %204 = vector.load %arg16[%c1_207, %c1_208, %c0_209] : memref<10x18x8xbf16, #tpu.memory_space<vmem>>, vector<8x16x8xbf16>
    %c3_210 = arith.constant 3 : index
    %c0_211 = arith.constant 0 : index
    %c0_212 = arith.constant 0 : index
    %205 = vector.load %arg12[%c3_210, %c0_211, %c0_212] : memref<12x8x4xbf16, #tpu.memory_space<vmem>>, vector<1x8x4xbf16>
    %206 = vector.shape_cast %205 : vector<1x8x4xbf16> to vector<8x4xbf16>
    %cst_213 = arith.constant dense<0.000000e+00> : vector<8x16x4xf32>
    %207 = tpu.matmul %204, %206, %cst_213 {dimension_numbers = #tpu.dot_dimension_numbers<[2], [0], [0, 1], [1], [0, 0, 0, 1, 1, 1], [], []>} : vector<8x16x8xbf16>, vector<8x4xbf16>, vector<8x16x4xf32> -> vector<8x16x4xf32>
    %208 = arith.addf %203, %207 : vector<8x16x4xf32>
    %c2_214 = arith.constant 2 : index
    %c0_215 = arith.constant 0 : index
    %c0_216 = arith.constant 0 : index
    %209 = vector.load %arg16[%c2_214, %c0_215, %c0_216] : memref<10x18x8xbf16, #tpu.memory_space<vmem>>, vector<8x16x8xbf16>
    %c4_217 = arith.constant 4 : index
    %c0_218 = arith.constant 0 : index
    %c0_219 = arith.constant 0 : index
    %210 = vector.load %arg12[%c4_217, %c0_218, %c0_219] : memref<12x8x4xbf16, #tpu.memory_space<vmem>>, vector<1x8x4xbf16>
    %211 = vector.shape_cast %210 : vector<1x8x4xbf16> to vector<8x4xbf16>
    %cst_220 = arith.constant dense<0.000000e+00> : vector<8x16x4xf32>
    %212 = tpu.matmul %209, %211, %cst_220 {dimension_numbers = #tpu.dot_dimension_numbers<[2], [0], [0, 1], [1], [0, 0, 0, 1, 1, 1], [], []>} : vector<8x16x8xbf16>, vector<8x4xbf16>, vector<8x16x4xf32> -> vector<8x16x4xf32>
    %213 = arith.addf %208, %212 : vector<8x16x4xf32>
    %c2_221 = arith.constant 2 : index
    %c1_222 = arith.constant 1 : index
    %c0_223 = arith.constant 0 : index
    %214 = vector.load %arg16[%c2_221, %c1_222, %c0_223] : memref<10x18x8xbf16, #tpu.memory_space<vmem>>, vector<8x16x8xbf16>
    %c5_224 = arith.constant 5 : index
    %c0_225 = arith.constant 0 : index
    %c0_226 = arith.constant 0 : index
    %215 = vector.load %arg12[%c5_224, %c0_225, %c0_226] : memref<12x8x4xbf16, #tpu.memory_space<vmem>>, vector<1x8x4xbf16>
    %216 = vector.shape_cast %215 : vector<1x8x4xbf16> to vector<8x4xbf16>
    %cst_227 = arith.constant dense<0.000000e+00> : vector<8x16x4xf32>
    %217 = tpu.matmul %214, %216, %cst_227 {dimension_numbers = #tpu.dot_dimension_numbers<[2], [0], [0, 1], [1], [0, 0, 0, 1, 1, 1], [], []>} : vector<8x16x8xbf16>, vector<8x4xbf16>, vector<8x16x4xf32> -> vector<8x16x4xf32>
    %218 = arith.addf %213, %217 : vector<8x16x4xf32>
    %c0_228 = arith.constant 0 : index
    %c0_229 = arith.constant 0 : index
    %219 = vector.load %arg13[%c0_228, %c0_229] : memref<1x4xf32, #tpu.memory_space<vmem>>, vector<1x4xf32>
    %220 = vector.shape_cast %219 : vector<1x4xf32> to vector<1x1x4xf32>
    %221 = vector.broadcast %220 : vector<1x1x4xf32> to vector<8x16x4xf32>
    %222 = arith.addf %218, %221 : vector<8x16x4xf32>
    %cst_230 = arith.constant 0.000000e+00 : f32
    %223 = vector.broadcast %cst_230 : f32 to vector<8x16x4xf32>
    %224 = arith.maximumf %222, %223 : vector<8x16x4xf32>
    %c0_231 = arith.constant 0 : index
    %c0_232 = arith.constant 0 : index
    %c0_233 = arith.constant 0 : index
    %c0_234 = arith.constant 0 : index
    %225 = vector.load %arg14[%c0_231, %c0_232, %c0_233, %c0_234] : memref<1x8x16x8xf32, #tpu.memory_space<vmem>>, vector<1x8x16x4xf32>
    %226 = vector.shape_cast %225 : vector<1x8x16x4xf32> to vector<8x16x4xf32>
    %227 = vector.shape_cast %224 : vector<8x16x4xf32> to vector<1x8x16x4xf32>
    tpu.vector_store %arg14[%c0_231, %c0_232, %c0_233, %c0_234], %227 {strides = array<i32>} : memref<1x8x16x8xf32, #tpu.memory_space<vmem>>, vector<1x8x16x4xf32>,
    %cst_235 = arith.constant 0.000000e+00 : f32
    %228 = vector.broadcast %cst_235 : f32 to vector<8x16x4xf32>
    %c0_236 = arith.constant 0 : index
    %c1_237 = arith.constant 1 : index
    %c0_238 = arith.constant 0 : index
    %229 = vector.load %arg16[%c0_236, %c1_237, %c0_238] : memref<10x18x8xbf16, #tpu.memory_space<vmem>>, vector<8x16x8xbf16>
    %c6_239 = arith.constant 6 : index
    %c0_240 = arith.constant 0 : index
    %c0_241 = arith.constant 0 : index
    %230 = vector.load %arg12[%c6_239, %c0_240, %c0_241] : memref<12x8x4xbf16, #tpu.memory_space<vmem>>, vector<1x8x4xbf16>
    %231 = vector.shape_cast %230 : vector<1x8x4xbf16> to vector<8x4xbf16>
    %cst_242 = arith.constant dense<0.000000e+00> : vector<8x16x4xf32>
    %232 = tpu.matmul %229, %231, %cst_242 {dimension_numbers = #tpu.dot_dimension_numbers<[2], [0], [0, 1], [1], [0, 0, 0, 1, 1, 1], [], []>} : vector<8x16x8xbf16>, vector<8x4xbf16>, vector<8x16x4xf32> -> vector<8x16x4xf32>
    %233 = arith.addf %228, %232 : vector<8x16x4xf32>
    %c0_243 = arith.constant 0 : index
    %c2_244 = arith.constant 2 : index
    %c0_245 = arith.constant 0 : index
    %234 = vector.load %arg16[%c0_243, %c2_244, %c0_245] : memref<10x18x8xbf16, #tpu.memory_space<vmem>>, vector<8x16x8xbf16>
    %c7_246 = arith.constant 7 : index
    %c0_247 = arith.constant 0 : index
    %c0_248 = arith.constant 0 : index
    %235 = vector.load %arg12[%c7_246, %c0_247, %c0_248] : memref<12x8x4xbf16, #tpu.memory_space<vmem>>, vector<1x8x4xbf16>
    %236 = vector.shape_cast %235 : vector<1x8x4xbf16> to vector<8x4xbf16>
    %cst_249 = arith.constant dense<0.000000e+00> : vector<8x16x4xf32>
    %237 = tpu.matmul %234, %236, %cst_249 {dimension_numbers = #tpu.dot_dimension_numbers<[2], [0], [0, 1], [1], [0, 0, 0, 1, 1, 1], [], []>} : vector<8x16x8xbf16>, vector<8x4xbf16>, vector<8x16x4xf32> -> vector<8x16x4xf32>
    %238 = arith.addf %233, %237 : vector<8x16x4xf32>
    %c1_250 = arith.constant 1 : index
    %c1_251 = arith.constant 1 : index
    %c0_252 = arith.constant 0 : index
    %239 = vector.load %arg16[%c1_250, %c1_251, %c0_252] : memref<10x18x8xbf16, #tpu.memory_space<vmem>>, vector<8x16x8xbf16>
    %c8_253 = arith.constant 8 : index
    %c0_254 = arith.constant 0 : index
    %c0_255 = arith.constant 0 : index
    %240 = vector.load %arg12[%c8_253, %c0_254, %c0_255] : memref<12x8x4xbf16, #tpu.memory_space<vmem>>, vector<1x8x4xbf16>
    %241 = vector.shape_cast %240 : vector<1x8x4xbf16> to vector<8x4xbf16>
    %cst_256 = arith.constant dense<0.000000e+00> : vector<8x16x4xf32>
    %242 = tpu.matmul %239, %241, %cst_256 {dimension_numbers = #tpu.dot_dimension_numbers<[2], [0], [0, 1], [1], [0, 0, 0, 1, 1, 1], [], []>} : vector<8x16x8xbf16>, vector<8x4xbf16>, vector<8x16x4xf32> -> vector<8x16x4xf32>
    %243 = arith.addf %238, %242 : vector<8x16x4xf32>
    %c1_257 = arith.constant 1 : index
    %c2_258 = arith.constant 2 : index
    %c0_259 = arith.constant 0 : index
    %244 = vector.load %arg16[%c1_257, %c2_258, %c0_259] : memref<10x18x8xbf16, #tpu.memory_space<vmem>>, vector<8x16x8xbf16>
    %c9_260 = arith.constant 9 : index
    %c0_261 = arith.constant 0 : index
    %c0_262 = arith.constant 0 : index
    %245 = vector.load %arg12[%c9_260, %c0_261, %c0_262] : memref<12x8x4xbf16, #tpu.memory_space<vmem>>, vector<1x8x4xbf16>
    %246 = vector.shape_cast %245 : vector<1x8x4xbf16> to vector<8x4xbf16>
    %cst_263 = arith.constant dense<0.000000e+00> : vector<8x16x4xf32>
    %247 = tpu.matmul %244, %246, %cst_263 {dimension_numbers = #tpu.dot_dimension_numbers<[2], [0], [0, 1], [1], [0, 0, 0, 1, 1, 1], [], []>} : vector<8x16x8xbf16>, vector<8x4xbf16>, vector<8x16x4xf32> -> vector<8x16x4xf32>
    %248 = arith.addf %243, %247 : vector<8x16x4xf32>
    %c2_264 = arith.constant 2 : index
    %c1_265 = arith.constant 1 : index
    %c0_266 = arith.constant 0 : index
    %249 = vector.load %arg16[%c2_264, %c1_265, %c0_266] : memref<10x18x8xbf16, #tpu.memory_space<vmem>>, vector<8x16x8xbf16>
    %c10_267 = arith.constant 10 : index
    %c0_268 = arith.constant 0 : index
    %c0_269 = arith.constant 0 : index
    %250 = vector.load %arg12[%c10_267, %c0_268, %c0_269] : memref<12x8x4xbf16, #tpu.memory_space<vmem>>, vector<1x8x4xbf16>
    %251 = vector.shape_cast %250 : vector<1x8x4xbf16> to vector<8x4xbf16>
    %cst_270 = arith.constant dense<0.000000e+00> : vector<8x16x4xf32>
    %252 = tpu.matmul %249, %251, %cst_270 {dimension_numbers = #tpu.dot_dimension_numbers<[2], [0], [0, 1], [1], [0, 0, 0, 1, 1, 1], [], []>} : vector<8x16x8xbf16>, vector<8x4xbf16>, vector<8x16x4xf32> -> vector<8x16x4xf32>
    %253 = arith.addf %248, %252 : vector<8x16x4xf32>
    %c2_271 = arith.constant 2 : index
    %c2_272 = arith.constant 2 : index
    %c0_273 = arith.constant 0 : index
    %254 = vector.load %arg16[%c2_271, %c2_272, %c0_273] : memref<10x18x8xbf16, #tpu.memory_space<vmem>>, vector<8x16x8xbf16>
    %c11_274 = arith.constant 11 : index
    %c0_275 = arith.constant 0 : index
    %c0_276 = arith.constant 0 : index
    %255 = vector.load %arg12[%c11_274, %c0_275, %c0_276] : memref<12x8x4xbf16, #tpu.memory_space<vmem>>, vector<1x8x4xbf16>
    %256 = vector.shape_cast %255 : vector<1x8x4xbf16> to vector<8x4xbf16>
    %cst_277 = arith.constant dense<0.000000e+00> : vector<8x16x4xf32>
    %257 = tpu.matmul %254, %256, %cst_277 {dimension_numbers = #tpu.dot_dimension_numbers<[2], [0], [0, 1], [1], [0, 0, 0, 1, 1, 1], [], []>} : vector<8x16x8xbf16>, vector<8x4xbf16>, vector<8x16x4xf32> -> vector<8x16x4xf32>
    %258 = arith.addf %253, %257 : vector<8x16x4xf32>
    %c0_278 = arith.constant 0 : index
    %c0_279 = arith.constant 0 : index
    %259 = vector.load %arg13[%c0_278, %c0_279] : memref<1x4xf32, #tpu.memory_space<vmem>>, vector<1x4xf32>
    %260 = vector.shape_cast %259 : vector<1x4xf32> to vector<1x1x4xf32>
    %261 = vector.broadcast %260 : vector<1x1x4xf32> to vector<8x16x4xf32>
    %262 = arith.addf %258, %261 : vector<8x16x4xf32>
    %cst_280 = arith.constant 0.000000e+00 : f32
    %263 = vector.broadcast %cst_280 : f32 to vector<8x16x4xf32>
    %264 = arith.maximumf %262, %263 : vector<8x16x4xf32>
    %c0_281 = arith.constant 0 : index
    %c0_282 = arith.constant 0 : index
    %c0_283 = arith.constant 0 : index
    %c4_284 = arith.constant 4 : index
    %265 = vector.load %arg14[%c0_281, %c0_282, %c0_283, %c4_284] : memref<1x8x16x8xf32, #tpu.memory_space<vmem>>, vector<1x8x16x4xf32>
    %266 = vector.shape_cast %265 : vector<1x8x16x4xf32> to vector<8x16x4xf32>
    %267 = vector.shape_cast %264 : vector<8x16x4xf32> to vector<1x8x16x4xf32>
    tpu.vector_store %arg14[%c0_281, %c0_282, %c0_283, %c4_284], %267 {strides = array<i32>} : memref<1x8x16x8xf32, #tpu.memory_space<vmem>>, vector<1x8x16x4xf32>,
    return
  }
  func.func @transform_0(%arg0: i32, %arg1: i32) -> (i32, i32, i32, i32) {
    %c4_i32 = arith.constant 4 : i32
    %0 = arith.muli %arg1, %c4_i32 : i32
    %c1_i32 = arith.constant 1 : i32
    %1 = arith.subi %0, %c1_i32 : i32
    %c0_i32 = arith.constant 0 : i32
    %2 = arith.maxsi %1, %c0_i32 : i32
    %c0_i32_0 = arith.constant 0 : i32
    %c0_i32_1 = arith.constant 0 : i32
    %c0_i32_2 = arith.constant 0 : i32
    return %arg0, %2, %c0_i32_0, %c0_i32_1 : i32, i32, i32, i32
  }
  func.func @transform_1(%arg0: i32, %arg1: i32) -> (i32, i32, i32, i32) {
    %c0_i32 = arith.constant 0 : i32
    %c0_i32_0 = arith.constant 0 : i32
    %c0_i32_1 = arith.constant 0 : i32
    return %arg0, %arg1, %c0_i32, %c0_i32_0 : i32, i32, i32, i32
  }
  func.func @transform_2(%arg0: i32, %arg1: i32) -> (i32, i32, i32, i32) {
    %c4_i32 = arith.constant 4 : i32
    %0 = arith.muli %arg1, %c4_i32 : i32
    %c4_i32_0 = arith.constant 4 : i32
    %1 = arith.addi %0, %c4_i32_0 : i32
    %c11_i32 = arith.constant 11 : i32
    %2 = arith.minsi %1, %c11_i32 : i32
    %c0_i32 = arith.constant 0 : i32
    %c0_i32_1 = arith.constant 0 : i32
    %c0_i32_2 = arith.constant 0 : i32
    return %arg0, %2, %c0_i32, %c0_i32_1 : i32, i32, i32, i32
  }
  func.func @transform_3(%arg0: i32, %arg1: i32) -> (i32, i32, i32, i32) {
    %c4_i32 = arith.constant 4 : i32
    %0 = arith.muli %arg1, %c4_i32 : i32
    %c1_i32 = arith.constant 1 : i32
    %1 = arith.subi %0, %c1_i32 : i32
    %c0_i32 = arith.constant 0 : i32
    %2 = arith.maxsi %1, %c0_i32 : i32
    %c0_i32_0 = arith.constant 0 : i32
    %c0_i32_1 = arith.constant 0 : i32
    %c0_i32_2 = arith.constant 0 : i32
    return %arg0, %2, %c0_i32_0, %c0_i32_1 : i32, i32, i32, i32
  }
  func.func @transform_4(%arg0: i32, %arg1: i32) -> (i32, i32, i32, i32) {
    %c0_i32 = arith.constant 0 : i32
    %c0_i32_0 = arith.constant 0 : i32
    %c0_i32_1 = arith.constant 0 : i32
    return %arg0, %arg1, %c0_i32, %c0_i32_0 : i32, i32, i32, i32
  }
  func.func @transform_5(%arg0: i32, %arg1: i32) -> (i32, i32, i32, i32) {
    %c4_i32 = arith.constant 4 : i32
    %0 = arith.muli %arg1, %c4_i32 : i32
    %c4_i32_0 = arith.constant 4 : i32
    %1 = arith.addi %0, %c4_i32_0 : i32
    %c11_i32 = arith.constant 11 : i32
    %2 = arith.minsi %1, %c11_i32 : i32
    %c0_i32 = arith.constant 0 : i32
    %c0_i32_1 = arith.constant 0 : i32
    %c0_i32_2 = arith.constant 0 : i32
    return %arg0, %2, %c0_i32, %c0_i32_1 : i32, i32, i32, i32
  }
  func.func @transform_6(%arg0: i32, %arg1: i32) -> (i32, i32, i32) {
    %c0_i32 = arith.constant 0 : i32
    %c0_i32_0 = arith.constant 0 : i32
    %c0_i32_1 = arith.constant 0 : i32
    %c0_i32_2 = arith.constant 0 : i32
    return %c0_i32, %c0_i32_0, %c0_i32_1 : i32, i32, i32
  }
  func.func @transform_7(%arg0: i32, %arg1: i32) -> (i32, i32) {
    %c0_i32 = arith.constant 0 : i32
    %c0_i32_0 = arith.constant 0 : i32
    %c0_i32_1 = arith.constant 0 : i32
    return %c0_i32, %c0_i32_0 : i32, i32
  }
  func.func @transform_8(%arg0: i32, %arg1: i32) -> (i32, i32, i32) {
    %c0_i32 = arith.constant 0 : i32
    %c0_i32_0 = arith.constant 0 : i32
    %c0_i32_1 = arith.constant 0 : i32
    %c0_i32_2 = arith.constant 0 : i32
    return %c0_i32, %c0_i32_0, %c0_i32_1 : i32, i32, i32
  }
  func.func @transform_9(%arg0: i32, %arg1: i32) -> (i32, i32) {
    %c0_i32 = arith.constant 0 : i32
    %c0_i32_0 = arith.constant 0 : i32
    %c0_i32_1 = arith.constant 0 : i32
    return %c0_i32, %c0_i32_0 : i32, i32
  }
  func.func @transform_10(%arg0: i32, %arg1: i32) -> (i32, i32, i32) {
    %c0_i32 = arith.constant 0 : i32
    %c0_i32_0 = arith.constant 0 : i32
    %c0_i32_1 = arith.constant 0 : i32
    %c0_i32_2 = arith.constant 0 : i32
    return %c0_i32, %c0_i32_0, %c0_i32_1 : i32, i32, i32
  }
  func.func @transform_11(%arg0: i32, %arg1: i32) -> (i32, i32) {
    %c0_i32 = arith.constant 0 : i32
    %c0_i32_0 = arith.constant 0 : i32
    %c0_i32_1 = arith.constant 0 : i32
    return %c0_i32, %c0_i32_0 : i32, i32
  }
  func.func @transform_12(%arg0: i32, %arg1: i32) -> (i32, i32, i32, i32) {
    %c0_i32 = arith.constant 0 : i32
    %c0_i32_0 = arith.constant 0 : i32
    %c0_i32_1 = arith.constant 0 : i32
    return %arg0, %arg1, %c0_i32, %c0_i32_0 : i32, i32, i32, i32
  }
}

</mosaic_0001>

<bundles_post_ra>
// kernel: tile.9
= control target key start
LH: loop header
LB: loop body
LE: loop exit
PB: predicated region body
PF: predicated region fallthrough
CT: control target
= control target key end

     0   :  { %vm7_vm0 = vcmask 31744   ;;  %vm13_vm1 = vcmask 64544   ;;  %s39_s0 = inlined_call_operand.vmem [shape: f32[2,4], index: 0, kind: input, shape index: {}]   ;;  %s40_s1 = inlined_call_operand.vmem [shape: f32[1,8], index: 1, kind: output, shape index: {}]  }
   0x1   :  { %v4_v0 = vld [vmem:[%s39_s0] sm:$0x3]  ;;  %s22_s0 = smov 4  }
   0x2   :  { %5 = vst [vmem:[#allocation1] sm:$0x3] %v4_v0 }
   0x9   :  { %v10_v1 = vld [vmem:[#allocation1 + $0x1] sm:$0x1]   ;;  %v6_v2 = vld [vmem:[#allocation1] sm:$0x1]  }
   0xa   :  { %11 = vrot.lane.b32.xlu0 %v10_v1, %s22_s0  ;;  %8 = vst.msk [vmem:[#allocation0] sm:$0x1] %vm7_vm0, %v6_v2  }
  0x7c   :  { %v12_v3 = vpop.permute.xlu0 %11  }
  0x7d   :  { %14 = vst.msk [vmem:[#allocation0] sm:$0x1] %vm13_vm1, %v12_v3  }
  0x84   :  { %v17_v4 = vld [vmem:[#allocation0] sm:$0x1] }
  0x85   :  { %20 = vst [vmem:[%s40_s1] sm:$0x1] %v17_v4 }

// kernel: tile.8
= control target key start
LH: loop header
LB: loop body
LE: loop exit
PB: predicated region body
PF: predicated region fallthrough
CT: control target
= control target key end

     0   :  { %2 = vsyncpa [#allocation1], 0  ;;  %s48_s8 = smov [#allocation0]   ;;  %s65_s0 = inlined_call_operand.hbm [shape: f32[4], index: 0, kind: input, shape index: {}]   ;;  %s66_s1 = inlined_call_operand.vmem [shape: f32[2,4], index: 1, kind: output, shape index: {}]  }
   0x1   :  { %s8_s0 = sshll.u32 %s65_s0, 4  ;;  %s10_s9 = sshll.u32 %s48_s8, 4  ;;  %s9_s0 = int_to_ptr.hbm [resolvable:$true] %s8_s0  ;;  %s11_s9 = int_to_ptr.vmem [resolvable:$true] %s10_s9 }
   0x2   :  { %13 = dma.hbm_to_vmem [thread:$0]  %s9_s0, 16, %s11_s9, [#allocation1]  }
   0x3   :  { %46 = dma.done.wait [#allocation1], 16  }
   0x4   :  { %47 = vsyncadd [#allocation1], 4294967280  ;;  %v18_v0 = vld [vmem:[#allocation0] ss:$0 sm:$0xff] }
   0x5   :  { %19 = vst [vmem:[%s66_s1] sm:$0x3] %v18_v0 }
   0x6   :  { %20 = vsyncpa [#allocation1], 1 }

// kernel: upsample_forward.1
= control target key start
LH: loop header
LB: loop body
LE: loop exit
PB: predicated region body
PF: predicated region fallthrough
CT: control target
= control target key end

     0   :  { %s10642_s21 = smov 0   ;;  %s10644_s22 = smov 0   ;;  %s14036_s0 = inlined_call_operand.vmem [shape: bf16[2,12,16,8], index: 0, kind: input, shape index: {}, may-alias: {0,1,2}]   ;;  %s14037_s1 = inlined_call_operand.vmem [shape: bf16[2,12,16,8], index: 1, kind: input, shape index: {}, may-alias: {0,1,2}]   ;;  %s14038_s2 = inlined_call_operand.vmem [shape: bf16[2,12,16,8], index: 2, kind: input, shape index: {}, may-alias: {0,1,2}]   ;;  %s14039_s3 = inlined_call_operand.vmem [shape: bf16[2,24,16,8], index: 3, kind: input, shape index: {}, may-alias: {3,4,5}]   ;;  %s14040_s4 = inlined_call_operand.vmem [shape: bf16[2,24,16,8], index: 4, kind: input, shape index: {}, may-alias: {3,4,5}]   ;;  %s14041_s5 = inlined_call_operand.vmem [shape: bf16[2,24,16,8], index: 5, kind: input, shape index: {}, may-alias: {3,4,5}]   ;;  %s14042_s6 = inlined_call_operand.vmem [shape: bf16[2,8,8], index: 6, kind: input, shape index: {}]   ;;  %s14043_s7 = inlined_call_operand.vmem [shape: f32[1,8], index: 7, kind: input, shape index: {}]   ;;  %s14044_s8 = inlined_call_operand.vmem [shape: bf16[12,16,4], index: 8, kind: input, shape index: {}]   ;;  %s14045_s9 = inlined_call_operand.vmem [shape: f32[1,4], index: 9, kind: input, shape index: {}]   ;;  %s14046_s10 = inlined_call_operand.vmem [shape: bf16[12,8,4], index: 10, kind: input, shape index: {}]   ;;  %s14047_s11 = inlined_call_operand.vmem [shape: f32[1,4], index: 11, kind: input, shape index: {}]   ;;  %s14048_s12 = inlined_call_operand.vmem [shape: f32[2,24,16,8], index: 12, kind: output, shape index: {}]  }
   0x1   :  { %14055 = sst [smem:[#allocation31_spill]] %s14037_s1  ;;  %s10646_s23 = smov 0  }
   0x2   :  { %14056 = sst [smem:[#allocation32_spill]] %s14042_s6  ;;  %s10648_s24 = smov 0  }
   0x3   :  { %s10650_s25 = smov 0  }
   0x4 LB: > { %14057 = sst [smem:[#allocation4_spill]] %s10561_s23  ;;  %s31_s26 = sadd.s32 1, %s10561_s23  ;;  %s10569_s25 = sphi %s10650_s25, %s22_s25   ;;  %s10565_s24 = sphi %s10648_s24, %s14147_s24   ;;  %s10561_s23 = sphi %s10646_s23, %s14146_s23   ;;  %s10557_s22 = sphi %s10644_s22, %s14145_s22   ;;  %s10553_s21 = sphi %s10642_s21, %s14144_s21  }
   0x5   : > { %14058 = sst [smem:[#allocation5_spill]] %s10565_s24  ;;  %s34_s27 = sadd.s32 1, %s10565_s24 }
   0x6   : > { %p32_p0 = scmp.ge.s32.totalorder %s31_s26, 3  ;;  %p9754_p1 = scmp.ge.s32.totalorder %s10569_s25, 1 }
   0x7   : > { %p534_p2 = scmp.lt.s32.totalorder %s10569_s25, 7 }
   0x8   : > { %s14149_s26 = smov (%p32_p0, %s31_s26), 0  ;;  %s14151_s27 = smov (!%p32_p0, %s34_s27), %s10565_s24 }
   0x9   : > { %14059 = sst [smem:[#allocation6_spill]] %s14149_s26  ;;  %p535_p3 = pnand %p9754_p1, %p534_p2 }
   0xa   : > { %p36_p4 = scmp.ge.s32.totalorder %s14151_s27, 2 }
   0xb   : > { %538 = sbr.rel (%p535_p3) target bundleno = 1731 (0x6c3), region = 68 }
   0xc   : > { %s14153_s27 = smov (%p36_p4, %s14151_s27), 0 }
   0xd   : > { %14060 = sst [smem:[#allocation7_spill]] %s14153_s27 }
  0x10   : > { %s14061_s6 = sld [smem:[#allocation32_spill]]  ;;  %vm822_vm0 = vcmask 1043456   ;;  %s10681_s14 = sshll.u32 %s10553_s21, 2  ;;  %vm803_vm1 = vcmask 64512   ;;  %vm877_vm2 = vsmask.f32 256 }
  0x11   : > { %p654_p5 = scmp.lt.s32.totalorder %s10557_s22, 1  ;;  %p670_p6 = scmp.lt.s32.totalorder %s10681_s14, 11  ;;  %vm878_vm3 = vsmask.f32 4368  ;;  %v14064_v13 = vmov 0  ;;  %vm900_vm5 = vcmask 60416  }
  0x12   : > { %s9778_s15 = sshll.u32 %s10553_s21, 3  ;;  %s10688_s16 = sadd.s32 4294967295, %s10681_s14  ;;  %vm10736_vm4 = vmor %vm877_vm2, %vm878_vm3  ;;  %vm901_vm6 = vsmask.f32 7938  ;;  %vm908_vm8 = vcmask 57344   ;;  %vm1337_vm9 = vcmask 126016  }
  0x13   : > { %s14155_s22 = smov (!%p654_p5, %s10557_s22), 1  ;;  %p717_p7 = scmp.lt.s32.totalorder %s9778_s15, 23  ;;  %v14065_v13 = vsel %vm10736_vm4, 4294967295, %v14064_v13  ;;  %vm10894_vm7 = vmand %vm900_vm5, %vm901_vm6  ;;  %vm1706_vm12 = vcmask 122880   ;;  %vm1344_vm14 = vcmask 122944  }
  0x14   : > { %s671_s17 = scalar_select %p670_p6, %s10681_s14, 11  ;;  %14066 = vst [vmem:[#allocation8_spill] sm:$0xff] %v14065_v13  ;;  %vm10925_vm10 = vmand %vm908_vm8, %vm877_vm2 }
  0x15   : > { %s10691_s18 = smul.u32 24, %s14155_s22  ;;  %p652_p8 = scmp.gt.s32.totalorder %s10688_s16, 0  ;;  %vm10941_vm11 = vmand %vm1337_vm9, %vm901_vm6 }
  0x16   : > { %v768_v0 = vld [vmem:[%s14061_s6] sm:$0xf]  ;;  %v9818_v1 = vld [vmem:[%s14061_s6 + $0x4] sm:$0xf]  ;;  %s9765_s19 = sshll.u32 %s671_s17, 1  ;;  %s10695_s29 = smul.u32 48, %s14155_s22  ;;  %vm10992_vm13 = vmand %vm1706_vm12, %vm877_vm2 }
  0x17   : > { %v824_v2 = vsel %vm822_vm0, %v768_v0, 0  ;;  %v1060_v3 = vsel %vm822_vm0, %v9818_v1, 0  ;;  %s674_s20 = sadd.s32 %s10691_s18, %s9765_s19  ;;  %s14062_s1 = sld [smem:[#allocation31_spill]]  ;;  %vm11010_vm15 = vmand %vm1344_vm14, %vm877_vm2 }
  0x18   : > { %10472 = vmatpush.bf16.msra.mxu2 %v824_v2  ;;  %10473 = vmatpush.bf16.msra.mxu3 %v1060_v3  ;;  %s9766_s28 = sshll.u32 %s674_s20, 2  ;;  %p9757_p9 = scmp.lt.s32.totalorder %s10688_s16, 11  ;;  %vm11058_vm3 = vmand %vm1706_vm12, %vm901_vm6 }
  0x19   : > { %833 = vmatpush.bf16.msra.mxu0 %v824_v2  ;;  %1069 = vmatpush.bf16.msra.mxu1 %v1060_v3  ;;  %s14157_s15 = smov (!%p717_p7, %s9778_s15), 23  ;;  %s679_s22 = sadd.s32 4, %s10681_s14 }
  0x1a   : > { %s10705_s27 = scalar_select %p652_p8, %s10688_s16, 0 }
  0x1b   : > { %s9779_s17 = sshll.u32 %s14157_s15, 1  ;;  %p10730_p11 = scmp.lt.s32.totalorder %s679_s22, 11 }
  0x1c   : > { %s721_s19 = sadd.s32 %s10695_s29, %s9779_s17  ;;  %s9775_s20 = sshll.u32 %s10705_s27, 1 }
  0x1d   : > { %s10700_s6 = scalar_lea.vmem %s14062_s1, %s9766_s28  ;;  %s9780_s28 = sshll.u32 %s721_s19, 2 }
  0x1e   : > { %v10403_v4 = vld [vmem:[%s10700_s6 + $0x10] sm:$0xff]  ;;  %s9787_s30 = sshll.u32 %s721_s19, 3  ;;  %s10715_s26 = scalar_lea.vmem %s14040_s4, %s9780_s28  ;;  %v10404_v20 = vld [vmem:[%s10700_s6 + $0x18] sm:$0xff]  ;;  %v10401_v42 = vld [vmem:[%s10700_s6] sm:$0xff] }
  0x1f   : > { %9815 = vmatmul.msk.bf16.vlgmr.msra.gmra.mxu2 %vm803_vm1, %v10403_v4  ;;  %9822 = vmatmul.msk.bf16.vlgmr.msra.gmra.mxu3 %vm803_vm1, %v10403_v4  ;;  %s10720_s15 = scalar_lea.vmem %s14048_s12, %s9787_s30  ;;  %s14159_s27 = smov (!%p9757_p9, %s10705_s27), 11  ;;  %v1356_v5 = vld [vmem:[%s10715_s26] sm:$0xf]  ;;  %v1357_v6 = vld [vmem:[%s10715_s26 + $0x4] sm:$0xf] }
  0x20   : > { %v1373_v7 = vshrl.u32 %v1356_v5, 16  ;;  %v1376_v8 = vshll.u32 %v1356_v5, 16  ;;  %v1381_v9 = vshrl.u32 %v1357_v6, 16  ;;  %v1384_v10 = vshll.u32 %v1357_v6, 16  ;;  %s9762_s1 = sshll.u32 %s14159_s27, 1  ;;  %p702_p10 = scmp.lt.s32.totalorder %s9775_s20, 23 }
  0x21   : > { %s660_s17 = sadd.s32 %s10691_s18, %s9762_s1  ;;  %s10571_s28 = smov 8   ;;  %v1358_v36 = vld [vmem:[%s10715_s26 + $0x8] sm:$0xf]  ;;  %v1359_v37 = vld [vmem:[%s10715_s26 + $0xc] sm:$0xf] }
  0x22   : > { %v1375_v11 = vrot.slane %v1373_v7, 7  ;;  %v1383_v12 = vrot.slane %v1381_v9, 7  ;;  %s9763_s24 = sshll.u32 %s660_s17, 2  ;;  %s14161_s20 = smov (!%p702_p10, %s9775_s20), 23  ;;  %v1390_v45 = vshrl.u32 %v1358_v36, 16  ;;  %v1398_v46 = vshrl.u32 %v1359_v37, 16 }
  0x23   : > { %s662_s19 = scalar_lea.vmem %s14036_s0, %s9763_s24  ;;  %s14163_s22 = smov (!%p10730_p11, %s679_s22), 11  ;;  %v1401_v53 = vshll.u32 %v1359_v37, 16  ;;  %v1360_v55 = vld [vmem:[%s10715_s26 + $0x10] sm:$0xf]  ;;  %v1361_v56 = vld [vmem:[%s10715_s26 + $0x14] sm:$0xf] }
  0x24   : > { %v1378_v14 = vor.u32 %v1376_v8, %v1375_v11  ;;  %v1379_v15 = vrot.slane %v1375_v11, 4  ;;  %v1386_v16 = vor.u32 %v1384_v10, %v1383_v12  ;;  %v1388_v17 = vrot.slane %v1383_v12, 4  ;;  %v10400_v18 = vld [vmem:[%s662_s19] sm:$0xff]  ;;  %s9776_s30 = sshll.u32 %s14161_s20, 1  ;;  %v1362_v5 = vld [vmem:[%s10715_s26 + $0x18] sm:$0xf] }
  0x25   : > { %9812 = vmatmul.msk.bf16.vlgmr.msra.gmra.mxu0 %vm803_vm1, %v10400_v18  ;;  %9819 = vmatmul.msk.bf16.vlgmr.msra.gmra.mxu1 %vm803_vm1, %v10400_v18  ;;  %s706_s13 = sadd.s32 %s10695_s29, %s9776_s30  ;;  %v1392_v51 = vrot.slane %v1390_v45, 7  ;;  %v1400_v52 = vrot.slane %v1398_v46, 7  ;;  %v1393_v58 = vshll.u32 %v1358_v36, 16  ;;  %v1407_v61 = vshrl.u32 %v1360_v55, 16  ;;  %v1363_v6 = vld [vmem:[%s10715_s26 + $0x1c] sm:$0xf] }
  0x26   : > { %1508 = vrot.lane.b32.xlu0 %v1378_v14, %s10571_s28  ;;  %v1387_v19 = vsel %vm10736_vm4, %v1379_v15, %v1386_v16  ;;  %1512 = vrot.lane.b32.xlu2 %v1388_v17, %s10571_s28  ;;  %s9777_s1 = sshll.u32 %s706_s13, 2  ;;  %v1415_v62 = vshrl.u32 %v1361_v56, 16  ;;  %v1418_v3 = vshll.u32 %v1361_v56, 16  ;;  %v1410_v7 = vshll.u32 %v1360_v55, 16  ;;  %v10402_v8 = vld [vmem:[%s10700_s6 + $0x8] sm:$0xff]  ;;  %s9782_s6 = sshll.u32 %s14163_s22, 1 }
  0x27   : > { %1510 = vrot.lane.b32.xlu1 %v1387_v19, %s10571_s28  ;;  %s708_s16 = scalar_lea.vmem %s14039_s3, %s9777_s1  ;;  %v1396_v59 = vrot.slane %v1392_v51, 4  ;;  %v1403_v60 = vor.u32 %v1401_v53, %v1400_v52  ;;  %v1395_v63 = vor.u32 %v1393_v58, %v1392_v51  ;;  %v1409_v1 = vrot.slane %v1407_v61, 7  ;;  %p732_p12 = scmp.lt.s32.totalorder %s9782_s6, 23  ;;  %v1366_v36 = vld [vmem:[%s10715_s26 + $0x28] sm:$0xf] }
  0x28   : > { %v1281_v21 = vld [vmem:[%s708_s16] sm:$0xf]  ;;  %v1282_v22 = vld [vmem:[%s708_s16 + $0x4] sm:$0xf]  ;;  %v1283_v23 = vld [vmem:[%s708_s16 + $0x8] sm:$0xf] }
  0x29   : > { %v1286_v24 = vshrl.u32 %v1281_v21, 16  ;;  %v1289_v25 = vshll.u32 %v1281_v21, 16  ;;  %v1294_v26 = vshrl.u32 %v1282_v22, 16  ;;  %v1284_v27 = vld [vmem:[%s708_s16 + $0xc] sm:$0xf]  ;;  %s685_s14 = scalar_select %p10730_p11, %s14163_s22, 11  ;;  %v1404_v0 = vsel %vm10736_vm4, %v1396_v59, %v1403_v60 }
  0x2a   : > { %v1311_v28 = vshrl.u32 %v1284_v27, 16  ;;  %v1303_v31 = vshrl.u32 %v1283_v23, 16  ;;  %v1297_v32 = vshll.u32 %v1282_v22, 16  ;;  %v1314_v39 = vshll.u32 %v1284_v27, 16  ;;  %v1365_v21 = vld [vmem:[%s10715_s26 + $0x24] sm:$0xf] }
  0x2b   : > { %v1288_v29 = vrot.slane %v1286_v24, 7  ;;  %v1296_v30 = vrot.slane %v1294_v26, 7  ;;  %s9771_s20 = sshll.u32 %s685_s14, 1  ;;  %v1306_v41 = vshll.u32 %v1283_v23, 16  ;;  %v1417_v2 = vrot.slane %v1415_v62, 7  ;;  %s14165_s6 = smov (!%p732_p12, %s9782_s6), 23 }
  0x2c   : > { %v1313_v33 = vrot.slane %v1311_v28, 7  ;;  %s688_s27 = sadd.s32 %s10691_s18, %s9771_s20  ;;  %v1305_v40 = vrot.slane %v1303_v31, 7  ;;  %v1405_v4 = vrot.slane %v1400_v52, 4  ;;  %v1413_v9 = vrot.slane %v1409_v1, 4  ;;  %v10813_v37 = vld [vmem:[%s10715_s26 + $0x2c] sm:$0xf] }
  0x2d   : > { %v1291_v34 = vor.u32 %v1289_v25, %v1288_v29  ;;  %v1301_v35 = vrot.slane %v1296_v30, 4  ;;  %s9772_s19 = sshll.u32 %s688_s27, 2  ;;  %v1292_v43 = vrot.slane %v1288_v29, 4  ;;  %v1299_v44 = vor.u32 %v1297_v32, %v1296_v30  ;;  %s9783_s22 = sshll.u32 %s14165_s6, 1  ;;  %v1371_v52 = vld [vmem:[%s10715_s26 + $0x3c] sm:$0xf] }
  0x2e   : > { %v1318_v38 = vrot.slane %v1313_v33, 4  ;;  %s690_s30 = scalar_lea.vmem %s14038_s2, %s9772_s19  ;;  %v1309_v47 = vrot.slane %v1305_v40, 4  ;;  %v1316_v48 = vor.u32 %v1314_v39, %v1313_v33  ;;  %v1308_v49 = vor.u32 %v1306_v41, %v1305_v40  ;;  %s736_s13 = sadd.s32 %s10695_s29, %s9783_s22 }
  0x2f   : > { %9816 = vmatmul.msk.bf16.gmra.mxu2 %vm803_vm1, %v10404_v20  ;;  %9823 = vmatmul.msk.bf16.gmra.mxu3 %vm803_vm1, %v10404_v20  ;;  %v1300_v50 = vsel %vm10736_vm4, %v1292_v43, %v1299_v44  ;;  %v10405_v54 = vld [vmem:[%s690_s30] sm:$0xff]  ;;  %v1420_v10 = vor.u32 %v1418_v3, %v1417_v2  ;;  %v1424_v11 = vshrl.u32 %v1362_v5, 16  ;;  %v1432_v12 = vshrl.u32 %v1363_v6, 16  ;;  %s9784_s1 = sshll.u32 %s736_s13, 2  ;;  %p9825_p13 = scmp.ne.s32.totalorder %s10553_s21, 0 }
  0x30   : > { %1319 = vrot.lane.b32.xlu0 %v1291_v34, %s10571_s28  ;;  %1323 = vrot.lane.b32.xlu1 %v1301_v35, %s10571_s28  ;;  %v1317_v57 = vsel %vm10736_vm4, %v1309_v47, %v1316_v48  ;;  %v1412_v14 = vor.u32 %v1410_v7, %v1409_v1  ;;  %v1435_v18 = vshll.u32 %v1363_v6, 16  ;;  %v1422_v19 = vrot.slane %v1417_v2, 4  ;;  %v1364_v20 = vld [vmem:[%s10715_s26 + $0x20] sm:$0xf]  ;;  %v1369_v48 = vld [vmem:[%s10715_s26 + $0x34] sm:$0xf]  ;;  %s738_s16 = scalar_lea.vmem %s14041_s5, %s9784_s1 }
  0x31   : > { %1329 = vrot.lane.b32.xlu2 %v1318_v38, %s10571_s28  ;;  %v1421_v15 = vsel %vm10736_vm4, %v1413_v9, %v1420_v10  ;;  %v1426_v16 = vrot.slane %v1424_v11, 7  ;;  %v1434_v17 = vrot.slane %v1432_v12, 7  ;;  %v1427_v22 = vshll.u32 %v1362_v5, 16  ;;  %v1368_v38 = vld [vmem:[%s10715_s26 + $0x30] sm:$0xf] }
  0x32   : > { %v1441_v25 = vshrl.u32 %v1364_v20, 16  ;;  %v1449_v26 = vshrl.u32 %v1365_v21, 16  ;;  %v1452_v31 = vshll.u32 %v1365_v21, 16  ;;  %v1444_v33 = vshll.u32 %v1364_v20, 16  ;;  %v1636_v62 = vld [vmem:[%s738_s16] sm:$0xf] }
  0x33   : > { %v1430_v23 = vrot.slane %v1426_v16, 4  ;;  %v1437_v24 = vor.u32 %v1435_v18, %v1434_v17  ;;  %v1429_v27 = vor.u32 %v1427_v22, %v1426_v16  ;;  %v1439_v32 = vrot.slane %v1434_v17, 4  ;;  %v1638_v1 = vld [vmem:[%s738_s16 + $0x8] sm:$0xf]  ;;  %v1639_v11 = vld [vmem:[%s738_s16 + $0xc] sm:$0xf] }
  0x34   : > { %v1443_v29 = vrot.slane %v1441_v25, 7  ;;  %v1451_v30 = vrot.slane %v1449_v26, 7  ;;  %v1458_v40 = vshrl.u32 %v1366_v36, 16  ;;  %v1466_v41 = vshrl.u32 %v10813_v37, 16 }
  0x35   : > { %9813 = vmatmul.msk.bf16.gmra.mxu0 %vm803_vm1, %v10401_v42  ;;  %9820 = vmatmul.msk.bf16.gmra.mxu1 %vm803_vm1, %v10401_v42  ;;  %v1438_v28 = vsel %vm10736_vm4, %v1430_v23, %v1437_v24  ;;  %v1475_v44 = vshrl.u32 %v1368_v38, 16  ;;  %v1461_v46 = vshll.u32 %v1366_v36, 16  ;;  %v1478_v51 = vshll.u32 %v1368_v38, 16 }
  0x36   : > { %v1447_v34 = vrot.slane %v1443_v29, 4  ;;  %v1454_v35 = vor.u32 %v1452_v31, %v1451_v30  ;;  %v1446_v39 = vor.u32 %v1444_v33, %v1443_v29  ;;  %v1456_v43 = vrot.slane %v1451_v30, 4 }
  0x37   : > { %v1460_v45 = vrot.slane %v1458_v40, 7  ;;  %v1468_v47 = vrot.slane %v1466_v41, 7  ;;  %v1483_v55 = vshrl.u32 %v1369_v48, 16  ;;  %v1500_v58 = vshrl.u32 %v1371_v52, 16 }
  0x38   : > { %1321 = vrot.lane.b32.xlu0 %v1300_v50, %s10571_s28  ;;  %1325 = vrot.lane.b32.xlu1 %v1308_v49, %s10571_s28  ;;  %v1455_v42 = vsel %vm10736_vm4, %v1447_v34, %v1454_v35  ;;  %v1370_v49 = vld [vmem:[%s10715_s26 + $0x38] sm:$0xf]  ;;  %v1477_v50 = vrot.slane %v1475_v44, 7  ;;  %v1658_v7 = vshrl.u32 %v1638_v1, 16  ;;  %v1644_v9 = vshll.u32 %v1636_v62, 16 }
  0x39   : > { %1327 = vrot.lane.b32.xlu2 %v1317_v57, %s10571_s28  ;;  %v1463_v53 = vor.u32 %v1461_v46, %v1460_v45  ;;  %v1492_v56 = vshrl.u32 %v1370_v49, 16  ;;  %v1485_v59 = vrot.slane %v1483_v55, 7  ;;  %v1495_v61 = vshll.u32 %v1370_v49, 16  ;;  %v10872_v46 = vld [vmem:[%s14043_s7] ss:$0 sm:$0xff] }
  0x3a   : > { %v1480_v57 = vor.u32 %v1478_v51, %v1477_v50  ;;  %v1660_v12 = vrot.slane %v1658_v7, 7  ;;  %v1666_v17 = vshrl.u32 %v1639_v11, 16  ;;  %v1469_v18 = vshll.u32 %v10813_v37, 16 }
  0x3b   : > { %v1494_v60 = vrot.slane %v1492_v56, 7  ;;  %v1490_v2 = vrot.slane %v1485_v59, 4  ;;  %v1486_v20 = vshll.u32 %v1369_v48, 16  ;;  %v1464_v22 = vrot.slane %v1460_v45, 4  ;;  %v10867_v45 = vld [vmem:[%s14043_s7] ss:$0 sm:$0xff] }
  0x3c   : > { %v1668_v21 = vrot.slane %v1666_v17, 7  ;;  %v1471_v23 = vor.u32 %v1469_v18, %v1468_v47  ;;  %v1481_v24 = vrot.slane %v1477_v50, 4  ;;  %v1503_v29 = vshll.u32 %v1371_v52, 16 }
  0x3d   : > { %v1497_v3 = vor.u32 %v1495_v61, %v1494_v60  ;;  %v1488_v25 = vor.u32 %v1486_v20, %v1485_v59  ;;  %v1669_v31 = vshll.u32 %v1639_v11, 16  ;;  %v1498_v34 = vrot.slane %v1494_v60, 4 }
  0x3e   : > { %v1673_v26 = vrot.slane %v1668_v21, 4  ;;  %v1664_v36 = vrot.slane %v1660_v12, 4 }
  0x3f   : > { %9817 = vmatmul.msk.bf16.gmra.mxu2 %vm803_vm1, %v10405_v54  ;;  %9824 = vmatmul.msk.bf16.gmra.mxu3 %vm803_vm1, %v10405_v54  ;;  %v1473_v54 = vrot.slane %v1468_v47, 4  ;;  %v1489_v30 = vsel %vm10736_vm4, %v1481_v24, %v1488_v25  ;;  %v1671_v37 = vor.u32 %v1669_v31, %v1668_v21  ;;  %v1134_v24 = vld [vmem:[#allocation2 + $0xc] sm:$0xf] }
  0x40   : > { %1514 = vrot.lane.b32.xlu0 %v1395_v63, %s10571_s28  ;;  %1516 = vrot.lane.b32.xlu1 %v1404_v0, %s10571_s28  ;;  %v1637_v63 = vld [vmem:[%s738_s16 + $0x4] sm:$0xf]  ;;  %v1502_v0 = vrot.slane %v1500_v58, 7 }
  0x41   : > { %1518 = vrot.lane.b32.xlu2 %v1405_v4, %s10571_s28  ;;  %v1641_v4 = vshrl.u32 %v1636_v62, 16  ;;  %v1649_v5 = vshrl.u32 %v1637_v63, 16  ;;  %v1672_v40 = vsel %vm10736_vm4, %v1664_v36, %v1671_v37 }
  0x42   : > { %v1507_v6 = vrot.slane %v1502_v0, 4  ;;  %v1505_v35 = vor.u32 %v1503_v29, %v1502_v0 }
  0x43   : > { %v1651_v10 = vrot.slane %v1649_v5, 7 }
  0x45   : > { %9814 = vmatmul.msk.bf16.gmra.mxu0 %vm803_vm1, %v10402_v8  ;;  %9821 = vmatmul.msk.bf16.gmra.mxu1 %vm803_vm1, %v10402_v8  ;;  %v1643_v8 = vrot.slane %v1641_v4, 7  ;;  %v1656_v16 = vrot.slane %v1651_v10, 4 }
  0x48   : > { %1520 = vrot.lane.b32.xlu0 %v1412_v14, %s10571_s28  ;;  %1522 = vrot.lane.b32.xlu1 %v1421_v15, %s10571_s28  ;;  %v1661_v14 = vshll.u32 %v1638_v1, 16  ;;  %v1646_v15 = vor.u32 %v1644_v9, %v1643_v8  ;;  %v990_v1 = vld [vmem:[#allocation2 + $0x48] sm:$0xf] }
  0x49   : > { %1524 = vrot.lane.b32.xlu2 %v1422_v19, %s10571_s28 }
  0x4a   : > { %v1663_v19 = vor.u32 %v1661_v14, %v1660_v12 }
  0x50   : > { %1526 = vrot.lane.b32.xlu0 %v1429_v27, %s10571_s28  ;;  %1528 = vrot.lane.b32.xlu1 %v1438_v28, %s10571_s28  ;;  %v1472_v27 = vsel %vm10736_vm4, %v1464_v22, %v1471_v23  ;;  %v1652_v28 = vshll.u32 %v1637_v63, 16  ;;  %v903_v23 = vld [vmem:[#allocation2] sm:$0xf] }
  0x51   : > { %1530 = vrot.lane.b32.xlu2 %v1439_v32, %s10571_s28  ;;  %v1647_v32 = vrot.slane %v1643_v8, 4 }
  0x52   : > { %v1654_v33 = vor.u32 %v1652_v28, %v1651_v10 }
  0x54   : > { %v1655_v38 = vsel %vm10736_vm4, %v1647_v32, %v1654_v33 }
  0x58   : > { %1532 = vrot.lane.b32.xlu0 %v1446_v39, %s10571_s28  ;;  %1534 = vrot.lane.b32.xlu1 %v1455_v42, %s10571_s28  ;;  %v1506_v39 = vsel %vm10736_vm4, %v1498_v34, %v1505_v35 }
  0x59   : > { %1536 = vrot.lane.b32.xlu2 %v1456_v43, %s10571_s28 }
  0x60   : > { %1538 = vrot.lane.b32.xlu0 %v1463_v53, %s10571_s28  ;;  %1542 = vrot.lane.b32.xlu1 %v1473_v54, %s10571_s28 }
  0x61   : > { %1544 = vrot.lane.b32.xlu2 %v1480_v57, %s10571_s28 }
  0x68   : > { %1548 = vrot.lane.b32.xlu0 %v1490_v2, %s10571_s28  ;;  %1550 = vrot.lane.b32.xlu1 %v1497_v3, %s10571_s28  ;;  %v1218_v2 = vld [vmem:[#allocation2 + $0x54] sm:$0xf] }
  0x69   : > { %1554 = vrot.lane.b32.xlu2 %v1507_v6, %s10571_s28 }
  0x70   : > { %1674 = vrot.lane.b32.xlu0 %v1646_v15, %s10571_s28  ;;  %1678 = vrot.lane.b32.xlu1 %v1656_v16, %s10571_s28 }
  0x71   : > { %1680 = vrot.lane.b32.xlu2 %v1663_v19, %s10571_s28 }
  0x78   : > { %1684 = vrot.lane.b32.xlu0 %v1673_v26, %s10571_s28  ;;  %1540 = vrot.lane.b32.xlu1 %v1472_v27, %s10571_s28 }
  0x79   : > { %1546 = vrot.lane.b32.xlu2 %v1489_v30, %s10571_s28 }
  0x80   : > { %1676 = vrot.lane.b32.xlu1 %v1655_v38, %s10571_s28  ;;  %1552 = vrot.lane.b32.xlu0 %v1506_v39, %s10571_s28  ;;  %v10856_v41 = vpop.permute.xlu2 %1512 }
  0x81   : > { %1682 = vrot.lane.b32.xlu2 %v1672_v40, %s10571_s28 }
  0x8b   : > { %v10860_v43 = vpop.permute.xlu2 %1329 }
  0x93   : > { %v10876_v57 = vpop.permute.xlu2 %1327 }
  0x98   : > { %v10858_v42 = vpop.permute.xlu0 %1508 }
  0x99   : > { %v10862_v44 = vpop.permute.xlu1 %1510 }
  0x9b   : > { %v10918_v39 = vpop.permute.xlu2 %1518 }
  0xa2   : > { %v850_v47 = vpop.f32.mrf.mxu2  ;;  %v1086_v48 = vpop.f32.mrf.mxu3 }
  0xa3   : > { %v851_v49 = vadd.f32 %v10867_v45, %v850_v47  ;;  %v1087_v50 = vadd.f32 %v10872_v46, %v1086_v48  ;;  %v10878_v58 = vpop.permute.xlu0 %1319  ;;  %v835_v59 = vpop.f32.mrf.mxu0 }
  0xa4   : > { %v1071_v60 = vpop.f32.mrf.mxu1  ;;  %v836_v63 = vadd.f32 %v10867_v45, %v835_v59  ;;  %v10890_v7 = vpop.permute.xlu1 %1323 }
  0xa5   : > { %v871_v51 = vpack.c.bf16 %v851_v49, %v851_v49  ;;  %v1107_v52 = vpack.c.bf16 %v1087_v50, %v1087_v50  ;;  %v1072_v0 = vadd.f32 %v10872_v46, %v1071_v60  ;;  %v14069_v60 = vmov 0 }
  0xa6   : > { %v865_v8 = vpack.c.bf16 %v836_v63, %v836_v63  ;;  %v14070_v60 = vsel %vm10925_vm10, 4294967295, %v14069_v60 }
  0xa7   : > { %v970_v53 = vshrl.u32 %v871_v51, 16  ;;  %v973_v54 = vshll.u32 %v871_v51, 16  ;;  %v1198_v55 = vshrl.u32 %v1107_v52, 16  ;;  %v1201_v56 = vshll.u32 %v1107_v52, 16  ;;  %14071 = vst [vmem:[#allocation9_spill] sm:$0xff] %v14070_v60 }
  0xa8   : > { %v1101_v10 = vpack.c.bf16 %v1072_v0, %v1072_v0  ;;  %v881_v15 = vshrl.u32 %v865_v8, 16  ;;  %v884_v16 = vshll.u32 %v865_v8, 16 }
  0xa9   : > { %v10880_v61 = vrot.slane %v970_v53, 7  ;;  %v10882_v62 = vrot.slane %v1198_v55, 7  ;;  %v994_v53 = vld [vmem:[#allocation2 + $0x50] sm:$0x1] }
  0xaa   : > { %v852_v3 = vpop.f32.mrf.mxu2  ;;  %v10886_v4 = vpop.f32.mrf.mxu3  ;;  %v1114_v17 = vshrl.u32 %v1101_v10, 16  ;;  %v1117_v18 = vshll.u32 %v1101_v10, 16  ;;  %v10903_v20 = vrot.slane %v881_v15, 7 }
  0xab   : > { %v975_v5 = vor.u32 %v973_v54, %v10880_v61  ;;  %v1203_v6 = vor.u32 %v1201_v56, %v10882_v62  ;;  %v853_v11 = vadd.f32 %v10867_v45, %v852_v3  ;;  %v10907_v22 = vpop.permute.xlu0 %1321  ;;  %v837_v25 = vpop.f32.mrf.mxu0  ;;  %v976_v32 = vrot.slane %v10880_v61, 4 }
  0xac   : > { %v10905_v21 = vrot.slane %v1114_v17, 7  ;;  %v1073_v26 = vpop.f32.mrf.mxu1  ;;  %v886_v29 = vor.u32 %v884_v16, %v10903_v20  ;;  %v838_v33 = vadd.f32 %v10867_v45, %v837_v25  ;;  %v1326_v52 = vpop.permute.xlu1 %1325  ;;  %v887_v59 = vrot.slane %v10903_v20, 4 }
  0xad   : > { %v991_v12 = vsel %vm10894_vm7, %v975_v5, %v990_v1  ;;  %v1219_v14 = vsel %vm10894_vm7, %v1203_v6, %v1218_v2  ;;  %v872_v19 = vpack.c.bf16 %v853_v11, %v853_v11  ;;  %v1074_v34 = vadd.f32 %v10872_v46, %v1073_v26 }
  0xae   : > { %992 = vst [vmem:[#allocation2 + $0x48] sm:$0xf] %v991_v12  ;;  %v1119_v30 = vor.u32 %v1117_v18, %v10905_v21  ;;  %v904_v37 = vsel %vm10894_vm7, %v886_v29, %v903_v23  ;;  %v866_v48 = vpack.c.bf16 %v838_v33, %v838_v33  ;;  %v1120_v15 = vrot.slane %v10905_v21, 4  ;;  %v910_v18 = vld [vmem:[#allocation2 + $0x8] sm:$0x1] }
  0xaf   : > { %1220 = vst [vmem:[#allocation2 + $0x54] sm:$0xf] %v1219_v14  ;;  %v978_v27 = vshrl.u32 %v872_v19, 16  ;;  %v981_v28 = vshll.u32 %v872_v19, 16  ;;  %v1102_v49 = vpack.c.bf16 %v1074_v34, %v1074_v34  ;;  %v1138_v34 = vld [vmem:[#allocation2 + $0x14] sm:$0x1] }
  0xb0   : > { %v1135_v38 = vsel %vm10894_vm7, %v1119_v30, %v1134_v24  ;;  %905 = vst [vmem:[#allocation2] sm:$0xf] %v904_v37  ;;  %v889_v54 = vshrl.u32 %v866_v48, 16  ;;  %v892_v55 = vshll.u32 %v866_v48, 16  ;;  %v934_v37 = vld [vmem:[#allocation2 + $0x18] sm:$0xf] }
  0xb1   : > { %v980_v35 = vrot.slane %v978_v27, 7  ;;  %1136 = vst [vmem:[#allocation2 + $0xc] sm:$0xf] %v1135_v38  ;;  %v1122_v56 = vshrl.u32 %v1102_v49, 16  ;;  %v1125_v61 = vshll.u32 %v1102_v49, 16 }
  0xb2   : > { %v855_v31 = vpop.f32.mrf.mxu2  ;;  %v1091_v36 = vpop.f32.mrf.mxu3  ;;  %v891_v2 = vrot.slane %v889_v54, 7 }
  0xb3   : > { %v856_v40 = vadd.f32 %v10867_v45, %v855_v31  ;;  %v1092_v47 = vadd.f32 %v10872_v46, %v1091_v36  ;;  %v983_v50 = vor.u32 %v981_v28, %v980_v35  ;;  %v985_v51 = vrot.slane %v980_v35, 4  ;;  %v10929_v63 = vpop.permute.xlu0 %1514  ;;  %v840_v5 = vpop.f32.mrf.mxu0 }
  0xb4   : > { %v1124_v3 = vrot.slane %v1122_v56, 7  ;;  %v1076_v6 = vpop.f32.mrf.mxu1  ;;  %v841_v12 = vadd.f32 %v10867_v45, %v840_v5  ;;  %v894_v16 = vor.u32 %v892_v55, %v891_v2  ;;  %v896_v17 = vrot.slane %v891_v2, 4  ;;  %v10964_v35 = vpop.permute.xlu2 %1524 }
  0xb5   : > { %v10931_v0 = vpack.c.bf16 %v856_v40, %v856_v40  ;;  %v10933_v1 = vpack.c.bf16 %v1092_v47, %v1092_v47  ;;  %v995_v8 = vsel %vm10925_vm10, %v985_v51, %v994_v53  ;;  %v984_v10 = vsel %vm10736_vm4, %v976_v32, %v983_v50  ;;  %v10969_v48 = vpop.permute.xlu1 %1516 }
  0xb6   : > { %v1077_v14 = vadd.f32 %v10872_v46, %v1076_v6  ;;  %996 = vst [vmem:[#allocation2 + $0x50] sm:$0x1] %v995_v8  ;;  %v1127_v20 = vor.u32 %v1125_v61, %v1124_v3  ;;  %v867_v23 = vpack.c.bf16 %v841_v12, %v841_v12  ;;  %v895_v21 = vsel %vm10736_vm4, %v887_v59, %v894_v16 }
  0xb7   : > { %993 = vst.msk [vmem:[#allocation2 + $0x4c] sm:$0xf] %vm900_vm5, %v984_v10  ;;  %v1339_v19 = vld [vmem:[#allocation2] sm:$0xf]  ;;  %v998_v25 = vshrl.u32 %v10931_v0, 16  ;;  %v1129_v29 = vrot.slane %v1124_v3, 4  ;;  %v911_v33 = vsel %vm10925_vm10, %v896_v17, %v910_v18  ;;  %v1089_v61 = vadd.f32 %v10872_v46, %v10886_v4 }
  0xb8   : > { %v1103_v24 = vpack.c.bf16 %v1077_v14, %v1077_v14  ;;  %v1340_v27 = vsel %vm10941_vm11, %v10878_v58, %v1339_v19  ;;  %v1349_v28 = vld [vmem:[#allocation2 + $0xc] sm:$0xf]  ;;  %v1226_v30 = vshrl.u32 %v10933_v1, 16  ;;  %v914_v58 = vshrl.u32 %v867_v23, 16  ;;  %907 = vst.msk [vmem:[#allocation2 + $0x4] sm:$0xf] %vm900_vm5, %v895_v21 }
  0xb9   : > { %1341 = vst [vmem:[#allocation2] sm:$0xf] %v1340_v27  ;;  %v1350_v32 = vsel %vm10941_vm11, %v1326_v52, %v1349_v28  ;;  %v917_v36 = vshll.u32 %v867_v23, 16  ;;  %v1128_v47 = vsel %vm10736_vm4, %v1120_v15, %v1127_v20  ;;  %v10973_v50 = vrot.slane %v998_v25, 7  ;;  %v1018_v10 = vld [vmem:[#allocation2 + $0x60] sm:$0xf] }
  0xba   : > { %v10950_v26 = vpop.f32.mrf.mxu2  ;;  %v10958_v31 = vpop.f32.mrf.mxu3  ;;  %1351 = vst [vmem:[#allocation2 + $0xc] sm:$0xf] %v1350_v32  ;;  %v1142_v38 = vshrl.u32 %v1103_v24, 16  ;;  %v1145_v40 = vshll.u32 %v1103_v24, 16  ;;  %v10971_v49 = vrot.slane %v914_v58, 7  ;;  %v1001_v51 = vshll.u32 %v10931_v0, 16 }
  0xbb   : > { %912 = vst [vmem:[#allocation2 + $0x8] sm:$0x1] %v911_v33  ;;  %v1139_v52 = vsel %vm10925_vm10, %v1129_v29, %v1138_v34  ;;  %v10980_v54 = vrot.slane %v1226_v30, 7  ;;  %v1229_v55 = vshll.u32 %v10933_v1, 16  ;;  %v842_v56 = vpop.f32.mrf.mxu0  ;;  %v1162_v1 = vld [vmem:[#allocation2 + $0x24] sm:$0xf]  ;;  %v10998_v6 = vpop.permute.xlu0 %1520  ;;  %v11014_v23 = vpack.c.bf16 %v1089_v61, %v1089_v61 }
  0xbc   : > { %v10978_v53 = vrot.slane %v1142_v38, 7  ;;  %v1078_v59 = vpop.f32.mrf.mxu1  ;;  %1343 = vst.msk [vmem:[#allocation2 + $0x4] sm:$0xf] %vm1337_vm9, %v10907_v22  ;;  %v919_v0 = vor.u32 %v917_v36, %v10971_v49  ;;  %v843_v2 = vadd.f32 %v10867_v45, %v842_v56  ;;  %v1003_v8 = vor.u32 %v1001_v51, %v10973_v50  ;;  %v1246_v17 = vld [vmem:[#allocation2 + $0x6c] sm:$0xf]  ;;  %v11024_v58 = vpop.permute.xlu2 %1530 }
  0xbd   : > { %v1079_v3 = vadd.f32 %v10872_v46, %v1078_v59  ;;  %1137 = vst.msk [vmem:[#allocation2 + $0x10] sm:$0xf] %vm900_vm5, %v1128_v47  ;;  %v1231_v16 = vor.u32 %v1229_v55, %v10980_v54  ;;  %v920_v33 = vrot.slane %v10971_v49, 4  ;;  %v11032_v55 = vpop.permute.xlu1 %1522  ;;  %v938_v61 = vld [vmem:[#allocation2 + $0x20] sm:$0x1] }
  0xbe   : > { %v1147_v22 = vor.u32 %v1145_v40, %v10978_v53  ;;  %1140 = vst [vmem:[#allocation2 + $0x14] sm:$0x1] %v1139_v52  ;;  %v935_v4 = vsel %vm10894_vm7, %v919_v0, %v934_v37  ;;  %v868_v12 = vpack.c.bf16 %v843_v2, %v843_v2  ;;  %v1019_v34 = vsel %vm10894_vm7, %v1003_v8, %v1018_v10 }
  0xbf   : > { %v1104_v14 = vpack.c.bf16 %v1079_v3, %v1079_v3  ;;  %1352 = vst.msk [vmem:[#allocation2 + $0x10] sm:$0xf] %vm1337_vm9, %v10876_v57  ;;  %v1247_v40 = vsel %vm10894_vm7, %v1231_v16, %v1246_v17  ;;  %v1206_v2 = vshrl.u32 %v11014_v23, 16  ;;  %v1209_v10 = vshll.u32 %v11014_v23, 16 }
  0xc0   : > { %v1708_v15 = vld [vmem:[#allocation2] sm:$0x1]  ;;  %936 = vst [vmem:[#allocation2 + $0x18] sm:$0xf] %v935_v4  ;;  %v1163_v24 = vsel %vm10894_vm7, %v1147_v22, %v1162_v1  ;;  %v922_v57 = vshrl.u32 %v868_v12, 16  ;;  %v925_v28 = vshll.u32 %v868_v12, 16 }
  0xc1   : > { %v1709_v18 = vsel %vm10992_vm13, 0, %v1708_v15  ;;  %v1711_v19 = vld [vmem:[#allocation2 + $0xc] sm:$0x1]  ;;  %v1150_v21 = vshrl.u32 %v1104_v14, 16  ;;  %1164 = vst [vmem:[#allocation2 + $0x24] sm:$0xf] %v1163_v24 }
  0xc2   : > { %v860_v25 = vpop.f32.mrf.mxu2  ;;  %1710 = vst [vmem:[#allocation2] sm:$0x1] %v1709_v18  ;;  %v1712_v27 = vsel %vm10992_vm13, 0, %v1711_v19  ;;  %v1096_v30 = vpop.f32.mrf.mxu3  ;;  %v1346_v32 = vld [vmem:[#allocation2 + $0x8] sm:$0x1]  ;;  %v924_v36 = vrot.slane %v922_v57, 7 }
  0xc3   : > { %v861_v29 = vadd.f32 %v10867_v45, %v860_v25  ;;  %1713 = vst [vmem:[#allocation2 + $0xc] sm:$0x1] %v1712_v27  ;;  %v1097_v37 = vadd.f32 %v10872_v46, %v1096_v30  ;;  %v1347_v38 = vsel %vm11010_vm15, %v10890_v7, %v1346_v32  ;;  %v1152_v47 = vrot.slane %v1150_v21, 7  ;;  %v845_v52 = vpop.f32.mrf.mxu0  ;;  %v11050_v17 = vpop.permute.xlu0 %1526  ;;  %v1166_v57 = vld [vmem:[#allocation2 + $0x2c] sm:$0x1] }
  0xc4   : > { %v1153_v51 = vshll.u32 %v1104_v14, 16  ;;  %v1081_v49 = vpop.f32.mrf.mxu1  ;;  %1348 = vst [vmem:[#allocation2 + $0x8] sm:$0x1] %v1347_v38  ;;  %v927_v56 = vor.u32 %v925_v28, %v924_v36  ;;  %v929_v59 = vrot.slane %v924_v36, 4  ;;  %v846_v7 = vadd.f32 %v10867_v45, %v845_v52 }
  0xc5   : > { %v1353_v0 = vld [vmem:[#allocation2 + $0x14] sm:$0x1]  ;;  %1020 = vst [vmem:[#allocation2 + $0x60] sm:$0xf] %v1019_v34  ;;  %v11036_v3 = vpack.c.bf16 %v861_v29, %v861_v29  ;;  %v1082_v4 = vadd.f32 %v10872_v46, %v1081_v49  ;;  %v11044_v8 = vpack.c.bf16 %v1097_v37, %v1097_v37  ;;  %v1148_v14 = vrot.slane %v10978_v53, 4 }
  0xc6   : > { %v1354_v22 = vsel %vm11010_vm15, %v10860_v43, %v1353_v0  ;;  %1248 = vst [vmem:[#allocation2 + $0x6c] sm:$0xf] %v1247_v40  ;;  %v928_v1 = vsel %vm10736_vm4, %v920_v33, %v927_v56  ;;  %v939_v15 = vsel %vm10925_vm10, %v929_v59, %v938_v61  ;;  %v1155_v16 = vor.u32 %v1153_v51, %v1152_v47  ;;  %v11089_v61 = vpop.permute.xlu1 %1528  ;;  %v962_v0 = vld [vmem:[#allocation2 + $0x30] sm:$0xf] }
  0xc7   : > { %1355 = vst [vmem:[#allocation2 + $0x14] sm:$0x1] %v1354_v22  ;;  %v1580_v12 = vld [vmem:[#allocation2 + $0x18] sm:$0xf]  ;;  %v1157_v18 = vrot.slane %v1152_v47, 4  ;;  %v869_v19 = vpack.c.bf16 %v846_v7, %v846_v7  ;;  %v1105_v24 = vpack.c.bf16 %v1082_v4, %v1082_v4  ;;  %v11062_v53 = vrot.slane %v1206_v2, 7  ;;  %v1537_v47 = vpop.permute.xlu2 %1536 }
  0xc8   : > { %v1581_v43 = vsel %vm10941_vm11, %v10858_v42, %v1580_v12  ;;  %937 = vst.msk [vmem:[#allocation2 + $0x1c] sm:$0xf] %vm900_vm5, %v928_v1  ;;  %v1026_v25 = vshrl.u32 %v11036_v3, 16  ;;  %v1587_v27 = vld [vmem:[#allocation2 + $0x24] sm:$0xf]  ;;  %v858_v42 = vadd.f32 %v10867_v45, %v10950_v26  ;;  %v1254_v21 = vshrl.u32 %v11044_v8, 16 }
  0xc9   : > { %1582 = vst [vmem:[#allocation2 + $0x18] sm:$0xf] %v1581_v43  ;;  %v942_v28 = vshrl.u32 %v869_v19, 16  ;;  %v1588_v30 = vsel %vm10941_vm11, %v10929_v63, %v1587_v27  ;;  %v1156_v32 = vsel %vm10736_vm4, %v1148_v14, %v1155_v16  ;;  %v945_v33 = vshll.u32 %v869_v19, 16 }
  0xca   : > { %940 = vst [vmem:[#allocation2 + $0x20] sm:$0x1] %v939_v15  ;;  %v1170_v34 = vshrl.u32 %v1105_v24, 16  ;;  %v1167_v37 = vsel %vm10925_vm10, %v1157_v18, %v1166_v57  ;;  %v1173_v40 = vshll.u32 %v1105_v24, 16  ;;  %v1204_v63 = vrot.slane %v10882_v62, 4 }
  0xcb   : > { %v1745_v29 = vld [vmem:[#allocation2 + $0x8] sm:$0x1]  ;;  %1583 = vst.msk [vmem:[#allocation2 + $0x1c] sm:$0xf] %vm1337_vm9, %v10862_v44  ;;  %v847_v36 = vpop.f32.mrf.mxu0  ;;  %v11079_v38 = vrot.slane %v942_v28, 7  ;;  %v1211_v56 = vor.u32 %v1209_v10, %v11062_v53  ;;  %v11087_v59 = vpack.c.bf16 %v858_v42, %v858_v42  ;;  %v11091_v2 = vrot.slane %v1026_v25, 7  ;;  %v862_v10 = vpop.f32.mrf.mxu2 }
  0xcc   : > { %v1746_v26 = vsel %vm11058_vm3, 0, %v1745_v29  ;;  %1589 = vst [vmem:[#allocation2 + $0x24] sm:$0xf] %v1588_v30  ;;  %v1612_v44 = vld [vmem:[#allocation2 + $0x50] sm:$0x1]  ;;  %v11082_v51 = vrot.slane %v1170_v34, 7  ;;  %v848_v52 = vadd.f32 %v10867_v45, %v847_v36  ;;  %v1083_v16 = vpop.f32.mrf.mxu1  ;;  %v11107_v19 = vpop.permute.xlu0 %1532  ;;  %v863_v27 = vadd.f32 %v10867_v45, %v862_v10 }
  0xcd   : > { %1747 = vst [vmem:[#allocation2 + $0x8] sm:$0x1] %v1746_v26  ;;  %v1029_v62 = vshll.u32 %v11036_v3, 16  ;;  %v947_v22 = vor.u32 %v945_v33, %v11079_v38  ;;  %v11097_v1 = vrot.slane %v1254_v21, 7  ;;  %v1257_v4 = vshll.u32 %v11044_v8, 16 }
  0xce   : > { %v1748_v49 = vld [vmem:[#allocation2 + $0x14] sm:$0x1]  ;;  %1165 = vst.msk [vmem:[#allocation2 + $0x28] sm:$0xf] %vm900_vm5, %v1156_v32  ;;  %v1175_v14 = vor.u32 %v1173_v40, %v11082_v51  ;;  %v1190_v15 = vld [vmem:[#allocation2 + $0x3c] sm:$0xf]  ;;  %v1613_v18 = vsel %vm11010_vm15, %v1537_v47, %v1612_v44  ;;  %v870_v8 = vpack.c.bf16 %v848_v52, %v848_v52  ;;  %v1084_v29 = vadd.f32 %v10872_v46, %v1083_v16 }
  0xcf   : > { %v1749_v7 = vsel %vm11058_vm3, 0, %v1748_v49  ;;  %1168 = vst [vmem:[#allocation2 + $0x2c] sm:$0x1] %v1167_v37  ;;  %v1006_v57 = vshrl.u32 %v11087_v59, 16  ;;  %v1031_v25 = vor.u32 %v1029_v62, %v11091_v2  ;;  %v1046_v28 = vld [vmem:[#allocation2 + $0x78] sm:$0xf]  ;;  %v1259_v21 = vor.u32 %v1257_v4, %v11097_v1  ;;  %v1545_v52 = vpop.permute.xlu2 %1544 }
  0xd0   : > { %1750 = vst [vmem:[#allocation2 + $0x14] sm:$0x1] %v1749_v7  ;;  %v1714_v12 = vld [vmem:[#allocation2 + $0x18] sm:$0x1]  ;;  %v11121_v30 = vsel %vm10736_vm4, %v1204_v63, %v1211_v56  ;;  %v1094_v45 = vadd.f32 %v10872_v46, %v10958_v31  ;;  %v1191_v32 = vsel %vm10894_vm7, %v1175_v14, %v1190_v15  ;;  %v1274_v33 = vld [vmem:[#allocation2 + $0x84] sm:$0xf]  ;;  %v11134_v44 = vpack.c.bf16 %v863_v27, %v863_v27 }
  0xd1   : > { %v1715_v3 = vsel %vm10992_vm13, 0, %v1714_v12  ;;  %v1584_v43 = vld [vmem:[#allocation2 + $0x20] sm:$0x1]  ;;  %1590 = vst.msk [vmem:[#allocation2 + $0x28] sm:$0xf] %vm1337_vm9, %v10969_v48  ;;  %v963_v48 = vsel %vm10894_vm7, %v947_v22, %v962_v0  ;;  %v950_v34 = vshrl.u32 %v870_v8, 16  ;;  %v1047_v63 = vsel %vm10894_vm7, %v1031_v25, %v1046_v28  ;;  %v1535_v0 = vpop.permute.xlu1 %1534  ;;  %v1098_v22 = vpop.f32.mrf.mxu3 }
  0xd2   : > { %1716 = vst [vmem:[#allocation2 + $0x18] sm:$0x1] %v1715_v3  ;;  %v1585_v24 = vsel %vm11010_vm15, %v10856_v41, %v1584_v43  ;;  %v1622_v36 = vld [vmem:[#allocation2 + $0x60] sm:$0xf]  ;;  %v11129_v37 = vrot.slane %v1006_v57, 7  ;;  %v1009_v40 = vshll.u32 %v11087_v59, 16  ;;  %v1275_v47 = vsel %vm10894_vm7, %v1259_v21, %v1274_v33 }
  0xd3   : > { %v1717_v42 = vld [vmem:[#allocation2 + $0x24] sm:$0x1]  ;;  %1586 = vst [vmem:[#allocation2 + $0x20] sm:$0x1] %v1585_v24  ;;  %v1106_v49 = vpack.c.bf16 %v1084_v29, %v1084_v29  ;;  %v11141_v56 = vpack.c.bf16 %v1094_v45, %v1094_v45  ;;  %v1623_v59 = vsel %vm10941_vm11, %v1545_v52, %v1622_v36  ;;  %v952_v62 = vrot.slane %v950_v34, 7 }
  0xd4   : > { %v1718_v41 = vsel %vm10992_vm13, 0, %v1717_v42  ;;  %1614 = vst [vmem:[#allocation2 + $0x50] sm:$0x1] %v1613_v18  ;;  %v953_v7 = vshll.u32 %v870_v8, 16  ;;  %v1608_v4 = vld [vmem:[#allocation2 + $0x48] sm:$0xf]  ;;  %v1011_v9 = vor.u32 %v1009_v40, %v11129_v37  ;;  %v1099_v43 = vadd.f32 %v10872_v46, %v1098_v22  ;;  %v11154_v18 = vpop.permute.xlu0 %1538 }
  0xd5   : > { %1719 = vst [vmem:[#allocation2 + $0x24] sm:$0x1] %v1718_v41  ;;  %v1034_v12 = vshrl.u32 %v11134_v44, 16  ;;  %v1609_v16 = vsel %vm10941_vm11, %v11107_v19, %v1608_v4  ;;  %v1178_v3 = vshrl.u32 %v1106_v49, 16  ;;  %v948_v24 = vrot.slane %v11079_v38, 4 }
  0xd6   : > { %v1591_v26 = vld [vmem:[#allocation2 + $0x2c] sm:$0x1]  ;;  %964 = vst [vmem:[#allocation2 + $0x30] sm:$0xf] %v963_v48  ;;  %v955_v57 = vor.u32 %v953_v7, %v952_v62  ;;  %v966_v27 = vld [vmem:[#allocation2 + $0x38] sm:$0x1]  ;;  %v11172_v45 = vpack.c.bf16 %v1099_v43, %v1099_v43 }
  0xd7   : > { %v1592_v31 = vsel %vm11010_vm15, %v10918_v39, %v1591_v26  ;;  %1192 = vst [vmem:[#allocation2 + $0x3c] sm:$0xf] %v1191_v32  ;;  %v1004_v39 = vrot.slane %v10973_v50, 4  ;;  %v1234_v50 = vshrl.u32 %v11141_v56, 16  ;;  %v957_v46 = vrot.slane %v952_v62, 4  ;;  %v1555_v62 = vpop.permute.xlu2 %1554 }
  0xd8   : > { %1593 = vst [vmem:[#allocation2 + $0x2c] sm:$0x1] %v1592_v31  ;;  %v11163_v48 = vrot.slane %v1034_v12, 7  ;;  %v1180_v29 = vrot.slane %v1178_v3, 7  ;;  %v1181_v41 = vshll.u32 %v1106_v49, 16  ;;  %v956_v32 = vsel %vm10736_vm4, %v948_v24, %v955_v57 }
  0xd9   : > { %1048 = vst [vmem:[#allocation2 + $0x78] sm:$0xf] %v1047_v63  ;;  %v11167_v28 = vsel %vm10736_vm4, %v1004_v39, %v1011_v9  ;;  %v1236_v33 = vrot.slane %v1234_v50, 7  ;;  %v967_v36 = vsel %vm10925_vm10, %v957_v46, %v966_v27  ;;  %v11182_v26 = vpop.permute.xlu1 %1542  ;;  %v1176_v40 = vrot.slane %v11082_v51, 4  ;;  %v1194_v49 = vld [vmem:[#allocation2 + $0x44] sm:$0x1] }
  0xda   : > { %v1751_v10 = vld [vmem:[#allocation2 + $0x20] sm:$0x1]  ;;  %1276 = vst [vmem:[#allocation2 + $0x84] sm:$0xf] %v1275_v47  ;;  %v1183_v31 = vor.u32 %v1181_v41, %v1180_v29  ;;  %v1262_v47 = vshrl.u32 %v11172_v45, 16  ;;  %v1185_v52 = vrot.slane %v1180_v29, 4 }
  0xdb   : > { %v1752_v14 = vsel %vm11058_vm3, 0, %v1751_v10  ;;  %v1763_v15 = vld [vmem:[#allocation2 + $0x50] sm:$0x1]  ;;  %1624 = vst [vmem:[#allocation2 + $0x60] sm:$0xf] %v1623_v59  ;;  %v1241_v4 = vrot.slane %v1236_v33, 4 }
  0xdc   : > { %1753 = vst [vmem:[#allocation2 + $0x20] sm:$0x1] %v1752_v14  ;;  %v1764_v8 = vsel %vm11058_vm3, 0, %v1763_v15  ;;  %v11189_v7 = vpop.permute.xlu0 %1548  ;;  %v1050_v22 = vld [vmem:[#allocation2 + $0x80] sm:$0x1]  ;;  %v1184_v14 = vsel %vm10736_vm4, %v1176_v40, %v1183_v31  ;;  %v11203_v15 = vrot.slane %v1262_v47, 7 }
  0xdd   : > { %1765 = vst [vmem:[#allocation2 + $0x50] sm:$0x1] %v1764_v8  ;;  %v1594_v25 = vld [vmem:[#allocation2 + $0x30] sm:$0xf]  ;;  %v1213_v3 = vrot.slane %v11062_v53, 4  ;;  %v1013_v50 = vrot.slane %v11129_v37, 4 }
  0xde   : > { %v1595_v19 = vsel %vm10941_vm11, %v10998_v6, %v1594_v25  ;;  %v1601_v42 = vld [vmem:[#allocation2 + $0x3c] sm:$0xf]  ;;  %1610 = vst [vmem:[#allocation2 + $0x48] sm:$0xf] %v1609_v16  ;;  %v1615_v24 = vld [vmem:[#allocation2 + $0x54] sm:$0xf] }
  0xdf   : > { %v1754_v21 = vld [vmem:[#allocation2 + $0x2c] sm:$0x1]  ;;  %1596 = vst [vmem:[#allocation2 + $0x30] sm:$0xf] %v1595_v19  ;;  %v1602_v38 = vsel %vm10941_vm11, %v11050_v17, %v1601_v42  ;;  %v1041_v17 = vrot.slane %v11163_v48, 4  ;;  %v1237_v57 = vshll.u32 %v11141_v56, 16  ;;  %v1616_v53 = vsel %vm10941_vm11, %v11154_v18, %v1615_v24 }
  0xe0   : > { %v1755_v6 = vsel %vm11058_vm3, 0, %v1754_v21  ;;  %1603 = vst [vmem:[#allocation2 + $0x3c] sm:$0xf] %v1602_v38  ;;  %v1222_v43 = vld [vmem:[#allocation2 + $0x5c] sm:$0x1]  ;;  %v1269_v25 = vrot.slane %v11203_v15, 4  ;;  %v1681_v21 = vpop.permute.xlu2 %1680 }
  0xe1   : > { %1756 = vst [vmem:[#allocation2 + $0x2c] sm:$0x1] %v1755_v6  ;;  %v11197_v10 = vsel %vm10925_vm10, %v1041_v17, %v1050_v22  ;;  %v1022_v27 = vld [vmem:[#allocation2 + $0x68] sm:$0x1]  ;;  %v1551_v37 = vpop.permute.xlu1 %1550  ;;  %v1223_v56 = vsel %vm10925_vm10, %v1213_v3, %v1222_v43  ;;  %v1699_v46 = vld [vmem:[#allocation2 + $0x84] sm:$0xf]  ;;  %v1239_v18 = vor.u32 %v1237_v57, %v1236_v33 }
  0xe2   : > { %v1732_v34 = vld [vmem:[#allocation2 + $0x60] sm:$0x1]  ;;  %1611 = vst.msk [vmem:[#allocation2 + $0x4c] sm:$0xf] %vm1337_vm9, %v1535_v0  ;;  %v1250_v0 = vld [vmem:[#allocation2 + $0x74] sm:$0x1]  ;;  %v1023_v38 = vsel %vm10925_vm10, %v1013_v50, %v1022_v27 }
  0xe3   : > { %v1733_v63 = vsel %vm10992_vm13, 0, %v1732_v34  ;;  %965 = vst.msk [vmem:[#allocation2 + $0x34] sm:$0xf] %vm900_vm5, %v956_v32  ;;  %v1251_v8 = vsel %vm10925_vm10, %v1241_v4, %v1250_v0  ;;  %v1278_v29 = vld [vmem:[#allocation2 + $0x8c] sm:$0x1]  ;;  %v1232_v41 = vrot.slane %v10980_v54, 4  ;;  %v1700_v34 = vsel %vm10941_vm11, %v1681_v21, %v1699_v46 }
  0xe4   : > { %1734 = vst [vmem:[#allocation2 + $0x60] sm:$0x1] %v1733_v63  ;;  %v1279_v32 = vsel %vm10925_vm10, %v1269_v25, %v1278_v29  ;;  %v1260_v50 = vrot.slane %v11097_v1, 4  ;;  %v1037_v57 = vshll.u32 %v11134_v44, 16  ;;  %v1032_v1 = vrot.slane %v11091_v2, 4 }
  0xe5   : > { %v1726_v59 = vld [vmem:[#allocation2 + $0x48] sm:$0x1]  ;;  %968 = vst [vmem:[#allocation2 + $0x38] sm:$0x1] %v967_v36  ;;  %v1692_v36 = vld [vmem:[#allocation2 + $0x78] sm:$0xf]  ;;  %v11242_v40 = vsel %vm10736_vm4, %v1232_v41, %v1239_v18 }
  0xe6   : > { %v1720_v51 = vld [vmem:[#allocation2 + $0x30] sm:$0x1]  ;;  %v1727_v39 = vsel %vm10992_vm13, 0, %v1726_v59  ;;  %1597 = vst.msk [vmem:[#allocation2 + $0x34] sm:$0xf] %vm1337_vm9, %v11032_v55  ;;  %v1195_v55 = vsel %vm10925_vm10, %v1185_v52, %v1194_v49  ;;  %v1039_v44 = vor.u32 %v1037_v57, %v11163_v48 }
  0xe7   : > { %v1721_v9 = vsel %vm10992_vm13, 0, %v1720_v51  ;;  %v1723_v12 = vld [vmem:[#allocation2 + $0x3c] sm:$0x1]  ;;  %1728 = vst [vmem:[#allocation2 + $0x48] sm:$0x1] %v1727_v39 }
  0xe8   : > { %1722 = vst [vmem:[#allocation2 + $0x30] sm:$0x1] %v1721_v9  ;;  %v1724_v16 = vsel %vm10992_vm13, 0, %v1723_v12  ;;  %v1547_v43 = vpop.permute.xlu2 %1546 }
  0xe9   : > { %1725 = vst [vmem:[#allocation2 + $0x3c] sm:$0x1] %v1724_v16  ;;  %v1679_v49 = vpop.permute.xlu1 %1678  ;;  %v1265_v16 = vshll.u32 %v11172_v45, 16 }
  0xea   : > { %1193 = vst.msk [vmem:[#allocation2 + $0x40] sm:$0xf] %vm900_vm5, %v1184_v14 }
  0xeb   : > { %1196 = vst [vmem:[#allocation2 + $0x44] sm:$0x1] %v1195_v55  ;;  %v1267_v45 = vor.u32 %v1265_v16, %v11203_v15 }
  0xec   : > { %v1598_v19 = vld [vmem:[#allocation2 + $0x38] sm:$0x1]  ;;  %1604 = vst.msk [vmem:[#allocation2 + $0x40] sm:$0xf] %vm1337_vm9, %v11089_v61  ;;  %v1629_v61 = vld [vmem:[#allocation2 + $0x6c] sm:$0xf] }
  0xed   : > { %v1599_v42 = vsel %vm11010_vm15, %v10964_v35, %v1598_v19  ;;  %1252 = vst [vmem:[#allocation2 + $0x74] sm:$0x1] %v1251_v8  ;;  %v1630_v6 = vsel %vm10941_vm11, %v1551_v37, %v1629_v61  ;;  %v1675_v35 = vpop.permute.xlu0 %1674 }
  0xee   : > { %1600 = vst [vmem:[#allocation2 + $0x38] sm:$0x1] %v1599_v42  ;;  %v1693_v54 = vsel %vm10941_vm11, %v1675_v35, %v1692_v36 }
  0xef   : > { %1617 = vst [vmem:[#allocation2 + $0x54] sm:$0xf] %v1616_v53 }
  0xf0   : > { %1224 = vst [vmem:[#allocation2 + $0x5c] sm:$0x1] %v1223_v56  ;;  %v1683_v2 = vpop.permute.xlu2 %1682 }
  0xf1   : > { %1024 = vst [vmem:[#allocation2 + $0x68] sm:$0x1] %v1023_v38  ;;  %v1541_v24 = vpop.permute.xlu1 %1540 }
  0xf2   : > { %v1605_v17 = vld [vmem:[#allocation2 + $0x44] sm:$0x1]  ;;  %1631 = vst [vmem:[#allocation2 + $0x6c] sm:$0xf] %v1630_v6 }
  0xf3   : > { %v1606_v33 = vsel %vm11010_vm15, %v11024_v58, %v1605_v17  ;;  %1701 = vst [vmem:[#allocation2 + $0x84] sm:$0xf] %v1700_v34 }
  0xf4   : > { %1607 = vst [vmem:[#allocation2 + $0x44] sm:$0x1] %v1606_v33  ;;  %v1633_v63 = vld [vmem:[#allocation2 + $0x74] sm:$0x1] }
  0xf5   : > { %v1757_v31 = vld [vmem:[#allocation2 + $0x38] sm:$0x1]  ;;  %v1634_v47 = vsel %vm11010_vm15, %v1555_v62, %v1633_v63  ;;  %1694 = vst [vmem:[#allocation2 + $0x78] sm:$0xf] %v1693_v54  ;;  %v1685_v19 = vpop.permute.xlu0 %1684 }
  0xf6   : > { %v1758_v11 = vsel %vm11058_vm3, 0, %v1757_v31  ;;  %1635 = vst [vmem:[#allocation2 + $0x74] sm:$0x1] %v1634_v47  ;;  %v1729_v52 = vld [vmem:[#allocation2 + $0x54] sm:$0x1] }
  0xf7   : > { %1759 = vst [vmem:[#allocation2 + $0x38] sm:$0x1] %v1758_v11  ;;  %v1730_v58 = vsel %vm10992_vm13, 0, %v1729_v52  ;;  %v1619_v59 = vld [vmem:[#allocation2 + $0x5c] sm:$0x1] }
  0xf8   : > { %1731 = vst [vmem:[#allocation2 + $0x54] sm:$0x1] %v1730_v58  ;;  %v1620_v0 = vsel %vm11010_vm15, %v11182_v26, %v1619_v59  ;;  %v1626_v22 = vld [vmem:[#allocation2 + $0x68] sm:$0x1] }
  0xf9   : > { %1621 = vst [vmem:[#allocation2 + $0x5c] sm:$0x1] %v1620_v0  ;;  %v1627_v62 = vsel %vm11010_vm15, %v11189_v7, %v1626_v22  ;;  %v1735_v4 = vld [vmem:[#allocation2 + $0x6c] sm:$0x1]  ;;  %v1677_v42 = vpop.permute.xlu1 %1676 }
  0xfa   : > { %1628 = vst [vmem:[#allocation2 + $0x68] sm:$0x1] %v1627_v62  ;;  %v1736_v51 = vsel %vm10992_vm13, 0, %v1735_v4  ;;  %v1741_v39 = vld [vmem:[#allocation2 + $0x84] sm:$0x1] }
  0xfb   : > { %v1760_v9 = vld [vmem:[#allocation2 + $0x44] sm:$0x1]  ;;  %1737 = vst [vmem:[#allocation2 + $0x6c] sm:$0x1] %v1736_v51  ;;  %v1742_v12 = vsel %vm10992_vm13, 0, %v1741_v39 }
  0xfc   : > { %v1761_v26 = vsel %vm11058_vm3, 0, %v1760_v9  ;;  %1743 = vst [vmem:[#allocation2 + $0x84] sm:$0x1] %v1742_v12  ;;  %v1738_v14 = vld [vmem:[#allocation2 + $0x78] sm:$0x1] }
  0xfd   : > { %1762 = vst [vmem:[#allocation2 + $0x44] sm:$0x1] %v1761_v26  ;;  %v1772_v7 = vld [vmem:[#allocation2 + $0x74] sm:$0x1]  ;;  %v1739_v55 = vsel %vm10992_vm13, 0, %v1738_v14 }
  0xfe   : > { %v1773_v3 = vsel %vm11058_vm3, 0, %v1772_v7  ;;  %1740 = vst [vmem:[#allocation2 + $0x78] sm:$0x1] %v1739_v55 }
  0xff   : > { %1774 = vst [vmem:[#allocation2 + $0x74] sm:$0x1] %v1773_v3 }
 0x100   : > { %v1766_v8 = vld [vmem:[#allocation2 + $0x5c] sm:$0x1]  ;;  %1052 = vst [vmem:[#allocation2 + $0x80] sm:$0x1] %v11197_v10  ;;  %v1268_v10 = vsel %vm10736_vm4, %v1260_v50, %v1267_v45 }
 0x101   : > { %v1767_v5 = vsel %vm11058_vm3, 0, %v1766_v8  ;;  %v1769_v25 = vld [vmem:[#allocation2 + $0x68] sm:$0x1]  ;;  %1280 = vst [vmem:[#allocation2 + $0x8c] sm:$0x1] %v1279_v32 }
 0x102   : > { %1768 = vst [vmem:[#allocation2 + $0x5c] sm:$0x1] %v1767_v5  ;;  %v1770_v27 = vsel %vm11058_vm3, 0, %v1769_v25 }
 0x103   : > { %1771 = vst [vmem:[#allocation2 + $0x68] sm:$0x1] %v1770_v27 }
 0x104   : > { %1021 = vst.msk [vmem:[#allocation2 + $0x64] sm:$0xf] %vm900_vm5, %v11167_v28  ;;  %v1040_v28 = vsel %vm10736_vm4, %v1032_v1, %v1039_v44 }
 0x105   : > { %1625 = vst.msk [vmem:[#allocation2 + $0x64] sm:$0xf] %vm1337_vm9, %v1547_v43 }
 0x106   : > { %1221 = vst.msk [vmem:[#allocation2 + $0x58] sm:$0xf] %vm900_vm5, %v11121_v30  ;;  %v1553_v30 = vpop.permute.xlu0 %1552 }
 0x107   : > { %v1696_v15 = vld [vmem:[#allocation2 + $0x80] sm:$0x1]  ;;  %1618 = vst.msk [vmem:[#allocation2 + $0x58] sm:$0xf] %vm1337_vm9, %v1541_v24 }
 0x108   : > { %v1697_v53 = vsel %vm11010_vm15, %v1679_v49, %v1696_v15  ;;  %v1703_v37 = vld [vmem:[#allocation2 + $0x8c] sm:$0x1]  ;;  %1277 = vst.msk [vmem:[#allocation2 + $0x88] sm:$0xf] %vm900_vm5, %v1268_v10 }
 0x109   : > { %1698 = vst [vmem:[#allocation2 + $0x80] sm:$0x1] %v1697_v53  ;;  %v1704_v48 = vsel %vm11010_vm15, %v1685_v19, %v1703_v37 }
 0x10a   : > { %1705 = vst [vmem:[#allocation2 + $0x8c] sm:$0x1] %v1704_v48 }
 0x10b   : > { %1702 = vst.msk [vmem:[#allocation2 + $0x88] sm:$0xf] %vm1337_vm9, %v1683_v2 }
 0x10c   : > { %1049 = vst.msk [vmem:[#allocation2 + $0x7c] sm:$0xf] %vm900_vm5, %v1040_v28 }
 0x10d   : > { %1695 = vst.msk [vmem:[#allocation2 + $0x7c] sm:$0xf] %vm1337_vm9, %v1677_v42 }
 0x10e   : > { %1249 = vst.msk [vmem:[#allocation2 + $0x70] sm:$0xf] %vm900_vm5, %v11242_v40 }
 0x10f   : > { %1632 = vst.msk [vmem:[#allocation2 + $0x70] sm:$0xf] %vm1337_vm9, %v1553_v30  ;;  %1784 = sbr.rel (%p9825_p13) target bundleno = 283 (0x11b), region = 72 }
 0x110   : > { %v1775_v56 = vld [vmem:[#allocation2 + $0x80] sm:$0x1] }
 0x111   : > { %v1776_v20 = vsel %vm11058_vm3, 0, %v1775_v56  ;;  %v1778_v46 = vld [vmem:[#allocation2 + $0x8c] sm:$0x1] }
 0x112   : > { %1777 = vst [vmem:[#allocation2 + $0x80] sm:$0x1] %v1776_v20  ;;  %v1779_v21 = vsel %vm11058_vm3, 0, %v1778_v46 }
 0x113   : > { %1780 = vst [vmem:[#allocation2 + $0x8c] sm:$0x1] %v1779_v21 }
 0x114   : > { %vm1785_vm7 = vcmask 125952   ;;  %v10572_v38 = vmov 0  }
 0x115   : > { %1786 = vst.msk [vmem:[#allocation2] sm:$0xf] %vm1785_vm7, %v10572_v38 }
 0x116   : > { %1787 = vst.msk [vmem:[#allocation2 + $0x4] sm:$0xf] %vm1785_vm7, %v10572_v38 }
 0x117   : > { %1789 = vst.msk [vmem:[#allocation2 + $0x8] sm:$0x1] %vm1706_vm12, %v10572_v38 }
 0x118   : > { %1790 = vst.msk [vmem:[#allocation2 + $0xc] sm:$0xf] %vm1785_vm7, %v10572_v38 }
 0x119   : > { %1791 = vst.msk [vmem:[#allocation2 + $0x10] sm:$0xf] %vm1785_vm7, %v10572_v38 }
 0x11a   : > { %1792 = vst.msk [vmem:[#allocation2 + $0x14] sm:$0x1] %vm1706_vm12, %v10572_v38 }
 0x11b PF: > { %p9826_p0 = scmp.ne.s32.totalorder %s10553_s21, 2 }
 0x11d   : > { %1796 = sbr.rel (%p9826_p0) target bundleno = 297 (0x129), region = 76 }
 0x122   : > { %vm1797_vm9 = vcmask 125952   ;;  %v10573_v23 = vmov 0  }
 0x123   : > { %1798 = vst.msk [vmem:[#allocation2 + $0x78] sm:$0xf] %vm1797_vm9, %v10573_v23 }
 0x124   : > { %1799 = vst.msk [vmem:[#allocation2 + $0x7c] sm:$0xf] %vm1797_vm9, %v10573_v23 }
 0x125   : > { %1801 = vst.msk [vmem:[#allocation2 + $0x80] sm:$0x1] %vm1706_vm12, %v10573_v23 }
 0x126   : > { %1802 = vst.msk [vmem:[#allocation2 + $0x84] sm:$0xf] %vm1797_vm9, %v10573_v23 }
 0x127   : > { %1803 = vst.msk [vmem:[#allocation2 + $0x88] sm:$0xf] %vm1797_vm9, %v10573_v23 }
 0x128   : > { %1804 = vst.msk [vmem:[#allocation2 + $0x8c] sm:$0x1] %vm1706_vm12, %v10573_v23 }
 0x129 PF: > { %v10416_v61 = vld [vmem:[%s14044_s8] sm:$0xff]  ;;  %vm2119_vm11 = vcmask 130048   ;;  %v10417_v41 = vld [vmem:[%s14044_s8 + $0x8] sm:$0xff]  ;;  %vm1840_vm13 = vsmask.f32 3328  ;;  %v10428_v18 = vld [vmem:[%s14044_s8 + $0x10] sm:$0xff] }
 0x12a   : > { %v10406_v29 = vld [vmem:[#allocation2] sm:$0xff]  ;;  %v10429_v6 = vld [vmem:[%s14044_s8 + $0x18] sm:$0xff]  ;;  %vm1841_vm12 = vsmask.f32 7440  ;;  %2302 = vmatpush.bf16.msrb.mxu3 %v10416_v61  ;;  %2157 = vmatpush.bf16.msrb.mxu2 %v10417_v41  ;;  %v1827_v34 = vld [vmem:[#allocation2 + $0x8] sm:$0x1] }
 0x12b   : > { %v1805_v35 = vld [vmem:[#allocation2] sm:$0xf]  ;;  %v1806_v32 = vld [vmem:[#allocation2 + $0x4] sm:$0xf]  ;;  %2470 = vmatpush.bf16.msrb.mxu0 %v10428_v18  ;;  %2888 = vmatpush.bf16.msrb.mxu1 %v10429_v6  ;;  %v1863_v40 = vshll.u32 %v1827_v34, 16  ;;  %v10418_v31 = vld [vmem:[#allocation2 + $0xc] sm:$0xff] }
 0x12c   : > { %v1844_v36 = vshrl.u32 %v1805_v35, 16  ;;  %v1847_v17 = vshll.u32 %v1805_v35, 16  ;;  %v1853_v54 = vshll.u32 %v1806_v32, 16  ;;  %v1857_v33 = vshrl.u32 %v1806_v32, 16  ;;  %v10440_v63 = vld [vmem:[%s14044_s8 + $0x20] sm:$0xff]  ;;  %v10441_v47 = vld [vmem:[%s14044_s8 + $0x28] sm:$0xff]  ;;  %vm11340_vm14 = vmor %vm1840_vm13, %vm1841_vm12 }
 0x12d   : > { %v2542_v49 = vld [vmem:[#allocation2 + $0xc] sm:$0xf]  ;;  %v2543_v58 = vld [vmem:[#allocation2 + $0x10] sm:$0xf]  ;;  %9887 = vmatmul.msk.bf16.vlgmr.msrb.gmra.mxu3 %vm2119_vm11, %v10406_v29  ;;  %v1865_v22 = vrot.slane %v1863_v40, 5  ;;  %v10443_v26 = vld [vmem:[%s14044_s8 + $0x38] sm:$0xff] }
 0x12e   : > { %v1846_v11 = vrot.slane %v1844_v36, 4  ;;  %v1849_v52 = vrot.slane %v1847_v17, 5  ;;  %v1855_v59 = vrot.slane %v1853_v54, 5  ;;  %v1859_v0 = vrot.slane %v1857_v33, 4  ;;  %3076 = vmatpush.bf16.msra.mxu2 %v10440_v63  ;;  %v2544_v62 = vld [vmem:[#allocation2 + $0x14] sm:$0x1]  ;;  %9943 = vmatmul.msk.bf16.vlgmr.msrb.gmra.mxu0 %vm2119_vm11, %v10418_v31 }
 0x12f   : > { %v2576_v4 = vshrl.u32 %v2542_v49, 16  ;;  %v2579_v39 = vshll.u32 %v2542_v49, 16  ;;  %v2585_v9 = vshll.u32 %v2543_v58, 16  ;;  %v2589_v12 = vshrl.u32 %v2543_v58, 16  ;;  %3494 = vmatpush.bf16.msra.mxu3 %v10441_v47  ;;  %v10442_v14 = vld [vmem:[%s14044_s8 + $0x30] sm:$0xff]  ;;  %4127 = vmatpush.bf16.msra.mxu0 %v10443_v26  ;;  %s10574_s24 = smov 4  }
 0x130   : > { %v1850_v51 = vor.u32 %v1849_v52, %v1846_v11  ;;  %v1860_v7 = vor.u32 %v1859_v0, %v1855_v59  ;;  %v2595_v3 = vshll.u32 %v2544_v62, 16  ;;  %v1807_v43 = vld [vmem:[#allocation2 + $0xc] sm:$0xf]  ;;  %v1808_v50 = vld [vmem:[#allocation2 + $0x10] sm:$0xf]  ;;  %4492 = vmatpush.bf16.msra.mxu1 %v10442_v14  ;;  %v10419_v0 = vld [vmem:[#allocation2 + $0x18] sm:$0xff] }
 0x131   : > { %v2578_v55 = vrot.slane %v2576_v4, 4  ;;  %v2581_v24 = vrot.slane %v2579_v39, 5  ;;  %v2587_v57 = vrot.slane %v2585_v9, 5  ;;  %v2591_v45 = vrot.slane %v2589_v12, 4  ;;  %v1828_v15 = vld [vmem:[#allocation2 + $0x14] sm:$0x1] }
 0x132   : > { %v1851_v8 = vrot.slane %v1850_v51, 4  ;;  %v1861_v5 = vrot.slane %v1860_v7, 4  ;;  %v2597_v25 = vrot.slane %v2595_v3, 5  ;;  %v1868_v27 = vshrl.u32 %v1807_v43, 16  ;;  %v2545_v37 = vld [vmem:[#allocation2 + $0x18] sm:$0xf] }
 0x133   : > { %v1871_v19 = vshll.u32 %v1807_v43, 16  ;;  %v2582_v44 = vor.u32 %v2581_v24, %v2578_v55  ;;  %v2592_v10 = vor.u32 %v2591_v45, %v2587_v57  ;;  %v1877_v53 = vshll.u32 %v1808_v50, 16  ;;  %v2546_v61 = vld [vmem:[#allocation2 + $0x1c] sm:$0xf]  ;;  %v10407_v36 = vld [vmem:[#allocation2 + $0xc] sm:$0xff] }
 0x134   : > { %v1856_v1 = vsel %vm11340_vm14, %v1851_v8, %v1855_v59  ;;  %v1866_v2 = vsel %vm11340_vm14, %v1861_v5, %v1865_v22  ;;  %v1870_v28 = vrot.slane %v1868_v27, 4  ;;  %v1881_v38 = vshrl.u32 %v1808_v50, 16  ;;  %v2547_v54 = vld [vmem:[#allocation2 + $0x20] sm:$0x1]  ;;  %v1809_v47 = vld [vmem:[#allocation2 + $0x18] sm:$0xf] }
 0x135   : > { %v2083_v48 = vunpack.c.l.b16 %v1856_v1  ;;  %v1873_v42 = vrot.slane %v1871_v19, 5  ;;  %v2084_v30 = vunpack.c.l.b16 %v1866_v2  ;;  %v2583_v56 = vrot.slane %v2582_v44, 4  ;;  %v1810_v59 = vld [vmem:[#allocation2 + $0x1c] sm:$0xf]  ;;  %v2548_v8 = vld [vmem:[#allocation2 + $0x24] sm:$0xf] }
 0x136   : > { %v2593_v20 = vrot.slane %v2592_v10, 4  ;;  %v1879_v46 = vrot.slane %v1877_v53, 5  ;;  %v1887_v23 = vshll.u32 %v1828_v15, 16  ;;  %v2600_v29 = vshrl.u32 %v2545_v37, 16  ;;  %v2549_v45 = vld [vmem:[#allocation2 + $0x28] sm:$0xf] }
 0x137   : > { %v1874_v21 = vor.u32 %v1873_v42, %v1870_v28  ;;  %v2103_v41 = vpack.c.b16 %v2084_v30, %v2083_v48  ;;  %v2588_v18 = vsel %vm11340_vm14, %v2583_v56, %v2587_v57  ;;  %v2603_v35 = vshll.u32 %v2545_v37, 16  ;;  %v1829_v1 = vld [vmem:[#allocation2 + $0x20] sm:$0x1] }
 0x138   : > { %v2598_v6 = vsel %vm11340_vm14, %v2593_v20, %v2597_v25  ;;  %v2815_v32 = vunpack.c.l.b16 %v2588_v18  ;;  %v1883_v17 = vrot.slane %v1881_v38, 4  ;;  %v2602_v40 = vrot.slane %v2600_v29, 4 }
 0x139   : > { %v2816_v34 = vunpack.c.l.b16 %v2598_v6  ;;  %9833 = vmatmul.msk.bf16.vlgmr.msrb.gmra.mxu2 %vm2119_vm11, %v2103_v41  ;;  %v1875_v33 = vrot.slane %v1874_v21, 4  ;;  %v2605_v63 = vrot.slane %v2603_v35, 5  ;;  %v2609_v31 = vshll.u32 %v2546_v61, 16  ;;  %v1811_v35 = vld [vmem:[#allocation2 + $0x24] sm:$0xf] }
 0x13a   : > { %v1884_v52 = vor.u32 %v1883_v17, %v1879_v46  ;;  %v1889_v49 = vrot.slane %v1887_v23, 5  ;;  %v2613_v58 = vshrl.u32 %v2546_v61, 16  ;;  %v2619_v4 = vshll.u32 %v2547_v54, 16  ;;  %v2550_v61 = vld [vmem:[#allocation2 + $0x2c] sm:$0x1] }
 0x13b   : > { %v2835_v11 = vpack.c.b16 %v2816_v34, %v2815_v32  ;;  %v2606_v22 = vor.u32 %v2605_v63, %v2602_v40  ;;  %v2611_v62 = vrot.slane %v2609_v31, 5  ;;  %v1892_v9 = vshrl.u32 %v1809_v47, 16  ;;  %v1812_v32 = vld [vmem:[#allocation2 + $0x28] sm:$0xf] }
 0x13c   : > { %v1885_v51 = vrot.slane %v1884_v52, 4  ;;  %v2615_v39 = vrot.slane %v2613_v58, 4  ;;  %v1895_v12 = vshll.u32 %v1809_v47, 16  ;;  %v1880_v26 = vsel %vm11340_vm14, %v1875_v33, %v1879_v46  ;;  %v10408_v33 = vld [vmem:[#allocation2 + $0x18] sm:$0xff]  ;;  %v10420_v40 = vld [vmem:[#allocation2 + $0x24] sm:$0xff] }
 0x13d   : > { %9959 = vmatmul.msk.bf16.vlgmr.msrb.gmra.mxu1 %vm2119_vm11, %v2835_v11  ;;  %v2607_v14 = vrot.slane %v2606_v22, 4  ;;  %v1901_v7 = vshll.u32 %v1810_v59, 16  ;;  %v1905_v55 = vshrl.u32 %v1810_v59, 16  ;;  %9888 = vmatmul.msk.bf16.gmra.mxu3 %vm2119_vm11, %v10407_v36  ;;  %v2621_v50 = vrot.slane %v2619_v4, 5  ;;  %v2551_v22 = vld [vmem:[#allocation2 + $0x30] sm:$0xf] }
 0x13e   : > { %v1890_v3 = vsel %vm11340_vm14, %v1885_v51, %v1889_v49  ;;  %v2616_v43 = vor.u32 %v2615_v39, %v2611_v62  ;;  %9944 = vmatmul.msk.bf16.gmra.mxu0 %vm2119_vm11, %v10419_v0  ;;  %v1894_v24 = vrot.slane %v1892_v9, 4  ;;  %v1897_v57 = vrot.slane %v1895_v12, 5 }
 0x13f   : > { %v2085_v5 = vunpack.c.l.b16 %v1880_v26  ;;  %v2086_v25 = vunpack.c.l.b16 %v1890_v3  ;;  %v2612_v27 = vsel %vm11340_vm14, %v2607_v14, %v2611_v62  ;;  %v1903_v44 = vrot.slane %v1901_v7, 5  ;;  %v2552_v62 = vld [vmem:[#allocation2 + $0x34] sm:$0xf]  ;;  %v1830_v14 = vld [vmem:[#allocation2 + $0x2c] sm:$0x1] }
 0x140   : > { %v2617_v19 = vrot.slane %v2616_v43, 4  ;;  %v1907_v10 = vrot.slane %v1905_v55, 4  ;;  %v2624_v15 = vshrl.u32 %v2548_v8, 16  ;;  %v2627_v53 = vshll.u32 %v2548_v8, 16 }
 0x141   : > { %v2633_v2 = vshll.u32 %v2549_v45, 16  ;;  %v2817_v48 = vunpack.c.l.b16 %v2612_v27  ;;  %v1898_v28 = vor.u32 %v1897_v57, %v1894_v24  ;;  %v2104_v42 = vpack.c.b16 %v2086_v25, %v2085_v5 }
 0x142   : > { %v2622_v37 = vsel %vm11340_vm14, %v2617_v19, %v2621_v50  ;;  %v1911_v56 = vshll.u32 %v1829_v1, 16  ;;  %v2637_v20 = vshrl.u32 %v2549_v45, 16  ;;  %v1908_v46 = vor.u32 %v1907_v10, %v1903_v44 }
 0x143   : > { %v2818_v30 = vunpack.c.l.b16 %v2622_v37  ;;  %v2626_v21 = vrot.slane %v2624_v15, 4  ;;  %v2629_v38 = vrot.slane %v2627_v53, 5  ;;  %v2635_v23 = vrot.slane %v2633_v2, 5  ;;  %v2553_v15 = vld [vmem:[#allocation2 + $0x38] sm:$0x1] }
 0x144   : > { %v2639_v29 = vrot.slane %v2637_v20, 4  ;;  %v1899_v18 = vrot.slane %v1898_v28, 4  ;;  %v1913_v6 = vrot.slane %v1911_v56, 5  ;;  %v1909_v34 = vrot.slane %v1908_v46, 4  ;;  %v1814_v20 = vld [vmem:[#allocation2 + $0x34] sm:$0xf] }
 0x145   : > { %v2836_v41 = vpack.c.b16 %v2818_v30, %v2817_v48  ;;  %v2630_v36 = vor.u32 %v2629_v38, %v2626_v21  ;;  %v2643_v54 = vshll.u32 %v2550_v61, 16  ;;  %v1916_v63 = vshrl.u32 %v1811_v35, 16  ;;  %v10409_v46 = vld [vmem:[#allocation2 + $0x24] sm:$0xff] }
 0x146   : > { %v2640_v17 = vor.u32 %v2639_v29, %v2635_v23  ;;  %v1919_v31 = vshll.u32 %v1811_v35, 16  ;;  %v1925_v47 = vshll.u32 %v1812_v32, 16  ;;  %v1929_v11 = vshrl.u32 %v1812_v32, 16  ;;  %v2554_v35 = vld [vmem:[#allocation2 + $0x3c] sm:$0xf] }
 0x147   : > { %v1904_v52 = vsel %vm11340_vm14, %v1899_v18, %v1903_v44  ;;  %v1914_v49 = vsel %vm11340_vm14, %v1909_v34, %v1913_v6  ;;  %v2631_v58 = vrot.slane %v2630_v36, 4  ;;  %v2645_v0 = vrot.slane %v2643_v54, 5  ;;  %v2555_v36 = vld [vmem:[#allocation2 + $0x40] sm:$0xf] }
 0x148   : > { %v2641_v59 = vrot.slane %v2640_v17, 4  ;;  %v1918_v4 = vrot.slane %v1916_v63, 4  ;;  %v1921_v51 = vrot.slane %v1919_v31, 5  ;;  %v1927_v39 = vrot.slane %v1925_v47, 5  ;;  %v1831_v31 = vld [vmem:[#allocation2 + $0x38] sm:$0x1] }
 0x149   : > { %9834 = vmatmul.msk.bf16.gmra.mxu2 %vm2119_vm11, %v2104_v42  ;;  %v1931_v9 = vrot.slane %v1929_v11, 4  ;;  %v2087_v12 = vunpack.c.l.b16 %v1904_v52  ;;  %v2088_v26 = vunpack.c.l.b16 %v1914_v49  ;;  %v2648_v7 = vshrl.u32 %v2551_v22, 16  ;;  %v1813_v42 = vld [vmem:[#allocation2 + $0x30] sm:$0xf] }
 0x14a   : > { %v2651_v55 = vshll.u32 %v2551_v22, 16  ;;  %v2636_v3 = vsel %vm11340_vm14, %v2631_v58, %v2635_v23  ;;  %v2646_v43 = vsel %vm11340_vm14, %v2641_v59, %v2645_v0  ;;  %v2657_v50 = vshll.u32 %v2552_v62, 16  ;;  %v10421_v23 = vld [vmem:[#allocation2 + $0x30] sm:$0xff] }
 0x14b   : > { %v2661_v8 = vshrl.u32 %v2552_v62, 16  ;;  %v1922_v24 = vor.u32 %v1921_v51, %v1918_v4  ;;  %v1932_v57 = vor.u32 %v1931_v9, %v1927_v39  ;;  %v1935_v45 = vshll.u32 %v1830_v14, 16 }
 0x14c   : > { %v2819_v5 = vunpack.c.l.b16 %v2636_v3  ;;  %v2820_v25 = vunpack.c.l.b16 %v2646_v43  ;;  %v2650_v27 = vrot.slane %v2648_v7, 4  ;;  %v2653_v19 = vrot.slane %v2651_v55, 5  ;;  %v1815_v3 = vld [vmem:[#allocation2 + $0x3c] sm:$0xf]  ;;  %v1816_v43 = vld [vmem:[#allocation2 + $0x40] sm:$0xf] }
 0x14d   : > { %9960 = vmatmul.msk.bf16.gmra.mxu1 %vm2119_vm11, %v2836_v41  ;;  %9889 = vmatmul.msk.bf16.gmra.mxu3 %vm2119_vm11, %v10408_v33  ;;  %v2105_v1 = vpack.c.b16 %v2088_v26, %v2087_v12  ;;  %v2659_v44 = vrot.slane %v2657_v50, 5  ;;  %v2663_v10 = vrot.slane %v2661_v8, 4  ;;  %v1923_v53 = vrot.slane %v1922_v24, 4  ;;  %v2556_v26 = vld [vmem:[#allocation2 + $0x44] sm:$0x1] }
 0x14e   : > { %9945 = vmatmul.msk.bf16.gmra.mxu0 %vm2119_vm11, %v10420_v40  ;;  %v1933_v37 = vrot.slane %v1932_v57, 4  ;;  %v1937_v2 = vrot.slane %v1935_v45, 5  ;;  %v2837_v48 = vpack.c.b16 %v2820_v25, %v2819_v5  ;;  %v2654_v28 = vor.u32 %v2653_v19, %v2650_v27  ;;  %v10410_v27 = vld [vmem:[#allocation2 + $0x30] sm:$0xff] }
 0x14f   : > { %v2664_v30 = vor.u32 %v2663_v10, %v2659_v44  ;;  %v2667_v56 = vshll.u32 %v2553_v15, 16  ;;  %v1928_v21 = vsel %vm11340_vm14, %v1923_v53, %v1927_v39  ;;  %v1940_v61 = vshrl.u32 %v1813_v42, 16  ;;  %v10422_v15 = vld [vmem:[#allocation2 + $0x3c] sm:$0xff] }
 0x150   : > { %v1938_v38 = vsel %vm11340_vm14, %v1933_v37, %v1937_v2  ;;  %v2655_v29 = vrot.slane %v2654_v28, 4  ;;  %v1943_v41 = vshll.u32 %v1813_v42, 16  ;;  %v1949_v18 = vshll.u32 %v1814_v20, 16  ;;  %v2557_v37 = vld [vmem:[#allocation2 + $0x48] sm:$0xf] }
 0x151   : > { %v1953_v6 = vshrl.u32 %v1814_v20, 16  ;;  %v2665_v32 = vrot.slane %v2664_v30, 4  ;;  %v2669_v34 = vrot.slane %v2667_v56, 5  ;;  %v2089_v17 = vunpack.c.l.b16 %v1928_v21  ;;  %v2558_v2 = vld [vmem:[#allocation2 + $0x4c] sm:$0xf] }
 0x152   : > { %v2090_v54 = vunpack.c.l.b16 %v1938_v38  ;;  %v1942_v33 = vrot.slane %v1940_v61, 4  ;;  %v2672_v40 = vshrl.u32 %v2554_v35, 16  ;;  %v2660_v63 = vsel %vm11340_vm14, %v2655_v29, %v2659_v44  ;;  %v1832_v38 = vld [vmem:[#allocation2 + $0x44] sm:$0x1] }
 0x153   : > { %v1945_v47 = vrot.slane %v1943_v41, 5  ;;  %v1951_v11 = vrot.slane %v1949_v18, 5  ;;  %v1955_v52 = vrot.slane %v1953_v6, 4  ;;  %v2670_v49 = vsel %vm11340_vm14, %v2665_v32, %v2669_v34 }
 0x154   : > { %v2675_v58 = vshll.u32 %v2554_v35, 16  ;;  %v2681_v59 = vshll.u32 %v2555_v36, 16  ;;  %v2685_v0 = vshrl.u32 %v2555_v36, 16  ;;  %v2106_v22 = vpack.c.b16 %v2090_v54, %v2089_v17 }
 0x155   : > { %v1959_v62 = vshll.u32 %v1831_v31, 16  ;;  %v2821_v4 = vunpack.c.l.b16 %v2660_v63  ;;  %v2822_v51 = vunpack.c.l.b16 %v2670_v49  ;;  %v1946_v39 = vor.u32 %v1945_v47, %v1942_v33 }
 0x156   : > { %v2674_v9 = vrot.slane %v2672_v40, 4  ;;  %v1956_v12 = vor.u32 %v1955_v52, %v1951_v11  ;;  %v2677_v14 = vrot.slane %v2675_v58, 5  ;;  %v2683_v7 = vrot.slane %v2681_v59, 5 }
 0x157   : > { %v2687_v55 = vrot.slane %v2685_v0, 4  ;;  %v2838_v50 = vpack.c.b16 %v2822_v51, %v2821_v4  ;;  %v1961_v8 = vrot.slane %v1959_v62, 5  ;;  %v2691_v24 = vshll.u32 %v2556_v26, 16  ;;  %v1817_v51 = vld [vmem:[#allocation2 + $0x48] sm:$0xf] }
 0x158   : > { %v1947_v57 = vrot.slane %v1946_v39, 4  ;;  %v1957_v45 = vrot.slane %v1956_v12, 4  ;;  %v2678_v5 = vor.u32 %v2677_v14, %v2674_v9  ;;  %v1964_v19 = vshrl.u32 %v1815_v3, 16  ;;  %v1818_v39 = vld [vmem:[#allocation2 + $0x4c] sm:$0xf]  ;;  %v10411_v9 = vld [vmem:[#allocation2 + $0x3c] sm:$0xff] }
 0x159   : > { %9835 = vmatmul.msk.bf16.gmra.mxu2 %vm2119_vm11, %v2105_v1  ;;  %v2688_v25 = vor.u32 %v2687_v55, %v2683_v7  ;;  %v1967_v1 = vshll.u32 %v1815_v3, 16  ;;  %v1973_v44 = vshll.u32 %v1816_v43, 16  ;;  %v1977_v10 = vshrl.u32 %v1816_v43, 16  ;;  %v10423_v14 = vld [vmem:[#allocation2 + $0x48] sm:$0xff] }
 0x15a   : > { %v2693_v53 = vrot.slane %v2691_v24, 5  ;;  %v1962_v28 = vsel %vm11340_vm14, %v1957_v45, %v1961_v8  ;;  %v2679_v42 = vrot.slane %v2678_v5, 4  ;;  %v1966_v56 = vrot.slane %v1964_v19, 4  ;;  %v2561_v45 = vld [vmem:[#allocation2 + $0x58] sm:$0xf] }
 0x15b   : > { %v2689_v30 = vrot.slane %v2688_v25, 4  ;;  %v1969_v20 = vrot.slane %v1967_v1, 5  ;;  %v1979_v21 = vrot.slane %v1977_v10, 4  ;;  %v2699_v61 = vshll.u32 %v2557_v37, 16 }
 0x15c   : > { %v2705_v29 = vshll.u32 %v2558_v2, 16  ;;  %v2709_v41 = vshrl.u32 %v2558_v2, 16  ;;  %v2092_v6 = vunpack.c.l.b16 %v1962_v28  ;;  %v2684_v35 = vsel %vm11340_vm14, %v2679_v42, %v2683_v7 }
 0x15d   : > { %9961 = vmatmul.msk.bf16.gmra.mxu1 %vm2119_vm11, %v2837_v48  ;;  %9890 = vmatmul.msk.bf16.gmra.mxu3 %vm2119_vm11, %v10409_v46  ;;  %v1952_v48 = vsel %vm11340_vm14, %v1947_v57, %v1951_v11  ;;  %v1975_v46 = vrot.slane %v1973_v44, 5  ;;  %v2694_v32 = vsel %vm11340_vm14, %v2689_v30, %v2693_v53  ;;  %v1970_v34 = vor.u32 %v1969_v20, %v1966_v56  ;;  %v2559_v11 = vld [vmem:[#allocation2 + $0x50] sm:$0x1]  ;;  %v2560_v57 = vld [vmem:[#allocation2 + $0x54] sm:$0xf] }
 0x15e   : > { %9946 = vmatmul.msk.bf16.gmra.mxu0 %vm2119_vm11, %v10421_v23  ;;  %v2696_v23 = vshrl.u32 %v2557_v37, 16  ;;  %v2091_v18 = vunpack.c.l.b16 %v1952_v48  ;;  %v1983_v17 = vshll.u32 %v1832_v38, 16  ;;  %v2701_v33 = vrot.slane %v2699_v61, 5  ;;  %v1833_v53 = vld [vmem:[#allocation2 + $0x50] sm:$0x1] }
 0x15f   : > { %v1980_v36 = vor.u32 %v1979_v21, %v1975_v46  ;;  %v2707_v40 = vrot.slane %v2705_v29, 5  ;;  %v2711_v63 = vrot.slane %v2709_v41, 4  ;;  %v2823_v31 = vunpack.c.l.b16 %v2684_v35  ;;  %v2562_v41 = vld [vmem:[#allocation2 + $0x5c] sm:$0x1] }
 0x160   : > { %v2698_v54 = vrot.slane %v2696_v23, 4  ;;  %v2824_v47 = vunpack.c.l.b16 %v2694_v32  ;;  %v2107_v52 = vpack.c.b16 %v2092_v6, %v2091_v18  ;;  %v1971_v49 = vrot.slane %v1970_v34, 4  ;;  %v1819_v18 = vld [vmem:[#allocation2 + $0x54] sm:$0xf]  ;;  %v1820_v6 = vld [vmem:[#allocation2 + $0x58] sm:$0xf] }
 0x161   : > { %v1985_v58 = vrot.slane %v1983_v17, 5  ;;  %v1981_v59 = vrot.slane %v1980_v36, 4  ;;  %v2715_v62 = vshll.u32 %v2559_v11, 16  ;;  %v1988_v43 = vshrl.u32 %v1817_v51, 16 }
 0x162   : > { %v2702_v0 = vor.u32 %v2701_v33, %v2698_v54  ;;  %v2839_v4 = vpack.c.b16 %v2824_v47, %v2823_v31  ;;  %v1976_v12 = vsel %vm11340_vm14, %v1971_v49, %v1975_v46  ;;  %v1997_v8 = vshll.u32 %v1818_v39, 16 }
 0x163   : > { %v1986_v26 = vsel %vm11340_vm14, %v1981_v59, %v1985_v58  ;;  %v2717_v3 = vrot.slane %v2715_v62, 5  ;;  %v2001_v24 = vshrl.u32 %v1818_v39, 16  ;;  %v2093_v5 = vunpack.c.l.b16 %v1976_v12  ;;  %v2563_v58 = vld [vmem:[#allocation2 + $0x60] sm:$0xf]  ;;  %v2564_v59 = vld [vmem:[#allocation2 + $0x64] sm:$0xf] }
 0x164   : > { %v2703_v7 = vrot.slane %v2702_v0, 4  ;;  %v2094_v25 = vunpack.c.l.b16 %v1986_v26  ;;  %v1990_v1 = vrot.slane %v1988_v43, 4  ;;  %v1999_v10 = vrot.slane %v1997_v8, 5  ;;  %v1834_v26 = vld [vmem:[#allocation2 + $0x5c] sm:$0x1] }
 0x165   : > { %v2720_v37 = vshrl.u32 %v2560_v57, 16  ;;  %v2723_v2 = vshll.u32 %v2560_v57, 16  ;;  %v2729_v48 = vshll.u32 %v2561_v45, 16  ;;  %v2733_v28 = vshrl.u32 %v2561_v45, 16 }
 0x166   : > { %v2108_v42 = vpack.c.b16 %v2094_v25, %v2093_v5  ;;  %v2007_v21 = vshll.u32 %v1833_v53, 16  ;;  %v2739_v33 = vshll.u32 %v2562_v41, 16  ;;  %v2015_v31 = vshll.u32 %v1819_v18, 16 }
 0x167   : > { %v2722_v38 = vrot.slane %v2720_v37, 4  ;;  %v2725_v23 = vrot.slane %v2723_v2, 5  ;;  %v2731_v61 = vrot.slane %v2729_v48, 5  ;;  %v2735_v29 = vrot.slane %v2733_v28, 4 }
 0x168   : > { %v2009_v34 = vrot.slane %v2007_v21, 5  ;;  %v2021_v47 = vshll.u32 %v1820_v6, 16  ;;  %v2025_v11 = vshrl.u32 %v1820_v6, 16  ;;  %v2017_v39 = vrot.slane %v2015_v31, 5  ;;  %v10413_v21 = vld [vmem:[#allocation2 + $0x54] sm:$0xff] }
 0x169   : > { %9836 = vmatmul.msk.bf16.gmra.mxu2 %vm2119_vm11, %v2106_v22  ;;  %v2712_v22 = vor.u32 %v2711_v63, %v2707_v40  ;;  %v2726_v17 = vor.u32 %v2725_v23, %v2722_v38  ;;  %v2736_v54 = vor.u32 %v2735_v29, %v2731_v61  ;;  %v2012_v63 = vshrl.u32 %v1819_v18, 16 }
 0x16a   : > { %v2027_v12 = vrot.slane %v2025_v11, 4  ;;  %v2031_v5 = vshll.u32 %v1834_v26, 16  ;;  %v2568_v26 = vld [vmem:[#allocation2 + $0x74] sm:$0x1]  ;;  %vm3981_vm15 = vcmask 1042432   ;;  %vm3982_vm3 = vcmask 1046532  }
 0x16b   : > { %v2713_v55 = vrot.slane %v2712_v22, 4  ;;  %v2727_v22 = vrot.slane %v2726_v17, 4  ;;  %v2737_v62 = vrot.slane %v2736_v54, 4  ;;  %v2567_v17 = vld [vmem:[#allocation2 + $0x70] sm:$0xf]  ;;  %vm11491_vm7 = vmor %vm3981_vm15, %vm3982_vm3  ;;  %vm3830_vm9 = vcmask 27648  }
 0x16c   : > { %v2033_v2 = vrot.slane %v2031_v5, 5  ;;  %vm12467_vm13 = vmand %vm3830_vm9, %vm901_vm6  ;;  %vm3837_vm12 = vcmask 24576  }
 0x16d   : > { %9962 = vmatmul.msk.bf16.gmra.mxu1 %vm2119_vm11, %v2838_v50  ;;  %9891 = vmatmul.msk.bf16.gmra.mxu3 %vm2119_vm11, %v10410_v27  ;;  %v1991_v50 = vshll.u32 %v1817_v51, 16  ;;  %v2708_v27 = vsel %vm11340_vm14, %v2703_v7, %v2707_v40  ;;  %v2718_v19 = vsel %vm11340_vm14, %v2713_v55, %v2717_v3  ;;  %v10412_v40 = vld [vmem:[#allocation2 + $0x48] sm:$0xff]  ;;  %v2014_v51 = vrot.slane %v2012_v63, 4  ;;  %vm12485_vm15 = vmand %vm3837_vm12, %vm877_vm2 }
 0x16e   : > { %9947 = vmatmul.msk.bf16.gmra.mxu0 %vm2119_vm11, %v10422_v15  ;;  %v2003_v15 = vrot.slane %v2001_v24, 4  ;;  %v2825_v30 = vunpack.c.l.b16 %v2708_v27  ;;  %v2826_v56 = vunpack.c.l.b16 %v2718_v19  ;;  %v2747_v7 = vshll.u32 %v2563_v58, 16 }
 0x16f   : > { %v1993_v44 = vrot.slane %v1991_v50, 5  ;;  %v2753_v55 = vshll.u32 %v2564_v59, 16  ;;  %v2757_v3 = vshrl.u32 %v2564_v59, 16  ;;  %v2732_v8 = vsel %vm11340_vm14, %v2727_v22, %v2731_v61  ;;  %v10425_v61 = vld [vmem:[#allocation2 + $0x60] sm:$0xff] }
 0x170   : > { %v2004_v46 = vor.u32 %v2003_v15, %v1999_v10  ;;  %v2840_v35 = vpack.c.b16 %v2826_v56, %v2825_v30  ;;  %v2018_v57 = vor.u32 %v2017_v39, %v2014_v51  ;;  %v2749_v27 = vrot.slane %v2747_v7, 5  ;;  %v2565_v15 = vld [vmem:[#allocation2 + $0x68] sm:$0x1] }
 0x171   : > { %v1994_v20 = vor.u32 %v1993_v44, %v1990_v1  ;;  %v2755_v19 = vrot.slane %v2753_v55, 5  ;;  %v2759_v1 = vrot.slane %v2757_v3, 4  ;;  %v2827_v44 = vunpack.c.l.b16 %v2732_v8 }
 0x172   : > { %v2005_v36 = vrot.slane %v2004_v46, 4  ;;  %v2019_v37 = vrot.slane %v2018_v57, 4  ;;  %v2763_v30 = vshll.u32 %v2565_v15, 16  ;;  %v1822_v46 = vld [vmem:[#allocation2 + $0x64] sm:$0xf]  ;;  %v2781_v22 = vshrl.u32 %v2567_v17, 16 }
 0x173   : > { %v1995_v32 = vrot.slane %v1994_v20, 4  ;;  %v1821_v20 = vld [vmem:[#allocation2 + $0x60] sm:$0xf]  ;;  %vm6220_vm12 = vcmask 60448  }
 0x174   : > { %v2010_v0 = vsel %vm11340_vm14, %v2005_v36, %v2009_v34  ;;  %v2765_v18 = vrot.slane %v2763_v30, 5  ;;  %v2036_v6 = vshrl.u32 %v1821_v20, 16  ;;  %v2049_v34 = vshrl.u32 %v1822_v46, 16  ;;  %v2566_v36 = vld [vmem:[#allocation2 + $0x6c] sm:$0xf] }
 0x175   : > { %v2000_v49 = vsel %vm11340_vm14, %v1995_v32, %v1999_v10  ;;  %v2096_v50 = vunpack.c.l.b16 %v2010_v0  ;;  %v2045_v32 = vshll.u32 %v1822_v46, 16  ;;  %v2771_v59 = vshll.u32 %v2566_v36, 16 }
 0x176   : > { %v2095_v43 = vunpack.c.l.b16 %v2000_v49  ;;  %v2038_v31 = vrot.slane %v2036_v6, 4  ;;  %v1835_v49 = vld [vmem:[#allocation2 + $0x68] sm:$0x1]  ;;  %v2777_v0 = vshll.u32 %v2567_v17, 16  ;;  %v2783_v3 = vrot.slane %v2781_v22, 4 }
 0x177   : > { %v2047_v11 = vrot.slane %v2045_v32, 5  ;;  %v2773_v7 = vrot.slane %v2771_v59, 5 }
 0x178   : > { %v2109_v53 = vpack.c.b16 %v2096_v50, %v2095_v43  ;;  %v2779_v55 = vrot.slane %v2777_v0, 5  ;;  %v1823_v43 = vld [vmem:[#allocation2 + $0x6c] sm:$0xf]  ;;  %v2787_v50 = vshll.u32 %v2568_v26, 16  ;;  %v2571_v0 = vld [vmem:[#allocation2 + $0x80] sm:$0x1] }
 0x179   : > { %9837 = vmatmul.msk.bf16.gmra.mxu2 %vm2119_vm11, %v2107_v52  ;;  %v10424_v52 = vld [vmem:[#allocation2 + $0x54] sm:$0xff] }
 0x17a   : > { %v2789_v15 = vrot.slane %v2787_v50, 5  ;;  %v2811_v50 = vshll.u32 %v2571_v0, 16 }
 0x17d   : > { %9963 = vmatmul.msk.bf16.gmra.mxu1 %vm2119_vm11, %v2839_v4  ;;  %9892 = vmatmul.msk.bf16.gmra.mxu3 %vm2119_vm11, %v10411_v9  ;;  %v2741_v4 = vrot.slane %v2739_v33, 5  ;;  %v2023_v9 = vrot.slane %v2021_v47, 5 }
 0x17e   : > { %9948 = vmatmul.msk.bf16.gmra.mxu0 %vm2119_vm11, %v10423_v14  ;;  %v2744_v14 = vshrl.u32 %v2563_v58, 16  ;;  %v2768_v58 = vshrl.u32 %v2566_v36, 16 }
 0x17f   : > { %v2742_v24 = vsel %vm11340_vm14, %v2737_v62, %v2741_v4  ;;  %v2028_v45 = vor.u32 %v2027_v12, %v2023_v9  ;;  %v2024_v38 = vsel %vm11340_vm14, %v2019_v37, %v2023_v9  ;;  %v2055_v12 = vshll.u32 %v1835_v49, 16  ;;  %v2570_v37 = vld [vmem:[#allocation2 + $0x7c] sm:$0xf] }
 0x180   : > { %v2746_v25 = vrot.slane %v2744_v14, 4  ;;  %v2828_v10 = vunpack.c.l.b16 %v2742_v24  ;;  %v2097_v54 = vunpack.c.l.b16 %v2024_v38  ;;  %v2770_v14 = vrot.slane %v2768_v58, 4 }
 0x181   : > { %v2029_v48 = vrot.slane %v2028_v45, 4  ;;  %v2057_v45 = vrot.slane %v2055_v12, 5 }
 0x182   : > { %v2750_v28 = vor.u32 %v2749_v27, %v2746_v25  ;;  %v2841_v56 = vpack.c.b16 %v2828_v10, %v2827_v44  ;;  %v2774_v5 = vor.u32 %v2773_v7, %v2770_v14  ;;  %v2784_v25 = vor.u32 %v2783_v3, %v2779_v55  ;;  %v1824_v27 = vld [vmem:[#allocation2 + $0x70] sm:$0xf]  ;;  %v10414_v44 = vld [vmem:[#allocation2 + $0x60] sm:$0xff] }
 0x183   : > { %v2034_v23 = vsel %vm11340_vm14, %v2029_v48, %v2033_v2  ;;  %v10426_v10 = vld [vmem:[#allocation2 + $0x6c] sm:$0xff]  ;;  %v2073_v30 = vshrl.u32 %v1824_v27, 16  ;;  %v3150_v7 = vld [vmem:[#allocation2 + $0x20] sm:$0x1] }
 0x184   : > { %v2751_v29 = vrot.slane %v2750_v28, 4  ;;  %v2098_v33 = vunpack.c.l.b16 %v2034_v23  ;;  %v2775_v46 = vrot.slane %v2774_v5, 4 }
 0x186   : > { %v2110_v62 = vpack.c.b16 %v2098_v33, %v2097_v54  ;;  %v2075_v54 = vrot.slane %v2073_v30, 4 }
 0x189   : > { %9838 = vmatmul.msk.bf16.gmra.mxu2 %vm2119_vm11, %v2108_v42  ;;  %v2760_v42 = vor.u32 %v2759_v1, %v2755_v19  ;;  %v2063_v1 = vshll.u32 %v1823_v43, 16 }
 0x18b   : > { %v2761_v41 = vrot.slane %v2760_v42, 4  ;;  %v2069_v42 = vshll.u32 %v1824_v27, 16  ;;  %v2065_v23 = vrot.slane %v2063_v1, 5 }
 0x18d   : > { %9964 = vmatmul.msk.bf16.gmra.mxu1 %vm2119_vm11, %v2840_v35  ;;  %9893 = vmatmul.msk.bf16.gmra.mxu3 %vm2119_vm11, %v10412_v40  ;;  %v2039_v35 = vshll.u32 %v1821_v20, 16  ;;  %v2756_v40 = vsel %vm11340_vm14, %v2751_v29, %v2755_v19  ;;  %v2766_v63 = vsel %vm11340_vm14, %v2761_v41, %v2765_v18  ;;  %v2060_v19 = vshrl.u32 %v1823_v43, 16  ;;  %v3149_v20 = vld [vmem:[#allocation2 + $0x1c] sm:$0xf] }
 0x18e   : > { %9949 = vmatmul.msk.bf16.gmra.mxu0 %vm2119_vm11, %v10424_v52  ;;  %v2051_v52 = vrot.slane %v2049_v34, 4  ;;  %v2829_v4 = vunpack.c.l.b16 %v2756_v40  ;;  %v2830_v51 = vunpack.c.l.b16 %v2766_v63  ;;  %v2801_v41 = vshll.u32 %v2570_v37, 16 }
 0x18f   : > { %v2041_v47 = vrot.slane %v2039_v35, 5  ;;  %v2062_v38 = vrot.slane %v2060_v19, 4  ;;  %v2805_v18 = vshrl.u32 %v2570_v37, 16  ;;  %v3191_v32 = vshll.u32 %v3149_v20, 16 }
 0x190   : > { %v2052_v9 = vor.u32 %v2051_v52, %v2047_v11  ;;  %v2842_v8 = vpack.c.b16 %v2830_v51, %v2829_v4  ;;  %v3195_v34 = vshrl.u32 %v3149_v20, 16  ;;  %v11446_v17 = vrot.slane %v2069_v42, 5  ;;  %v10427_v42 = vld [vmem:[#allocation2 + $0x78] sm:$0xff] }
 0x191   : > { %v2042_v39 = vor.u32 %v2041_v47, %v2038_v31  ;;  %v2780_v63 = vsel %vm11340_vm14, %v2775_v46, %v2779_v55  ;;  %v1836_v47 = vld [vmem:[#allocation2 + $0x74] sm:$0x1]  ;;  %v11452_v58 = vrot.slane %v2801_v41, 5  ;;  %v2807_v59 = vrot.slane %v2805_v18, 4 }
 0x192   : > { %v2053_v57 = vrot.slane %v2052_v9, 4  ;;  %v11454_v4 = vrot.slane %v3191_v32, 5  ;;  %v3197_v51 = vrot.slane %v3195_v34, 4  ;;  %v2076_v26 = vor.u32 %v2075_v54, %v11446_v17 }
 0x193   : > { %v2043_v24 = vrot.slane %v2042_v39, 4  ;;  %v2831_v39 = vunpack.c.l.b16 %v2780_v63  ;;  %v2079_v14 = vshll.u32 %v1836_v47, 16  ;;  %v3907_v63 = vld [vmem:[#allocation2 + $0x8] sm:$0x1] }
 0x194   : > { %v2058_v28 = vsel %vm11340_vm14, %v2053_v57, %v2057_v45  ;;  %v3198_v57 = vor.u32 %v3197_v51, %v11454_v4  ;;  %v3201_v45 = vshll.u32 %v3150_v7, 16 }
 0x195   : > { %v2048_v48 = vsel %vm11340_vm14, %v2043_v24, %v2047_v11  ;;  %v2100_v40 = vunpack.c.l.b16 %v2058_v28  ;;  %v2066_v11 = vor.u32 %v2065_v23, %v2062_v38  ;;  %v2081_v27 = vrot.slane %v2079_v14, 5  ;;  %v3906_v28 = vld [vmem:[#allocation2 + $0x4] sm:$0xf] }
 0x196   : > { %v2099_v36 = vunpack.c.l.b16 %v2048_v48  ;;  %v2813_v48 = vrot.slane %v2811_v50, 5  ;;  %v3199_v20 = vrot.slane %v3198_v57, 4  ;;  %v3203_v46 = vrot.slane %v3201_v45, 5 }
 0x197   : > { %v2067_v3 = vrot.slane %v2066_v11, 4  ;;  %v4189_v32 = vshll.u32 %v3906_v28, 16 }
 0x198   : > { %v2111_v55 = vpack.c.b16 %v2100_v40, %v2099_v36  ;;  %v4193_v36 = vshrl.u32 %v3906_v28, 16 }
 0x199   : > { %9839 = vmatmul.msk.bf16.gmra.mxu2 %vm2119_vm11, %v2109_v53  ;;  %v2569_v53 = vld [vmem:[#allocation2 + $0x78] sm:$0xf] }
 0x19a   : > { %v2795_v29 = vshll.u32 %v2569_v53, 16 }
 0x19c   : > { %v2797_v49 = vrot.slane %v2795_v29, 5  ;;  %v3986_v29 = vrot.slane %v3906_v28, 5 }
 0x19d   : > { %9965 = vmatmul.msk.bf16.gmra.mxu1 %vm2119_vm11, %v2841_v56  ;;  %9894 = vmatmul.msk.bf16.gmra.mxu3 %vm2119_vm11, %v10413_v21  ;;  %v3148_v56 = vld [vmem:[#allocation2 + $0x18] sm:$0xf]  ;;  %v2785_v21 = vrot.slane %v2784_v25, 4  ;;  %v2077_v25 = vrot.slane %v2076_v26, 4 }
 0x19e   : > { %9950 = vmatmul.msk.bf16.gmra.mxu0 %vm2119_vm11, %v10425_v61  ;;  %v2792_v61 = vshrl.u32 %v2569_v53, 16  ;;  %v3182_v6 = vshrl.u32 %v3148_v56, 16  ;;  %v3185_v35 = vshll.u32 %v3148_v56, 16  ;;  %v2072_v53 = vsel %vm11340_vm14, %v2067_v3, %v11446_v17 }
 0x19f   : > { %v2790_v31 = vsel %vm11340_vm14, %v2785_v21, %v2789_v15  ;;  %v10415_v15 = vld [vmem:[#allocation2 + $0x6c] sm:$0xff]  ;;  %v2082_v23 = vsel %vm11340_vm14, %v2077_v25, %v2081_v27  ;;  %v2101_v34 = vunpack.c.l.b16 %v2072_v53 }
 0x1a0   : > { %v2794_v52 = vrot.slane %v2792_v61, 4  ;;  %v3184_v22 = vrot.slane %v3182_v6, 4  ;;  %v2832_v9 = vunpack.c.l.b16 %v2790_v31  ;;  %v3938_v61 = vld [vmem:[#allocation2] sm:$0xe]  ;;  %v10445_v6 = vld [vmem:[%s14044_s8 + $0x48] sm:$0xff]  ;;  %v2102_v54 = vunpack.c.l.b16 %v2082_v23 }
 0x1a1   : > { %v10045_v31 = vrot.slane %v3938_v61, 9  ;;  %5148 = vmatpush.bf16.msrb.mxu3 %v10445_v6  ;;  %v3908_v6 = vld [vmem:[#allocation2 + $0xc] sm:$0xf] }
 0x1a2   : > { %v2798_v43 = vor.u32 %v2797_v49, %v2794_v52  ;;  %v2843_v5 = vpack.c.b16 %v2832_v9, %v2831_v39  ;;  %v3988_v52 = vrot.slane %v3986_v29, 4  ;;  %v3989_v49 = vrot.slane %v3907_v63, 5 }
 0x1a3   : > { %v11497_v39 = vrot.slane %v4189_v32, 5  ;;  %v4195_v9 = vrot.slane %v4193_v36, 4  ;;  %v3987_v3 = vsel %vm11491_vm7, %v10045_v31, %v3986_v29 }
 0x1a4   : > { %v2799_v37 = vrot.slane %v2798_v43, 4  ;;  %v3990_v25 = vsel %vm11491_vm7, %v3988_v52, %v3989_v49 }
 0x1a5   : > { %v4196_v53 = vor.u32 %v4195_v9, %v11497_v39 }
 0x1a6   : > { %v2804_v40 = vsel %vm11340_vm14, %v2799_v37, %v11452_v58 }
 0x1a9   : > { %9840 = vmatmul.msk.bf16.gmra.mxu2 %vm2119_vm11, %v2110_v62  ;;  %v3187_v62 = vrot.slane %v3185_v35, 5 }
 0x1ab   : > { %v11438_v2 = vpop.f32.mrf.mxu0  ;;  %v3188_v24 = vor.u32 %v3187_v62, %v3184_v22  ;;  %v3204_v22 = vsel %vm11340_vm14, %v3199_v20, %v3203_v46  ;;  %v10447_v20 = vld [vmem:[%s14044_s8 + $0x58] sm:$0xff] }
 0x1ac   : > { %5824 = vmatpush.bf16.msrb.mxu1 %v10447_v20 }
 0x1ad   : > { %9966 = vmatmul.msk.bf16.gmra.mxu1 %vm2119_vm11, %v2842_v8  ;;  %9895 = vmatmul.msk.bf16.gmra.mxu3 %vm2119_vm11, %v10414_v44  ;;  %v2808_v8 = vor.u32 %v2807_v59, %v11452_v58  ;;  %v10444_v44 = vld [vmem:[%s14044_s8 + $0x40] sm:$0xff]  ;;  %v3189_v56 = vrot.slane %v3188_v24, 4  ;;  %v3152_v58 = vld [vmem:[#allocation2 + $0x28] sm:$0xf]  ;;  %v2833_v24 = vunpack.c.l.b16 %v2804_v40 }
 0x1ae   : > { %9951 = vmatmul.msk.bf16.gmra.mxu0 %vm2119_vm11, %v10426_v10  ;;  %v3905_v10 = vld [vmem:[#allocation2] sm:$0xf]  ;;  %4890 = vmatpush.bf16.msrb.mxu2 %v10444_v44  ;;  %v3215_v43 = vshll.u32 %v3152_v58, 16  ;;  %v3219_v50 = vshrl.u32 %v3152_v58, 16 }
 0x1af   : > { %v2809_v30 = vrot.slane %v2808_v8, 4  ;;  %v4180_v41 = vshrl.u32 %v3905_v10, 16  ;;  %v4183_v18 = vshll.u32 %v3905_v10, 16  ;;  %v3194_v11 = vsel %vm11340_vm14, %v3189_v56, %v11454_v4  ;;  %v10446_v4 = vld [vmem:[%s14044_s8 + $0x50] sm:$0xff] }
 0x1b0   : > { %v2304_v33 = vpop.f32.mrf.mxu3  ;;  %5566 = vmatpush.bf16.msrb.mxu0 %v10446_v4  ;;  %v4199_v10 = vshll.u32 %v3907_v63, 16  ;;  %v3221_v56 = vrot.slane %v3219_v50, 4  ;;  %v3939_v63 = vld [vmem:[#allocation2 + $0xc] sm:$0xe] }
 0x1b1   : > { %v2814_v47 = vsel %vm11340_vm14, %v2809_v30, %v2813_v48  ;;  %v4182_v62 = vrot.slane %v4180_v41, 4  ;;  %v4185_v51 = vrot.slane %v4183_v18, 5  ;;  %v11513_v30 = vrot.slane %v3215_v43, 5 }
 0x1b2   : > { %v2834_v57 = vunpack.c.l.b16 %v2814_v47  ;;  %v4197_v41 = vrot.slane %v4196_v53, 4  ;;  %v4201_v18 = vrot.slane %v4199_v10, 5  ;;  %v4204_v47 = vshrl.u32 %v3908_v6, 16 }
 0x1b3   : > { %v11456_v12 = vpop.f32.mrf.mxu0  ;;  %v4186_v44 = vor.u32 %v4185_v51, %v4182_v62  ;;  %v10046_v4 = vrot.slane %v3939_v63, 9 }
 0x1b4   : > { %v2844_v46 = vpack.c.b16 %v2834_v57, %v2833_v24  ;;  %v4202_v49 = vsel %vm11340_vm14, %v4197_v41, %v4201_v18  ;;  %v4206_v50 = vrot.slane %v4204_v47, 4 }
 0x1b5   : > { %v4187_v29 = vrot.slane %v4186_v44, 4  ;;  %v4420_v53 = vunpack.c.l.b16 %v4202_v49 }
 0x1b7   : > { %v4192_v52 = vsel %vm11340_vm14, %v4187_v29, %v11497_v39 }
 0x1b8   : > { %v11462_v1 = vpop.f32.mrf.mxu3 }
 0x1b9   : > { %9841 = vmatmul.msk.bf16.gmra.mxu2 %vm2119_vm11, %v2111_v55  ;;  %v2112_v55 = vpack.c.b16 %v2102_v54, %v2101_v34  ;;  %v3222_v34 = vor.u32 %v3221_v56, %v11513_v30  ;;  %v10430_v56 = vld [vmem:[#allocation2 + $0x18] sm:$0xff] }
 0x1ba   : > { %v2890_v19 = vpop.f32.mrf.mxu1 }
 0x1bb   : > { %v11471_v38 = vpop.f32.mrf.mxu0  ;;  %v3223_v62 = vrot.slane %v3222_v34, 4 }
 0x1bc   : > { %v2159_v21 = vpop.f32.mrf.mxu2 }
 0x1bd   : > { %9967 = vmatmul.msk.bf16.gmra.mxu1 %vm2119_vm11, %v2843_v5  ;;  %v2305_v35 = vadd.f32 %v2304_v33, %v2159_v21  ;;  %9896 = vmatmul.msk.bf16.gmra.mxu3 %vm2119_vm11, %v10415_v15  ;;  %v3151_v33 = vld [vmem:[#allocation2 + $0x24] sm:$0xf]  ;;  %v3421_v5 = vunpack.c.l.b16 %v3194_v11  ;;  %v4054_v15 = vunpack.c.l.b16 %v3987_v3  ;;  %v4207_v11 = vshll.u32 %v3908_v6, 16  ;;  %v3155_v3 = vld [vmem:[#allocation2 + $0x34] sm:$0xf] }
 0x1be   : > { %9952 = vmatmul.msk.bf16.gmra.mxu0 %vm2119_vm11, %v10427_v42  ;;  %v3206_v26 = vshrl.u32 %v3151_v33, 16  ;;  %v3209_v14 = vshll.u32 %v3151_v33, 16  ;;  %v4055_v42 = vunpack.c.l.b16 %v3990_v25  ;;  %v3239_v44 = vshll.u32 %v3155_v3, 16 }
 0x1bf   : > { %v2522_v17 = vadd.f32 %v11438_v2, %v2305_v35  ;;  %v3243_v10 = vshrl.u32 %v3155_v3, 16 }
 0x1c0   : > { %v2309_v0 = vpop.f32.mrf.mxu3  ;;  %v3208_v37 = vrot.slane %v3206_v26, 4  ;;  %v3211_v48 = vrot.slane %v3209_v14, 5  ;;  %v4074_v32 = vpack.c.b16 %v4055_v42, %v4054_v15  ;;  %v11549_v6 = vrot.slane %v3239_v44, 5 }
 0x1c1   : > { %v11502_v7 = vadd.f32 %v2890_v19, %v2522_v17  ;;  %v3422_v19 = vunpack.c.l.b16 %v3204_v22  ;;  %v3909_v17 = vld [vmem:[#allocation2 + $0x10] sm:$0xf] }
 0x1c2   : > { %v2892_v59 = vpop.f32.mrf.mxu1  ;;  %v3993_v31 = vrot.slane %v3909_v17, 5  ;;  %v4213_v14 = vshll.u32 %v3909_v17, 16 }
 0x1c3   : > { %v11506_v45 = vpop.f32.mrf.mxu0  ;;  %v3441_v61 = vpack.c.b16 %v3422_v19, %v3421_v5  ;;  %v4419_v5 = vunpack.c.l.b16 %v4192_v52 }
 0x1c4   : > { %v2161_v8 = vpop.f32.mrf.mxu2  ;;  %v3995_v9 = vrot.slane %v3993_v31, 4  ;;  %v3994_v19 = vsel %vm11491_vm7, %v10046_v4, %v3993_v31  ;;  %v3157_v4 = vld [vmem:[#allocation2 + $0x3c] sm:$0xf] }
 0x1c5   : > { %v2307_v27 = vadd.f32 %v11462_v1, %v2161_v8  ;;  %v3153_v1 = vld [vmem:[#allocation2 + $0x2c] sm:$0x1]  ;;  %v4209_v8 = vrot.slane %v4207_v11, 5  ;;  %v4056_v29 = vunpack.c.l.b16 %v3994_v19  ;;  %v4439_v34 = vpack.c.b16 %v4420_v53, %v4419_v5  ;;  %v3911_v11 = vld [vmem:[#allocation2 + $0x18] sm:$0xf] }
 0x1c6   : > { %v3225_v36 = vshll.u32 %v3153_v1, 16  ;;  %v4228_v3 = vshrl.u32 %v3911_v11, 16  ;;  %v3257_v19 = vshll.u32 %v3157_v4, 16 }
 0x1c7   : > { %v2523_v28 = vadd.f32 %v11456_v12, %v2307_v27  ;;  %v3212_v12 = vor.u32 %v3211_v48, %v3208_v37  ;;  %v4210_v20 = vor.u32 %v4209_v8, %v4206_v50  ;;  %v4231_v50 = vshll.u32 %v3911_v11, 16 }
 0x1c8   : > { %v2311_v23 = vpop.f32.mrf.mxu3  ;;  %v3227_v51 = vrot.slane %v3225_v36, 5 }
 0x1c9   : > { %9842 = vmatmul.msk.bf16.gmra.mxu2 %vm2119_vm11, %v2112_v55  ;;  %v11519_v35 = vadd.f32 %v2892_v59, %v2523_v28  ;;  %v3213_v58 = vrot.slane %v3212_v12, 4  ;;  %v3154_v59 = vld [vmem:[#allocation2 + $0x30] sm:$0xf]  ;;  %v4217_v55 = vshrl.u32 %v3909_v17, 16  ;;  %v11546_v28 = vrot.slane %v4213_v14, 5 }
 0x1ca   : > { %v2895_v21 = vpop.f32.mrf.mxu1  ;;  %v3230_v24 = vshrl.u32 %v3154_v59, 16  ;;  %v3233_v57 = vshll.u32 %v3154_v59, 16  ;;  %v3228_v27 = vsel %vm11340_vm14, %v3223_v62, %v3227_v51  ;;  %v3156_v12 = vld [vmem:[#allocation2 + $0x38] sm:$0x1]  ;;  %v4211_v63 = vrot.slane %v4210_v20, 4 }
 0x1cb   : > { %v11523_v40 = vpop.f32.mrf.mxu0  ;;  %v4219_v42 = vrot.slane %v4217_v55, 4  ;;  %v3249_v47 = vshll.u32 %v3156_v12, 16  ;;  %v3940_v55 = vld [vmem:[#allocation2 + $0x18] sm:$0xe]  ;;  %v4233_v20 = vrot.slane %v4231_v50, 5 }
 0x1cc   : > { %v2164_v54 = vpop.f32.mrf.mxu2  ;;  %v3235_v1 = vrot.slane %v3233_v57, 5  ;;  %v3158_v57 = vld [vmem:[#allocation2 + $0x40] sm:$0xf] }
 0x1cd   : > { %9968 = vmatmul.msk.bf16.gmra.mxu1 %vm2119_vm11, %v2844_v46  ;;  %v2310_v33 = vadd.f32 %v2309_v0, %v2164_v54  ;;  %10031 = vmatmul.msk.bf16.vlgmr.msra.gmra.mxu3 %vm2119_vm11, %v3441_v61  ;;  %v3910_v0 = vld [vmem:[#allocation2 + $0x14] sm:$0x1]  ;;  %v3232_v46 = vrot.slane %v3230_v24, 4  ;;  %v3424_v61 = vunpack.c.l.b16 %v3228_v27  ;;  %v4220_v36 = vor.u32 %v4219_v42, %v11546_v28 }
 0x1ce   : > { %10059 = vmatmul.msk.bf16.vlgmr.msra.gmra.mxu0 %vm2119_vm11, %v4074_v32  ;;  %v3996_v26 = vrot.slane %v3910_v0, 5  ;;  %v3245_v32 = vrot.slane %v3243_v10, 4  ;;  %v4223_v17 = vshll.u32 %v3910_v0, 16  ;;  %v3254_v27 = vshrl.u32 %v3157_v4, 16 }
 0x1cf   : > { %v2524_v22 = vadd.f32 %v11471_v38, %v2310_v33  ;;  %v3218_v38 = vsel %vm11340_vm14, %v3213_v58, %v11513_v30  ;;  %v3236_v31 = vor.u32 %v3235_v1, %v3232_v46  ;;  %v3912_v58 = vld [vmem:[#allocation2 + $0x1c] sm:$0xf]  ;;  %v4221_v62 = vrot.slane %v4220_v36, 4 }
 0x1d0   : > { %v2314_v39 = vpop.f32.mrf.mxu3  ;;  %v3997_v48 = vsel %vm11491_vm7, %v3995_v9, %v3996_v26  ;;  %v3246_v49 = vor.u32 %v3245_v32, %v11549_v6  ;;  %v4225_v51 = vrot.slane %v4223_v17, 5  ;;  %v4000_v0 = vrot.slane %v3912_v58, 5 }
 0x1d1   : > { %v11536_v25 = vadd.f32 %v2895_v21, %v2524_v22  ;;  %v3423_v21 = vunpack.c.l.b16 %v3218_v38  ;;  %v4057_v18 = vunpack.c.l.b16 %v3997_v48  ;;  %v4216_v26 = vsel %vm11340_vm14, %v4211_v63, %v11546_v28  ;;  %v10431_v63 = vld [vmem:[#allocation2 + $0x24] sm:$0xff] }
 0x1d2   : > { %v2897_v43 = vpop.f32.mrf.mxu1  ;;  %v3237_v14 = vrot.slane %v3236_v31, 4  ;;  %v4237_v8 = vshll.u32 %v3912_v58, 16  ;;  %v4241_v24 = vshrl.u32 %v3912_v58, 16  ;;  %v3247_v38 = vrot.slane %v3246_v49, 4  ;;  %v3159_v31 = vld [vmem:[#allocation2 + $0x44] sm:$0x1] }
 0x1d3   : > { %v11542_v37 = vpop.f32.mrf.mxu0  ;;  %v3442_v33 = vpack.c.b16 %v3424_v61, %v3423_v21  ;;  %v4226_v44 = vsel %vm11340_vm14, %v4221_v62, %v4225_v51  ;;  %v10047_v10 = vrot.slane %v3940_v55, 9  ;;  %v4421_v12 = vunpack.c.l.b16 %v4216_v26  ;;  %v3914_v26 = vld [vmem:[#allocation2 + $0x24] sm:$0xf] }
 0x1d4   : > { %v2166_v15 = vpop.f32.mrf.mxu2  ;;  %v3242_v42 = vsel %vm11340_vm14, %v3237_v14, %v11549_v6  ;;  %v11570_v46 = vrot.slane %v4237_v8, 5  ;;  %v4243_v1 = vrot.slane %v4241_v24, 4  ;;  %v4422_v32 = vunpack.c.l.b16 %v4226_v44  ;;  %v3915_v8 = vld [vmem:[#allocation2 + $0x28] sm:$0xf] }
 0x1d5   : > { %v2312_v30 = vadd.f32 %v2311_v23, %v2166_v15  ;;  %v4002_v15 = vrot.slane %v4000_v0, 4  ;;  %v4001_v6 = vsel %vm11491_vm7, %v10047_v10, %v4000_v0  ;;  %v4007_v44 = vrot.slane %v3915_v8, 5 }
 0x1d6   : > { %v4244_v49 = vor.u32 %v4243_v1, %v11570_v46  ;;  %v4058_v62 = vunpack.c.l.b16 %v4001_v6  ;;  %v4440_v4 = vpack.c.b16 %v4422_v32, %v4421_v12  ;;  %v4255_v10 = vshll.u32 %v3914_v26, 16 }
 0x1d7   : > { %v2525_v41 = vadd.f32 %v11506_v45, %v2312_v30  ;;  %v4075_v45 = vpack.c.b16 %v4057_v18, %v4056_v29  ;;  %v4230_v30 = vrot.slane %v4228_v3, 4  ;;  %v3256_v29 = vrot.slane %v3254_v27, 4 }
 0x1d8   : > { %v2316_v23 = vpop.f32.mrf.mxu3  ;;  %v4245_v50 = vrot.slane %v4244_v49, 4  ;;  %v4009_v12 = vrot.slane %v4007_v44, 4  ;;  %v4257_v6 = vrot.slane %v4255_v10, 5  ;;  %v3918_v10 = vld [vmem:[#allocation2 + $0x34] sm:$0xf] }
 0x1d9   : > { %10015 = vmatmul.msk.bf16.vlgmr.msra.gmra.mxu2 %vm2119_vm11, %v10430_v56  ;;  %v11553_v52 = vadd.f32 %v2897_v43, %v2525_v41  ;;  %v3251_v43 = vrot.slane %v3249_v47, 5  ;;  %v3267_v56 = vshrl.u32 %v3158_v57, 16  ;;  %v3259_v41 = vrot.slane %v3257_v19, 5 }
 0x1da   : > { %v2900_v54 = vpop.f32.mrf.mxu1 }
 0x1db   : > { %v11557_v22 = vpop.f32.mrf.mxu0  ;;  %v3252_v61 = vsel %vm11340_vm14, %v3247_v38, %v3251_v43  ;;  %v3269_v47 = vrot.slane %v3267_v56, 4  ;;  %v3260_v0 = vor.u32 %v3259_v41, %v3256_v29  ;;  %v4252_v38 = vshrl.u32 %v3914_v26, 16  ;;  %v3160_v56 = vld [vmem:[#allocation2 + $0x48] sm:$0xf]  ;;  %v3161_v41 = vld [vmem:[#allocation2 + $0x4c] sm:$0xf] }
 0x1dc   : > { %v2169_v59 = vpop.f32.mrf.mxu2  ;;  %v3426_v11 = vunpack.c.l.b16 %v3252_v61  ;;  %v3916_v61 = vld [vmem:[#allocation2 + $0x2c] sm:$0x1] }
 0x1dd   : > { %10073 = vmatmul.msk.bf16.vlgmr.msra.gmra.mxu1 %vm2119_vm11, %v4439_v34  ;;  %v2315_v9 = vadd.f32 %v2314_v39, %v2169_v59  ;;  %10032 = vmatmul.msk.bf16.gmra.mxu3 %vm2119_vm11, %v3442_v33  ;;  %v3913_v39 = vld [vmem:[#allocation2 + $0x20] sm:$0x1]  ;;  %v4254_v29 = vrot.slane %v4252_v38, 4  ;;  %v4010_v32 = vrot.slane %v3916_v61, 5 }
 0x1de   : > { %10060 = vmatmul.msk.bf16.gmra.mxu0 %vm2119_vm11, %v4075_v45  ;;  %v4003_v53 = vrot.slane %v3913_v39, 5  ;;  %v4234_v45 = vor.u32 %v4233_v20, %v4230_v30  ;;  %v4247_v58 = vshll.u32 %v3913_v39, 16  ;;  %v4261_v30 = vshll.u32 %v3915_v8, 16 }
 0x1df   : > { %v2526_v5 = vadd.f32 %v11523_v40, %v2315_v9  ;;  %v3263_v40 = vshll.u32 %v3158_v57, 16  ;;  %v3273_v9 = vshll.u32 %v3159_v31, 16  ;;  %v3281_v31 = vshll.u32 %v3160_v56, 16 }
 0x1e0   : > { %v2319_v28 = vpop.f32.mrf.mxu3  ;;  %v4004_v36 = vsel %vm11491_vm7, %v4002_v15, %v4003_v53  ;;  %v4235_v43 = vrot.slane %v4234_v45, 4 }
 0x1e1   : > { %v11572_v21 = vadd.f32 %v2900_v54, %v2526_v5  ;;  %v3425_v54 = vunpack.c.l.b16 %v3242_v42  ;;  %v11582_v33 = vrot.slane %v3263_v40, 5  ;;  %v4059_v51 = vunpack.c.l.b16 %v4004_v36  ;;  %v3941_v42 = vld [vmem:[#allocation2 + $0x24] sm:$0xe] }
 0x1e2   : > { %v2902_v48 = vpop.f32.mrf.mxu1  ;;  %v3261_v5 = vrot.slane %v3260_v0, 4  ;;  %v3275_v19 = vrot.slane %v3273_v9, 5  ;;  %v4265_v40 = vshrl.u32 %v3915_v8, 16  ;;  %v4011_v0 = vsel %vm11491_vm7, %v4009_v12, %v4010_v32  ;;  %v10432_v9 = vld [vmem:[#allocation2 + $0x30] sm:$0xff] }
 0x1e3   : > { %v11576_v34 = vpop.f32.mrf.mxu0  ;;  %v3270_v55 = vor.u32 %v3269_v47, %v11582_v33  ;;  %v3443_v3 = vpack.c.b16 %v3426_v11, %v3425_v54  ;;  %v4076_v57 = vpack.c.b16 %v4059_v51, %v4058_v62  ;;  %v3278_v54 = vshrl.u32 %v3160_v56, 16 }
 0x1e4   : > { %v2171_v18 = vpop.f32.mrf.mxu2  ;;  %v3287_v47 = vshll.u32 %v3161_v41, 16  ;;  %v3291_v11 = vshrl.u32 %v3161_v41, 16  ;;  %v4061_v38 = vunpack.c.l.b16 %v4011_v0  ;;  %v4014_v12 = vrot.slane %v3918_v10, 5 }
 0x1e5   : > { %v2317_v17 = vadd.f32 %v2316_v23, %v2171_v18  ;;  %v3271_v53 = vrot.slane %v3270_v55, 4  ;;  %v10048_v18 = vrot.slane %v3941_v42, 9  ;;  %v4258_v55 = vor.u32 %v4257_v6, %v4254_v29 }
 0x1e6   : > { %v11617_v8 = vrot.slane %v3287_v47, 5  ;;  %v4285_v29 = vshll.u32 %v3918_v10, 16  ;;  %v4289_v32 = vshrl.u32 %v3918_v10, 16  ;;  %v4016_v0 = vrot.slane %v4014_v12, 4 }
 0x1e7   : > { %v2527_v59 = vadd.f32 %v11542_v37, %v2317_v17  ;;  %v4249_v37 = vrot.slane %v4247_v58, 5  ;;  %v11606_v17 = vrot.slane %v4261_v30, 5  ;;  %v4008_v51 = vsel %vm11491_vm7, %v10048_v18, %v4007_v44 }
 0x1e8   : > { %v2321_v14 = vpop.f32.mrf.mxu3  ;;  %v4259_v42 = vrot.slane %v4258_v55, 4 }
 0x1e9   : > { %10016 = vmatmul.msk.bf16.gmra.mxu2 %vm2119_vm11, %v10431_v63  ;;  %v11588_v24 = vadd.f32 %v2902_v48, %v2527_v59  ;;  %v4240_v48 = vsel %vm11340_vm14, %v4235_v43, %v11570_v46  ;;  %v4250_v1 = vsel %vm11340_vm14, %v4245_v50, %v4249_v37  ;;  %v4267_v63 = vrot.slane %v4265_v40, 4 }
 0x1ea   : > { %v2905_v23 = vpop.f32.mrf.mxu1  ;;  %v4423_v45 = vunpack.c.l.b16 %v4240_v48  ;;  %v4424_v58 = vunpack.c.l.b16 %v4250_v1  ;;  %v3280_v43 = vrot.slane %v3278_v54, 4  ;;  %v3283_v50 = vrot.slane %v3281_v31, 5 }
 0x1eb   : > { %v11591_v27 = vpop.f32.mrf.mxu0 }
 0x1ec   : > { %v2174_v39 = vpop.f32.mrf.mxu2  ;;  %v4441_v44 = vpack.c.b16 %v4424_v58, %v4423_v45  ;;  %v3284_v48 = vor.u32 %v3283_v50, %v3280_v43 }
 0x1ed   : > { %10074 = vmatmul.msk.bf16.gmra.mxu1 %vm2119_vm11, %v4440_v4  ;;  %v2320_v15 = vadd.f32 %v2319_v28, %v2174_v39  ;;  %10033 = vmatmul.msk.bf16.gmra.mxu3 %vm2119_vm11, %v3443_v3  ;;  %v3266_v28 = vsel %vm11340_vm14, %v3261_v5, %v11582_v33  ;;  %v4268_v3 = vor.u32 %v4267_v63, %v11606_v17  ;;  %v4060_v5 = vunpack.c.l.b16 %v4008_v51  ;;  %v3942_v63 = vld [vmem:[#allocation2 + $0x30] sm:$0xe] }
 0x1ee   : > { %10061 = vmatmul.msk.bf16.gmra.mxu0 %vm2119_vm11, %v4076_v57  ;;  %v3427_v62 = vunpack.c.l.b16 %v3266_v28  ;;  %v3293_v57 = vrot.slane %v3291_v11, 4  ;;  %v4271_v39 = vshll.u32 %v3916_v61, 16  ;;  %v3163_v11 = vld [vmem:[#allocation2 + $0x54] sm:$0xf]  ;;  %v10049_v51 = vrot.slane %v3942_v63, 9 }
 0x1ef   : > { %v2528_v20 = vadd.f32 %v11557_v22, %v2320_v15  ;;  %v3276_v22 = vsel %vm11340_vm14, %v3271_v53, %v3275_v19  ;;  %v3917_v19 = vld [vmem:[#allocation2 + $0x30] sm:$0xf]  ;;  %v4269_v30 = vrot.slane %v4268_v3, 4  ;;  %v3302_v3 = vshrl.u32 %v3163_v11, 16 }
 0x1f0   : > { %v2324_v36 = vpop.f32.mrf.mxu3  ;;  %v3428_v26 = vunpack.c.l.b16 %v3276_v22  ;;  %v3294_v56 = vor.u32 %v3293_v57, %v11617_v8  ;;  %v4273_v28 = vrot.slane %v4271_v39, 5  ;;  %v4279_v61 = vshll.u32 %v3917_v19, 16 }
 0x1f1   : > { %v11608_v33 = vadd.f32 %v2905_v23, %v2528_v20  ;;  %v3162_v23 = vld [vmem:[#allocation2 + $0x50] sm:$0x1]  ;;  %v4276_v20 = vshrl.u32 %v3917_v19, 16  ;;  %v4264_v22 = vsel %vm11340_vm14, %v4259_v42, %v11606_v17  ;;  %v3164_v17 = vld [vmem:[#allocation2 + $0x58] sm:$0xf]  ;;  %v4015_v10 = vsel %vm11491_vm7, %v10049_v51, %v4014_v12 }
 0x1f2   : > { %v2907_v46 = vpop.f32.mrf.mxu1  ;;  %v3444_v53 = vpack.c.b16 %v3428_v26, %v3427_v62  ;;  %v3297_v40 = vshll.u32 %v3162_v23, 16  ;;  %v3295_v54 = vrot.slane %v3294_v56, 4  ;;  %v4281_v58 = vrot.slane %v4279_v61, 5  ;;  %v3165_v12 = vld [vmem:[#allocation2 + $0x5c] sm:$0x1] }
 0x1f3   : > { %v11610_v59 = vpop.f32.mrf.mxu0  ;;  %v4278_v47 = vrot.slane %v4276_v20, 4  ;;  %v11635_v62 = vrot.slane %v4285_v29, 5  ;;  %v3305_v23 = vshll.u32 %v3163_v11, 16  ;;  %v4425_v43 = vunpack.c.l.b16 %v4264_v22 }
 0x1f4   : > { %v2176_v49 = vpop.f32.mrf.mxu2  ;;  %v3299_v31 = vrot.slane %v3297_v40, 5  ;;  %v3315_v50 = vshrl.u32 %v3164_v17, 16  ;;  %v10433_v40 = vld [vmem:[#allocation2 + $0x3c] sm:$0xff]  ;;  %v4062_v29 = vunpack.c.l.b16 %v4015_v10  ;;  %v3321_v11 = vshll.u32 %v3165_v12, 16 }
 0x1f5   : > { %v2322_v4 = vadd.f32 %v2321_v14, %v2176_v49  ;;  %v4274_v49 = vsel %vm11340_vm14, %v4269_v30, %v4273_v28  ;;  %v4282_v39 = vor.u32 %v4281_v58, %v4278_v47 }
 0x1f6   : > { %v3317_v28 = vrot.slane %v3315_v50, 4  ;;  %v3167_v50 = vld [vmem:[#allocation2 + $0x64] sm:$0xf] }
 0x1f7   : > { %v2529_v37 = vadd.f32 %v11576_v34, %v2322_v4  ;;  %v4077_v34 = vpack.c.b16 %v4061_v38, %v4060_v5  ;;  %v3300_v38 = vsel %vm11340_vm14, %v3295_v54, %v3299_v31 }
 0x1f8   : > { %v2326_v15 = vpop.f32.mrf.mxu3  ;;  %v3430_v20 = vunpack.c.l.b16 %v3300_v38 }
 0x1f9   : > { %10017 = vmatmul.msk.bf16.gmra.mxu2 %vm2119_vm11, %v10432_v9  ;;  %v11622_v1 = vadd.f32 %v2907_v46, %v2529_v37  ;;  %v3285_v46 = vrot.slane %v3284_v48, 4  ;;  %v4291_v9 = vrot.slane %v4289_v32, 4  ;;  %v4426_v37 = vunpack.c.l.b16 %v4274_v49 }
 0x1fa   : > { %v2910_v14 = vpop.f32.mrf.mxu1  ;;  %v3304_v48 = vrot.slane %v3302_v3, 4  ;;  %v3166_v3 = vld [vmem:[#allocation2 + $0x60] sm:$0xf] }
 0x1fb   : > { %v11625_v18 = vpop.f32.mrf.mxu0  ;;  %v3290_v5 = vsel %vm11340_vm14, %v3285_v46, %v11617_v8  ;;  %v3307_v8 = vrot.slane %v3305_v23, 5  ;;  %v4442_v32 = vpack.c.b16 %v4426_v37, %v4425_v43 }
 0x1fc   : > { %v2179_v41 = vpop.f32.mrf.mxu2  ;;  %v3429_v56 = vunpack.c.l.b16 %v3290_v5  ;;  %v3323_v5 = vrot.slane %v3321_v11, 5 }
 0x1fd   : > { %10075 = vmatmul.msk.bf16.gmra.mxu1 %vm2119_vm11, %v4441_v44  ;;  %v2325_v6 = vadd.f32 %v2324_v36, %v2179_v41  ;;  %10034 = vmatmul.msk.bf16.gmra.mxu3 %vm2119_vm11, %v3444_v53  ;;  %v3919_v36 = vld [vmem:[#allocation2 + $0x38] sm:$0x1]  ;;  %v3308_v54 = vor.u32 %v3307_v8, %v3304_v48 }
 0x1fe   : > { %10062 = vmatmul.msk.bf16.gmra.mxu0 %vm2119_vm11, %v4077_v34  ;;  %v4017_v4 = vrot.slane %v3919_v36, 5  ;;  %v4295_v42 = vshll.u32 %v3919_v36, 16  ;;  %v3445_v31 = vpack.c.b16 %v3430_v20, %v3429_v56  ;;  %v3921_v36 = vld [vmem:[#allocation2 + $0x40] sm:$0xf] }
 0x1ff   : > { %v2530_v45 = vadd.f32 %v11591_v27, %v2325_v6  ;;  %v3311_v27 = vshll.u32 %v3164_v17, 16  ;;  %v4283_v6 = vrot.slane %v4282_v39, 4  ;;  %v4309_v38 = vshll.u32 %v3921_v36, 16 }
 0x200   : > { %v2329_v55 = vpop.f32.mrf.mxu3  ;;  %v4018_v53 = vsel %vm11491_vm7, %v4016_v0, %v4017_v4  ;;  %v4297_v63 = vrot.slane %v4295_v42, 5  ;;  %v3943_v4 = vld [vmem:[#allocation2 + $0x3c] sm:$0xe]  ;;  %v4313_v39 = vshrl.u32 %v3921_v36, 16 }
 0x201   : > { %v11637_v57 = vadd.f32 %v2910_v14, %v2530_v45  ;;  %v4292_v14 = vor.u32 %v4291_v9, %v11635_v62  ;;  %v11651_v34 = vrot.slane %v3311_v27, 5  ;;  %v4063_v41 = vunpack.c.l.b16 %v4018_v53  ;;  %v3920_v45 = vld [vmem:[#allocation2 + $0x3c] sm:$0xf] }
 0x202   : > { %v2912_v26 = vpop.f32.mrf.mxu1  ;;  %v4288_v51 = vsel %vm11340_vm14, %v4283_v6, %v11635_v62  ;;  %v4021_v9 = vrot.slane %v3921_v36, 5  ;;  %v4300_v43 = vshrl.u32 %v3920_v45, 16  ;;  %v4303_v27 = vshll.u32 %v3920_v45, 16  ;;  %v3922_v62 = vld [vmem:[#allocation2 + $0x44] sm:$0x1] }
 0x203   : > { %v11644_v44 = vpop.f32.mrf.mxu0  ;;  %v4293_v22 = vrot.slane %v4292_v14, 4  ;;  %v3318_v47 = vor.u32 %v3317_v28, %v11651_v34  ;;  %v10050_v10 = vrot.slane %v3943_v4, 9  ;;  %v3326_v53 = vshrl.u32 %v3166_v3, 16 }
 0x204   : > { %v2181_v19 = vpop.f32.mrf.mxu2  ;;  %v3329_v14 = vshll.u32 %v3166_v3, 16  ;;  %v4023_v42 = vrot.slane %v4021_v9, 4  ;;  %v4302_v20 = vrot.slane %v4300_v43, 4  ;;  %v4305_v28 = vrot.slane %v4303_v27, 5  ;;  %v3923_v43 = vld [vmem:[#allocation2 + $0x48] sm:$0xf] }
 0x205   : > { %v2327_v30 = vadd.f32 %v2326_v15, %v2181_v19  ;;  %v4298_v0 = vsel %vm11340_vm14, %v4293_v22, %v4297_v63  ;;  %v3319_v37 = vrot.slane %v3318_v47, 4  ;;  %v4427_v12 = vunpack.c.l.b16 %v4288_v51  ;;  %v3168_v51 = vld [vmem:[#allocation2 + $0x68] sm:$0x1] }
 0x206   : > { %v3328_v6 = vrot.slane %v3326_v53, 4  ;;  %v3331_v22 = vrot.slane %v3329_v14, 5  ;;  %v4319_v4 = vshll.u32 %v3922_v62, 16 }
 0x207   : > { %v2531_v61 = vadd.f32 %v11610_v59, %v2327_v30  ;;  %v4078_v59 = vpack.c.b16 %v4063_v41, %v4062_v29  ;;  %v3335_v30 = vshll.u32 %v3167_v50, 16  ;;  %v4315_v29 = vrot.slane %v4313_v39, 4 }
 0x208   : > { %v2331_v15 = vpop.f32.mrf.mxu3  ;;  %v4321_v53 = vrot.slane %v4319_v4, 5 }
 0x209   : > { %10018 = vmatmul.msk.bf16.gmra.mxu2 %vm2119_vm11, %v10433_v40  ;;  %v11656_v49 = vadd.f32 %v2912_v26, %v2531_v61  ;;  %v3309_v26 = vrot.slane %v3308_v54, 4  ;;  %v3339_v40 = vshrl.u32 %v3167_v50, 16  ;;  %v11674_v61 = vrot.slane %v4309_v38, 5 }
 0x20a   : > { %v2915_v46 = vpop.f32.mrf.mxu1  ;;  %v11684_v47 = vrot.slane %v3335_v30, 5  ;;  %v4327_v30 = vshll.u32 %v3923_v43, 16 }
 0x20b   : > { %v11659_v17 = vpop.f32.mrf.mxu0  ;;  %v3314_v56 = vsel %vm11340_vm14, %v3309_v26, %v11651_v34  ;;  %v4022_v34 = vsel %vm11491_vm7, %v10050_v10, %v4021_v9  ;;  %v3341_v11 = vrot.slane %v3339_v40, 4  ;;  %v3332_v9 = vor.u32 %v3331_v22, %v3328_v6 }
 0x20c   : > { %v2184_v58 = vpop.f32.mrf.mxu2 }
 0x20d   : > { %10076 = vmatmul.msk.bf16.gmra.mxu1 %vm2119_vm11, %v4442_v32  ;;  %v2330_v23 = vadd.f32 %v2329_v55, %v2184_v58  ;;  %10035 = vmatmul.msk.bf16.gmra.mxu3 %vm2119_vm11, %v3445_v31  ;;  %v4024_v55 = vrot.slane %v3922_v62, 5  ;;  %v4428_v32 = vunpack.c.l.b16 %v4298_v0  ;;  %v4306_v58 = vor.u32 %v4305_v28, %v4302_v20 }
 0x20e   : > { %10063 = vmatmul.msk.bf16.gmra.mxu0 %vm2119_vm11, %v4078_v59  ;;  %v10434_v59 = vld [vmem:[#allocation2 + $0x48] sm:$0xff]  ;;  %v4316_v0 = vor.u32 %v4315_v29, %v11674_v61  ;;  %v3342_v50 = vor.u32 %v3341_v11, %v11684_v47  ;;  %v4324_v62 = vshrl.u32 %v3923_v43, 16  ;;  %v3925_v11 = vld [vmem:[#allocation2 + $0x50] sm:$0x1] }
 0x20f   : > { %v2532_v19 = vadd.f32 %v11625_v18, %v2330_v23  ;;  %v3324_v18 = vsel %vm11340_vm14, %v3319_v37, %v3323_v5  ;;  %v4025_v31 = vsel %vm11491_vm7, %v4023_v42, %v4024_v55  ;;  %v4064_v23 = vunpack.c.l.b16 %v4022_v34  ;;  %v3924_v5 = vld [vmem:[#allocation2 + $0x4c] sm:$0xf]  ;;  %v3944_v55 = vld [vmem:[#allocation2 + $0x48] sm:$0xe] }
 0x210   : > { %v2334_v8 = vpop.f32.mrf.mxu3  ;;  %v3432_v36 = vunpack.c.l.b16 %v3324_v18  ;;  %v4065_v26 = vunpack.c.l.b16 %v4025_v31  ;;  %v4443_v27 = vpack.c.b16 %v4428_v32, %v4427_v12  ;;  %v3345_v37 = vshll.u32 %v3168_v51, 16  ;;  %v3169_v34 = vld [vmem:[#allocation2 + $0x6c] sm:$0xf] }
 0x211   : > { %v11676_v41 = vadd.f32 %v2915_v46, %v2532_v19  ;;  %v3431_v46 = vunpack.c.l.b16 %v3314_v56  ;;  %v4307_v19 = vrot.slane %v4306_v58, 4  ;;  %v4317_v10 = vrot.slane %v4316_v0, 4 }
 0x212   : > { %v2917_v48 = vpop.f32.mrf.mxu1  ;;  %v3333_v42 = vrot.slane %v3332_v9, 4  ;;  %v4333_v40 = vshll.u32 %v3924_v5, 16  ;;  %v3343_v28 = vrot.slane %v3342_v50, 4  ;;  %v3347_v18 = vrot.slane %v3345_v37, 5 }
 0x213   : > { %v11678_v54 = vpop.f32.mrf.mxu0  ;;  %v3446_v39 = vpack.c.b16 %v3432_v36, %v3431_v46  ;;  %v4028_v29 = vrot.slane %v3924_v5, 5  ;;  %v4337_v12 = vshrl.u32 %v3924_v5, 16  ;;  %v4322_v6 = vsel %vm11340_vm14, %v4317_v10, %v4321_v53  ;;  %v3170_v46 = vld [vmem:[#allocation2 + $0x70] sm:$0xf]  ;;  %v3926_v5 = vld [vmem:[#allocation2 + $0x54] sm:$0xf] }
 0x214   : > { %v2186_v63 = vpop.f32.mrf.mxu2  ;;  %v10051_v22 = vrot.slane %v3944_v55, 9  ;;  %v4031_v58 = vrot.slane %v3925_v11, 5 }
 0x215   : > { %v2332_v45 = vadd.f32 %v2331_v15, %v2186_v63  ;;  %v4326_v63 = vrot.slane %v4324_v62, 4  ;;  %v4030_v36 = vrot.slane %v4028_v29, 4  ;;  %v4339_v51 = vrot.slane %v4337_v12, 4 }
 0x216   : > { %v4348_v12 = vshrl.u32 %v3926_v5, 16 }
 0x217   : > { %v2533_v3 = vadd.f32 %v11644_v44, %v2332_v45  ;;  %v4079_v44 = vpack.c.b16 %v4065_v26, %v4064_v23  ;;  %v4329_v45 = vrot.slane %v4327_v30, 5  ;;  %v4029_v23 = vsel %vm11491_vm7, %v10051_v22, %v4028_v29 }
 0x218   : > { %v2336_v38 = vpop.f32.mrf.mxu3  ;;  %v3359_v26 = vshll.u32 %v3170_v46, 16  ;;  %v4032_v10 = vsel %vm11491_vm7, %v4030_v36, %v4031_v58  ;;  %v4066_v30 = vunpack.c.l.b16 %v4029_v23 }
 0x219   : > { %10019 = vmatmul.msk.bf16.gmra.mxu2 %vm2119_vm11, %v10434_v59  ;;  %v11690_v14 = vadd.f32 %v2917_v48, %v2533_v3  ;;  %v4312_v48 = vsel %vm11340_vm14, %v4307_v19, %v11674_v61  ;;  %v11706_v59 = vrot.slane %v4333_v40, 5  ;;  %v3348_v61 = vsel %vm11340_vm14, %v3343_v28, %v3347_v18  ;;  %v3171_v28 = vld [vmem:[#allocation2 + $0x74] sm:$0x1] }
 0x21a   : > { %v2920_v15 = vpop.f32.mrf.mxu1  ;;  %v3353_v3 = vshll.u32 %v3169_v34, 16  ;;  %v4429_v43 = vunpack.c.l.b16 %v4312_v48  ;;  %v3434_v37 = vunpack.c.l.b16 %v3348_v61  ;;  %v4330_v53 = vor.u32 %v4329_v45, %v4326_v63 }
 0x21b   : > { %v11693_v20 = vpop.f32.mrf.mxu0  ;;  %v4340_v62 = vor.u32 %v4339_v51, %v11706_v59  ;;  %v11721_v18 = vrot.slane %v3359_v26, 5  ;;  %v3369_v36 = vshll.u32 %v3171_v28, 16  ;;  %v4350_v51 = vrot.slane %v4348_v12, 4 }
 0x21c   : > { %v2189_v56 = vpop.f32.mrf.mxu2 }
 0x21d   : > { %10077 = vmatmul.msk.bf16.gmra.mxu1 %vm2119_vm11, %v4443_v27  ;;  %v2335_v32 = vadd.f32 %v2334_v8, %v2189_v56  ;;  %10036 = vmatmul.msk.bf16.gmra.mxu3 %vm2119_vm11, %v3446_v39  ;;  %v3338_v8 = vsel %vm11340_vm14, %v3333_v42, %v11684_v47  ;;  %v3363_v47 = vshrl.u32 %v3170_v46, 16  ;;  %v4430_v27 = vunpack.c.l.b16 %v4322_v6  ;;  %v11719_v42 = vld [vmem:[#allocation2 + $0x58] sm:$0xf] }
 0x21e   : > { %10064 = vmatmul.msk.bf16.gmra.mxu0 %vm2119_vm11, %v4079_v44  ;;  %v3433_v50 = vunpack.c.l.b16 %v3338_v8  ;;  %v4343_v44 = vshll.u32 %v3925_v11, 16  ;;  %v3355_v56 = vrot.slane %v3353_v3, 5  ;;  %v4067_v6 = vunpack.c.l.b16 %v4032_v10  ;;  %v3172_v10 = vld [vmem:[#allocation2 + $0x78] sm:$0xf] }
 0x21f   : > { %v2534_v31 = vadd.f32 %v11659_v17, %v2335_v32  ;;  %v3350_v17 = vshrl.u32 %v3169_v34, 16  ;;  %v3365_v29 = vrot.slane %v3363_v47, 4  ;;  %v4351_v32 = vshll.u32 %v3926_v5, 16 }
 0x220   : > { %v2339_v4 = vpop.f32.mrf.mxu3  ;;  %v4357_v22 = vshll.u32 %v11719_v42, 16  ;;  %v4361_v63 = vshrl.u32 %v11719_v42, 16  ;;  %v4444_v34 = vpack.c.b16 %v4430_v27, %v4429_v43  ;;  %v4341_v45 = vrot.slane %v4340_v62, 4  ;;  %v3928_v27 = vld [vmem:[#allocation2 + $0x5c] sm:$0x1] }
 0x221   : > { %v11712_v9 = vadd.f32 %v2920_v15, %v2534_v31  ;;  %v10435_v15 = vld [vmem:[#allocation2 + $0x54] sm:$0xff]  ;;  %v3352_v40 = vrot.slane %v3350_v17, 4  ;;  %v3447_v31 = vpack.c.b16 %v3434_v37, %v3433_v50  ;;  %v4345_v46 = vrot.slane %v4343_v44, 5 }
 0x222   : > { %v2922_v0 = vpop.f32.mrf.mxu1  ;;  %v3366_v58 = vor.u32 %v3365_v29, %v11721_v18  ;;  %v4080_v3 = vpack.c.b16 %v4067_v6, %v4066_v30  ;;  %v11730_v23 = vrot.slane %v4357_v22, 5  ;;  %v4363_v26 = vrot.slane %v4361_v63, 4  ;;  %v3945_v50 = vld [vmem:[#allocation2 + $0x54] sm:$0xe] }
 0x223   : > { %v11714_v19 = vpop.f32.mrf.mxu0  ;;  %v3356_v61 = vor.u32 %v3355_v56, %v3352_v40  ;;  %v4035_v37 = vrot.slane %v11719_v42, 5  ;;  %v3371_v44 = vrot.slane %v3369_v36, 5  ;;  %v4367_v40 = vshll.u32 %v3928_v27, 16 }
 0x224   : > { %v2191_v39 = vpop.f32.mrf.mxu2  ;;  %v3367_v62 = vrot.slane %v3366_v58, 4  ;;  %v4364_v42 = vor.u32 %v4363_v26, %v11730_v23  ;;  %v4038_v56 = vrot.slane %v3928_v27, 5  ;;  %v3374_v28 = vshrl.u32 %v3172_v10, 16  ;;  %v3174_v26 = vld [vmem:[#allocation2 + $0x80] sm:$0x1] }
 0x225   : > { %v2337_v55 = vadd.f32 %v2336_v38, %v2191_v39  ;;  %v4331_v38 = vrot.slane %v4330_v53, 4  ;;  %v3357_v53 = vrot.slane %v3356_v61, 4  ;;  %v3377_v29 = vshll.u32 %v3172_v10, 16 }
 0x227   : > { %v2535_v48 = vadd.f32 %v11678_v54, %v2337_v55  ;;  %v4353_v54 = vrot.slane %v4351_v32, 5  ;;  %v4336_v39 = vsel %vm11340_vm14, %v4331_v38, %v11706_v59  ;;  %v4037_v59 = vrot.slane %v4035_v37, 4 }
 0x228   : > { %v2341_v11 = vpop.f32.mrf.mxu3  ;;  %v4431_v22 = vunpack.c.l.b16 %v4336_v39  ;;  %v3929_v39 = vld [vmem:[#allocation2 + $0x60] sm:$0xf] }
 0x229   : > { %10020 = vmatmul.msk.bf16.gmra.mxu2 %vm2119_vm11, %v10435_v15  ;;  %v11728_v17 = vadd.f32 %v2922_v0, %v2535_v48  ;;  %v4346_v0 = vsel %vm11340_vm14, %v4341_v45, %v4345_v46  ;;  %v4354_v55 = vor.u32 %v4353_v54, %v4350_v51  ;;  %v3173_v15 = vld [vmem:[#allocation2 + $0x7c] sm:$0xf]  ;;  %v4365_v45 = vrot.slane %v4364_v42, 4  ;;  %v3930_v42 = vld [vmem:[#allocation2 + $0x64] sm:$0xf] }
 0x22a   : > { %v2925_v8 = vpop.f32.mrf.mxu1  ;;  %v3383_v48 = vshll.u32 %v3173_v15, 16  ;;  %v3387_v6 = vshrl.u32 %v3173_v15, 16  ;;  %v4432_v63 = vunpack.c.l.b16 %v4346_v0  ;;  %v4369_v46 = vrot.slane %v4367_v40, 5 }
 0x22b   : > { %v11733_v43 = vpop.f32.mrf.mxu0  ;;  %v4355_v38 = vrot.slane %v4354_v55, 4  ;;  %v4039_v51 = vsel %vm11491_vm7, %v4037_v59, %v4038_v56  ;;  %v3376_v54 = vrot.slane %v3374_v28, 4  ;;  %v3393_v55 = vshll.u32 %v3174_v26, 16 }
 0x22c   : > { %v2194_v47 = vpop.f32.mrf.mxu2  ;;  %v3389_v27 = vrot.slane %v3387_v6, 4  ;;  %v4445_v10 = vpack.c.b16 %v4432_v63, %v4431_v22  ;;  %v4375_v40 = vshll.u32 %v3929_v39, 16  ;;  %v4042_v56 = vrot.slane %v3930_v42, 5  ;;  %v3946_v6 = vld [vmem:[#allocation2 + $0x60] sm:$0xe] }
 0x22d   : > { %10078 = vmatmul.msk.bf16.gmra.mxu1 %vm2119_vm11, %v4444_v34  ;;  %v2340_v5 = vadd.f32 %v2339_v4, %v2194_v47  ;;  %10037 = vmatmul.msk.bf16.gmra.mxu3 %vm2119_vm11, %v3447_v31  ;;  %v10052_v4 = vrot.slane %v3945_v50, 9  ;;  %v3372_v31 = vsel %vm11340_vm14, %v3367_v62, %v3371_v44  ;;  %v11758_v47 = vrot.slane %v3383_v48, 5  ;;  %v3175_v22 = vld [vmem:[#allocation2 + $0x84] sm:$0xf] }
 0x22e   : > { %10065 = vmatmul.msk.bf16.gmra.mxu0 %vm2119_vm11, %v4080_v3  ;;  %v3379_v3 = vrot.slane %v3377_v29, 5  ;;  %v4069_v62 = vunpack.c.l.b16 %v4039_v51  ;;  %v3931_v51 = vld [vmem:[#allocation2 + $0x68] sm:$0x1] }
 0x22f   : > { %v2536_v30 = vadd.f32 %v11693_v20, %v2340_v5  ;;  %v3362_v20 = vsel %vm11340_vm14, %v3357_v53, %v11721_v18  ;;  %v4036_v58 = vsel %vm11491_vm7, %v10052_v4, %v4035_v37  ;;  %v3436_v5 = vunpack.c.l.b16 %v3372_v31 }
 0x230   : > { %v2344_v32 = vpop.f32.mrf.mxu3  ;;  %v3435_v50 = vunpack.c.l.b16 %v3362_v20  ;;  %v4068_v53 = vunpack.c.l.b16 %v4036_v58  ;;  %v4360_v37 = vsel %vm11340_vm14, %v4355_v38, %v11730_v23  ;;  %v3380_v44 = vor.u32 %v3379_v3, %v3376_v54 }
 0x231   : > { %v11748_v34 = vadd.f32 %v2925_v8, %v2536_v30  ;;  %v10436_v8 = vld [vmem:[#allocation2 + $0x60] sm:$0xff]  ;;  %v3390_v4 = vor.u32 %v3389_v27, %v11758_v47  ;;  %v11770_v23 = vunpack.c.l.b16 %v4360_v37  ;;  %v3395_v38 = vrot.slane %v3393_v55, 5  ;;  %v3932_v55 = vld [vmem:[#allocation2 + $0x6c] sm:$0xf] }
 0x232   : > { %v2927_v12 = vpop.f32.mrf.mxu1  ;;  %v3448_v59 = vpack.c.b16 %v3436_v5, %v3435_v50  ;;  %v4081_v29 = vpack.c.b16 %v4069_v62, %v4068_v53  ;;  %v3381_v31 = vrot.slane %v3380_v44, 4  ;;  %v4377_v3 = vrot.slane %v4375_v40, 5 }
 0x233   : > { %v11752_v36 = vpop.f32.mrf.mxu0  ;;  %v4045_v26 = vrot.slane %v3931_v51, 5  ;;  %v3398_v27 = vshrl.u32 %v3175_v22, 16  ;;  %v3401_v5 = vshll.u32 %v3175_v22, 16 }
 0x234   : > { %v2196_v61 = vpop.f32.mrf.mxu2 }
 0x235   : > { %v2342_v18 = vadd.f32 %v2341_v11, %v2196_v61  ;;  %v4370_v11 = vsel %vm11340_vm14, %v4365_v45, %v4369_v46  ;;  %v4381_v45 = vshll.u32 %v3930_v42, 16  ;;  %v4385_v46 = vshrl.u32 %v3930_v42, 16  ;;  %v3176_v61 = vld [vmem:[#allocation2 + $0x88] sm:$0xf] }
 0x236   : > { %v11772_v48 = vunpack.c.l.b16 %v4370_v11  ;;  %v3386_v11 = vsel %vm11340_vm14, %v3381_v31, %v11758_v47  ;;  %v3400_v40 = vrot.slane %v3398_v27, 4  ;;  %v3177_v31 = vld [vmem:[#allocation2 + $0x8c] sm:$0x1] }
 0x237   : > { %v2537_v0 = vadd.f32 %v11714_v19, %v2342_v18  ;;  %v4372_v19 = vshrl.u32 %v3929_v39, 16  ;;  %v10053_v18 = vrot.slane %v3946_v6, 9  ;;  %v3407_v39 = vshll.u32 %v3176_v61, 16 }
 0x238   : > { %v2346_v30 = vpop.f32.mrf.mxu3  ;;  %v4446_v37 = vpack.c.b16 %v11772_v48, %v11770_v23  ;;  %v11797_v48 = vld [vmem:[#allocation2 + $0x70] sm:$0xf] }
 0x239   : > { %10021 = vmatmul.msk.bf16.gmra.mxu2 %vm2119_vm11, %v10436_v8  ;;  %v11768_v28 = vadd.f32 %v2927_v12, %v2537_v0  ;;  %v3391_v12 = vrot.slane %v3390_v4, 4  ;;  %v4374_v54 = vrot.slane %v4372_v19, 4  ;;  %v4044_v8 = vrot.slane %v4042_v56, 4 }
 0x23a   : > { %v2930_v15 = vpop.f32.mrf.mxu1  ;;  %v3411_v0 = vshrl.u32 %v3176_v61, 16  ;;  %v4043_v4 = vsel %vm11491_vm7, %v10053_v18, %v4042_v56  ;;  %v4396_v56 = vshrl.u32 %v3932_v55, 16  ;;  %v4409_v18 = vshrl.u32 %v11797_v48, 16 }
 0x23b   : > { %v11775_v20 = vpop.f32.mrf.mxu0  ;;  %v4378_v44 = vor.u32 %v4377_v3, %v4374_v54  ;;  %v4046_v42 = vsel %vm11491_vm7, %v4044_v8, %v4045_v26  ;;  %v4405_v3 = vshll.u32 %v11797_v48, 16 }
 0x23c   : > { %v2199_v63 = vpop.f32.mrf.mxu2  ;;  %v3413_v23 = vrot.slane %v3411_v0, 4  ;;  %v4071_v54 = vunpack.c.l.b16 %v4046_v42 }
 0x23d   : > { %10079 = vmatmul.msk.bf16.gmra.mxu1 %vm2119_vm11, %v4445_v10  ;;  %v2345_v58 = vadd.f32 %v2344_v32, %v2199_v63  ;;  %10038 = vmatmul.msk.bf16.gmra.mxu3 %vm2119_vm11, %v3448_v59  ;;  %v11780_v10 = vrot.slane %v4381_v45, 5  ;;  %v4387_v32 = vrot.slane %v4385_v46, 4  ;;  %v3403_v59 = vrot.slane %v3401_v5, 5  ;;  %v10437_v46 = vld [vmem:[#allocation2 + $0x6c] sm:$0xff] }
 0x23e   : > { %10066 = vmatmul.msk.bf16.gmra.mxu0 %vm2119_vm11, %v4081_v29  ;;  %v11795_v29 = vrot.slane %v3407_v39, 5  ;;  %v4391_v63 = vshll.u32 %v3931_v51, 16  ;;  %v3417_v51 = vshll.u32 %v3177_v31, 16  ;;  %v4398_v39 = vrot.slane %v4396_v56, 4 }
 0x23f   : > { %v2538_v50 = vadd.f32 %v11733_v43, %v2345_v58  ;;  %v3396_v43 = vsel %vm11340_vm14, %v3391_v12, %v3395_v38  ;;  %v4388_v22 = vor.u32 %v4387_v32, %v11780_v10  ;;  %v4399_v38 = vshll.u32 %v3932_v55, 16 }
 0x240   : > { %v2349_v62 = vpop.f32.mrf.mxu3  ;;  %v3438_v61 = vunpack.c.l.b16 %v3396_v43  ;;  %v4379_v58 = vrot.slane %v4378_v44, 4  ;;  %v4070_v12 = vunpack.c.l.b16 %v4043_v4  ;;  %v3404_v26 = vor.u32 %v3403_v59, %v3400_v40  ;;  %v3947_v43 = vld [vmem:[#allocation2 + $0x6c] sm:$0xe] }
 0x241   : > { %v11793_v19 = vadd.f32 %v2930_v15, %v2538_v50  ;;  %v3437_v15 = vunpack.c.l.b16 %v3386_v11  ;;  %v3414_v27 = vor.u32 %v3413_v23, %v11795_v29  ;;  %v4389_v50 = vrot.slane %v4388_v22, 4 }
 0x242   : > { %v2932_v53 = vpop.f32.mrf.mxu1  ;;  %v4393_v5 = vrot.slane %v4391_v63, 5  ;;  %v4049_v11 = vrot.slane %v11797_v48, 5  ;;  %v11810_v4 = vrot.slane %v4405_v3, 5  ;;  %v4082_v42 = vpack.c.b16 %v4071_v54, %v4070_v12  ;;  %v3934_v63 = vld [vmem:[#allocation2 + $0x74] sm:$0x1] }
 0x243   : > { %v11799_v6 = vpop.f32.mrf.mxu0  ;;  %v3449_v55 = vpack.c.b16 %v3438_v61, %v3437_v15  ;;  %v3405_v40 = vrot.slane %v3404_v26, 4  ;;  %v3415_v59 = vrot.slane %v3414_v27, 4  ;;  %v3419_v23 = vrot.slane %v3417_v51, 5  ;;  %v4545_v15 = vld [vmem:[#allocation2 + $0x10] sm:$0xf] }
 0x244   : > { %v2201_v47 = vpop.f32.mrf.mxu2  ;;  %v4384_v48 = vsel %vm11340_vm14, %v4379_v58, %v11780_v10  ;;  %v5220_v12 = vld [vmem:[#allocation2 + $0x18] sm:$0xf] }
 0x245   : > { %v2347_v45 = vadd.f32 %v2346_v30, %v2201_v47  ;;  %v4401_v30 = vrot.slane %v4399_v38, 5  ;;  %v10054_v38 = vrot.slane %v3947_v43, 9  ;;  %v3410_v10 = vsel %vm11340_vm14, %v3405_v40, %v11795_v29  ;;  %v4962_v29 = vld [vmem:[#allocation2 + $0xc] sm:$0xe] }
 0x246   : > { %v3420_v58 = vsel %vm11340_vm14, %v3415_v59, %v3419_v23  ;;  %v4435_v54 = vunpack.c.l.b16 %v4384_v48  ;;  %v4544_v43 = vld [vmem:[#allocation2 + $0xc] sm:$0xf]  ;;  %v5257_v40 = vshll.u32 %v5220_v12, 16 }
 0x247   : > { %v2539_v8 = vadd.f32 %v11752_v36, %v2347_v45  ;;  %v4411_v36 = vrot.slane %v4409_v18, 4  ;;  %v4402_v31 = vor.u32 %v4401_v30, %v4398_v39  ;;  %v4051_v45 = vrot.slane %v4049_v11, 4  ;;  %v11829_v18 = vld [vmem:[#allocation2 + $0x1c] sm:$0xf] }
 0x248   : > { %v2351_v32 = vpop.f32.mrf.mxu3  ;;  %v3440_v39 = vunpack.c.l.b16 %v3420_v58  ;;  %v5263_v59 = vshll.u32 %v11829_v18, 16  ;;  %v5267_v23 = vshrl.u32 %v11829_v18, 16  ;;  %v4587_v58 = vshll.u32 %v4545_v15, 16 }
 0x249   : > { %10022 = vmatmul.msk.bf16.gmra.mxu2 %vm2119_vm11, %v10437_v46  ;;  %v11808_v44 = vadd.f32 %v2932_v53, %v2539_v8  ;;  %v4394_v53 = vsel %vm11340_vm14, %v4389_v50, %v4393_v5  ;;  %v4052_v46 = vrot.slane %v3934_v63, 5  ;;  %v4403_v51 = vrot.slane %v4402_v31, 4 }
 0x24a   : > { %v2935_v0 = vpop.f32.mrf.mxu1  ;;  %v4436_v3 = vunpack.c.l.b16 %v4394_v53  ;;  %v5007_v50 = vrot.slane %v4545_v15, 5  ;;  %v3439_v5 = vunpack.c.l.b16 %v3410_v10  ;;  %v4581_v10 = vshll.u32 %v4544_v43, 16 }
 0x24b   : > { %14084 = vst [vmem:[#allocation10_spill] sm:$0xff] %v11808_v44  ;;  %v11813_v22 = vpop.f32.mrf.mxu0  ;;  %v4053_v27 = vsel %vm11491_vm7, %v4051_v45, %v4052_v46  ;;  %v5259_v13 = vrot.slane %v5257_v40, 5  ;;  %v11845_v44 = vrot.slane %v5263_v59, 5 }
 0x24c   : > { %v2204_v47 = vpop.f32.mrf.mxu2  ;;  %v4073_v53 = vunpack.c.l.b16 %v4053_v27  ;;  %v5009_v45 = vrot.slane %v5007_v50, 4  ;;  %v4447_v27 = vpack.c.b16 %v4436_v3, %v4435_v54 }
 0x24d   : > { %10080 = vmatmul.msk.bf16.gmra.mxu1 %vm2119_vm11, %v4446_v37  ;;  %v2350_v56 = vadd.f32 %v2349_v62, %v2204_v47  ;;  %10039 = vmatmul.msk.bf16.gmra.mxu3 %vm2119_vm11, %v3449_v55  ;;  %v4412_v37 = vor.u32 %v4411_v36, %v11810_v4  ;;  %v4415_v62 = vshll.u32 %v3934_v63, 16  ;;  %v11837_v55 = vld [vmem:[#allocation2 + $0x14] sm:$0x1]  ;;  %v5254_v36 = vshrl.u32 %v5220_v12, 16 }
 0x24e   : > { %10067 = vmatmul.msk.bf16.gmra.mxu0 %vm2119_vm11, %v4082_v42  ;;  %v10101_v63 = vrot.slane %v4962_v29, 9  ;;  %v5010_v46 = vrot.slane %v11837_v55, 5  ;;  %v3450_v29 = vpack.c.b16 %v3440_v39, %v3439_v5  ;;  %v11866_v39 = vrot.slane %v4587_v58, 5 }
 0x24f   : > { %v2540_v61 = vadd.f32 %v11775_v20, %v2350_v56  ;;  %v4050_v20 = vsel %vm11491_vm7, %v10054_v38, %v4049_v11  ;;  %v4413_v30 = vrot.slane %v4412_v37, 4  ;;  %v4417_v42 = vrot.slane %v4415_v62, 5  ;;  %v10438_v38 = vld [vmem:[#allocation2 + $0x78] sm:$0xff] }
 0x250   : > { %v11831_v26 = vpop.f32.mrf.mxu3  ;;  %v4072_v48 = vunpack.c.l.b16 %v4050_v20  ;;  %v4578_v37 = vshrl.u32 %v4544_v43, 16  ;;  %v4591_v62 = vshrl.u32 %v4545_v15, 16  ;;  %v5256_v12 = vrot.slane %v5254_v36, 4 }
 0x251   : > { %v11841_v31 = vadd.f32 %v2935_v0, %v2540_v61  ;;  %v5269_v20 = vrot.slane %v5267_v23, 4  ;;  %v4408_v0 = vsel %vm11340_vm14, %v4403_v51, %v11810_v4  ;;  %v11852_v61 = vld [vmem:[#allocation2 + $0x20] sm:$0x1]  ;;  %v5011_v54 = vsel %vm11491_vm7, %v5009_v45, %v5010_v46 }
 0x252   : > { %v2937_v8 = vpop.f32.mrf.mxu1  ;;  %v4580_v3 = vrot.slane %v4578_v37, 4  ;;  %v4583_v51 = vrot.slane %v4581_v10, 5  ;;  %v4083_v36 = vpack.c.b16 %v4073_v53, %v4072_v48  ;;  %v5273_v59 = vshll.u32 %v11852_v61, 16 }
 0x253   : > { %v4131_v47 = vpop.f32.mrf.mxu0  ;;  %v5270_v40 = vor.u32 %v5269_v20, %v11845_v44  ;;  %v4597_v53 = vshll.u32 %v11837_v55, 16  ;;  %v11891_v20 = vld [vmem:[#allocation2 + $0x28] sm:$0xf] }
 0x254   : > { %v2206_v11 = vpop.f32.mrf.mxu2  ;;  %v5275_v46 = vrot.slane %v5273_v59, 5 }
 0x255   : > { %v2352_v56 = vadd.f32 %v2351_v32, %v2206_v11  ;;  %v4418_v32 = vsel %vm11340_vm14, %v4413_v30, %v4417_v42  ;;  %v4593_v30 = vrot.slane %v4591_v62, 4  ;;  %v5260_v42 = vor.u32 %v5259_v13, %v5256_v12  ;;  %v4547_v62 = vld [vmem:[#allocation2 + $0x18] sm:$0xf]  ;;  %v5223_v12 = vld [vmem:[#allocation2 + $0x24] sm:$0xf] }
 0x256   : > { %v4584_v13 = vor.u32 %v4583_v51, %v4580_v3  ;;  %v5271_v45 = vrot.slane %v5270_v40, 4  ;;  %v5281_v40 = vshll.u32 %v5223_v12, 16 }
 0x257   : > { %v2541_v60 = vadd.f32 %v11799_v6, %v2352_v56  ;;  %v5008_v6 = vsel %vm11491_vm7, %v10101_v63, %v5007_v50  ;;  %v5076_v63 = vunpack.c.l.b16 %v5011_v54  ;;  %v4594_v48 = vor.u32 %v4593_v30, %v11866_v39  ;;  %v5638_v54 = vld [vmem:[#allocation2 + $0x18] sm:$0xe] }
 0x258   : > { %v11855_v15 = vpop.f32.mrf.mxu3  ;;  %v5075_v11 = vunpack.c.l.b16 %v5008_v6  ;;  %v5276_v6 = vsel %vm11340_vm14, %v5271_v45, %v5275_v46  ;;  %v4549_v45 = vld [vmem:[#allocation2 + $0x20] sm:$0x1] }
 0x259   : > { %10023 = vmatmul.msk.bf16.gmra.mxu2 %vm2119_vm11, %v10438_v38  ;;  %v11861_v5 = vadd.f32 %v2937_v8, %v2541_v60  ;;  %v11873_v60 = vunpack.c.l.b16 %v4408_v0  ;;  %v11876_v8 = vunpack.c.l.b16 %v4418_v32  ;;  %v5261_v38 = vrot.slane %v5260_v42, 4  ;;  %v4548_v0 = vld [vmem:[#allocation2 + $0x1c] sm:$0xf] }
 0x25a   : > { %v4494_v43 = vpop.f32.mrf.mxu1  ;;  %v11889_v58 = vpack.c.b16 %v5076_v63, %v5075_v11  ;;  %v4595_v32 = vrot.slane %v4594_v48, 4  ;;  %v4611_v3 = vshll.u32 %v4548_v0, 16  ;;  %v5278_v42 = vshrl.u32 %v5223_v12, 16 }
 0x25b   : > { %v11864_v4 = vadd.f32 %v4494_v43, %v11813_v22  ;;  %v11871_v23 = vpop.f32.mrf.mxu0  ;;  %v4448_v10 = vpack.c.b16 %v11876_v8, %v11873_v60  ;;  %v5266_v43 = vsel %vm11340_vm14, %v5261_v38, %v11845_v44  ;;  %v4605_v60 = vshll.u32 %v4547_v62, 16 }
 0x25c   : > { %v3078_v50 = vpop.f32.mrf.mxu2  ;;  %v5291_v44 = vshrl.u32 %v11891_v20, 16  ;;  %v10143_v8 = vrot.slane %v5638_v54, 9  ;;  %v5686_v63 = vrot.slane %v11852_v61, 5  ;;  %v5494_v38 = vunpack.c.l.b16 %v5276_v6 }
 0x25d   : > { %10081 = vmatmul.msk.bf16.gmra.mxu1 %vm2119_vm11, %v4447_v27  ;;  %v3128_v22 = vadd.f32 %v3078_v50, %v11502_v7  ;;  %10040 = vmatmul.msk.bf16.gmra.mxu3 %vm2119_vm11, %v3450_v29  ;;  %v11895_v27 = vrot.slane %v4597_v53, 5  ;;  %v5683_v29 = vrot.slane %v11829_v18, 5  ;;  %v5287_v18 = vshll.u32 %v11891_v20, 16  ;;  %v10439_v50 = vld [vmem:[#allocation2 + $0x84] sm:$0xff] }
 0x25e   : > { %10068 = vmatmul.msk.bf16.gmra.mxu0 %vm2119_vm11, %v4083_v36  ;;  %v4602_v36 = vshrl.u32 %v4547_v62, 16  ;;  %v5493_v53 = vunpack.c.l.b16 %v5266_v43  ;;  %v5283_v12 = vrot.slane %v5281_v40, 5  ;;  %v5293_v62 = vrot.slane %v5291_v44, 4 }
 0x25f   : > { %v11882_v56 = vadd.f32 %v11831_v26, %v3128_v22  ;;  %v4585_v26 = vrot.slane %v4584_v13, 4  ;;  %v4615_v22 = vshrl.u32 %v4548_v0, 16  ;;  %v5685_v11 = vrot.slane %v5683_v29, 4 }
 0x260   : > { %v11885_v37 = vpop.f32.mrf.mxu3  ;;  %v5014_v13 = vrot.slane %v4548_v0, 5  ;;  %v4607_v61 = vrot.slane %v4605_v60, 5  ;;  %v11917_v0 = vrot.slane %v4611_v3, 5  ;;  %v4600_v40 = vsel %vm11340_vm14, %v4595_v32, %v11895_v27 }
 0x261   : > { %v4590_v6 = vsel %vm11340_vm14, %v4585_v26, %v11866_v39  ;;  %v5684_v3 = vsel %vm11491_vm7, %v10143_v8, %v5683_v29  ;;  %v4621_v44 = vshll.u32 %v4549_v45, 16 }
 0x262   : > { %v4496_v7 = vpop.f32.mrf.mxu1 }
 0x263   : > { %v11893_v55 = vadd.f32 %v4496_v7, %v4131_v47  ;;  %v11903_v30 = vpop.f32.mrf.mxu0  ;;  %v4963_v47 = vld [vmem:[#allocation2 + $0x18] sm:$0xe]  ;;  %v5280_v7 = vrot.slane %v5278_v42, 4  ;;  %v5017_v42 = vrot.slane %v4549_v45, 5 }
 0x264   : > { %v3080_v51 = vpop.f32.mrf.mxu2  ;;  %v10102_v46 = vrot.slane %v4963_v47, 9  ;;  %v5016_v47 = vrot.slane %v5014_v13, 4 }
 0x265   : > { %14085 = vst [vmem:[#allocation11_spill] sm:$0xff] %v11893_v55  ;;  %v3129_v59 = vadd.f32 %v3080_v51, %v11519_v35  ;;  %v11912_v35 = vrot.slane %v5287_v18, 5  ;;  %v4604_v55 = vrot.slane %v4602_v36, 4  ;;  %v5513_v36 = vpack.c.b16 %v5494_v38, %v5493_v53 }
 0x266   : > { %v5687_v18 = vsel %vm11491_vm7, %v5685_v11, %v5686_v63  ;;  %v5015_v39 = vsel %vm11491_vm7, %v10102_v46, %v5014_v13  ;;  %v5284_v26 = vor.u32 %v5283_v12, %v5280_v7  ;;  %v5018_v8 = vsel %vm11491_vm7, %v5016_v47, %v5017_v42 }
 0x267   : > { %v11910_v48 = vadd.f32 %v11855_v15, %v3129_v59  ;;  %v4617_v15 = vrot.slane %v4615_v22, 4  ;;  %v11919_v59 = vld [vmem:[#allocation2 + $0x2c] sm:$0x1]  ;;  %v5294_v60 = vor.u32 %v5293_v62, %v11912_v35  ;;  %v4608_v22 = vor.u32 %v4607_v61, %v4604_v55  ;;  %v11958_v61 = vld [vmem:[#allocation2 + $0x24] sm:$0xe] }
 0x268   : > { %v11915_v54 = vpop.f32.mrf.mxu3  ;;  %v5297_v27 = vshll.u32 %v11919_v59, 16  ;;  %v4818_v63 = vunpack.c.l.b16 %v4600_v40  ;;  %v5751_v13 = vunpack.c.l.b16 %v5684_v3  ;;  %v5752_v53 = vunpack.c.l.b16 %v5687_v18  ;;  %v4551_v18 = vld [vmem:[#allocation2 + $0x28] sm:$0xf] }
 0x269   : > { %10024 = vmatmul.msk.bf16.gmra.mxu2 %vm2119_vm11, %v10439_v50  ;;  %v4618_v29 = vor.u32 %v4617_v15, %v11917_v0  ;;  %v5285_v55 = vrot.slane %v5284_v26, 4  ;;  %v5295_v38 = vrot.slane %v5294_v60, 4  ;;  %v4609_v12 = vrot.slane %v4608_v22, 4  ;;  %v5226_v15 = vld [vmem:[#allocation2 + $0x30] sm:$0xf] }
 0x26a   : > { %v4499_v51 = vpop.f32.mrf.mxu1  ;;  %v5299_v46 = vrot.slane %v5297_v27, 5  ;;  %v5771_v42 = vpack.c.b16 %v5752_v53, %v5751_v13  ;;  %v4550_v60 = vld [vmem:[#allocation2 + $0x24] sm:$0xf]  ;;  %v10144_v27 = vrot.slane %v11958_v61, 9  ;;  %v5302_v22 = vshrl.u32 %v5226_v15, 16 }
 0x26b   : > { %v11922_v43 = vadd.f32 %v4499_v51, %v11871_v23  ;;  %v11935_v50 = vpop.f32.mrf.mxu0  ;;  %v11953_v62 = vrot.slane %v4618_v29, 4  ;;  %v4623_v51 = vrot.slane %v4621_v44, 5  ;;  %v5305_v29 = vshll.u32 %v5226_v15, 16 }
 0x26c   : > { %v3083_v23 = vpop.f32.mrf.mxu2  ;;  %v5300_v3 = vsel %vm11340_vm14, %v5295_v38, %v5299_v46  ;;  %v4626_v13 = vshrl.u32 %v4550_v60, 16  ;;  %v4635_v53 = vshll.u32 %v4551_v18, 16  ;;  %v4629_v46 = vshll.u32 %v4550_v60, 16 }
 0x26d   : > { %10082 = vmatmul.msk.bf16.gmra.mxu1 %vm2119_vm11, %v4448_v10  ;;  %v3130_v32 = vadd.f32 %v3083_v23, %v11536_v25  ;;  %10115 = vmatmul.msk.bf16.vlgmr.msrb.gmra.mxu3 %vm2119_vm11, %v11889_v58  ;;  %v4817_v10 = vunpack.c.l.b16 %v4590_v6  ;;  %v5077_v25 = vunpack.c.l.b16 %v5015_v39  ;;  %v5078_v58 = vunpack.c.l.b16 %v5018_v8  ;;  %v11981_v8 = vld [vmem:[#allocation2 + $0x2c] sm:$0x1] }
 0x26e   : > { %10131 = vmatmul.msk.bf16.vlgmr.msrb.gmra.mxu0 %vm2119_vm11, %v5513_v36  ;;  %v5290_v36 = vsel %vm11340_vm14, %v5285_v55, %v11912_v35  ;;  %v4614_v39 = vsel %vm11340_vm14, %v4609_v12, %v11917_v0  ;;  %v4624_v26 = vsel %vm11340_vm14, %v11953_v62, %v4623_v51  ;;  %v5690_v35 = vrot.slane %v11891_v20, 5 }
 0x26f   : > { %v11948_v11 = vadd.f32 %v11885_v37, %v3130_v32  ;;  %v4837_v47 = vpack.c.b16 %v4818_v63, %v4817_v10  ;;  %v11976_v32 = vld [vmem:[#allocation2 + $0x34] sm:$0xf]  ;;  %v5495_v44 = vunpack.c.l.b16 %v5290_v36  ;;  %v5496_v10 = vunpack.c.l.b16 %v5300_v3  ;;  %v4964_v63 = vld [vmem:[#allocation2 + $0x24] sm:$0xe] }
 0x270   : > { %v11951_v7 = vpop.f32.mrf.mxu3  ;;  %v5021_v0 = vrot.slane %v4551_v18, 5  ;;  %v5307_v55 = vrot.slane %v5305_v29, 5  ;;  %v5315_v12 = vshrl.u32 %v11976_v32, 16  ;;  %v5692_v51 = vrot.slane %v5690_v35, 4 }
 0x271   : > { %v5693_v61 = vrot.slane %v11919_v59, 5  ;;  %v5024_v15 = vrot.slane %v11981_v8, 5  ;;  %v10103_v60 = vrot.slane %v4964_v63, 9  ;;  %v4628_v29 = vrot.slane %v4626_v13, 4 }
 0x272   : > { %v4501_v45 = vpop.f32.mrf.mxu1  ;;  %v5317_v3 = vrot.slane %v5315_v12, 4  ;;  %v11998_v59 = vrot.slane %v4635_v53, 5  ;;  %v5691_v63 = vsel %vm11491_vm7, %v10144_v27, %v5690_v35  ;;  %v4645_v27 = vshll.u32 %v11981_v8, 16 }
 0x273   : > { %v11956_v37 = vadd.f32 %v4501_v45, %v11903_v30  ;;  %v11960_v40 = vpop.f32.mrf.mxu0  ;;  %v5096_v30 = vpack.c.b16 %v5078_v58, %v5077_v25  ;;  %v5304_v25 = vrot.slane %v5302_v22, 4  ;;  %v4639_v45 = vshrl.u32 %v4551_v18, 16  ;;  %v11984_v58 = vld [vmem:[#allocation2 + $0x38] sm:$0x1] }
 0x274   : > { %v3085_v6 = vpop.f32.mrf.mxu2  ;;  %v5023_v22 = vrot.slane %v5021_v0, 4  ;;  %v5022_v53 = vsel %vm11491_vm7, %v10103_v60, %v5021_v0  ;;  %v5753_v12 = vunpack.c.l.b16 %v5691_v63  ;;  %v4647_v60 = vrot.slane %v4645_v27, 5 }
 0x275   : > { %14086 = vst [vmem:[#allocation12_spill] sm:$0xff] %v11956_v37  ;;  %v3131_v23 = vadd.f32 %v3085_v6, %v11553_v52  ;;  %v5514_v6 = vpack.c.b16 %v5496_v10, %v5495_v44  ;;  %v5308_v36 = vor.u32 %v5307_v55, %v5304_v25  ;;  %v4641_v37 = vrot.slane %v4639_v45, 4 }
 0x276   : > { %v4819_v44 = vunpack.c.l.b16 %v4614_v39  ;;  %v5700_v27 = vrot.slane %v11984_v58, 5 }
 0x277   : > { %v11979_v52 = vadd.f32 %v11915_v54, %v3131_v23  ;;  %v5311_v54 = vshll.u32 %v11976_v32, 16  ;;  %v5309_v13 = vrot.slane %v5308_v36, 4  ;;  %v4642_v45 = vor.u32 %v4641_v37, %v11998_v59  ;;  %v5640_v37 = vld [vmem:[#allocation2 + $0x30] sm:$0xe] }
 0x278   : > { %v3508_v20 = vpop.f32.mrf.mxu3  ;;  %v5079_v36 = vunpack.c.l.b16 %v5022_v53 }
 0x279   : > { %10089 = vmatmul.msk.bf16.vlgmr.msrb.gmra.mxu2 %vm2119_vm11, %v4837_v47  ;;  %v5313_v47 = vrot.slane %v5311_v54, 5 }
 0x27a   : > { %v4504_v38 = vpop.f32.mrf.mxu1 }
 0x27b   : > { %v11989_v62 = vadd.f32 %v4504_v38, %v11935_v50  ;;  %v11994_v18 = vpop.f32.mrf.mxu0  ;;  %v5321_v50 = vshll.u32 %v11984_v58, 16  ;;  %v5318_v10 = vor.u32 %v5317_v3, %v5313_v47  ;;  %v5314_v0 = vsel %vm11340_vm14, %v5309_v13, %v5313_v47 }
 0x27c   : > { %v3088_v23 = vpop.f32.mrf.mxu2  ;;  %v10145_v13 = vrot.slane %v5640_v37, 9 }
 0x27d   : > { %14087 = vst [vmem:[#allocation13_spill] sm:$0xff] %v11989_v62  ;;  %10157 = vmatmul.msk.bf16.vlgmr.msrb.gmra.mxu1 %vm2119_vm11, %v5771_v42  ;;  %v3132_v38 = vadd.f32 %v3088_v23, %v11572_v21  ;;  %v4631_v62 = vrot.slane %v4629_v46, 5  ;;  %10116 = vmatmul.msk.bf16.gmra.mxu3 %vm2119_vm11, %v5096_v30  ;;  %v4820_v42 = vunpack.c.l.b16 %v4624_v26  ;;  %v5694_v21 = vsel %vm11491_vm7, %v5692_v51, %v5693_v61 }
 0x27e   : > { %10132 = vmatmul.msk.bf16.gmra.mxu0 %vm2119_vm11, %v5514_v6  ;;  %v5319_v55 = vrot.slane %v5318_v10, 4  ;;  %v5323_v30 = vrot.slane %v5321_v50, 5  ;;  %v5754_v61 = vunpack.c.l.b16 %v5694_v21  ;;  %v4643_v23 = vrot.slane %v4642_v45, 4  ;;  %v12033_v21 = vld [vmem:[#allocation2 + $0x38] sm:$0x1] }
 0x27f   : > { %v12002_v25 = vadd.f32 %v11951_v7, %v3132_v38  ;;  %v5025_v7 = vsel %vm11491_vm7, %v5023_v22, %v5024_v15  ;;  %v4632_v26 = vor.u32 %v4631_v62, %v4628_v29  ;;  %v4838_v54 = vpack.c.b16 %v4820_v42, %v4819_v44  ;;  %v12026_v15 = vld [vmem:[#allocation2 + $0x34] sm:$0xf]  ;;  %v4553_v22 = vld [vmem:[#allocation2 + $0x30] sm:$0xf] }
 0x280   : > { %v12011_v46 = vpop.f32.mrf.mxu3  ;;  %v5080_v3 = vunpack.c.l.b16 %v5025_v7  ;;  %v5324_v62 = vsel %vm11340_vm14, %v5319_v55, %v5323_v30  ;;  %v5497_v29 = vunpack.c.l.b16 %v5314_v0  ;;  %v5697_v38 = vrot.slane %v11976_v32, 5  ;;  %v4965_v44 = vld [vmem:[#allocation2 + $0x30] sm:$0xe]  ;;  %v5229_v7 = vld [vmem:[#allocation2 + $0x3c] sm:$0xf] }
 0x281   : > { %v4633_v8 = vrot.slane %v4632_v26, 4  ;;  %v5498_v50 = vunpack.c.l.b16 %v5324_v62  ;;  %v5028_v10 = vrot.slane %v12026_v15, 5  ;;  %v5772_v42 = vpack.c.b16 %v5754_v61, %v5753_v12  ;;  %v12044_v26 = vld [vmem:[#allocation2 + $0x40] sm:$0xf] }
 0x282   : > { %v4506_v39 = vpop.f32.mrf.mxu1  ;;  %v5097_v63 = vpack.c.b16 %v5080_v3, %v5079_v36  ;;  %v4650_v53 = vshrl.u32 %v4553_v22, 16  ;;  %v4648_v32 = vsel %vm11340_vm14, %v4643_v23, %v4647_v60  ;;  %v4653_v30 = vshll.u32 %v4553_v22, 16 }
 0x283   : > { %v12018_v35 = vadd.f32 %v4506_v39, %v11960_v40  ;;  %v12022_v6 = vpop.f32.mrf.mxu0  ;;  %v4659_v39 = vshll.u32 %v12026_v15, 16  ;;  %v4663_v12 = vshrl.u32 %v12026_v15, 16  ;;  %v5515_v0 = vpack.c.b16 %v5498_v50, %v5497_v29  ;;  %v12059_v15 = vld [vmem:[#allocation2 + $0x44] sm:$0x1] }
 0x284   : > { %v3090_v51 = vpop.f32.mrf.mxu2  ;;  %v5031_v61 = vrot.slane %v12033_v21, 5  ;;  %v4652_v62 = vrot.slane %v4650_v53, 4  ;;  %v5326_v37 = vshrl.u32 %v5229_v7, 16  ;;  %v5339_v60 = vshrl.u32 %v12044_v26, 16 }
 0x285   : > { %v3133_v40 = vadd.f32 %v3090_v51, %v11588_v24  ;;  %v5699_v51 = vrot.slane %v5697_v38, 4  ;;  %v12057_v23 = vrot.slane %v4659_v39, 5  ;;  %v4665_v22 = vrot.slane %v4663_v12, 4 }
 0x286   : > { %v5328_v29 = vrot.slane %v5326_v37, 4 }
 0x287   : > { %v12029_v47 = vadd.f32 %v3508_v20, %v3133_v40  ;;  %v4638_v20 = vsel %vm11340_vm14, %v4633_v8, %v11998_v59  ;;  %v5030_v59 = vrot.slane %v5028_v10, 4  ;;  %v5329_v40 = vshll.u32 %v5229_v7, 16 }
 0x288   : > { %v12036_v55 = vpop.f32.mrf.mxu3  ;;  %v4655_v8 = vrot.slane %v4653_v30, 5  ;;  %v4821_v53 = vunpack.c.l.b16 %v4638_v20  ;;  %v5701_v30 = vsel %vm11491_vm7, %v5699_v51, %v5700_v27  ;;  %v5341_v7 = vrot.slane %v5339_v60, 4 }
 0x289   : > { %10090 = vmatmul.msk.bf16.gmra.mxu2 %vm2119_vm11, %v4838_v54  ;;  %v10104_v54 = vrot.slane %v4965_v44, 9  ;;  %v5331_v50 = vrot.slane %v5329_v40, 5  ;;  %v5032_v20 = vsel %vm11491_vm7, %v5030_v59, %v5031_v61 }
 0x28a   : > { %v4509_v24 = vpop.f32.mrf.mxu1 }
 0x28b   : > { %v12047_v45 = vadd.f32 %v4509_v24, %v11994_v18  ;;  %v12053_v3 = vpop.f32.mrf.mxu0  ;;  %v5335_v18 = vshll.u32 %v12044_v26, 16  ;;  %v4822_v24 = vunpack.c.l.b16 %v4648_v32  ;;  %v5332_v39 = vor.u32 %v5331_v50, %v5328_v29 }
 0x28c   : > { %v3093_v36 = vpop.f32.mrf.mxu2  ;;  %v4656_v32 = vor.u32 %v4655_v8, %v4652_v62  ;;  %v4557_v62 = vld [vmem:[#allocation2 + $0x40] sm:$0xf] }
 0x28d   : > { %10158 = vmatmul.msk.bf16.gmra.mxu1 %vm2119_vm11, %v5772_v42  ;;  %v3134_v58 = vadd.f32 %v3093_v36, %v11608_v33  ;;  %10117 = vmatmul.msk.bf16.gmra.mxu3 %vm2119_vm11, %v5097_v63  ;;  %v5337_v44 = vrot.slane %v5335_v18, 5  ;;  %v5698_v33 = vsel %vm11491_vm7, %v10145_v13, %v5697_v38  ;;  %v5345_v63 = vshll.u32 %v12059_v15, 16 }
 0x28e   : > { %10133 = vmatmul.msk.bf16.gmra.mxu0 %vm2119_vm11, %v5515_v0  ;;  %v4669_v0 = vshll.u32 %v12033_v21, 16  ;;  %v4666_v13 = vor.u32 %v4665_v22, %v12057_v23  ;;  %v5333_v27 = vrot.slane %v5332_v39, 4  ;;  %v5755_v18 = vunpack.c.l.b16 %v5698_v33 }
 0x28f   : > { %v12064_v42 = vadd.f32 %v12011_v46, %v3134_v58  ;;  %v5029_v46 = vsel %vm11491_vm7, %v10104_v54, %v5028_v10  ;;  %v5342_v51 = vor.u32 %v5341_v7, %v5337_v44  ;;  %v5347_v37 = vrot.slane %v5345_v63, 5  ;;  %v5641_v7 = vld [vmem:[#allocation2 + $0x3c] sm:$0xe] }
 0x290   : > { %v12072_v36 = vpop.f32.mrf.mxu3  ;;  %v5756_v58 = vunpack.c.l.b16 %v5701_v30  ;;  %v5338_v10 = vsel %vm11340_vm14, %v5333_v27, %v5337_v44  ;;  %v4839_v21 = vpack.c.b16 %v4822_v24, %v4821_v53  ;;  %v5081_v61 = vunpack.c.l.b16 %v5029_v46 }
 0x291   : > { %v5343_v54 = vrot.slane %v5342_v51, 4  ;;  %v4657_v8 = vrot.slane %v4656_v32, 4  ;;  %v4667_v22 = vrot.slane %v4666_v13, 4  ;;  %v4671_v29 = vrot.slane %v4669_v0, 5  ;;  %v4556_v32 = vld [vmem:[#allocation2 + $0x3c] sm:$0xf] }
 0x292   : > { %v4511_v12 = vpop.f32.mrf.mxu1  ;;  %v5499_v30 = vunpack.c.l.b16 %v5338_v10  ;;  %v5704_v44 = vrot.slane %v12044_v26, 5  ;;  %v5773_v63 = vpack.c.b16 %v5756_v58, %v5755_v18  ;;  %v5035_v53 = vrot.slane %v4557_v62, 5  ;;  %v5232_v18 = vld [vmem:[#allocation2 + $0x48] sm:$0xf] }
 0x293   : > { %v12080_v38 = vadd.f32 %v4511_v12, %v12022_v6  ;;  %v12083_v60 = vpop.f32.mrf.mxu0  ;;  %v5082_v6 = vunpack.c.l.b16 %v5032_v20  ;;  %v5348_v50 = vsel %vm11340_vm14, %v5343_v54, %v5347_v37  ;;  %v12097_v20 = vld [vmem:[#allocation2 + $0x44] sm:$0x1]  ;;  %v4662_v0 = vsel %vm11340_vm14, %v4657_v8, %v12057_v23 }
 0x294   : > { %v3095_v40 = vpop.f32.mrf.mxu2  ;;  %v5500_v39 = vunpack.c.l.b16 %v5348_v50  ;;  %v4672_v26 = vsel %vm11340_vm14, %v4667_v22, %v4671_v29  ;;  %v10146_v13 = vrot.slane %v5641_v7, 9  ;;  %v5706_v51 = vrot.slane %v5704_v44, 4  ;;  %v12114_v22 = vld [vmem:[#allocation2 + $0x4c] sm:$0xf] }
 0x295   : > { %v3135_v59 = vadd.f32 %v3095_v40, %v11622_v1  ;;  %v4966_v1 = vld [vmem:[#allocation2 + $0x3c] sm:$0xe]  ;;  %v5098_v46 = vpack.c.b16 %v5082_v6, %v5081_v61  ;;  %v5707_v37 = vrot.slane %v12059_v15, 5  ;;  %v5038_v54 = vrot.slane %v12097_v20, 5 }
 0x296   : > { %v5516_v27 = vpack.c.b16 %v5500_v39, %v5499_v30  ;;  %v10105_v40 = vrot.slane %v4966_v1, 9  ;;  %v4677_v23 = vshll.u32 %v4556_v32, 16  ;;  %v4683_v61 = vshll.u32 %v4557_v62, 16 }
 0x297   : > { %v12091_v33 = vadd.f32 %v12036_v55, %v3135_v59  ;;  %v4674_v59 = vshrl.u32 %v4556_v32, 16  ;;  %v4687_v6 = vshrl.u32 %v4557_v62, 16  ;;  %v4823_v8 = vunpack.c.l.b16 %v4662_v0  ;;  %v12132_v32 = vld [vmem:[#allocation2 + $0x50] sm:$0x1] }
 0x298   : > { %v12095_v12 = vpop.f32.mrf.mxu3  ;;  %v4824_v15 = vunpack.c.l.b16 %v4672_v26  ;;  %v5350_v29 = vshrl.u32 %v5232_v18, 16  ;;  %v5705_v30 = vsel %vm11491_vm7, %v10146_v13, %v5704_v44  ;;  %v5036_v62 = vsel %vm11491_vm7, %v10105_v40, %v5035_v53 }
 0x299   : > { %10091 = vmatmul.msk.bf16.gmra.mxu2 %vm2119_vm11, %v4839_v21  ;;  %v4676_v7 = vrot.slane %v4674_v59, 4  ;;  %v5353_v44 = vshll.u32 %v5232_v18, 16  ;;  %v5359_v0 = vshll.u32 %v12114_v22, 16  ;;  %v5083_v59 = vunpack.c.l.b16 %v5036_v62 }
 0x29a   : > { %v4514_v24 = vpop.f32.mrf.mxu1  ;;  %v5352_v13 = vrot.slane %v5350_v29, 4  ;;  %v5369_v18 = vshll.u32 %v12132_v32, 16 }
 0x29b   : > { %v12100_v55 = vadd.f32 %v4514_v24, %v12053_v3  ;;  %v12109_v10 = vpop.f32.mrf.mxu0  ;;  %v5037_v3 = vrot.slane %v5035_v53, 4  ;;  %v4840_v53 = vpack.c.b16 %v4824_v15, %v4823_v8  ;;  %v5355_v40 = vrot.slane %v5353_v44, 5 }
 0x29c   : > { %v3098_v58 = vpop.f32.mrf.mxu2  ;;  %v4693_v8 = vshll.u32 %v12097_v20, 16 }
 0x29d   : > { %10159 = vmatmul.msk.bf16.gmra.mxu1 %vm2119_vm11, %v5773_v63  ;;  %v3136_v21 = vadd.f32 %v3098_v58, %v11637_v57  ;;  %10118 = vmatmul.msk.bf16.gmra.mxu3 %vm2119_vm11, %v5098_v46  ;;  %v5708_v57 = vsel %vm11491_vm7, %v5706_v51, %v5707_v37  ;;  %v5039_v39 = vsel %vm11491_vm7, %v5037_v3, %v5038_v54  ;;  %v4679_v63 = vrot.slane %v4677_v23, 5 }
 0x29e   : > { %10134 = vmatmul.msk.bf16.gmra.mxu0 %vm2119_vm11, %v5516_v27  ;;  %v4689_v46 = vrot.slane %v4687_v6, 4  ;;  %v5363_v27 = vshrl.u32 %v12114_v22, 16  ;;  %v5757_v51 = vunpack.c.l.b16 %v5705_v30  ;;  %v5758_v37 = vunpack.c.l.b16 %v5708_v57 }
 0x29f   : > { %v12117_v50 = vadd.f32 %v12072_v36, %v3136_v21  ;;  %v12130_v36 = vrot.slane %v4683_v61, 5  ;;  %v5361_v58 = vrot.slane %v5359_v0, 5  ;;  %v5084_v23 = vunpack.c.l.b16 %v5039_v39 }
 0x2a0   : > { %v12128_v24 = vpop.f32.mrf.mxu3  ;;  %v5365_v21 = vrot.slane %v5363_v27, 4  ;;  %v5356_v15 = vor.u32 %v5355_v40, %v5352_v13  ;;  %v5371_v30 = vrot.slane %v5369_v18, 5  ;;  %v5774_v44 = vpack.c.b16 %v5758_v37, %v5757_v51  ;;  %v4560_v27 = vld [vmem:[#allocation2 + $0x4c] sm:$0xf] }
 0x2a1   : > { %v4690_v6 = vor.u32 %v4689_v46, %v12130_v36  ;;  %v5711_v0 = vrot.slane %v12114_v22, 5  ;;  %v4695_v46 = vrot.slane %v4693_v8, 5 }
 0x2a2   : > { %v4516_v1 = vpop.f32.mrf.mxu1  ;;  %v5366_v29 = vor.u32 %v5365_v21, %v5361_v58  ;;  %v5357_v62 = vrot.slane %v5356_v15, 4  ;;  %v4559_v21 = vld [vmem:[#allocation2 + $0x48] sm:$0xf] }
 0x2a3   : > { %v12136_v26 = vadd.f32 %v4516_v1, %v12083_v60  ;;  %v12139_v54 = vpop.f32.mrf.mxu0  ;;  %v4680_v60 = vor.u32 %v4679_v63, %v4676_v7  ;;  %v5642_v1 = vld [vmem:[#allocation2 + $0x48] sm:$0xe]  ;;  %v5099_v7 = vpack.c.b16 %v5084_v23, %v5083_v59  ;;  %v4691_v63 = vrot.slane %v4690_v6, 4 }
 0x2a4   : > { %v3100_v3 = vpop.f32.mrf.mxu2  ;;  %v5367_v39 = vrot.slane %v5366_v29, 4  ;;  %v10147_v22 = vrot.slane %v5642_v1, 9  ;;  %v5713_v23 = vrot.slane %v5711_v0, 4  ;;  %v4698_v29 = vshrl.u32 %v4559_v21, 16 }
 0x2a5   : > { %14088 = vst [vmem:[#allocation14_spill] sm:$0xff] %v12136_v26  ;;  %v3137_v61 = vadd.f32 %v3100_v3, %v11656_v49  ;;  %v4681_v20 = vrot.slane %v4680_v60, 4  ;;  %v4967_v3 = vld [vmem:[#allocation2 + $0x48] sm:$0xe]  ;;  %v4696_v60 = vsel %vm11340_vm14, %v4691_v63, %v4695_v46 }
 0x2a6   : > { %v5372_v51 = vsel %vm11340_vm14, %v5367_v39, %v5371_v30  ;;  %v5712_v8 = vsel %vm11491_vm7, %v10147_v22, %v5711_v0  ;;  %v10106_v15 = vrot.slane %v4967_v3, 9  ;;  %v4701_v30 = vshll.u32 %v4559_v21, 16 }
 0x2a7   : > { %v12146_v57 = vadd.f32 %v12095_v12, %v3137_v61  ;;  %v5362_v12 = vsel %vm11340_vm14, %v5357_v62, %v5361_v58  ;;  %v5502_v40 = vunpack.c.l.b16 %v5372_v51  ;;  %v4686_v61 = vsel %vm11340_vm14, %v4681_v20, %v12130_v36 }
 0x2a8   : > { %v12150_v49 = vpop.f32.mrf.mxu3  ;;  %v5501_v37 = vunpack.c.l.b16 %v5362_v12  ;;  %v4703_v62 = vrot.slane %v4701_v30, 5  ;;  %v4707_v39 = vshll.u32 %v4560_v27, 16  ;;  %v4825_v0 = vunpack.c.l.b16 %v4686_v61  ;;  %v5235_v12 = vld [vmem:[#allocation2 + $0x54] sm:$0xf]  ;;  %v5237_v30 = vld [vmem:[#allocation2 + $0x5c] sm:$0x1] }
 0x2a9   : > { %10092 = vmatmul.msk.bf16.gmra.mxu2 %vm2119_vm11, %v4840_v53  ;;  %v5042_v53 = vrot.slane %v4560_v27, 5  ;;  %v4826_v63 = vunpack.c.l.b16 %v4696_v60  ;;  %v5759_v46 = vunpack.c.l.b16 %v5712_v8  ;;  %v5374_v60 = vshrl.u32 %v5235_v12, 16 }
 0x2aa   : > { %v4519_v26 = vpop.f32.mrf.mxu1  ;;  %v5517_v6 = vpack.c.b16 %v5502_v40, %v5501_v37  ;;  %v4709_v22 = vrot.slane %v4707_v39, 5  ;;  %v4711_v37 = vshrl.u32 %v4560_v27, 16  ;;  %v12185_v40 = vld [vmem:[#allocation2 + $0x58] sm:$0xf] }
 0x2ab   : > { %v12153_v13 = vadd.f32 %v4519_v26, %v12109_v10  ;;  %v12160_v59 = vpop.f32.mrf.mxu0  ;;  %v5714_v10 = vrot.slane %v12132_v32, 5  ;;  %v4561_v26 = vld [vmem:[#allocation2 + $0x50] sm:$0x1]  ;;  %v5043_v51 = vsel %vm11491_vm7, %v10106_v15, %v5042_v53  ;;  %v4841_v8 = vpack.c.b16 %v4826_v63, %v4825_v0  ;;  %v5643_v0 = vld [vmem:[#allocation2 + $0x54] sm:$0xe] }
 0x2ac   : > { %v3103_v18 = vpop.f32.mrf.mxu2  ;;  %v5045_v1 = vrot.slane %v4561_v26, 5  ;;  %v4713_v61 = vrot.slane %v4711_v37, 4  ;;  %v5383_v27 = vshll.u32 %v12185_v40, 16  ;;  %v5393_v37 = vshll.u32 %v5237_v30, 16 }
 0x2ad   : > { %10160 = vmatmul.msk.bf16.gmra.mxu1 %vm2119_vm11, %v5774_v44  ;;  %v3138_v58 = vadd.f32 %v3103_v18, %v11676_v41  ;;  %10119 = vmatmul.msk.bf16.gmra.mxu3 %vm2119_vm11, %v5099_v7  ;;  %v5044_v41 = vrot.slane %v5042_v53, 4  ;;  %v5715_v36 = vsel %vm11491_vm7, %v5713_v23, %v5714_v10  ;;  %v4700_v44 = vrot.slane %v4698_v29, 4 }
 0x2ae   : > { %10135 = vmatmul.msk.bf16.gmra.mxu0 %vm2119_vm11, %v5517_v6  ;;  %v5760_v3 = vunpack.c.l.b16 %v5715_v36  ;;  %v4717_v23 = vshll.u32 %v4561_v26, 16  ;;  %v5085_v53 = vunpack.c.l.b16 %v5043_v51  ;;  %v4714_v29 = vor.u32 %v4713_v61, %v4709_v22 }
 0x2af   : > { %v12173_v32 = vadd.f32 %v12128_v24, %v3138_v58  ;;  %v5046_v21 = vsel %vm11491_vm7, %v5044_v41, %v5045_v1  ;;  %v4704_v18 = vor.u32 %v4703_v62, %v4700_v44  ;;  %v5376_v36 = vrot.slane %v5374_v60, 4 }
 0x2b0   : > { %v12178_v20 = vpop.f32.mrf.mxu3  ;;  %v5086_v15 = vunpack.c.l.b16 %v5046_v21  ;;  %v5775_v26 = vpack.c.b16 %v5760_v3, %v5759_v46  ;;  %v4719_v44 = vrot.slane %v4717_v23, 5  ;;  %v4715_v62 = vrot.slane %v4714_v29, 4  ;;  %v4968_v23 = vld [vmem:[#allocation2 + $0x54] sm:$0xe]  ;;  %v4564_v29 = vld [vmem:[#allocation2 + $0x5c] sm:$0x1] }
 0x2b1   : > { %v4705_v1 = vrot.slane %v4704_v18, 4  ;;  %v10148_v18 = vrot.slane %v5643_v0, 9 }
 0x2b2   : > { %v4521_v7 = vpop.f32.mrf.mxu1  ;;  %v4720_v3 = vsel %vm11340_vm14, %v4715_v62, %v4719_v44 }
 0x2b3   : > { %v12181_v24 = vadd.f32 %v4521_v7, %v12139_v54  ;;  %v12189_v58 = vpop.f32.mrf.mxu0  ;;  %v5377_v54 = vshll.u32 %v5235_v12, 16  ;;  %v5385_v12 = vrot.slane %v5383_v27, 5  ;;  %v4710_v46 = vsel %vm11340_vm14, %v4705_v1, %v4709_v22 }
 0x2b4   : > { %v3105_v10 = vpop.f32.mrf.mxu2  ;;  %14090 = vst [vmem:[#allocation16_spill] sm:$0xff] %v12189_v58  ;;  %v5721_v22 = vrot.slane %v5237_v30, 5  ;;  %v10107_v1 = vrot.slane %v4968_v23, 9  ;;  %v4827_v44 = vunpack.c.l.b16 %v4710_v46  ;;  %v4828_v62 = vunpack.c.l.b16 %v4720_v3 }
 0x2b5   : > { %14089 = vst [vmem:[#allocation15_spill] sm:$0xff] %v12181_v24  ;;  %v3139_v6 = vadd.f32 %v3105_v10, %v11690_v14  ;;  %v5379_v39 = vrot.slane %v5377_v54, 5  ;;  %v5387_v14 = vshrl.u32 %v12185_v40, 16  ;;  %v5100_v10 = vpack.c.b16 %v5086_v15, %v5085_v53  ;;  %v4563_v15 = vld [vmem:[#allocation2 + $0x58] sm:$0xf] }
 0x2b6   : > { %v5718_v53 = vrot.slane %v12185_v40, 5  ;;  %v5049_v30 = vrot.slane %v4563_v15, 5  ;;  %v4842_v46 = vpack.c.b16 %v4828_v62, %v4827_v44  ;;  %v4735_v62 = vshrl.u32 %v4563_v15, 16 }
 0x2b7   : > { %v12194_v41 = vadd.f32 %v12150_v49, %v3139_v6  ;;  %v5380_v7 = vor.u32 %v5379_v39, %v5376_v36  ;;  %v5389_v61 = vrot.slane %v5387_v14, 4  ;;  %v5052_v14 = vrot.slane %v4564_v29, 5 }
 0x2b8   : > { %v3528_v51 = vpop.f32.mrf.mxu3  ;;  %v5720_v39 = vrot.slane %v5718_v53, 4 }
 0x2b9   : > { %10093 = vmatmul.msk.bf16.gmra.mxu2 %vm2119_vm11, %v4841_v8  ;;  %v5381_v49 = vrot.slane %v5380_v7, 4  ;;  %v5390_v6 = vor.u32 %v5389_v61, %v5385_v12  ;;  %v5395_v8 = vrot.slane %v5393_v37, 5 }
 0x2ba   : > { %v4524_v63 = vpop.f32.mrf.mxu1 }
 0x2bb   : > { %v12199_v21 = vadd.f32 %v4524_v63, %v12160_v59  ;;  %v12206_v54 = vpop.f32.mrf.mxu0  ;;  %v5386_v59 = vsel %vm11340_vm14, %v5381_v49, %v5385_v12  ;;  %v5391_v36 = vrot.slane %v5390_v6, 4  ;;  %v4562_v12 = vld [vmem:[#allocation2 + $0x54] sm:$0xf]  ;;  %v5051_v49 = vrot.slane %v5049_v30, 4 }
 0x2bc   : > { %v3108_v60 = vpop.f32.mrf.mxu2  ;;  %v5503_v7 = vunpack.c.l.b16 %v5386_v59  ;;  %v4722_v61 = vshrl.u32 %v4562_v12, 16 }
 0x2bd   : > { %14091 = vst [vmem:[#allocation17_spill] sm:$0xff] %v12199_v21  ;;  %10161 = vmatmul.msk.bf16.gmra.mxu1 %vm2119_vm11, %v5775_v26  ;;  %v3140_v27 = vadd.f32 %v3108_v60, %v11712_v9  ;;  %10120 = vmatmul.msk.bf16.gmra.mxu3 %vm2119_vm11, %v5100_v10  ;;  %v5396_v40 = vsel %vm11340_vm14, %v5391_v36, %v5395_v8  ;;  %v5238_v60 = vld [vmem:[#allocation2 + $0x60] sm:$0xf] }
 0x2be   : > { %v5719_v9 = vsel %vm11491_vm7, %v10148_v18, %v5718_v53  ;;  %v5504_v37 = vunpack.c.l.b16 %v5396_v40  ;;  %v5050_v10 = vsel %vm11491_vm7, %v10107_v1, %v5049_v30  ;;  %v5053_v8 = vsel %vm11491_vm7, %v5051_v49, %v5052_v14  ;;  %v5239_v14 = vld [vmem:[#allocation2 + $0x64] sm:$0xf] }
 0x2bf   : > { %v12214_v26 = vadd.f32 %v12178_v20, %v3140_v27  ;;  %v5722_v20 = vsel %vm11491_vm7, %v5720_v39, %v5721_v22  ;;  %v5761_v23 = vunpack.c.l.b16 %v5719_v9  ;;  %v4724_v53 = vrot.slane %v4722_v61, 4  ;;  %v12237_v9 = vld [vmem:[%s14045_s9] ss:$0 sm:$0xff]  ;;  %v5240_v61 = vld [vmem:[#allocation2 + $0x68] sm:$0x1] }
 0x2c0   : > { %v12222_v63 = vpop.f32.mrf.mxu3  ;;  %v5518_v3 = vpack.c.b16 %v5504_v37, %v5503_v7  ;;  %v5762_v59 = vunpack.c.l.b16 %v5722_v20  ;;  %v4725_v27 = vshll.u32 %v4562_v12, 16  ;;  %v5087_v36 = vunpack.c.l.b16 %v5050_v10 }
 0x2c1   : > { %v5088_v39 = vunpack.c.l.b16 %v5053_v8  ;;  %v4731_v1 = vshll.u32 %v4563_v15, 16  ;;  %v4741_v7 = vshll.u32 %v4564_v29, 16  ;;  %v5398_v40 = vshrl.u32 %v5238_v60, 16 }
 0x2c2   : > { %v12220_v0 = vpop.f32.mrf.mxu1  ;;  %10136 = vmatmul.msk.bf16.gmra.mxu0 %vm2119_vm11, %v5518_v3  ;;  %v4727_v44 = vrot.slane %v4725_v27, 5  ;;  %v5776_v12 = vpack.c.b16 %v5762_v59, %v5761_v23  ;;  %v4737_v20 = vrot.slane %v4735_v62, 4  ;;  %v3570_v23 = vadd.f32 %v12237_v9, %v11882_v56 }
 0x2c3   : > { %14092 = vst [vmem:[#allocation18_spill] sm:$0xff] %v12220_v0  ;;  %v12228_v6 = vpop.f32.mrf.mxu0  ;;  %v5101_v15 = vpack.c.b16 %v5088_v39, %v5087_v36  ;;  %v4743_v29 = vrot.slane %v4741_v7, 5  ;;  %v5400_v3 = vrot.slane %v5398_v40, 4 }
 0x2c4   : > { %v3110_v18 = vpop.f32.mrf.mxu2  ;;  %14093 = vst [vmem:[#allocation19_spill] sm:$0xff] %v12228_v6  ;;  %v4728_v37 = vor.u32 %v4727_v44, %v4724_v53  ;;  %v5411_v53 = vshrl.u32 %v5239_v14, 16 }
 0x2c5   : > { %v3141_v22 = vadd.f32 %v3110_v18, %v11728_v17  ;;  %v4733_v17 = vrot.slane %v4731_v1, 5  ;;  %v5401_v18 = vshll.u32 %v5238_v60, 16  ;;  %v5644_v1 = vld [vmem:[#allocation2 + $0x60] sm:$0xe]  ;;  %v5417_v60 = vshll.u32 %v5240_v61, 16 }
 0x2c6   : > { %v5413_v40 = vrot.slane %v5411_v53, 4  ;;  %v4566_v53 = vld [vmem:[#allocation2 + $0x64] sm:$0xf] }
 0x2c7   : > { %v12239_v30 = vadd.f32 %v3528_v51, %v3141_v22  ;;  %v4729_v51 = vrot.slane %v4728_v37, 4  ;;  %v4738_v27 = vor.u32 %v4737_v20, %v4733_v17  ;;  %v5407_v22 = vshll.u32 %v5239_v14, 16 }
 0x2c8   : > { %v12242_v10 = vpop.f32.mrf.mxu3  ;;  %v5403_v59 = vrot.slane %v5401_v18, 5  ;;  %v10149_v37 = vrot.slane %v5644_v1, 9  ;;  %v3590_v20 = vmax.f32 %v3570_v23, 0.0  ;;  %v4969_v18 = vld [vmem:[#allocation2 + $0x60] sm:$0xe] }
 0x2c9   : > { %10094 = vmatmul.msk.bf16.gmra.mxu2 %vm2119_vm11, %v4842_v46  ;;  %v4739_v39 = vrot.slane %v4738_v27, 4  ;;  %v5409_v44 = vrot.slane %v5407_v22, 5  ;;  %v4734_v7 = vsel %vm11340_vm14, %v4729_v51, %v4733_v17  ;;  %v5419_v27 = vrot.slane %v5417_v60, 5  ;;  %v4567_v23 = vld [vmem:[#allocation2 + $0x68] sm:$0x1] }
 0x2ca   : > { %v4529_v49 = vpop.f32.mrf.mxu1  ;;  %v5404_v62 = vor.u32 %v5403_v59, %v5400_v3  ;;  %v4829_v51 = vunpack.c.l.b16 %v4734_v7  ;;  %v5728_v59 = vrot.slane %v5240_v61, 5 }
 0x2cb   : > { %v12245_v8 = vadd.f32 %v4529_v49, %v12206_v54  ;;  %v12250_v36 = vpop.f32.mrf.mxu0  ;;  %v4744_v56 = vsel %vm11340_vm14, %v4739_v39, %v4743_v29  ;;  %v5414_v3 = vor.u32 %v5413_v40, %v5409_v44  ;;  %v12271_v39 = vpack.c.bf16 %v3590_v20, %v3590_v20 }
 0x2cc   : > { %v3113_v46 = vpop.f32.mrf.mxu2  ;;  %v4830_v29 = vunpack.c.l.b16 %v4744_v56 }
 0x2cd   : > { %14094 = vst [vmem:[#allocation20_spill] sm:$0xff] %v12245_v8  ;;  %10162 = vmatmul.msk.bf16.gmra.mxu1 %vm2119_vm11, %v5776_v12  ;;  %v3142_v54 = vadd.f32 %v3113_v46, %v11748_v34  ;;  %10121 = vmatmul.msk.bf16.gmra.mxu3 %vm2119_vm11, %v5101_v15  ;;  %v3571_v12 = vadd.f32 %v12237_v9, %v11910_v48  ;;  %v5405_v34 = vrot.slane %v5404_v62, 4  ;;  %v5725_v15 = vrot.slane %v5239_v14, 5  ;;  %v4565_v62 = vld [vmem:[#allocation2 + $0x60] sm:$0xf] }
 0x2ce   : > { %v5415_v1 = vrot.slane %v5414_v3, 4  ;;  %v10108_v46 = vrot.slane %v4969_v18, 9  ;;  %v4843_v3 = vpack.c.b16 %v4830_v29, %v4829_v51 }
 0x2cf   : > { %v12261_v49 = vadd.f32 %v12222_v63, %v3142_v54  ;;  %v5410_v48 = vsel %vm11340_vm14, %v5405_v34, %v5409_v44  ;;  %v5726_v63 = vsel %vm11491_vm7, %v10149_v37, %v5725_v15  ;;  %v3591_v14 = vmax.f32 %v3571_v12, 0.0 }
 0x2d0   : > { %v12265_v17 = vpop.f32.mrf.mxu3  ;;  %v5505_v60 = vunpack.c.l.b16 %v5410_v48  ;;  %v5727_v54 = vrot.slane %v5725_v15, 4  ;;  %v5420_v61 = vsel %vm11340_vm14, %v5415_v1, %v5419_v27  ;;  %v5763_v7 = vunpack.c.l.b16 %v5726_v63 }
 0x2d1   : > { %14095 = vst [vmem:[#allocation21_spill] sm:$0xff] %v12261_v49  ;;  %v5059_v44 = vrot.slane %v4567_v23, 5  ;;  %v5506_v37 = vunpack.c.l.b16 %v5420_v61  ;;  %v4746_v48 = vshrl.u32 %v4565_v62, 16  ;;  %v3631_v27 = vshrl.u32 %v12271_v39, 16 }
 0x2d2   : > { %v12263_v22 = vpop.f32.mrf.mxu1  ;;  %v5729_v20 = vsel %vm11491_vm7, %v5727_v54, %v5728_v59  ;;  %v3572_v1 = vadd.f32 %v12237_v9, %v11948_v11  ;;  %v12288_v51 = vpack.c.bf16 %v3591_v14, %v3591_v14  ;;  %v4749_v61 = vshll.u32 %v4565_v62, 16 }
 0x2d3   : > { %14096 = vst [vmem:[#allocation22_spill] sm:$0xff] %v12263_v22  ;;  %v12275_v56 = vpop.f32.mrf.mxu0  ;;  %v5056_v22 = vrot.slane %v4566_v53, 5  ;;  %v5764_v12 = vunpack.c.l.b16 %v5729_v20 }
 0x2d4   : > { %v3115_v40 = vpop.f32.mrf.mxu2 }
 0x2d5   : > { %v3143_v34 = vadd.f32 %v3115_v40, %v11768_v28  ;;  %v5057_v18 = vsel %vm11491_vm7, %v10108_v46, %v5056_v22  ;;  %v5058_v15 = vrot.slane %v5056_v22, 4  ;;  %v5519_v28 = vpack.c.b16 %v5506_v37, %v5505_v60  ;;  %v5241_v60 = vld [vmem:[#allocation2 + $0x6c] sm:$0xf] }
 0x2d6   : > { %v5777_v29 = vpack.c.b16 %v5764_v12, %v5763_v7  ;;  %v5089_v54 = vunpack.c.l.b16 %v5057_v18  ;;  %v3634_v46 = vshll.u32 %v12271_v39, 16  ;;  %v4755_v7 = vshll.u32 %v4566_v53, 16 }
 0x2d7   : > { %v12286_v63 = vadd.f32 %v12242_v10, %v3143_v34  ;;  %v5060_v59 = vsel %vm11491_vm7, %v5058_v15, %v5059_v44  ;;  %10137 = vmatmul.msk.bf16.gmra.mxu0 %vm2119_vm11, %v5519_v28  ;;  %v4748_v10 = vrot.slane %v4746_v48, 4  ;;  %v4759_v34 = vshrl.u32 %v4566_v53, 16 }
 0x2d8   : > { %v12295_v40 = vpop.f32.mrf.mxu3  ;;  %v5090_v11 = vunpack.c.l.b16 %v5060_v59  ;;  %v4765_v44 = vshll.u32 %v4567_v23, 16  ;;  %v12300_v37 = vrot.slane %v3631_v27, 7  ;;  %v3592_v39 = vmax.f32 %v3572_v1, 0.0 }
 0x2d9   : > { %14097 = vst [vmem:[#allocation23_spill] sm:$0xff] %v12286_v63  ;;  %10095 = vmatmul.msk.bf16.gmra.mxu2 %vm2119_vm11, %v4843_v3  ;;  %v4751_v12 = vrot.slane %v4749_v61, 5  ;;  %v5242_v3 = vld [vmem:[#allocation2 + $0x70] sm:$0xf]  ;;  %v3639_v18 = vshrl.u32 %v12288_v51, 16  ;;  %v4757_v62 = vrot.slane %v4755_v7, 5 }
 0x2da   : > { %v4534_v22 = vpop.f32.mrf.mxu1  ;;  %v5102_v20 = vpack.c.b16 %v5090_v11, %v5089_v54  ;;  %v4761_v28 = vrot.slane %v4759_v34, 4  ;;  %v4767_v23 = vrot.slane %v4765_v44, 5  ;;  %v5425_v27 = vshll.u32 %v5241_v60, 16  ;;  %v5243_v54 = vld [vmem:[#allocation2 + $0x74] sm:$0x1] }
 0x2db   : > { %v12298_v14 = vadd.f32 %v4534_v22, %v12250_v36  ;;  %v12304_v48 = vpop.f32.mrf.mxu0  ;;  %v5422_v36 = vshrl.u32 %v5241_v60, 16  ;;  %v4752_v53 = vor.u32 %v4751_v12, %v4748_v10  ;;  %v5431_v11 = vshll.u32 %v5242_v3, 16 }
 0x2dc   : > { %v3118_v15 = vpop.f32.mrf.mxu2  ;;  %v4762_v1 = vor.u32 %v4761_v28, %v4757_v62  ;;  %v5435_v61 = vshrl.u32 %v5242_v3, 16  ;;  %v12314_v60 = vrot.slane %v3639_v18, 7  ;;  %v5441_v28 = vshll.u32 %v5243_v54, 16 }
 0x2dd   : > { %14098 = vst [vmem:[#allocation24_spill] sm:$0xff] %v12298_v14  ;;  %10163 = vmatmul.msk.bf16.gmra.mxu1 %vm2119_vm11, %v5777_v29  ;;  %v3144_v59 = vadd.f32 %v3118_v15, %v11793_v19  ;;  %10122 = vmatmul.msk.bf16.gmra.mxu3 %vm2119_vm11, %v5102_v20  ;;  %v5424_v22 = vrot.slane %v5422_v36, 4  ;;  %v12309_v14 = vor.u32 %v3634_v46, %v12300_v37  ;;  %v4753_v34 = vrot.slane %v4752_v53, 4 }
 0x2de   : > { %v3612_v29 = vpack.c.bf16 %v3592_v39, %v3592_v39  ;;  %v4763_v6 = vrot.slane %v4762_v1, 4  ;;  %v5427_v19 = vrot.slane %v5425_v27, 5  ;;  %v5433_v10 = vrot.slane %v5431_v11, 5  ;;  %v5645_v39 = vld [vmem:[#allocation2 + $0x6c] sm:$0xe] }
 0x2df   : > { %v12312_v7 = vadd.f32 %v12265_v17, %v3144_v59  ;;  %v5437_v44 = vrot.slane %v5435_v61, 4  ;;  %v4758_v46 = vsel %vm11340_vm14, %v4753_v34, %v4757_v62  ;;  %v3573_v27 = vadd.f32 %v12237_v9, %v11979_v52 }
 0x2e0   : > { %v12317_v15 = vpop.f32.mrf.mxu3  ;;  %v4768_v36 = vsel %vm11340_vm14, %v4763_v6, %v4767_v23  ;;  %v4831_v59 = vunpack.c.l.b16 %v4758_v46  ;;  %v5428_v53 = vor.u32 %v5427_v19, %v5424_v22  ;;  %v3648_v18 = vshrl.u32 %v3612_v29, 16  ;;  %v4970_v46 = vld [vmem:[#allocation2 + $0x6c] sm:$0xe] }
 0x2e1   : > { %14099 = vst [vmem:[#allocation25_spill] sm:$0xff] %v12312_v7  ;;  %v4832_v1 = vunpack.c.l.b16 %v4768_v36  ;;  %v5438_v11 = vor.u32 %v5437_v44, %v5433_v10  ;;  %v5443_v8 = vrot.slane %v5441_v28, 5  ;;  %v10150_v62 = vrot.slane %v5645_v39, 9 }
 0x2e2   : > { %v4536_v12 = vpop.f32.mrf.mxu1  ;;  %v5429_v20 = vrot.slane %v5428_v53, 4  ;;  %v5732_v34 = vrot.slane %v5242_v3, 5  ;;  %v5735_v44 = vrot.slane %v5243_v54, 5  ;;  %v12336_v28 = vrot.slane %v3648_v18, 7  ;;  %v4570_v53 = vld [vmem:[#allocation2 + $0x74] sm:$0x1] }
 0x2e3   : > { %v12322_v17 = vadd.f32 %v4536_v12, %v12275_v56  ;;  %v12328_v0 = vpop.f32.mrf.mxu0  ;;  %v14101_v12 = vld [vmem:[#allocation10_spill] sm:$0xff]  ;;  %v4844_v6 = vpack.c.b16 %v4832_v1, %v4831_v59  ;;  %v5439_v23 = vrot.slane %v5438_v11, 4  ;;  %v3593_v3 = vmax.f32 %v3573_v27, 0.0  ;;  %v4569_v59 = vld [vmem:[#allocation2 + $0x70] sm:$0xf] }
 0x2e4   : > { %v3120_v61 = vpop.f32.mrf.mxu2  ;;  %v5434_v22 = vsel %vm11340_vm14, %v5429_v20, %v5433_v10  ;;  %v5733_v52 = vsel %vm11491_vm7, %v10150_v62, %v5732_v34  ;;  %v5734_v19 = vrot.slane %v5732_v34, 4  ;;  %v3651_v54 = vshll.u32 %v3612_v29, 16 }
 0x2e5   : > { %14100 = vst [vmem:[#allocation26_spill] sm:$0xff] %v12322_v17  ;;  %v3145_v17 = vadd.f32 %v3120_v61, %v14101_v12  ;;  %v5444_v36 = vsel %vm11340_vm14, %v5439_v23, %v5443_v8  ;;  %v5507_v1 = vunpack.c.l.b16 %v5434_v22  ;;  %v5765_v20 = vunpack.c.l.b16 %v5733_v52  ;;  %v4568_v61 = vld [vmem:[#allocation2 + $0x6c] sm:$0xf] }
 0x2e6   : > { %v5508_v11 = vunpack.c.l.b16 %v5444_v36  ;;  %v5736_v10 = vsel %vm11491_vm7, %v5734_v19, %v5735_v44  ;;  %v3574_v18 = vadd.f32 %v12237_v9, %v12002_v25  ;;  %v10109_v8 = vrot.slane %v4970_v46, 9 }
 0x2e7   : > { %v12339_v39 = vadd.f32 %v12295_v40, %v3145_v17  ;;  %v5766_v40 = vunpack.c.l.b16 %v5736_v10  ;;  %v5063_v12 = vrot.slane %v4569_v59, 5  ;;  %v5066_v23 = vrot.slane %v4570_v53, 5 }
 0x2e8   : > { %v12348_v17 = vpop.f32.mrf.mxu3  ;;  %v5520_v34 = vpack.c.b16 %v5508_v11, %v5507_v1  ;;  %v12354_v22 = vor.u32 %v3651_v54, %v12336_v28  ;;  %v12356_v29 = vpack.c.bf16 %v3593_v3, %v3593_v3  ;;  %v4770_v25 = vshrl.u32 %v4568_v61, 16 }
 0x2e9   : > { %14102 = vst [vmem:[#allocation10_spill] sm:$0xff] %v12339_v39  ;;  %10096 = vmatmul.msk.bf16.gmra.mxu2 %vm2119_vm11, %v4844_v6  ;;  %v5778_v52 = vpack.c.b16 %v5766_v40, %v5765_v20  ;;  %v5064_v19 = vsel %vm11491_vm7, %v10109_v8, %v5063_v12  ;;  %v5065_v44 = vrot.slane %v5063_v12, 4  ;;  %v4779_v36 = vshll.u32 %v4569_v59, 16  ;;  %v5244_v20 = vld [vmem:[#allocation2 + $0x78] sm:$0xf] }
 0x2ea   : > { %v4539_v27 = vpop.f32.mrf.mxu1  ;;  %10138 = vmatmul.msk.bf16.gmra.mxu0 %vm2119_vm11, %v5520_v34  ;;  %v3594_v1 = vmax.f32 %v3574_v18, 0.0  ;;  %v5091_v3 = vunpack.c.l.b16 %v5064_v19  ;;  %v4772_v10 = vrot.slane %v4770_v25, 4  ;;  %v4783_v34 = vshrl.u32 %v4569_v59, 16  ;;  %v4572_v39 = vld [vmem:[#allocation2 + $0x7c] sm:$0xf] }
 0x2eb   : > { %v12351_v62 = vadd.f32 %v4539_v27, %v12304_v48  ;;  %v12361_v46 = vpop.f32.mrf.mxu0  ;;  %v4773_v48 = vshll.u32 %v4568_v61, 16  ;;  %v5067_v54 = vsel %vm11491_vm7, %v5065_v44, %v5066_v23  ;;  %v4781_v40 = vrot.slane %v4779_v36, 5 }
 0x2ec   : > { %v3123_v6 = vpop.f32.mrf.mxu2  ;;  %v3656_v8 = vshrl.u32 %v12356_v29, 16  ;;  %v3575_v61 = vadd.f32 %v12237_v9, %v12029_v47  ;;  %v5446_v25 = vshrl.u32 %v5244_v20, 16  ;;  %v12374_v56 = vpack.c.bf16 %v3594_v1, %v3594_v1 }
 0x2ed   : > { %14103 = vst [vmem:[#allocation27_spill] sm:$0xff] %v12351_v62  ;;  %v3146_v11 = vadd.f32 %v3123_v6, %v11841_v31  ;;  %10164 = vmatmul.msk.bf16.gmra.mxu1 %vm2119_vm11, %v5778_v52  ;;  %v4775_v27 = vrot.slane %v4773_v48, 5  ;;  %v5092_v31 = vunpack.c.l.b16 %v5067_v54  ;;  %v4785_v52 = vrot.slane %v4783_v34, 4  ;;  %v5245_v48 = vld [vmem:[#allocation2 + $0x7c] sm:$0xf] }
 0x2ee   : > { %v4789_v6 = vshll.u32 %v4570_v53, 16  ;;  %v5449_v36 = vshll.u32 %v5244_v20, 16  ;;  %v3595_v53 = vmax.f32 %v3575_v61, 0.0  ;;  %v5448_v1 = vrot.slane %v5446_v25, 4 }
 0x2ef   : > { %v12371_v18 = vadd.f32 %v12317_v15, %v3146_v11  ;;  %v4776_v12 = vor.u32 %v4775_v27, %v4772_v10  ;;  %v5103_v44 = vpack.c.b16 %v5092_v31, %v5091_v3  ;;  %v4786_v11 = vor.u32 %v4785_v52, %v4781_v40  ;;  %v5246_v27 = vld [vmem:[#allocation2 + $0x80] sm:$0x1] }
 0x2f0   : > { %v12376_v59 = vpop.f32.mrf.mxu3  ;;  %v4791_v54 = vrot.slane %v4789_v6, 5  ;;  %v12381_v10 = vrot.slane %v3656_v8, 7  ;;  %v5451_v34 = vrot.slane %v5449_v36, 5  ;;  %v5455_v20 = vshll.u32 %v5245_v48, 16  ;;  %v5646_v6 = vld [vmem:[#allocation2 + $0x78] sm:$0xe] }
 0x2f1   : > { %14104 = vst [vmem:[#allocation28_spill] sm:$0xff] %v12371_v18  ;;  %v4777_v15 = vrot.slane %v4776_v12, 4  ;;  %10123 = vmatmul.msk.bf16.gmra.mxu3 %vm2119_vm11, %v5103_v44  ;;  %v4787_v31 = vrot.slane %v4786_v11, 4  ;;  %v5459_v62 = vshrl.u32 %v5245_v48, 16  ;;  %v3665_v12 = vshrl.u32 %v12374_v56, 16 }
 0x2f2   : > { %v4541_v23 = vpop.f32.mrf.mxu1  ;;  %v5452_v61 = vor.u32 %v5451_v34, %v5448_v1  ;;  %v5465_v36 = vshll.u32 %v5246_v27, 16  ;;  %v4971_v18 = vld [vmem:[#allocation2 + $0x78] sm:$0xe]  ;;  %v10151_v34 = vrot.slane %v5646_v6, 9 }
 0x2f3   : > { %v12379_v47 = vadd.f32 %v4541_v23, %v12328_v0  ;;  %v4782_v3 = vsel %vm11340_vm14, %v4777_v15, %v4781_v40  ;;  %v12386_v0 = vpop.f32.mrf.mxu0  ;;  %v4792_v25 = vsel %vm11340_vm14, %v4787_v31, %v4791_v54  ;;  %v5457_v23 = vrot.slane %v5455_v20, 5 }
 0x2f4   : > { %v3125_v19 = vpop.f32.mrf.mxu2  ;;  %v4833_v52 = vunpack.c.l.b16 %v4782_v3  ;;  %v5461_v44 = vrot.slane %v5459_v62, 4  ;;  %v3576_v40 = vadd.f32 %v12237_v9, %v12064_v42  ;;  %v4834_v11 = vunpack.c.l.b16 %v4792_v25  ;;  %v4573_v25 = vld [vmem:[#allocation2 + $0x80] sm:$0x1] }
 0x2f5   : > { %14105 = vst [vmem:[#allocation29_spill] sm:$0xff] %v12379_v47  ;;  %v3147_v8 = vadd.f32 %v3125_v19, %v11861_v5  ;;  %v12392_v47 = vpack.c.bf16 %v3595_v53, %v3595_v53  ;;  %v5453_v5 = vrot.slane %v5452_v61, 4  ;;  %v5467_v1 = vrot.slane %v5465_v36, 5 }
 0x2f6   : > { %v5462_v19 = vor.u32 %v5461_v44, %v5457_v23  ;;  %v3668_v54 = vshll.u32 %v12374_v56, 16  ;;  %v4845_v62 = vpack.c.b16 %v4834_v11, %v4833_v52  ;;  %v5739_v53 = vrot.slane %v5245_v48, 5  ;;  %v4571_v52 = vld [vmem:[#allocation2 + $0x78] sm:$0xf] }
 0x2f7   : > { %v12397_v15 = vadd.f32 %v12348_v17, %v3147_v8  ;;  %v5458_v42 = vsel %vm11340_vm14, %v5453_v5, %v5457_v23  ;;  %v5742_v8 = vrot.slane %v5246_v27, 5  ;;  %v10110_v61 = vrot.slane %v4971_v18, 9 }
 0x2f8   : > { %v12401_v20 = vpop.f32.mrf.mxu3  ;;  %v5463_v17 = vrot.slane %v5462_v19, 4  ;;  %v12405_v44 = vrot.slane %v3665_v12, 7  ;;  %v3673_v6 = vshrl.u32 %v12392_v47, 16  ;;  %v5509_v56 = vunpack.c.l.b16 %v5458_v42 }
 0x2f9   : > { %14106 = vst [vmem:[#allocation30_spill] sm:$0xff] %v12397_v15  ;;  %10097 = vmatmul.msk.bf16.gmra.mxu2 %vm2119_vm11, %v4845_v62  ;;  %v5740_v48 = vsel %vm11491_vm7, %v10151_v34, %v5739_v53  ;;  %v3596_v36 = vmax.f32 %v3576_v40, 0.0  ;;  %v5741_v5 = vrot.slane %v5739_v53, 4  ;;  %v5070_v27 = vrot.slane %v4572_v39, 5 }
 0x2fa   : > { %v5826_v31 = vpop.f32.mrf.mxu1  ;;  %v5468_v11 = vsel %vm11340_vm14, %v5463_v17, %v5467_v1  ;;  %v5767_v3 = vunpack.c.l.b16 %v5740_v48  ;;  %v5073_v15 = vrot.slane %v4573_v25, 5  ;;  %v4794_v42 = vshrl.u32 %v4571_v52, 16 }
 0x2fb   : > { %v12413_v19 = vpop.f32.mrf.mxu0  ;;  %v5510_v18 = vunpack.c.l.b16 %v5468_v11  ;;  %v5743_v62 = vsel %vm11491_vm7, %v5741_v5, %v5742_v8  ;;  %v5071_v34 = vsel %vm11491_vm7, %v10110_v61, %v5070_v27  ;;  %v5072_v40 = vrot.slane %v5070_v27, 4 }
 0x2fc   : > { %v4892_v23 = vpop.f32.mrf.mxu2  ;;  %v12421_v1 = vor.u32 %v3668_v54, %v12405_v44  ;;  %v12423_v53 = vrot.slane %v3673_v6, 7  ;;  %v12426_v58 = vpack.c.bf16 %v3596_v36, %v3596_v36  ;;  %v5093_v8 = vunpack.c.l.b16 %v5071_v34 }
 0x2fd   : > { %v4942_v12 = vadd.f32 %v4892_v23, %v11864_v4  ;;  %v5521_v17 = vpack.c.b16 %v5510_v18, %v5509_v56  ;;  %v5768_v4 = vunpack.c.l.b16 %v5743_v62  ;;  %v5074_v48 = vsel %vm11491_vm7, %v5072_v40, %v5073_v15  ;;  %v5247_v56 = vld [vmem:[#allocation2 + $0x84] sm:$0xf]  ;;  %v5248_v62 = vld [vmem:[#allocation2 + $0x88] sm:$0xf] }
 0x2fe   : > { %v5094_v5 = vunpack.c.l.b16 %v5074_v48  ;;  %v4796_v6 = vrot.slane %v4794_v42, 4  ;;  %v4797_v27 = vshll.u32 %v4571_v52, 16  ;;  %v4807_v36 = vshrl.u32 %v4572_v39, 16 }
 0x2ff   : > { %v5200_v11 = vadd.f32 %v12376_v59, %v4942_v12  ;;  %10139 = vmatmul.msk.bf16.gmra.mxu0 %vm2119_vm11, %v5521_v17  ;;  %v5779_v18 = vpack.c.b16 %v5768_v4, %v5767_v3  ;;  %v4803_v59 = vshll.u32 %v4572_v39, 16  ;;  %v4813_v12 = vshll.u32 %v4573_v25, 16  ;;  %v5249_v17 = vld [vmem:[#allocation2 + $0x8c] sm:$0x1]  ;;  %v14107_v39 = vld [vmem:[#allocation11_spill] sm:$0xff] }
 0x300   : > { %v12432_v54 = vpop.f32.mrf.mxu3  ;;  %v12436_v15 = vadd.f32 %v12237_v9, %v12091_v33  ;;  %v5104_v40 = vpack.c.b16 %v5094_v5, %v5093_v8  ;;  %v4809_v52 = vrot.slane %v4807_v36, 4  ;;  %v5470_v3 = vshrl.u32 %v5247_v56, 16 }
 0x301   : > { %v5618_v61 = vadd.f32 %v12361_v46, %v5200_v11  ;;  %v4799_v46 = vrot.slane %v4797_v27, 5  ;;  %10165 = vmatmul.msk.bf16.gmra.mxu1 %vm2119_vm11, %v5779_v18  ;;  %v4805_v42 = vrot.slane %v4803_v59, 5  ;;  %v4815_v48 = vrot.slane %v4813_v12, 5 }
 0x302   : > { %v5828_v23 = vpop.f32.mrf.mxu1  ;;  %10124 = vmatmul.msk.bf16.gmra.mxu3 %vm2119_vm11, %v5104_v40  ;;  %v5473_v33 = vshll.u32 %v5247_v56, 16  ;;  %v5479_v7 = vshll.u32 %v5248_v62, 16  ;;  %v5483_v5 = vshrl.u32 %v5248_v62, 16  ;;  %v5489_v27 = vshll.u32 %v5249_v17, 16  ;;  %v12447_v40 = vld [vmem:[%s14045_s9] ss:$0 sm:$0xff] }
 0x303   : > { %v5876_v34 = vadd.f32 %v5826_v31, %v5618_v61  ;;  %v12439_v4 = vpop.f32.mrf.mxu0  ;;  %v4800_v21 = vor.u32 %v4799_v46, %v4796_v6  ;;  %v5647_v31 = vld [vmem:[#allocation2 + $0x84] sm:$0xe]  ;;  %v4810_v8 = vor.u32 %v4809_v52, %v4805_v42  ;;  %v5472_v61 = vrot.slane %v5470_v3, 4 }
 0x304   : > { %v4894_v11 = vpop.f32.mrf.mxu2  ;;  %v5475_v36 = vrot.slane %v5473_v33, 5  ;;  %v5481_v12 = vrot.slane %v5479_v7, 5  ;;  %v5485_v24 = vrot.slane %v5483_v5, 4  ;;  %v5491_v49 = vrot.slane %v5489_v27, 5 }
 0x305   : > { %v4943_v25 = vadd.f32 %v4894_v11, %v14107_v39  ;;  %v4801_v59 = vrot.slane %v4800_v21, 4  ;;  %v4811_v63 = vrot.slane %v4810_v8, 4  ;;  %v10152_v6 = vrot.slane %v5647_v31, 9 }
 0x306   : > { %v5476_v52 = vor.u32 %v5475_v36, %v5472_v61  ;;  %v5486_v39 = vor.u32 %v5485_v24, %v5481_v12 }
 0x307   : > { %v5201_v18 = vadd.f32 %v12401_v20, %v4943_v25  ;;  %v4806_v46 = vsel %vm11340_vm14, %v4801_v59, %v4805_v42  ;;  %v5746_v20 = vrot.slane %v5248_v62, 5  ;;  %v4816_v7 = vsel %vm11340_vm14, %v4811_v63, %v4815_v48  ;;  %v3832_v48 = vld [vmem:[#allocation3] sm:$0xf] }
 0x308   : > { %v12452_v21 = vpop.f32.mrf.mxu3  ;;  %v4835_v3 = vunpack.c.l.b16 %v4806_v46  ;;  %v5749_v25 = vrot.slane %v5249_v17, 5  ;;  %v4836_v8 = vunpack.c.l.b16 %v4816_v7  ;;  %v5477_v5 = vrot.slane %v5476_v52, 4  ;;  %v3839_v7 = vld [vmem:[#allocation3 + $0x8] sm:$0x1] }
 0x309   : > { %v5619_v56 = vadd.f32 %v12386_v0, %v5201_v18  ;;  %v5747_v0 = vsel %vm11491_vm7, %v10152_v6, %v5746_v20  ;;  %v5487_v31 = vrot.slane %v5486_v39, 4  ;;  %v5748_v42 = vrot.slane %v5746_v20, 4  ;;  %v3846_v20 = vld [vmem:[#allocation3 + $0x14] sm:$0x1] }
 0x30a   : > { %v5831_v11 = vpop.f32.mrf.mxu1  ;;  %v5769_v18 = vunpack.c.l.b16 %v5747_v0  ;;  %v5900_v62 = vadd.f32 %v12447_v40, %v5876_v34  ;;  %v4846_v59 = vpack.c.b16 %v4836_v8, %v4835_v3  ;;  %v5482_v63 = vsel %vm11340_vm14, %v5477_v5, %v5481_v12 }
 0x30b   : > { %v5877_v33 = vadd.f32 %v5828_v23, %v5619_v56  ;;  %v12459_v61 = vpop.f32.mrf.mxu0  ;;  %v5492_v34 = vsel %vm11340_vm14, %v5487_v31, %v5491_v49  ;;  %v5511_v36 = vunpack.c.l.b16 %v5482_v63  ;;  %v5750_v6 = vsel %vm11491_vm7, %v5748_v42, %v5749_v25 }
 0x30c   : > { %v4897_v27 = vpop.f32.mrf.mxu2  ;;  %v5920_v56 = vmax.f32 %v5900_v62, 0.0  ;;  %10098 = vmatmul.msk.bf16.gmra.mxu2 %vm2119_vm11, %v4846_v59  ;;  %v5770_v46 = vunpack.c.l.b16 %v5750_v6  ;;  %v3833_v39 = vsel %vm12467_vm13, %v12309_v14, %v3832_v48  ;;  %v3654_v49 = vrot.slane %v12336_v28, 4 }
 0x30d   : > { %v4944_v24 = vadd.f32 %v4897_v27, %v11922_v43  ;;  %v5901_v23 = vadd.f32 %v12447_v40, %v5877_v33  ;;  %v5512_v43 = vunpack.c.l.b16 %v5492_v34  ;;  %3834 = vst [vmem:[#allocation3] sm:$0xf] %v3833_v39  ;;  %v3842_v27 = vld [vmem:[#allocation3 + $0xc] sm:$0xf]  ;;  %v14112_v62 = vrot.slane %v12381_v10, 4 }
 0x30e   : > { %v5940_v3 = vpack.c.bf16 %v5920_v56, %v5920_v56  ;;  %v5780_v8 = vpack.c.b16 %v5770_v46, %v5769_v18  ;;  %v3637_v56 = vrot.slane %v12300_v37, 4 }
 0x30f   : > { %v5202_v12 = vadd.f32 %v12432_v54, %v4944_v24  ;;  %v5921_v52 = vmax.f32 %v5901_v23, 0.0  ;;  %v5522_v33 = vpack.c.b16 %v5512_v43, %v5511_v36  ;;  %v3847_v28 = vsel %vm12485_vm15, %v14112_v62, %v3846_v20 }
 0x310   : > { %v12482_v0 = vpop.f32.mrf.mxu3  ;;  %v5961_v42 = vshrl.u32 %v5940_v3, 16  ;;  %v5964_v14 = vshll.u32 %v5940_v3, 16  ;;  %3848 = vst [vmem:[#allocation3 + $0x14] sm:$0x1] %v3847_v28  ;;  %v14114_v23 = vshll.u32 %v12356_v29, 16  ;;  %v14115_v43 = vshll.u32 %v12288_v51, 16 }
 0x311   : > { %v5620_v25 = vadd.f32 %v12413_v19, %v5202_v12  ;;  %v5941_v54 = vpack.c.bf16 %v5921_v52, %v5921_v52  ;;  %v14113_v19 = vrot.slane %v12314_v60, 4  ;;  %10140 = vmatmul.msk.bf16.gmra.mxu0 %vm2119_vm11, %v5522_v33  ;;  %10166 = vmatmul.msk.bf16.gmra.mxu1 %vm2119_vm11, %v5780_v8  ;;  %v3843_v12 = vsel %vm12467_vm13, %v12354_v22, %v3842_v27  ;;  %v3849_v3 = vld [vmem:[#allocation3 + $0x18] sm:$0xf] }
 0x312   : > { %v5833_v5 = vpop.f32.mrf.mxu1  ;;  %v3661_v48 = vor.u32 %v14114_v23, %v12381_v10  ;;  %v5963_v34 = vrot.slane %v5961_v42, 7  ;;  %v14116_v10 = vld [vmem:[#allocation12_spill] sm:$0xff]  ;;  %3844 = vst [vmem:[#allocation3 + $0xc] sm:$0xf] %v3843_v12  ;;  %v3680_v62 = vrot.slane %v12423_v53, 4  ;;  %v14118_v23 = vld [vmem:[#allocation13_spill] sm:$0xff] }
 0x313   : > { %v3840_v18 = vsel %vm12485_vm15, %v14113_v19, %v3839_v7  ;;  %v5878_v59 = vadd.f32 %v5831_v11, %v5620_v25  ;;  %v5969_v63 = vshrl.u32 %v5941_v54, 16  ;;  %v5972_v24 = vshll.u32 %v5941_v54, 16  ;;  %v12502_v6 = vpop.f32.mrf.mxu0 }
 0x314   : > { %v4899_v36 = vpop.f32.mrf.mxu2  ;;  %3841 = vst [vmem:[#allocation3 + $0x8] sm:$0x1] %v3840_v18  ;;  %v3644_v11 = vor.u32 %v14115_v43, %v12314_v60  ;;  %v3662_v7 = vsel %vm10736_vm4, %v3654_v49, %v3661_v48  ;;  %v5966_v39 = vor.u32 %v5964_v14, %v5963_v34  ;;  %v5967_v37 = vrot.slane %v5963_v34, 4 }
 0x315   : > { %v5902_v29 = vadd.f32 %v12447_v40, %v5878_v59  ;;  %v4945_v46 = vadd.f32 %v4899_v36, %v14116_v10  ;;  %v5971_v52 = vrot.slane %v5969_v63, 7  ;;  %3845 = vst.msk [vmem:[#allocation3 + $0x10] sm:$0xf] %vm3830_vm9, %v3662_v7  ;;  %v3850_v60 = vsel %vm12467_vm13, %v12421_v1, %v3849_v3 }
 0x316   : > { %v3645_v51 = vsel %vm10736_vm4, %v3637_v56, %v3644_v11  ;;  %v3597_v49 = vmax.f32 %v12436_v15, 0.0  ;;  %6130 = vrot.lane.b32.xlu0 %v5966_v39, %s10574_s24  ;;  %3851 = vst [vmem:[#allocation3 + $0x18] sm:$0xf] %v3850_v60  ;;  %v3676_v14 = vshll.u32 %v12392_v47, 16  ;;  %v3682_v15 = vshrl.u32 %v12426_v58, 16 }
 0x317   : > { %v5203_v22 = vadd.f32 %v12452_v21, %v4945_v46  ;;  %v5976_v33 = vrot.slane %v5971_v52, 4  ;;  %v5974_v25 = vor.u32 %v5972_v24, %v5971_v52  ;;  %v5922_v8 = vmax.f32 %v5902_v29, 0.0  ;;  %3836 = vst.msk [vmem:[#allocation3 + $0x4] sm:$0xf] %vm3830_vm9, %v3645_v51  ;;  %v3853_v56 = vld [vmem:[#allocation3 + $0x20] sm:$0x1] }
 0x318   : > { %v5162_v21 = vpop.f32.mrf.mxu3  ;;  %v12532_v18 = vpack.c.bf16 %v3597_v49, %v3597_v49  ;;  %v3671_v63 = vrot.slane %v12405_v44, 4  ;;  %v3678_v24 = vor.u32 %v3676_v14, %v12423_v53  ;;  %v12540_v43 = vrot.slane %v3682_v15, 7  ;;  %v3856_v49 = vld [vmem:[#allocation3 + $0x24] sm:$0xf] }
 0x319   : > { %v5621_v54 = vadd.f32 %v12439_v4, %v5203_v22  ;;  %6134 = vrot.lane.b32.xlu1 %v5976_v33, %s10574_s24  ;;  %v5975_v1 = vsel %vm10736_vm4, %v5967_v37, %v5974_v25  ;;  %v5942_v42 = vpack.c.bf16 %v5922_v8, %v5922_v8  ;;  %v3854_v11 = vsel %vm12485_vm15, %v3680_v62, %v3853_v56 }
 0x31a   : > { %v5836_v27 = vpop.f32.mrf.mxu1  ;;  %v3679_v44 = vsel %vm10736_vm4, %v3671_v63, %v3678_v24  ;;  %3855 = vst [vmem:[#allocation3 + $0x20] sm:$0x1] %v3854_v11  ;;  %v3685_v10 = vshll.u32 %v12426_v58, 16  ;;  %v3690_v46 = vshrl.u32 %v12532_v18, 16  ;;  %v3693_v24 = vshll.u32 %v12532_v18, 16 }
 0x31b   : > { %v5879_v28 = vadd.f32 %v5833_v5, %v5621_v54  ;;  %v5978_v19 = vshrl.u32 %v5942_v42, 16  ;;  %v12534_v4 = vpop.f32.mrf.mxu0  ;;  %v5981_v36 = vshll.u32 %v5942_v42, 16  ;;  %v3578_v5 = vadd.f32 %v12237_v9, %v12117_v50  ;;  %3852 = vst.msk [vmem:[#allocation3 + $0x1c] sm:$0xf] %vm3830_vm9, %v3679_v44 }
 0x31c   : > { %v4902_v59 = vpop.f32.mrf.mxu2  ;;  %v3692_v60 = vrot.slane %v3690_v46, 7  ;;  %v3579_v54 = vadd.f32 %v12237_v9, %v12146_v57  ;;  %vm6227_vm11 = vcmask 57376  }
 0x31d   : > { %v4946_v48 = vadd.f32 %v4902_v59, %v14118_v23  ;;  %v5980_v34 = vrot.slane %v5978_v19, 7  ;;  %v5903_v47 = vadd.f32 %v12447_v40, %v5879_v28  ;;  %v3598_v39 = vmax.f32 %v3578_v5, 0.0  ;;  %vm12726_vm3 = vmand %vm6227_vm11, %vm877_vm2 }
 0x31e   : > { %6132 = vrot.lane.b32.xlu0 %v5975_v1, %s10574_s24  ;;  %v3697_v23 = vrot.slane %v3692_v60, 4  ;;  %v3695_v5 = vor.u32 %v3693_v24, %v3692_v60  ;;  %vm12752_vm2 = vmand %vm6220_vm12, %vm901_vm6 }
 0x31f   : > { %v5204_v53 = vadd.f32 %v12482_v0, %v4946_v48  ;;  %v5983_v12 = vor.u32 %v5981_v36, %v5980_v34  ;;  %v5923_v29 = vmax.f32 %v5903_v47, 0.0  ;;  %v3687_v0 = vor.u32 %v3685_v10, %v12540_v43 }
 0x320   : > { %v5165_v7 = vpop.f32.mrf.mxu3  ;;  %v5984_v42 = vrot.slane %v5980_v34, 4  ;;  %v3599_v34 = vmax.f32 %v3579_v54, 0.0  ;;  %v3580_v47 = vadd.f32 %v12237_v9, %v12173_v32  ;;  %v3863_v54 = vld [vmem:[#allocation3 + $0x30] sm:$0xf] }
 0x321   : > { %v5622_v50 = vadd.f32 %v12459_v61, %v5204_v53  ;;  %6136 = vrot.lane.b32.xlu1 %v5983_v12, %s10574_s24  ;;  %v5943_v3 = vpack.c.bf16 %v5923_v29, %v5923_v29  ;;  %v3618_v61 = vpack.c.bf16 %v3598_v39, %v3598_v39  ;;  %v3860_v29 = vld [vmem:[#allocation3 + $0x2c] sm:$0x1] }
 0x322   : > { %v5838_v52 = vpop.f32.mrf.mxu1  ;;  %v3619_v10 = vpack.c.bf16 %v3599_v34, %v3599_v34  ;;  %v3861_v46 = vsel %vm12485_vm15, %v3697_v23, %v3860_v29 }
 0x323   : > { %v5880_v37 = vadd.f32 %v5836_v27, %v5622_v50  ;;  %v5986_v51 = vshrl.u32 %v5943_v3, 16  ;;  %v5989_v8 = vshll.u32 %v5943_v3, 16  ;;  %v12560_v1 = vpop.f32.mrf.mxu0  ;;  %v3857_v27 = vsel %vm12467_vm13, %v3687_v0, %v3856_v49  ;;  %3862 = vst [vmem:[#allocation3 + $0x2c] sm:$0x1] %v3861_v46 }
 0x324   : > { %v4904_v58 = vpop.f32.mrf.mxu2  ;;  %3858 = vst [vmem:[#allocation3 + $0x24] sm:$0xf] %v3857_v27  ;;  %v3699_v48 = vshrl.u32 %v3618_v61, 16  ;;  %v3600_v3 = vmax.f32 %v3580_v47, 0.0  ;;  %v12590_v27 = vld [vmem:[%s14045_s9] ss:$0 sm:$0xff] }
 0x325   : > { %v5904_v22 = vadd.f32 %v12447_v40, %v5880_v37  ;;  %v4947_v33 = vadd.f32 %v4904_v58, %v12018_v35  ;;  %v5988_v25 = vrot.slane %v5986_v51, 7  ;;  %v3710_v34 = vshll.u32 %v3619_v10, 16 }
 0x326   : > { %v12574_v18 = vrot.slane %v3699_v48, 7 }
 0x327   : > { %v5205_v14 = vadd.f32 %v5162_v21, %v4947_v33  ;;  %v5993_v62 = vrot.slane %v5988_v25, 4  ;;  %v5991_v15 = vor.u32 %v5989_v8, %v5988_v25  ;;  %v5924_v28 = vmax.f32 %v5904_v22, 0.0 }
 0x328   : > { %v5167_v59 = vpop.f32.mrf.mxu3  ;;  %v3620_v33 = vpack.c.bf16 %v3600_v3, %v3600_v3 }
 0x329   : > { %v5623_v35 = vadd.f32 %v12502_v6, %v5205_v14  ;;  %6140 = vrot.lane.b32.xlu2 %v5993_v62, %s10574_s24  ;;  %v5992_v57 = vsel %vm10736_vm4, %v5984_v42, %v5991_v15  ;;  %v5944_v63 = vpack.c.bf16 %v5924_v28, %v5924_v28  ;;  %v3688_v6 = vrot.slane %v12540_v43, 4 }
 0x32a   : > { %v5841_v19 = vpop.f32.mrf.mxu1  ;;  %v3581_v14 = vadd.f32 %v12590_v27, %v12194_v41  ;;  %v3719_v3 = vshll.u32 %v3620_v33, 16 }
 0x32b   : > { %v5881_v21 = vadd.f32 %v5838_v52, %v5623_v35  ;;  %v5995_v36 = vshrl.u32 %v5944_v63, 16  ;;  %v5998_v12 = vshll.u32 %v5944_v63, 16  ;;  %v3696_v32 = vsel %vm10736_vm4, %v3688_v6, %v3695_v5  ;;  %v5588_v0 = vpop.f32.mrf.mxu0 }
 0x32c   : > { %v4907_v56 = vpop.f32.mrf.mxu2  ;;  %v3702_v52 = vshll.u32 %v3618_v61, 16  ;;  %3859 = vst.msk [vmem:[#allocation3 + $0x28] sm:$0xf] %vm3830_vm9, %v3696_v32  ;;  %v3582_v32 = vadd.f32 %v12590_v27, %v12214_v26 }
 0x32d   : > { %v5905_v11 = vadd.f32 %v12447_v40, %v5881_v21  ;;  %v4948_v44 = vadd.f32 %v4907_v56, %v12047_v45  ;;  %v5997_v53 = vrot.slane %v5995_v36, 7  ;;  %v3601_v36 = vmax.f32 %v3581_v14, 0.0 }
 0x32e   : > { %v3704_v60 = vor.u32 %v3702_v52, %v12574_v18 }
 0x32f   : > { %v5206_v9 = vadd.f32 %v5165_v7, %v4948_v44  ;;  %v6000_v50 = vor.u32 %v5998_v12, %v5997_v53  ;;  %v5925_v43 = vmax.f32 %v5905_v11, 0.0  ;;  %v3707_v7 = vshrl.u32 %v3619_v10, 16  ;;  %v3867_v10 = vld [vmem:[#allocation3 + $0x38] sm:$0x1] }
 0x330   : > { %v5170_v37 = vpop.f32.mrf.mxu3  ;;  %v6001_v62 = vrot.slane %v5997_v53, 4  ;;  %v3864_v15 = vsel %vm12467_vm13, %v3704_v60, %v3863_v54  ;;  %v3621_v46 = vpack.c.bf16 %v3601_v36, %v3601_v36  ;;  %v3870_v54 = vld [vmem:[#allocation3 + $0x3c] sm:$0xf] }
 0x331   : > { %v5624_v45 = vadd.f32 %v12534_v4, %v5206_v9  ;;  %6138 = vrot.lane.b32.xlu2 %v5992_v57, %s10574_s24  ;;  %6142 = vrot.lane.b32.xlu0 %v6000_v50, %s10574_s24  ;;  %v5945_v51 = vpack.c.bf16 %v5925_v43, %v5925_v43  ;;  %v3709_v42 = vrot.slane %v3707_v7, 7  ;;  %3865 = vst [vmem:[#allocation3 + $0x30] sm:$0xf] %v3864_v15  ;;  %v3716_v57 = vshrl.u32 %v3620_v33, 16 }
 0x332   : > { %v5843_v39 = vpop.f32.mrf.mxu1  ;;  %v3724_v60 = vshrl.u32 %v3621_v46, 16  ;;  %v3602_v7 = vmax.f32 %v3582_v32, 0.0 }
 0x333   : > { %v5882_v58 = vadd.f32 %v5841_v19, %v5624_v45  ;;  %v6003_v22 = vshrl.u32 %v5945_v51, 16  ;;  %v6006_v4 = vshll.u32 %v5945_v51, 16  ;;  %v3714_v21 = vrot.slane %v3709_v42, 4 }
 0x334   : > { %v4909_v25 = vpop.f32.mrf.mxu2  ;;  %v12601_v6 = vrot.slane %v3716_v57, 7  ;;  %v3712_v11 = vor.u32 %v3710_v34, %v3709_v42  ;;  %v3726_v42 = vrot.slane %v3724_v60, 7  ;;  %v3622_v14 = vpack.c.bf16 %v3602_v7, %v3602_v7 }
 0x335   : > { %v5906_v8 = vadd.f32 %v12447_v40, %v5882_v58  ;;  %v4949_v49 = vadd.f32 %v4909_v25, %v12080_v38  ;;  %v6005_v61 = vrot.slane %v6003_v22, 7  ;;  %v3868_v9 = vsel %vm12485_vm15, %v3714_v21, %v3867_v10 }
 0x336   : > { %3869 = vst [vmem:[#allocation3 + $0x38] sm:$0x1] %v3868_v9  ;;  %v3721_v26 = vor.u32 %v3719_v3, %v12601_v6  ;;  %v3731_v34 = vrot.slane %v3726_v42, 4  ;;  %v3733_v21 = vshrl.u32 %v3622_v14, 16 }
 0x337   : > { %v5207_v28 = vadd.f32 %v5167_v59, %v4949_v49  ;;  %v6010_v35 = vrot.slane %v6005_v61, 4  ;;  %v6008_v19 = vor.u32 %v6006_v4, %v6005_v61  ;;  %v5926_v38 = vmax.f32 %v5906_v8, 0.0  ;;  %v5590_v59 = vpop.f32.mrf.mxu0  ;;  %v14119_v49 = vld [vmem:[#allocation14_spill] sm:$0xff] }
 0x338   : > { %v5172_v48 = vpop.f32.mrf.mxu3  ;;  %v3871_v15 = vsel %vm12467_vm13, %v3721_v26, %v3870_v54  ;;  %v12630_v10 = vrot.slane %v3733_v21, 7  ;;  %v14122_v54 = vld [vmem:[#allocation23_spill] sm:$0xff] }
 0x339   : > { %v5625_v63 = vadd.f32 %v12560_v1, %v5207_v28  ;;  %6146 = vrot.lane.b32.xlu2 %v6010_v35, %s10574_s24  ;;  %v6009_v23 = vsel %vm10736_vm4, %v6001_v62, %v6008_v19  ;;  %v5946_v41 = vpack.c.bf16 %v5926_v38, %v5926_v38  ;;  %v3705_v1 = vrot.slane %v12574_v18, 4  ;;  %3872 = vst [vmem:[#allocation3 + $0x3c] sm:$0xf] %v3871_v15  ;;  %v6253_v20 = vld [vmem:[#allocation3 + $0x30] sm:$0xf] }
 0x33a   : > { %v5846_v24 = vpop.f32.mrf.mxu1  ;;  %6144 = vrot.lane.b32.xlu1 %v6009_v23, %s10574_s24 }
 0x33b   : > { %v5883_v47 = vadd.f32 %v5843_v39, %v5625_v63  ;;  %v6012_v56 = vshrl.u32 %v5946_v41, 16  ;;  %v6015_v29 = vshll.u32 %v5946_v41, 16  ;;  %v3713_v50 = vsel %vm10736_vm4, %v3705_v1, %v3712_v11 }
 0x33c   : > { %v4912_v5 = vpop.f32.mrf.mxu2  ;;  %3866 = vst.msk [vmem:[#allocation3 + $0x34] sm:$0xf] %vm3830_vm9, %v3713_v50  ;;  %v3727_v41 = vshll.u32 %v3621_v46, 16  ;;  %v14120_v46 = vld [vmem:[#allocation21_spill] sm:$0xff] }
 0x33d   : > { %v5907_v44 = vadd.f32 %v12447_v40, %v5883_v47  ;;  %v4950_v53 = vadd.f32 %v4912_v5, %v12100_v55  ;;  %v6014_v12 = vrot.slane %v6012_v56, 7  ;;  %v3584_v32 = vadd.f32 %v12590_v27, %v14120_v46  ;;  %v3881_v46 = vld [vmem:[#allocation3 + $0x50] sm:$0x1] }
 0x33e   : > { %v3729_v1 = vor.u32 %v3727_v41, %v3726_v42  ;;  %v3585_v42 = vadd.f32 %v12590_v27, %v14122_v54 }
 0x33f   : > { %v5208_v43 = vadd.f32 %v5170_v37, %v4950_v53  ;;  %v6017_v18 = vor.u32 %v6015_v29, %v6014_v12  ;;  %v5927_v52 = vmax.f32 %v5907_v44, 0.0  ;;  %v3583_v37 = vadd.f32 %v12590_v27, %v12239_v30  ;;  %v5593_v8 = vpop.f32.mrf.mxu0  ;;  %v3874_v29 = vld [vmem:[#allocation3 + $0x44] sm:$0x1] }
 0x340   : > { %v5175_v39 = vpop.f32.mrf.mxu3  ;;  %v6018_v62 = vrot.slane %v6014_v12, 4  ;;  %v3875_v50 = vsel %vm12485_vm15, %v3731_v34, %v3874_v29  ;;  %v3604_v60 = vmax.f32 %v3584_v32, 0.0  ;;  %v3605_v34 = vmax.f32 %v3585_v42, 0.0  ;;  %v14127_v42 = vld [vmem:[#allocation10_spill] sm:$0xff] }
 0x341   : > { %v5626_v55 = vadd.f32 %v5588_v0, %v5208_v43  ;;  %6148 = vrot.lane.b32.xlu0 %v6017_v18, %s10574_s24  ;;  %v5947_v51 = vpack.c.bf16 %v5927_v52, %v5927_v52  ;;  %v3603_v30 = vmax.f32 %v3583_v37, 0.0  ;;  %3876 = vst [vmem:[#allocation3 + $0x44] sm:$0x1] %v3875_v50 }
 0x342   : > { %v5848_v45 = vpop.f32.mrf.mxu1 }
 0x343   : > { %v5884_v58 = vadd.f32 %v5846_v24, %v5626_v55  ;;  %v6020_v22 = vshrl.u32 %v5947_v51, 16  ;;  %v6023_v4 = vshll.u32 %v5947_v51, 16  ;;  %v12625_v56 = vpack.c.bf16 %v3603_v30, %v3603_v30 }
 0x344   : > { %v4914_v25 = vpop.f32.mrf.mxu2 }
 0x345   : > { %v5908_v33 = vadd.f32 %v12447_v40, %v5884_v58  ;;  %v4951_v0 = vadd.f32 %v4914_v25, %v14119_v49  ;;  %v6022_v61 = vrot.slane %v6020_v22, 7  ;;  %v3741_v3 = vshrl.u32 %v12625_v56, 16  ;;  %v14121_v25 = vld [vmem:[#allocation15_spill] sm:$0xff] }
 0x347   : > { %v5209_v28 = vadd.f32 %v5172_v48, %v4951_v0  ;;  %v6027_v35 = vrot.slane %v6022_v61, 4  ;;  %v6025_v19 = vor.u32 %v6023_v4, %v6022_v61  ;;  %v5928_v38 = vmax.f32 %v5908_v33, 0.0  ;;  %v5595_v9 = vpop.f32.mrf.mxu0  ;;  %v3877_v4 = vld [vmem:[#allocation3 + $0x48] sm:$0xf] }
 0x348   : > { %v5177_v48 = vpop.f32.mrf.mxu3  ;;  %v3743_v22 = vrot.slane %v3741_v3, 7 }
 0x349   : > { %v5627_v57 = vadd.f32 %v5590_v59, %v5209_v28  ;;  %6152 = vrot.lane.b32.xlu2 %v6027_v35, %s10574_s24  ;;  %v6026_v24 = vsel %vm10736_vm4, %v6018_v62, %v6025_v19  ;;  %v5948_v23 = vpack.c.bf16 %v5928_v38, %v5928_v38  ;;  %v3722_v59 = vrot.slane %v12601_v6, 4 }
 0x34a   : > { %v5851_v63 = vpop.f32.mrf.mxu1  ;;  %6150 = vrot.lane.b32.xlu1 %v6026_v24, %s10574_s24  ;;  %v3744_v24 = vshll.u32 %v12625_v56, 16 }
 0x34b   : > { %v5885_v36 = vadd.f32 %v5848_v45, %v5627_v57  ;;  %v6029_v47 = vshrl.u32 %v5948_v23, 16  ;;  %v6032_v12 = vshll.u32 %v5948_v23, 16  ;;  %v3730_v6 = vsel %vm10736_vm4, %v3722_v59, %v3729_v1 }
 0x34c   : > { %v4917_v5 = vpop.f32.mrf.mxu2  ;;  %3873 = vst.msk [vmem:[#allocation3 + $0x40] sm:$0xf] %vm3830_vm9, %v3730_v6  ;;  %v3748_v23 = vrot.slane %v3743_v22, 4  ;;  %v3739_v1 = vrot.slane %v12630_v10, 4 }
 0x34d   : > { %v5909_v11 = vadd.f32 %v12447_v40, %v5885_v36  ;;  %v4952_v44 = vadd.f32 %v4917_v5, %v12153_v13  ;;  %v6031_v53 = vrot.slane %v6029_v47, 7  ;;  %v3736_v13 = vshll.u32 %v3622_v14, 16  ;;  %v14123_v47 = vld [vmem:[#allocation25_spill] sm:$0xff] }
 0x34e   : > { %v3586_v5 = vadd.f32 %v12590_v27, %v14123_v47  ;;  %v3882_v50 = vsel %vm12485_vm15, %v3748_v23, %v3881_v46  ;;  %v14129_v46 = vld [vmem:[#allocation28_spill] sm:$0xff] }
 0x34f   : > { %v5210_v43 = vadd.f32 %v5175_v39, %v4952_v44  ;;  %v6034_v18 = vor.u32 %v6032_v12, %v6031_v53  ;;  %v5929_v52 = vmax.f32 %v5909_v11, 0.0  ;;  %v3738_v26 = vor.u32 %v3736_v13, %v12630_v10  ;;  %3883 = vst [vmem:[#allocation3 + $0x50] sm:$0x1] %v3882_v50 }
 0x350   : > { %v5180_v49 = vpop.f32.mrf.mxu3  ;;  %v6035_v14 = vrot.slane %v6031_v53, 4  ;;  %v3746_v11 = vor.u32 %v3744_v24, %v3743_v22  ;;  %v14124_v53 = vld [vmem:[#allocation17_spill] sm:$0xff]  ;;  %v3606_v3 = vmax.f32 %v3586_v5, 0.0 }
 0x351   : > { %v5628_v55 = vadd.f32 %v5593_v8, %v5210_v43  ;;  %6154 = vrot.lane.b32.xlu0 %v6034_v18, %s10574_s24  ;;  %v5949_v51 = vpack.c.bf16 %v5929_v52, %v5929_v52  ;;  %v3624_v8 = vpack.c.bf16 %v3604_v60, %v3604_v60  ;;  %v3878_v62 = vsel %vm12467_vm13, %v3738_v26, %v3877_v4 }
 0x352   : > { %v5853_v45 = vpop.f32.mrf.mxu1  ;;  %3879 = vst [vmem:[#allocation3 + $0x48] sm:$0xf] %v3878_v62  ;;  %v3747_v6 = vsel %vm10736_vm4, %v3739_v1, %v3746_v11  ;;  %v14128_v1 = vld [vmem:[#allocation20_spill] sm:$0xff] }
 0x353   : > { %v5886_v7 = vadd.f32 %v5851_v63, %v5628_v55  ;;  %v6037_v58 = vshrl.u32 %v5949_v51, 16  ;;  %v6040_v61 = vshll.u32 %v5949_v51, 16  ;;  %v3750_v41 = vshrl.u32 %v3624_v8, 16  ;;  %3880 = vst.msk [vmem:[#allocation3 + $0x4c] sm:$0xf] %vm3830_vm9, %v3747_v6 }
 0x354   : > { %v4919_v39 = vpop.f32.mrf.mxu2  ;;  %v5598_v38 = vpop.f32.mrf.mxu0  ;;  %v3753_v13 = vshll.u32 %v3624_v8, 16  ;;  %v3884_v8 = vld [vmem:[#allocation3 + $0x54] sm:$0xf] }
 0x355   : > { %v5910_v37 = vadd.f32 %v12447_v40, %v5886_v7  ;;  %v4953_v33 = vadd.f32 %v4919_v39, %v14121_v25  ;;  %v6039_v0 = vrot.slane %v6037_v58, 7  ;;  %v3752_v32 = vrot.slane %v3750_v41, 7  ;;  %v14125_v7 = vld [vmem:[#allocation16_spill] sm:$0xff]  ;;  %v14126_v58 = vld [vmem:[#allocation18_spill] sm:$0xff] }
 0x356   : > { %v4527_v22 = vadd.f32 %v14126_v58, %v14125_v7  ;;  %v3626_v25 = vpack.c.bf16 %v3606_v3, %v3606_v3  ;;  %v14131_v7 = vld [vmem:[#allocation22_spill] sm:$0xff] }
 0x357   : > { %v5211_v15 = vadd.f32 %v5177_v48, %v4953_v33  ;;  %v6044_v28 = vrot.slane %v6039_v0, 4  ;;  %v6042_v35 = vor.u32 %v6040_v61, %v6039_v0  ;;  %v5930_v19 = vmax.f32 %v5910_v37, 0.0 }
 0x358   : > { %v5182_v18 = vpop.f32.mrf.mxu3  ;;  %v3755_v51 = vor.u32 %v3753_v13, %v3752_v32  ;;  %v3756_v47 = vrot.slane %v3752_v32, 4 }
 0x359   : > { %v5629_v30 = vadd.f32 %v5595_v9, %v5211_v15  ;;  %6158 = vrot.lane.b32.xlu2 %v6044_v28, %s10574_s24  ;;  %v6043_v57 = vsel %vm10736_vm4, %v6035_v14, %v6042_v35  ;;  %v5950_v63 = vpack.c.bf16 %v5930_v19, %v5930_v19  ;;  %v3625_v9 = vpack.c.bf16 %v3605_v34, %v3605_v34 }
 0x35a   : > { %v5856_v21 = vpop.f32.mrf.mxu1  ;;  %6156 = vrot.lane.b32.xlu1 %v6043_v57, %s10574_s24  ;;  %v3587_v14 = vadd.f32 %v12590_v27, %v14127_v42  ;;  %v3885_v62 = vsel %vm12467_vm13, %v3755_v51, %v3884_v8  ;;  %v3767_v19 = vshrl.u32 %v3626_v25, 16 }
 0x35b   : > { %v5887_v36 = vadd.f32 %v5853_v45, %v5629_v30  ;;  %v6046_v48 = vshrl.u32 %v5950_v63, 16  ;;  %v6049_v29 = vshll.u32 %v5950_v63, 16  ;;  %v3758_v26 = vshrl.u32 %v3625_v9, 16  ;;  %3886 = vst [vmem:[#allocation3 + $0x54] sm:$0xf] %v3885_v62 }
 0x35c   : > { %v4922_v59 = vpop.f32.mrf.mxu2  ;;  %v5600_v60 = vpop.f32.mrf.mxu0  ;;  %v3761_v63 = vshll.u32 %v3625_v9, 16  ;;  %v3607_v23 = vmax.f32 %v3587_v14, 0.0  ;;  %v3588_v9 = vadd.f32 %v12590_v27, %v14129_v46 }
 0x35d   : > { %v5911_v44 = vadd.f32 %v12447_v40, %v5887_v36  ;;  %v4954_v12 = vadd.f32 %v4922_v59, %v14124_v53  ;;  %v12658_v56 = vrot.slane %v6046_v48, 7  ;;  %v3760_v54 = vrot.slane %v3758_v26, 7 }
 0x35e   : > { %v3608_v26 = vmax.f32 %v3588_v9, 0.0  ;;  %v14133_v9 = vld [vmem:[#allocation24_spill] sm:$0xff] }
 0x35f   : > { %v5212_v43 = vadd.f32 %v5180_v49, %v4954_v12  ;;  %v6051_v10 = vor.u32 %v6049_v29, %v12658_v56  ;;  %v5931_v52 = vmax.f32 %v5911_v44, 0.0  ;;  %v3765_v24 = vrot.slane %v3760_v54, 4  ;;  %v3888_v12 = vld [vmem:[#allocation3 + $0x5c] sm:$0x1] }
 0x360   : > { %v5185_v30 = vpop.f32.mrf.mxu3  ;;  %v3763_v5 = vor.u32 %v3761_v63, %v3760_v54  ;;  %v3627_v29 = vpack.c.bf16 %v3607_v23, %v3607_v23  ;;  %v3628_v54 = vpack.c.bf16 %v3608_v26, %v3608_v26 }
 0x361   : > { %v5630_v55 = vadd.f32 %v5598_v38, %v5212_v43  ;;  %6160 = vrot.lane.b32.xlu0 %v6051_v10, %s10574_s24  ;;  %v12667_v45 = vpack.c.bf16 %v5931_v52, %v5931_v52  ;;  %v3889_v6 = vsel %vm12485_vm15, %v3765_v24, %v3888_v12  ;;  %v3770_v52 = vshll.u32 %v3626_v25, 16 }
 0x362   : > { %v5858_v33 = vpop.f32.mrf.mxu1  ;;  %v3764_v32 = vsel %vm10736_vm4, %v3756_v47, %v3763_v5  ;;  %3890 = vst [vmem:[#allocation3 + $0x5c] sm:$0x1] %v3889_v6  ;;  %v3775_v51 = vshrl.u32 %v3627_v29, 16  ;;  %v3778_v63 = vshll.u32 %v3627_v29, 16  ;;  %v3784_v23 = vshrl.u32 %v3628_v54, 16 }
 0x363   : > { %v5888_v39 = vadd.f32 %v5856_v21, %v5630_v55  ;;  %v6054_v37 = vshrl.u32 %v12667_v45, 16  ;;  %v12681_v21 = vrot.slane %v3767_v19, 7  ;;  %3887 = vst.msk [vmem:[#allocation3 + $0x58] sm:$0xf] %vm3830_vm9, %v3764_v32  ;;  %v3787_v32 = vshll.u32 %v3628_v54, 16 }
 0x364   : > { %v4924_v49 = vpop.f32.mrf.mxu2  ;;  %v3777_v8 = vrot.slane %v3775_v51, 7 }
 0x365   : > { %v5912_v0 = vadd.f32 %v12447_v40, %v5888_v39  ;;  %v4955_v61 = vadd.f32 %v4924_v49, %v4527_v22  ;;  %v12673_v4 = vrot.slane %v6054_v37, 7  ;;  %v3772_v55 = vor.u32 %v3770_v52, %v12681_v21 }
 0x366   : > { %v3782_v24 = vrot.slane %v3777_v8, 4  ;;  %v3780_v47 = vor.u32 %v3778_v63, %v3777_v8  ;;  %v3898_v8 = vld [vmem:[#allocation3 + $0x6c] sm:$0xf] }
 0x367   : > { %v5213_v15 = vadd.f32 %v5182_v18, %v4955_v61  ;;  %v6061_v28 = vrot.slane %v12673_v4, 4  ;;  %v5932_v35 = vmax.f32 %v5912_v0, 0.0  ;;  %v5603_v36 = vpop.f32.mrf.mxu0  ;;  %v3891_v61 = vld [vmem:[#allocation3 + $0x60] sm:$0xf] }
 0x368   : > { %v5187_v39 = vpop.f32.mrf.mxu3  ;;  %v3892_v14 = vsel %vm12467_vm13, %v3772_v55, %v3891_v61 }
 0x369   : > { %v5631_v38 = vadd.f32 %v5600_v60, %v5213_v15  ;;  %6164 = vrot.lane.b32.xlu1 %v6061_v28, %s10574_s24  ;;  %v5952_v57 = vpack.c.bf16 %v5932_v35, %v5932_v35  ;;  %v14130_v60 = vld [vmem:[#allocation19_spill] sm:$0xff]  ;;  %3893 = vst [vmem:[#allocation3 + $0x60] sm:$0xf] %v3892_v14  ;;  %v14132_v35 = vld [vmem:[#allocation30_spill] sm:$0xff] }
 0x36a   : > { %v5861_v50 = vpop.f32.mrf.mxu1  ;;  %v4532_v58 = vadd.f32 %v14131_v7, %v14130_v60  ;;  %v3589_v19 = vadd.f32 %v12590_v27, %v14132_v35  ;;  %v6236_v60 = vld [vmem:[#allocation3 + $0x14] sm:$0x1] }
 0x36b   : > { %v5889_v41 = vadd.f32 %v5858_v33, %v5631_v38  ;;  %v6063_v34 = vshrl.u32 %v5952_v57, 16  ;;  %v6066_v53 = vshll.u32 %v5952_v57, 16 }
 0x36c   : > { %v4927_v48 = vpop.f32.mrf.mxu2 }
 0x36d   : > { %v5913_v59 = vadd.f32 %v12447_v40, %v5889_v41  ;;  %v4956_v11 = vadd.f32 %v4927_v48, %v14128_v1  ;;  %v12685_v44 = vrot.slane %v6063_v34, 7  ;;  %v3773_v48 = vrot.slane %v12681_v21, 4 }
 0x36f   : > { %v5214_v43 = vadd.f32 %v5185_v30, %v4956_v11  ;;  %v6068_v18 = vor.u32 %v6066_v53, %v12685_v44  ;;  %v5933_v10 = vmax.f32 %v5913_v59, 0.0  ;;  %v5605_v42 = vpop.f32.mrf.mxu0  ;;  %v3895_v11 = vld [vmem:[#allocation3 + $0x68] sm:$0x1]  ;;  %v12715_v53 = vrot.slane %v3784_v23, 7 }
 0x370   : > { %v3896_v29 = vsel %vm12485_vm15, %v3782_v24, %v3895_v11  ;;  %v3781_v46 = vsel %vm10736_vm4, %v3773_v48, %v3780_v47 }
 0x371   : > { %v5632_v13 = vadd.f32 %v5603_v36, %v5214_v43  ;;  %6166 = vrot.lane.b32.xlu2 %v6068_v18, %s10574_s24  ;;  %v12696_v3 = vpack.c.bf16 %v5933_v10, %v5933_v10  ;;  %v3609_v36 = vmax.f32 %v3589_v19, 0.0  ;;  %3897 = vst [vmem:[#allocation3 + $0x68] sm:$0x1] %v3896_v29  ;;  %v3789_v55 = vor.u32 %v3787_v32, %v12715_v53 }
 0x372   : > { %v5863_v38 = vpop.f32.mrf.mxu1  ;;  %3894 = vst.msk [vmem:[#allocation3 + $0x64] sm:$0xf] %vm3830_vm9, %v3781_v46  ;;  %v3790_v11 = vrot.slane %v12715_v53, 4 }
 0x373   : > { %v5890_v22 = vadd.f32 %v5861_v50, %v5632_v13  ;;  %v6071_v37 = vshrl.u32 %v12696_v3, 16  ;;  %v3629_v43 = vpack.c.bf16 %v3609_v36, %v3609_v36 }
 0x374   : > { %v4929_v33 = vpop.f32.mrf.mxu2  ;;  %v5190_v59 = vpop.f32.mrf.mxu3 }
 0x375   : > { %v5914_v25 = vadd.f32 %v12447_v40, %v5890_v22  ;;  %v4957_v49 = vadd.f32 %v4929_v33, %v4532_v58  ;;  %v12703_v0 = vrot.slane %v6071_v37, 7  ;;  %v6057_v22 = vshll.u32 %v12667_v45, 16 }
 0x376   : > { %v3795_v19 = vshll.u32 %v3629_v43, 16 }
 0x377   : > { %v5215_v62 = vadd.f32 %v5187_v39, %v4957_v49  ;;  %v6078_v15 = vrot.slane %v12703_v0, 4  ;;  %v5934_v28 = vmax.f32 %v5914_v25, 0.0  ;;  %v3792_v39 = vshrl.u32 %v3629_v43, 16 }
 0x378   : > { %v6052_v49 = vrot.slane %v12658_v56, 4  ;;  %v6059_v61 = vor.u32 %v6057_v22, %v12673_v4 }
 0x379   : > { %v5633_v30 = vadd.f32 %v5605_v42, %v5215_v62  ;;  %6170 = vrot.lane.b32.xlu0 %v6078_v15, %s10574_s24  ;;  %v5954_v57 = vpack.c.bf16 %v5934_v28, %v5934_v28  ;;  %v3899_v42 = vsel %vm12467_vm13, %v3789_v55, %v3898_v8  ;;  %v14136_v62 = vld [vmem:[#allocation26_spill] sm:$0xff]  ;;  %v3794_v56 = vrot.slane %v3792_v39, 7  ;;  %vm12759_vm13 = vmand %vm908_vm8, %vm901_vm6 }
 0x37a   : > { %v12748_v35 = vsel %vm10736_vm4, %v6052_v49, %v6059_v61  ;;  %3900 = vst [vmem:[#allocation3 + $0x6c] sm:$0xf] %v3899_v42  ;;  %v6232_v39 = vld [vmem:[#allocation3 + $0xc] sm:$0xf] }
 0x37b   : > { %v5891_v41 = vadd.f32 %v5863_v38, %v5633_v30  ;;  %v6080_v34 = vshrl.u32 %v5954_v57, 16  ;;  %v6083_v27 = vshll.u32 %v5954_v57, 16  ;;  %v6222_v30 = vld [vmem:[#allocation3] sm:$0xf]  ;;  %v3799_v47 = vrot.slane %v3794_v56, 4 }
 0x37c   : > { %v4932_v12 = vpop.f32.mrf.mxu2  ;;  %v5608_v18 = vpop.f32.mrf.mxu0 }
 0x37d   : > { %v5915_v5 = vadd.f32 %v12447_v40, %v5891_v41  ;;  %v12713_v1 = vrot.slane %v6080_v34, 7  ;;  %v4958_v21 = vadd.f32 %v4932_v12, %v14133_v9  ;;  %v5192_v14 = vpop.f32.mrf.mxu3  ;;  %v6229_v41 = vld [vmem:[#allocation3 + $0x8] sm:$0x1]  ;;  %v3797_v12 = vor.u32 %v3795_v19, %v3794_v56 }
 0x37e   : > { %v5866_v51 = vpop.f32.mrf.mxu1 }
 0x37f   : > { %v6085_v50 = vor.u32 %v6083_v27, %v12713_v1  ;;  %v5935_v6 = vmax.f32 %v5915_v5, 0.0  ;;  %v5216_v10 = vadd.f32 %v5190_v59, %v4958_v21  ;;  %v3798_v21 = vsel %vm10736_vm4, %v3790_v11, %v3797_v12 }
 0x380   : > { %3901 = vst.msk [vmem:[#allocation3 + $0x70] sm:$0xf] %vm3830_vm9, %v3798_v21 }
 0x381   : > { %6172 = vrot.lane.b32.xlu1 %v6085_v50, %s10574_s24  ;;  %v12730_v13 = vpack.c.bf16 %v5935_v6, %v5935_v6  ;;  %v5634_v26 = vadd.f32 %v5608_v18, %v5216_v10  ;;  %v3902_v50 = vld [vmem:[#allocation3 + $0x74] sm:$0x1]  ;;  %v10527_v6 = vld [vmem:[%s14045_s9] ss:$0 sm:$0xff] }
 0x382   : > { %v3903_v18 = vsel %vm12485_vm15, %v3799_v47, %v3902_v50 }
 0x383   : > { %v6141_v7 = vpop.permute.xlu2 %6140  ;;  %v6088_v58 = vshrl.u32 %v12730_v13, 16  ;;  %v5892_v33 = vadd.f32 %v5866_v51, %v5634_v26  ;;  %3904 = vst [vmem:[#allocation3 + $0x74] sm:$0x1] %v3903_v18 }
 0x384   : > { %v6237_v37 = vsel %vm12726_vm3, %v6141_v7, %v6236_v60  ;;  %v4934_v54 = vpop.f32.mrf.mxu2  ;;  %v5610_v38 = vpop.f32.mrf.mxu0 }
 0x385   : > { %6238 = vst [vmem:[#allocation3 + $0x14] sm:$0x1] %v6237_v37  ;;  %v12737_v25 = vrot.slane %v6088_v58, 7  ;;  %v5916_v45 = vadd.f32 %v12447_v40, %v5892_v33  ;;  %v4959_v15 = vadd.f32 %v4934_v54, %v14136_v62  ;;  %v5195_v10 = vpop.f32.mrf.mxu3  ;;  %v14141_v58 = vld [vmem:[#allocation27_spill] sm:$0xff] }
 0x386   : > { %v5868_v5 = vpop.f32.mrf.mxu1 }
 0x387   : > { %v6095_v28 = vrot.slane %v12737_v25, 4  ;;  %v5217_v17 = vadd.f32 %v5192_v14, %v4959_v15  ;;  %v5936_v40 = vmax.f32 %v5916_v45, 0.0  ;;  %v6243_v45 = vld [vmem:[#allocation3 + $0x20] sm:$0x1] }
 0x388   : > { %v6131_v57 = vpop.permute.xlu0 %6130 }
 0x389   : > { %6176 = vrot.lane.b32.xlu2 %v6095_v28, %s10574_s24  ;;  %v6223_v24 = vsel %vm12752_vm2, %v6131_v57, %v6222_v30  ;;  %v5635_v23 = vadd.f32 %v5610_v38, %v5217_v17  ;;  %v5956_v48 = vpack.c.bf16 %v5936_v40, %v5936_v40 }
 0x38a   : > { %6224 = vst [vmem:[#allocation3] sm:$0xf] %v6223_v24 }
 0x38b   : > { %v6135_v34 = vpop.permute.xlu1 %6134  ;;  %v6139_v36 = vpop.permute.xlu2 %6138  ;;  %v5893_v46 = vadd.f32 %v5868_v5, %v5635_v23  ;;  %v6097_v9 = vshrl.u32 %v5956_v48, 16  ;;  %v6100_v43 = vshll.u32 %v5956_v48, 16 }
 0x38c   : > { %v6329_v59 = vld [vmem:[#allocation3 + $0x14] sm:$0x1]  ;;  %v6230_v27 = vsel %vm12726_vm3, %v6135_v34, %v6229_v41  ;;  %6235 = vst.msk [vmem:[#allocation3 + $0x10] sm:$0xf] %vm6220_vm12, %v6139_v36  ;;  %v14143_v34 = vld [vmem:[#allocation29_spill] sm:$0xff] }
 0x38d   : > { %v6330_v29 = vsel %vm12759_vm13, 0, %v6329_v59  ;;  %6231 = vst [vmem:[#allocation3 + $0x8] sm:$0x1] %v6230_v27  ;;  %v5917_v32 = vadd.f32 %v10527_v6, %v5893_v46  ;;  %v6099_v53 = vrot.slane %v6097_v9, 7  ;;  %v5197_v47 = vpop.f32.mrf.mxu3 }
 0x38e   : > { %6331 = vst [vmem:[#allocation3 + $0x14] sm:$0x1] %v6330_v29  ;;  %v5613_v8 = vpop.f32.mrf.mxu0  ;;  %v5871_v56 = vpop.f32.mrf.mxu1 }
 0x38f   : > { %v6102_v55 = vor.u32 %v6100_v43, %v6099_v53  ;;  %v5937_v51 = vmax.f32 %v5917_v32, 0.0  ;;  %v4937_v60 = vpop.f32.mrf.mxu2  ;;  %v6103_v57 = vrot.slane %v6099_v53, 4 }
 0x390   : > { %v6133_v26 = vpop.permute.xlu0 %6132  ;;  %v4960_v22 = vadd.f32 %v4937_v60, %v14141_v58 }
 0x391   : > { %v6295_v7 = vld [vmem:[#allocation3] sm:$0x1]  ;;  %6226 = vst.msk [vmem:[#allocation3 + $0x4] sm:$0xf] %vm6220_vm12, %v6133_v26  ;;  %6178 = vrot.lane.b32.xlu0 %v6102_v55, %s10574_s24  ;;  %v5957_v49 = vpack.c.bf16 %v5937_v51, %v5937_v51  ;;  %v6239_v55 = vld [vmem:[#allocation3 + $0x18] sm:$0xf] }
 0x392   : > { %v6296_v31 = vsel %vm10925_vm10, 0, %v6295_v7  ;;  %v5218_v62 = vadd.f32 %v5195_v10, %v4960_v22  ;;  %v6250_v26 = vld [vmem:[#allocation3 + $0x2c] sm:$0x1] }
 0x393   : > { %v6137_v37 = vpop.permute.xlu1 %6136  ;;  %v6147_v33 = vpop.permute.xlu2 %6146  ;;  %6297 = vst [vmem:[#allocation3] sm:$0x1] %v6296_v31  ;;  %v6105_v28 = vshrl.u32 %v5957_v49, 16  ;;  %v6108_v19 = vshll.u32 %v5957_v49, 16 }
 0x394   : > { %v6326_v54 = vld [vmem:[#allocation3 + $0x8] sm:$0x1]  ;;  %v6233_v42 = vsel %vm12752_vm2, %v6137_v37, %v6232_v39  ;;  %v6244_v15 = vsel %vm12726_vm3, %v6147_v33, %v6243_v45  ;;  %v5636_v17 = vadd.f32 %v5613_v8, %v5218_v62 }
 0x395   : > { %v6327_v14 = vsel %vm12759_vm13, 0, %v6326_v54  ;;  %6234 = vst [vmem:[#allocation3 + $0xc] sm:$0xf] %v6233_v42  ;;  %v6107_v40 = vrot.slane %v6105_v28, 7  ;;  %v6069_v54 = vrot.slane %v12685_v44, 4 }
 0x396   : > { %6328 = vst [vmem:[#allocation3 + $0x8] sm:$0x1] %v6327_v14  ;;  %v5894_v38 = vadd.f32 %v5871_v56, %v5636_v17  ;;  %v5615_v27 = vpop.f32.mrf.mxu0  ;;  %v5873_v21 = vpop.f32.mrf.mxu1  ;;  %v6091_v56 = vshll.u32 %v12730_v13, 16 }
 0x397   : > { %6245 = vst [vmem:[#allocation3 + $0x20] sm:$0x1] %v6244_v15  ;;  %v6112_v30 = vrot.slane %v6107_v40, 4  ;;  %v6110_v24 = vor.u32 %v6108_v19, %v6107_v40  ;;  %v4939_v23 = vpop.f32.mrf.mxu2  ;;  %v6246_v40 = vld [vmem:[#allocation3 + $0x24] sm:$0xf] }
 0x398   : > { %v5918_v41 = vadd.f32 %v10527_v6, %v5894_v38  ;;  %v4961_v36 = vadd.f32 %v4939_v23, %v14143_v34  ;;  %v6093_v17 = vor.u32 %v6091_v56, %v12737_v25  ;;  %v6257_v38 = vld [vmem:[#allocation3 + $0x38] sm:$0x1] }
 0x399   : > { %6182 = vrot.lane.b32.xlu1 %v6112_v30, %s10574_s24  ;;  %v6111_v48 = vsel %vm10736_vm4, %v6103_v57, %v6110_v24  ;;  %v6086_v57 = vrot.slane %v12713_v1, 4 }
 0x39a   : > { %v5219_v5 = vadd.f32 %v5197_v47, %v4961_v36  ;;  %v5938_v59 = vmax.f32 %v5918_v41, 0.0 }
 0x39b   : > { %v6094_v41 = vsel %vm10736_vm4, %v6086_v57, %v6093_v17 }
 0x39c   : > { %v6298_v11 = vld [vmem:[#allocation3 + $0xc] sm:$0x1]  ;;  %v5637_v46 = vadd.f32 %v5615_v27, %v5219_v5  ;;  %v5958_v9 = vpack.c.bf16 %v5938_v59, %v5938_v59  ;;  %v6267_v5 = vld [vmem:[#allocation3 + $0x48] sm:$0xf] }
 0x39d   : > { %v6299_v12 = vsel %vm10925_vm10, 0, %v6298_v11 }
 0x39e   : > { %v6332_v29 = vld [vmem:[#allocation3 + $0x20] sm:$0x1]  ;;  %6300 = vst [vmem:[#allocation3 + $0xc] sm:$0x1] %v6299_v12  ;;  %v5895_v32 = vadd.f32 %v5873_v21, %v5637_v46  ;;  %v6114_v53 = vshrl.u32 %v5958_v9, 16  ;;  %v6117_v10 = vshll.u32 %v5958_v9, 16 }
 0x39f   : > { %v6333_v50 = vsel %vm12759_vm13, 0, %v6332_v29  ;;  %v6260_v46 = vld [vmem:[#allocation3 + $0x3c] sm:$0xf] }
 0x3a0   : > { %6334 = vst [vmem:[#allocation3 + $0x20] sm:$0x1] %v6333_v50  ;;  %v5919_v43 = vadd.f32 %v10527_v6, %v5895_v32  ;;  %v6116_v18 = vrot.slane %v6114_v53, 7  ;;  %v6264_v53 = vld [vmem:[#allocation3 + $0x44] sm:$0x1] }
 0x3a1   : > { %6162 = vrot.lane.b32.xlu1 %v12748_v35, %s10574_s24  ;;  %v6074_v35 = vshll.u32 %v12696_v3, 16 }
 0x3a2   : > { %v6119_v22 = vor.u32 %v6117_v10, %v6116_v18  ;;  %v5939_v39 = vmax.f32 %v5919_v43, 0.0  ;;  %v6120_v45 = vrot.slane %v6116_v18, 4 }
 0x3a3   : > { %v6143_v51 = vpop.permute.xlu0 %6142  ;;  %v6153_v60 = vpop.permute.xlu2 %6152  ;;  %v6076_v33 = vor.u32 %v6074_v35, %v12703_v0 }
 0x3a4   : > { %v6240_v7 = vsel %vm12752_vm2, %v6143_v51, %v6239_v55  ;;  %v6251_v58 = vsel %vm12726_vm3, %v6153_v60, %v6250_v26  ;;  %6184 = vrot.lane.b32.xlu2 %v6119_v22, %s10574_s24  ;;  %v5959_v6 = vpack.c.bf16 %v5939_v39, %v5939_v39  ;;  %v6278_v51 = vld [vmem:[#allocation3 + $0x5c] sm:$0x1]  ;;  %v6271_v22 = vld [vmem:[#allocation3 + $0x50] sm:$0x1] }
 0x3a5   : > { %6241 = vst [vmem:[#allocation3 + $0x18] sm:$0xf] %v6240_v7  ;;  %v6077_v28 = vsel %vm10736_vm4, %v6069_v54, %v6076_v33  ;;  %v6274_v33 = vld [vmem:[#allocation3 + $0x54] sm:$0xf] }
 0x3a6   : > { %6252 = vst [vmem:[#allocation3 + $0x2c] sm:$0x1] %v6251_v58  ;;  %v6122_v37 = vshrl.u32 %v5959_v6, 16  ;;  %v6125_v31 = vshll.u32 %v5959_v6, 16 }
 0x3a8   : > { %v6124_v49 = vrot.slane %v6122_v37, 7 }
 0x3a9   : > { %6180 = vrot.lane.b32.xlu1 %v6111_v48, %s10574_s24 }
 0x3aa   : > { %v6129_v15 = vrot.slane %v6124_v49, 4  ;;  %v6127_v3 = vor.u32 %v6125_v31, %v6124_v49 }
 0x3ac   : > { %v6301_v8 = vld [vmem:[#allocation3 + $0x18] sm:$0x1]  ;;  %v6145_v42 = vpop.permute.xlu1 %6144  ;;  %6168 = vrot.lane.b32.xlu2 %v6077_v28, %s10574_s24  ;;  %6188 = vrot.lane.b32.xlu0 %v6129_v15, %s10574_s24  ;;  %v6128_v44 = vsel %vm10736_vm4, %v6120_v45, %v6127_v3  ;;  %v6281_v3 = vld [vmem:[#allocation3 + $0x60] sm:$0xf] }
 0x3ad   : > { %v6302_v14 = vsel %vm10925_vm10, 0, %v6301_v8  ;;  %v6335_v62 = vld [vmem:[#allocation3 + $0x2c] sm:$0x1]  ;;  %6242 = vst.msk [vmem:[#allocation3 + $0x1c] sm:$0xf] %vm6220_vm12, %v6145_v42 }
 0x3ae   : > { %6303 = vst [vmem:[#allocation3 + $0x18] sm:$0x1] %v6302_v14  ;;  %v6336_v0 = vsel %vm12759_vm13, 0, %v6335_v62  ;;  %v6288_v14 = vld [vmem:[#allocation3 + $0x6c] sm:$0xf] }
 0x3af   : > { %6337 = vst [vmem:[#allocation3 + $0x2c] sm:$0x1] %v6336_v0 }
 0x3b3   : > { %v6149_v19 = vpop.permute.xlu0 %6148  ;;  %v6159_v30 = vpop.permute.xlu2 %6158 }
 0x3b4   : > { %v6247_v24 = vsel %vm12752_vm2, %v6149_v19, %v6246_v40  ;;  %v6258_v23 = vsel %vm12726_vm3, %v6159_v30, %v6257_v38  ;;  %6174 = vrot.lane.b32.xlu0 %v6094_v41, %s10574_s24  ;;  %6186 = vrot.lane.b32.xlu2 %v6128_v44, %s10574_s24  ;;  %v6285_v40 = vld [vmem:[#allocation3 + $0x68] sm:$0x1] }
 0x3b5   : > { %6248 = vst [vmem:[#allocation3 + $0x24] sm:$0xf] %v6247_v24 }
 0x3b6   : > { %6259 = vst [vmem:[#allocation3 + $0x38] sm:$0x1] %v6258_v23 }
 0x3bc   : > { %v6304_v13 = vld [vmem:[#allocation3 + $0x24] sm:$0x1]  ;;  %v6151_v25 = vpop.permute.xlu1 %6150 }
 0x3bd   : > { %v6305_v1 = vsel %vm10925_vm10, 0, %v6304_v13  ;;  %v6338_v34 = vld [vmem:[#allocation3 + $0x38] sm:$0x1]  ;;  %6249 = vst.msk [vmem:[#allocation3 + $0x28] sm:$0xf] %vm6220_vm12, %v6151_v25 }
 0x3be   : > { %6306 = vst [vmem:[#allocation3 + $0x24] sm:$0x1] %v6305_v1  ;;  %v6339_v36 = vsel %vm12759_vm13, 0, %v6338_v34  ;;  %v6292_v1 = vld [vmem:[#allocation3 + $0x74] sm:$0x1] }
 0x3bf   : > { %6340 = vst [vmem:[#allocation3 + $0x38] sm:$0x1] %v6339_v36 }
 0x3c3   : > { %v6155_v48 = vpop.permute.xlu0 %6154 }
 0x3c4   : > { %v6254_v47 = vsel %vm12752_vm2, %v6155_v48, %v6253_v20 }
 0x3c5   : > { %6255 = vst [vmem:[#allocation3 + $0x30] sm:$0xf] %v6254_v47 }
 0x3cb   : > { %v6167_v59 = vpop.permute.xlu2 %6166 }
 0x3cc   : > { %v6307_v27 = vld [vmem:[#allocation3 + $0x30] sm:$0x1]  ;;  %v6268_v11 = vsel %vm12752_vm2, %v6167_v59, %v6267_v5  ;;  %v6157_v12 = vpop.permute.xlu1 %6156 }
 0x3cd   : > { %v6308_v29 = vsel %vm10925_vm10, 0, %v6307_v27  ;;  %6269 = vst [vmem:[#allocation3 + $0x48] sm:$0xf] %v6268_v11 }
 0x3ce   : > { %6309 = vst [vmem:[#allocation3 + $0x30] sm:$0x1] %v6308_v29 }
 0x3cf   : > { %6256 = vst.msk [vmem:[#allocation3 + $0x34] sm:$0xf] %vm6220_vm12, %v6157_v12 }
 0x3d3   : > { %v6161_v9 = vpop.permute.xlu0 %6160 }
 0x3d4   : > { %v6313_v21 = vld [vmem:[#allocation3 + $0x48] sm:$0x1]  ;;  %v6261_v50 = vsel %vm12752_vm2, %v6161_v9, %v6260_v46 }
 0x3d5   : > { %v6314_v32 = vsel %vm10925_vm10, 0, %v6313_v21  ;;  %6262 = vst [vmem:[#allocation3 + $0x3c] sm:$0xf] %v6261_v50 }
 0x3d6   : > { %6315 = vst [vmem:[#allocation3 + $0x48] sm:$0x1] %v6314_v32 }
 0x3db   : > { %v6165_v43 = vpop.permute.xlu1 %6164 }
 0x3dc   : > { %v6310_v18 = vld [vmem:[#allocation3 + $0x3c] sm:$0x1]  ;;  %v6265_v10 = vsel %vm12726_vm3, %v6165_v43, %v6264_v53 }
 0x3dd   : > { %v6311_v55 = vsel %vm10925_vm10, 0, %v6310_v18  ;;  %6266 = vst [vmem:[#allocation3 + $0x44] sm:$0x1] %v6265_v10 }
 0x3de   : > { %6312 = vst [vmem:[#allocation3 + $0x3c] sm:$0x1] %v6311_v55 }
 0x3e3   : > { %v6177_v26 = vpop.permute.xlu2 %6176 }
 0x3e4   : > { %v6341_v60 = vld [vmem:[#allocation3 + $0x44] sm:$0x1]  ;;  %v6279_v7 = vsel %vm12726_vm3, %v6177_v26, %v6278_v51 }
 0x3e5   : > { %v6342_v58 = vsel %vm12759_vm13, 0, %v6341_v60  ;;  %6280 = vst [vmem:[#allocation3 + $0x5c] sm:$0x1] %v6279_v7 }
 0x3e6   : > { %6343 = vst [vmem:[#allocation3 + $0x44] sm:$0x1] %v6342_v58 }
 0x3eb   : > { %v6171_v39 = vpop.permute.xlu0 %6170 }
 0x3ec   : > { %v6347_v6 = vld [vmem:[#allocation3 + $0x5c] sm:$0x1]  ;;  %v6272_v35 = vsel %vm12726_vm3, %v6171_v39, %v6271_v22 }
 0x3ed   : > { %v6348_v37 = vsel %vm12759_vm13, 0, %v6347_v6  ;;  %6273 = vst [vmem:[#allocation3 + $0x50] sm:$0x1] %v6272_v35 }
 0x3ee   : > { %6349 = vst [vmem:[#allocation3 + $0x5c] sm:$0x1] %v6348_v37 }
 0x3f3   : > { %v6173_v49 = vpop.permute.xlu1 %6172 }
 0x3f4   : > { %v6344_v31 = vld [vmem:[#allocation3 + $0x50] sm:$0x1]  ;;  %v6275_v8 = vsel %vm12752_vm2, %v6173_v49, %v6274_v33 }
 0x3f5   : > { %v6345_v54 = vsel %vm12759_vm13, 0, %v6344_v31  ;;  %6276 = vst [vmem:[#allocation3 + $0x54] sm:$0xf] %v6275_v8 }
 0x3f6   : > { %6346 = vst [vmem:[#allocation3 + $0x50] sm:$0x1] %v6345_v54 }
 0x3fc   : > { %v6316_v42 = vld [vmem:[#allocation3 + $0x54] sm:$0x1] }
 0x3fd   : > { %v6317_v45 = vsel %vm10925_vm10, 0, %v6316_v42 }
 0x3fe   : > { %6318 = vst [vmem:[#allocation3 + $0x54] sm:$0x1] %v6317_v45  ;;  %v6185_v62 = vpop.permute.xlu2 %6184 }
 0x3ff   : > { %v6289_v15 = vsel %vm12752_vm2, %v6185_v62, %v6288_v14 }
 0x400   : > { %6290 = vst [vmem:[#allocation3 + $0x6c] sm:$0xf] %v6289_v15 }
 0x403   : > { %v6179_v0 = vpop.permute.xlu0 %6178 }
 0x404   : > { %v6282_v28 = vsel %vm12752_vm2, %v6179_v0, %v6281_v3 }
 0x405   : > { %6283 = vst [vmem:[#allocation3 + $0x60] sm:$0xf] %v6282_v28 }
 0x406   : > { %v6169_v44 = vpop.permute.xlu2 %6168 }
 0x407   : > { %v6322_v56 = vld [vmem:[#allocation3 + $0x6c] sm:$0x1]  ;;  %6270 = vst.msk [vmem:[#allocation3 + $0x4c] sm:$0xf] %vm6220_vm12, %v6169_v44 }
 0x408   : > { %v6323_v17 = vsel %vm10925_vm10, 0, %v6322_v56 }
 0x409   : > { %6324 = vst [vmem:[#allocation3 + $0x6c] sm:$0x1] %v6323_v17 }
 0x40b   : > { %v6183_v19 = vpop.permute.xlu1 %6182 }
 0x40c   : > { %v6319_v38 = vld [vmem:[#allocation3 + $0x60] sm:$0x1]  ;;  %v6286_v30 = vsel %vm12726_vm3, %v6183_v19, %v6285_v40 }
 0x40d   : > { %v6320_v57 = vsel %vm10925_vm10, 0, %v6319_v38  ;;  %6287 = vst [vmem:[#allocation3 + $0x68] sm:$0x1] %v6286_v30 }
 0x40e   : > { %6321 = vst [vmem:[#allocation3 + $0x60] sm:$0x1] %v6320_v57  ;;  %v6187_v4 = vpop.permute.xlu2 %6186 }
 0x40f   : > { %6291 = vst.msk [vmem:[#allocation3 + $0x70] sm:$0xf] %vm6220_vm12, %v6187_v4 }
 0x413   : > { %v6163_v24 = vpop.permute.xlu1 %6162 }
 0x414   : > { %v6350_v23 = vld [vmem:[#allocation3 + $0x68] sm:$0x1]  ;;  %6263 = vst.msk [vmem:[#allocation3 + $0x40] sm:$0xf] %vm6220_vm12, %v6163_v24 }
 0x415   : > { %v6351_v41 = vsel %vm12759_vm13, 0, %v6350_v23 }
 0x416   : > { %6352 = vst [vmem:[#allocation3 + $0x68] sm:$0x1] %v6351_v41 }
 0x41b   : > { %v6181_v13 = vpop.permute.xlu1 %6180 }
 0x41c   : > { %6284 = vst.msk [vmem:[#allocation3 + $0x64] sm:$0xf] %vm6220_vm12, %v6181_v13 }
 0x41e   : > { %v6189_v25 = vpop.permute.xlu0 %6188 }
 0x41f   : > { %v6293_v61 = vsel %vm12726_vm3, %v6189_v25, %v6292_v1 }
 0x420   : > { %6294 = vst [vmem:[#allocation3 + $0x74] sm:$0x1] %v6293_v61 }
 0x425   : > { %6358 = sbr.rel (%p9825_p13) target bundleno = 1070 (0x42e), region = 80 }
 0x426   : > { %v6175_v34 = vpop.permute.xlu0 %6174 }
 0x427   : > { %v6353_v36 = vld [vmem:[#allocation3 + $0x74] sm:$0x1]  ;;  %6277 = vst.msk [vmem:[#allocation3 + $0x58] sm:$0xf] %vm6220_vm12, %v6175_v34 }
 0x428   : > { %v6354_v20 = vsel %vm12759_vm13, 0, %v6353_v36 }
 0x429   : > { %6355 = vst [vmem:[#allocation3 + $0x74] sm:$0x1] %v6354_v20 }
 0x42a   : > { %v10575_v48 = vmov 0  }
 0x42b   : > { %6359 = vst.msk [vmem:[#allocation3] sm:$0xf] %vm900_vm5, %v10575_v48 }
 0x42c   : > { %6360 = vst.msk [vmem:[#allocation3 + $0x4] sm:$0xf] %vm900_vm5, %v10575_v48 }
 0x42d   : > { %6362 = vst.msk [vmem:[#allocation3 + $0x8] sm:$0x1] %vm908_vm8, %v10575_v48 }
 0x42e PF: > { %6365 = sbr.rel (%p9826_p0) target bundleno = 1079 (0x437), region = 84 }
 0x433   : > { %v10576_v52 = vmov 0  }
 0x434   : > { %6367 = vst.msk [vmem:[#allocation3 + $0x6c] sm:$0xf] %vm900_vm5, %v10576_v52 }
 0x435   : > { %6368 = vst.msk [vmem:[#allocation3 + $0x70] sm:$0xf] %vm900_vm5, %v10576_v52 }
 0x436   : > { %6370 = vst.msk [vmem:[#allocation3 + $0x74] sm:$0x1] %vm908_vm8, %v10576_v52 }
 0x437 PF: > { %v6387_v63 = vld [vmem:[%s14046_s10] sm:$0xf]  ;;  %v10448_v47 = vld [vmem:[#allocation3] sm:$0xff]  ;;  %v10169_v5 = vld [vmem:[%s14046_s10 + $0x4] sm:$0xf] }
 0x438   : > { %v6755_v59 = vsel %vm822_vm0, %v6387_v63, 0  ;;  %v6639_v27 = vsel %vm822_vm0, %v10169_v5, 0  ;;  %v10218_v11 = vld [vmem:[%s14046_s10 + $0x8] sm:$0xf]  ;;  %v10259_v12 = vld [vmem:[%s14046_s10 + $0xc] sm:$0xf] }
 0x439   : > { %6764 = vmatpush.bf16.msra.mxu3 %v6755_v59  ;;  %6648 = vmatpush.bf16.msra.mxu2 %v6639_v27  ;;  %v6890_v29 = vsel %vm822_vm0, %v10218_v11, 0  ;;  %v7224_v46 = vsel %vm822_vm0, %v10259_v12, 0  ;;  %v6371_v9 = vld [vmem:[#allocation3] sm:$0xf]  ;;  %v6372_v21 = vld [vmem:[#allocation3 + $0x4] sm:$0xf] }
 0x43a   : > { %6899 = vmatpush.bf16.msra.mxu0 %v6890_v29  ;;  %7233 = vmatpush.bf16.msra.mxu1 %v7224_v46  ;;  %v6388_v50 = vld [vmem:[#allocation3 + $0x8] sm:$0x1]  ;;  %v6399_v32 = vshrl.u32 %v6371_v9, 16  ;;  %v6402_v53 = vshll.u32 %v6371_v9, 16  ;;  %v6408_v43 = vshll.u32 %v6372_v21, 16  ;;  %v6412_v18 = vshrl.u32 %v6372_v21, 16 }
 0x43b   : > { %v6418_v10 = vshll.u32 %v6388_v50, 16  ;;  %v10268_v55 = vld [vmem:[%s14046_s10 + $0x10] sm:$0xf]  ;;  %v10456_v51 = vld [vmem:[#allocation3 + $0xc] sm:$0xff]  ;;  %v6959_v37 = vld [vmem:[#allocation3 + $0x14] sm:$0x1] }
 0x43c   : > { %v6957_v26 = vld [vmem:[#allocation3 + $0xc] sm:$0xf]  ;;  %10210 = vmatmul.msk.bf16.vlgmr.msra.gmra.mxu3 %vm803_vm1, %v10448_v47  ;;  %v6401_v60 = vrot.slane %v6399_v32, 4  ;;  %v6404_v7 = vrot.slane %v6402_v53, 5  ;;  %v6410_v58 = vrot.slane %v6408_v43, 5  ;;  %v6414_v22 = vrot.slane %v6412_v18, 4 }
 0x43d   : > { %v6958_v39 = vld [vmem:[#allocation3 + $0x10] sm:$0xf]  ;;  %v6420_v6 = vrot.slane %v6418_v10, 5  ;;  %v7375_v35 = vsel %vm822_vm0, %v10268_v55, 0  ;;  %10251 = vmatmul.msk.bf16.vlgmr.msra.gmra.mxu0 %vm803_vm1, %v10456_v51  ;;  %v6984_v33 = vshrl.u32 %v6957_v26, 16  ;;  %v6987_v49 = vshll.u32 %v6957_v26, 16 }
 0x43e   : > { %v6405_v31 = vor.u32 %v6404_v7, %v6401_v60  ;;  %v6415_v8 = vor.u32 %v6414_v22, %v6410_v58  ;;  %7384 = vmatpush.bf16.msrb.mxu2 %v7375_v35  ;;  %v6993_v54 = vshll.u32 %v6958_v39, 16  ;;  %v6997_v42 = vshrl.u32 %v6958_v39, 16  ;;  %v10309_v45 = vld [vmem:[%s14046_s10 + $0x14] sm:$0xf]  ;;  %v10319_v0 = vld [vmem:[%s14046_s10 + $0x1c] sm:$0xf] }
 0x43f   : > { %v6986_v14 = vrot.slane %v6984_v33, 4  ;;  %v6989_v62 = vrot.slane %v6987_v49, 5  ;;  %v7003_v15 = vshll.u32 %v6959_v37, 16  ;;  %v7709_v3 = vsel %vm822_vm0, %v10309_v45, 0  ;;  %v10318_v40 = vld [vmem:[%s14046_s10 + $0x18] sm:$0xf] }
 0x440   : > { %v6406_v28 = vrot.slane %v6405_v31, 4  ;;  %v6416_v44 = vrot.slane %v6415_v8, 4  ;;  %v6995_v56 = vrot.slane %v6993_v54, 5  ;;  %v6999_v17 = vrot.slane %v6997_v42, 4  ;;  %7718 = vmatpush.bf16.msrb.mxu3 %v7709_v3  ;;  %v6373_v4 = vld [vmem:[#allocation3 + $0xc] sm:$0xf] }
 0x441   : > { %v6990_v19 = vor.u32 %v6989_v62, %v6986_v14  ;;  %v7005_v38 = vrot.slane %v7003_v15, 5  ;;  %v7994_v30 = vsel %vm822_vm0, %v10319_v0, 0  ;;  %v8286_v57 = vsel %vm822_vm0, %v10318_v40, 0  ;;  %v6374_v13 = vld [vmem:[#allocation3 + $0x10] sm:$0xf]  ;;  %v10457_v35 = vld [vmem:[#allocation3 + $0x18] sm:$0xff] }
 0x442   : > { %v6411_v24 = vsel %vm11340_vm14, %v6406_v28, %v6410_v58  ;;  %v6421_v23 = vsel %vm11340_vm14, %v6416_v44, %v6420_v6  ;;  %v7000_v41 = vor.u32 %v6999_v17, %v6995_v56  ;;  %8003 = vmatpush.bf16.msrb.mxu0 %v7994_v30  ;;  %8295 = vmatpush.bf16.msrb.mxu1 %v8286_v57  ;;  %v6389_v25 = vld [vmem:[#allocation3 + $0x14] sm:$0x1]  ;;  %v6423_v1 = vshrl.u32 %v6373_v4, 16  ;;  %v6960_v5 = vld [vmem:[#allocation3 + $0x18] sm:$0xf]  ;;  %v10449_v51 = vld [vmem:[#allocation3 + $0xc] sm:$0xff] }
 0x443   : > { %v6590_v61 = vunpack.c.l.b16 %v6411_v24  ;;  %v6591_v34 = vunpack.c.l.b16 %v6421_v23  ;;  %v6991_v36 = vrot.slane %v6990_v19, 4  ;;  %v6426_v20 = vshll.u32 %v6373_v4, 16  ;;  %v6961_v29 = vld [vmem:[#allocation3 + $0x1c] sm:$0xf]  ;;  %v6962_v32 = vld [vmem:[#allocation3 + $0x20] sm:$0x1] }
 0x444   : > { %v7001_v48 = vrot.slane %v7000_v41, 4  ;;  %v6425_v52 = vrot.slane %v6423_v1, 4  ;;  %v6432_v63 = vshll.u32 %v6374_v13, 16  ;;  %v6436_v47 = vshrl.u32 %v6374_v13, 16  ;;  %v6375_v55 = vld [vmem:[#allocation3 + $0x18] sm:$0xf] }
 0x445   : > { %v6606_v59 = vpack.c.b16 %v6591_v34, %v6590_v61  ;;  %v6996_v27 = vsel %vm11340_vm14, %v6991_v36, %v6995_v56  ;;  %v6428_v11 = vrot.slane %v6426_v20, 5  ;;  %v6442_v12 = vshll.u32 %v6389_v25, 16  ;;  %v6376_v22 = vld [vmem:[#allocation3 + $0x1c] sm:$0xf]  ;;  %v6963_v28 = vld [vmem:[#allocation3 + $0x24] sm:$0xf] }
 0x446   : > { %v7006_v46 = vsel %vm11340_vm14, %v7001_v48, %v7005_v38  ;;  %v7175_v9 = vunpack.c.l.b16 %v6996_v27  ;;  %v6434_v21 = vrot.slane %v6432_v63, 5  ;;  %v6438_v50 = vrot.slane %v6436_v47, 4  ;;  %v6390_v30 = vld [vmem:[#allocation3 + $0x20] sm:$0x1]  ;;  %v6964_v23 = vld [vmem:[#allocation3 + $0x28] sm:$0xf] }
 0x447   : > { %10170 = vmatmul.msk.bf16.vlgmr.msra.gmra.mxu2 %vm803_vm1, %v6606_v59  ;;  %v7176_v53 = vunpack.c.l.b16 %v7006_v46  ;;  %v6429_v43 = vor.u32 %v6428_v11, %v6425_v52  ;;  %v6444_v18 = vrot.slane %v6442_v12, 5  ;;  %v7008_v10 = vshrl.u32 %v6960_v5, 16  ;;  %v6965_v12 = vld [vmem:[#allocation3 + $0x2c] sm:$0x1] }
 0x448   : > { %v6439_v26 = vor.u32 %v6438_v50, %v6434_v21  ;;  %v7011_v60 = vshll.u32 %v6960_v5, 16  ;;  %v7017_v7 = vshll.u32 %v6961_v29, 16  ;;  %v7021_v58 = vshrl.u32 %v6961_v29, 16 }
 0x449   : > { %v7191_v39 = vpack.c.b16 %v7176_v53, %v7175_v9  ;;  %v6430_v6 = vrot.slane %v6429_v43, 4  ;;  %v7010_v37 = vrot.slane %v7008_v10, 4  ;;  %v7027_v33 = vshll.u32 %v6962_v32, 16  ;;  %v6377_v53 = vld [vmem:[#allocation3 + $0x24] sm:$0xf]  ;;  %v10450_v43 = vld [vmem:[#allocation3 + $0x18] sm:$0xff] }
 0x44a   : > { %v6440_v49 = vrot.slane %v6439_v26, 4  ;;  %v7013_v31 = vrot.slane %v7011_v60, 5  ;;  %v7019_v8 = vrot.slane %v7017_v7, 5  ;;  %v7023_v54 = vrot.slane %v7021_v58, 4 }
 0x44b   : > { %10260 = vmatmul.msk.bf16.vlgmr.msra.gmra.mxu1 %vm803_vm1, %v7191_v39  ;;  %v6435_v42 = vsel %vm11340_vm14, %v6430_v6, %v6434_v21  ;;  %v6447_v45 = vshrl.u32 %v6375_v55, 16  ;;  %v6450_v14 = vshll.u32 %v6375_v55, 16  ;;  %v7029_v0 = vrot.slane %v7027_v33, 5  ;;  %v6378_v55 = vld [vmem:[#allocation3 + $0x28] sm:$0xf] }
 0x44c   : > { %10211 = vmatmul.msk.bf16.gmra.mxu3 %vm803_vm1, %v10449_v51  ;;  %v6445_v62 = vsel %vm11340_vm14, %v6440_v49, %v6444_v18  ;;  %v7014_v15 = vor.u32 %v7013_v31, %v7010_v37  ;;  %v7024_v3 = vor.u32 %v7023_v54, %v7019_v8  ;;  %v6592_v44 = vunpack.c.l.b16 %v6435_v42  ;;  %v10458_v51 = vld [vmem:[#allocation3 + $0x24] sm:$0xff]  ;;  %v6966_v33 = vld [vmem:[#allocation3 + $0x30] sm:$0xf]  ;;  %v6967_v49 = vld [vmem:[#allocation3 + $0x34] sm:$0xf] }
 0x44d   : > { %v6593_v56 = vunpack.c.l.b16 %v6445_v62  ;;  %10252 = vmatmul.msk.bf16.gmra.mxu0 %vm803_vm1, %v10457_v35  ;;  %v6449_v17 = vrot.slane %v6447_v45, 4  ;;  %v6456_v40 = vshll.u32 %v6376_v22, 16  ;;  %v6452_v57 = vrot.slane %v6450_v14, 5  ;;  %v6391_v14 = vld [vmem:[#allocation3 + $0x2c] sm:$0x1] }
 0x44e   : > { %v7015_v19 = vrot.slane %v7014_v15, 4  ;;  %v7025_v38 = vrot.slane %v7024_v3, 4  ;;  %v6460_v4 = vshrl.u32 %v6376_v22, 16  ;;  %v7032_v41 = vshrl.u32 %v6963_v28, 16 }
 0x44f   : > { %v6458_v24 = vrot.slane %v6456_v40, 5  ;;  %v6607_v61 = vpack.c.b16 %v6593_v56, %v6592_v44  ;;  %v6466_v34 = vshll.u32 %v6390_v30, 16  ;;  %v6453_v36 = vor.u32 %v6452_v57, %v6449_v17 }
 0x450   : > { %v7020_v13 = vsel %vm11340_vm14, %v7015_v19, %v7019_v8  ;;  %v7030_v25 = vsel %vm11340_vm14, %v7025_v38, %v7029_v0  ;;  %v6462_v1 = vrot.slane %v6460_v4, 4  ;;  %v7035_v20 = vshll.u32 %v6963_v28, 16 }
 0x451   : > { %v7041_v48 = vshll.u32 %v6964_v23, 16  ;;  %v7045_v52 = vshrl.u32 %v6964_v23, 16  ;;  %v7177_v63 = vunpack.c.l.b16 %v7020_v13  ;;  %v7178_v47 = vunpack.c.l.b16 %v7030_v25  ;;  %v6968_v13 = vld [vmem:[#allocation3 + $0x38] sm:$0x1] }
 0x452   : > { %v6463_v5 = vor.u32 %v6462_v1, %v6458_v24  ;;  %v7034_v59 = vrot.slane %v7032_v41, 4  ;;  %v7037_v27 = vrot.slane %v7035_v20, 5  ;;  %v6454_v46 = vrot.slane %v6453_v36, 4  ;;  %v6380_v36 = vld [vmem:[#allocation3 + $0x34] sm:$0xf]  ;;  %v10451_v20 = vld [vmem:[#allocation3 + $0x24] sm:$0xff] }
 0x453   : > { %v7043_v11 = vrot.slane %v7041_v48, 5  ;;  %v7047_v29 = vrot.slane %v7045_v52, 4  ;;  %v7192_v9 = vpack.c.b16 %v7178_v47, %v7177_v63  ;;  %v6468_v50 = vrot.slane %v6466_v34, 5  ;;  %v6379_v34 = vld [vmem:[#allocation3 + $0x30] sm:$0xf] }
 0x454   : > { %v6464_v21 = vrot.slane %v6463_v5, 4  ;;  %v7038_v32 = vor.u32 %v7037_v27, %v7034_v59  ;;  %v7051_v10 = vshll.u32 %v6965_v12, 16  ;;  %v6459_v26 = vsel %vm11340_vm14, %v6454_v46, %v6458_v24  ;;  %v10459_v5 = vld [vmem:[#allocation3 + $0x30] sm:$0xff]  ;;  %v6969_v59 = vld [vmem:[#allocation3 + $0x3c] sm:$0xf] }
 0x455   : > { %v7048_v18 = vor.u32 %v7047_v29, %v7043_v11  ;;  %v6471_v60 = vshrl.u32 %v6377_v53, 16  ;;  %v6474_v7 = vshll.u32 %v6377_v53, 16  ;;  %v6480_v39 = vshll.u32 %v6378_v55, 16  ;;  %v6970_v46 = vld [vmem:[#allocation3 + $0x40] sm:$0xf] }
 0x456   : > { %v6469_v58 = vsel %vm11340_vm14, %v6464_v21, %v6468_v50  ;;  %v7039_v22 = vrot.slane %v7038_v32, 4  ;;  %v6484_v6 = vshrl.u32 %v6378_v55, 16  ;;  %v7053_v37 = vrot.slane %v7051_v10, 5 }
 0x457   : > { %10171 = vmatmul.msk.bf16.gmra.mxu2 %vm803_vm1, %v6607_v61  ;;  %v7049_v35 = vrot.slane %v7048_v18, 4  ;;  %v6594_v31 = vunpack.c.l.b16 %v6459_v26  ;;  %v6595_v8 = vunpack.c.l.b16 %v6469_v58  ;;  %v6473_v54 = vrot.slane %v6471_v60, 4 }
 0x458   : > { %v6476_v42 = vrot.slane %v6474_v7, 5  ;;  %v7044_v45 = vsel %vm11340_vm14, %v7039_v22, %v7043_v11  ;;  %v6482_v62 = vrot.slane %v6480_v39, 5  ;;  %v6486_v15 = vrot.slane %v6484_v6, 4  ;;  %v6392_v39 = vld [vmem:[#allocation3 + $0x38] sm:$0x1] }
 0x459   : > { %v7056_v3 = vshrl.u32 %v6966_v33, 16  ;;  %v7054_v0 = vsel %vm11340_vm14, %v7049_v35, %v7053_v37  ;;  %v7059_v28 = vshll.u32 %v6966_v33, 16  ;;  %v7065_v44 = vshll.u32 %v6967_v49, 16 }
 0x45a   : > { %v7069_v56 = vshrl.u32 %v6967_v49, 16  ;;  %v6608_v17 = vpack.c.b16 %v6595_v8, %v6594_v31  ;;  %v6490_v40 = vshll.u32 %v6391_v14, 16  ;;  %v7179_v19 = vunpack.c.l.b16 %v7044_v45  ;;  %v6971_v45 = vld [vmem:[#allocation3 + $0x44] sm:$0x1] }
 0x45b   : > { %10261 = vmatmul.msk.bf16.gmra.mxu1 %vm803_vm1, %v7192_v9  ;;  %v7180_v38 = vunpack.c.l.b16 %v7054_v0  ;;  %v6477_v30 = vor.u32 %v6476_v42, %v6473_v54  ;;  %v6487_v57 = vor.u32 %v6486_v15, %v6482_v62  ;;  %v7058_v4 = vrot.slane %v7056_v3, 4 }
 0x45c   : > { %10212 = vmatmul.msk.bf16.gmra.mxu3 %vm803_vm1, %v10450_v43  ;;  %v7061_v24 = vrot.slane %v7059_v28, 5  ;;  %v7067_v23 = vrot.slane %v7065_v44, 5  ;;  %v7071_v41 = vrot.slane %v7069_v56, 4  ;;  %v6492_v61 = vrot.slane %v6490_v40, 5 }
 0x45d   : > { %10253 = vmatmul.msk.bf16.gmra.mxu0 %vm803_vm1, %v10458_v51  ;;  %v7193_v25 = vpack.c.b16 %v7180_v38, %v7179_v19  ;;  %v6478_v1 = vrot.slane %v6477_v30, 4  ;;  %v6488_v48 = vrot.slane %v6487_v57, 4  ;;  %v7075_v47 = vshll.u32 %v6968_v13, 16  ;;  %v6381_v19 = vld [vmem:[#allocation3 + $0x3c] sm:$0xf]  ;;  %v10452_v38 = vld [vmem:[#allocation3 + $0x30] sm:$0xff] }
 0x45e   : > { %v7062_v52 = vor.u32 %v7061_v24, %v7058_v4  ;;  %v7072_v63 = vor.u32 %v7071_v41, %v7067_v23  ;;  %v6495_v27 = vshrl.u32 %v6379_v34, 16  ;;  %v6498_v11 = vshll.u32 %v6379_v34, 16  ;;  %v6382_v30 = vld [vmem:[#allocation3 + $0x40] sm:$0xf] }
 0x45f   : > { %v6504_v12 = vshll.u32 %v6380_v36, 16  ;;  %v6508_v29 = vshrl.u32 %v6380_v36, 16  ;;  %v6483_v9 = vsel %vm11340_vm14, %v6478_v1, %v6482_v62  ;;  %v6493_v21 = vsel %vm11340_vm14, %v6488_v48, %v6492_v61  ;;  %v10460_v57 = vld [vmem:[#allocation3 + $0x3c] sm:$0xff]  ;;  %v6972_v36 = vld [vmem:[#allocation3 + $0x48] sm:$0xf] }
 0x460   : > { %v7063_v50 = vrot.slane %v7062_v52, 4  ;;  %v7073_v32 = vrot.slane %v7072_v63, 4  ;;  %v7077_v53 = vrot.slane %v7075_v47, 5  ;;  %v7080_v43 = vshrl.u32 %v6969_v59, 16 }
 0x461   : > { %v7083_v18 = vshll.u32 %v6969_v59, 16  ;;  %v7089_v10 = vshll.u32 %v6970_v46, 16  ;;  %v7093_v55 = vshrl.u32 %v6970_v46, 16  ;;  %v6497_v51 = vrot.slane %v6495_v27, 4 }
 0x462   : > { %v6500_v26 = vrot.slane %v6498_v11, 5  ;;  %v6506_v60 = vrot.slane %v6504_v12, 5  ;;  %v6510_v7 = vrot.slane %v6508_v29, 4  ;;  %v6596_v58 = vunpack.c.l.b16 %v6483_v9 }
 0x463   : > { %v6597_v22 = vunpack.c.l.b16 %v6493_v21  ;;  %v7068_v6 = vsel %vm11340_vm14, %v7063_v50, %v7067_v23  ;;  %v7078_v35 = vsel %vm11340_vm14, %v7073_v32, %v7077_v53  ;;  %v7082_v37 = vrot.slane %v7080_v43, 4 }
 0x464   : > { %v7085_v33 = vrot.slane %v7083_v18, 5  ;;  %v7091_v49 = vrot.slane %v7089_v10, 5  ;;  %v7095_v31 = vrot.slane %v7093_v55, 4  ;;  %v6501_v8 = vor.u32 %v6500_v26, %v6497_v51  ;;  %v6974_v26 = vld [vmem:[#allocation3 + $0x50] sm:$0x1] }
 0x465   : > { %v6511_v54 = vor.u32 %v6510_v7, %v6506_v60  ;;  %v6514_v42 = vshll.u32 %v6392_v39, 16  ;;  %v6609_v14 = vpack.c.b16 %v6597_v22, %v6596_v58  ;;  %v7181_v62 = vunpack.c.l.b16 %v7068_v6  ;;  %v6383_v58 = vld [vmem:[#allocation3 + $0x48] sm:$0xf]  ;;  %v6384_v39 = vld [vmem:[#allocation3 + $0x4c] sm:$0xf] }
 0x466   : > { %v7182_v15 = vunpack.c.l.b16 %v7078_v35  ;;  %v7086_v3 = vor.u32 %v7085_v33, %v7082_v37  ;;  %v7096_v0 = vor.u32 %v7095_v31, %v7091_v49  ;;  %v7099_v28 = vshll.u32 %v6971_v45, 16 }
 0x467   : > { %10172 = vmatmul.msk.bf16.gmra.mxu2 %vm803_vm1, %v6608_v17  ;;  %v6502_v44 = vrot.slane %v6501_v8, 4  ;;  %v6512_v56 = vrot.slane %v6511_v54, 4  ;;  %v6516_v17 = vrot.slane %v6514_v42, 5  ;;  %v6522_v1 = vshll.u32 %v6381_v19, 16  ;;  %v10453_v42 = vld [vmem:[#allocation3 + $0x3c] sm:$0xff] }
 0x468   : > { %v7194_v40 = vpack.c.b16 %v7182_v15, %v7181_v62  ;;  %v7087_v4 = vrot.slane %v7086_v3, 4  ;;  %v7097_v24 = vrot.slane %v7096_v0, 4  ;;  %v7101_v23 = vrot.slane %v7099_v28, 5  ;;  %v10461_v62 = vld [vmem:[#allocation3 + $0x48] sm:$0xff] }
 0x469   : > { %v6507_v41 = vsel %vm11340_vm14, %v6502_v44, %v6506_v60  ;;  %v6517_v13 = vsel %vm11340_vm14, %v6512_v56, %v6516_v17  ;;  %v6528_v61 = vshll.u32 %v6382_v30, 16  ;;  %v6532_v34 = vshrl.u32 %v6382_v30, 16  ;;  %v6394_v30 = vld [vmem:[#allocation3 + $0x50] sm:$0x1] }
 0x46a   : > { %v6598_v48 = vunpack.c.l.b16 %v6507_v41  ;;  %v6599_v52 = vunpack.c.l.b16 %v6517_v13  ;;  %v7092_v63 = vsel %vm11340_vm14, %v7087_v4, %v7091_v49  ;;  %v7102_v47 = vsel %vm11340_vm14, %v7097_v24, %v7101_v23 }
 0x46b   : > { %10262 = vmatmul.msk.bf16.gmra.mxu1 %vm803_vm1, %v7193_v25  ;;  %v6519_v25 = vshrl.u32 %v6381_v19, 16  ;;  %v6524_v27 = vrot.slane %v6522_v1, 5  ;;  %v7104_v11 = vshrl.u32 %v6972_v36, 16  ;;  %v7107_v12 = vshll.u32 %v6972_v36, 16 }
 0x46c   : > { %10213 = vmatmul.msk.bf16.gmra.mxu3 %vm803_vm1, %v10451_v20  ;;  %v6973_v20 = vld [vmem:[#allocation3 + $0x4c] sm:$0xf]  ;;  %v6530_v29 = vrot.slane %v6528_v61, 5  ;;  %v6534_v46 = vrot.slane %v6532_v34, 4  ;;  %v7183_v50 = vunpack.c.l.b16 %v7092_v63  ;;  %v7184_v53 = vunpack.c.l.b16 %v7102_v47 }
 0x46d   : > { %10254 = vmatmul.msk.bf16.gmra.mxu0 %vm803_vm1, %v10459_v5  ;;  %v6393_v5 = vld [vmem:[#allocation3 + $0x44] sm:$0x1]  ;;  %v6521_v59 = vrot.slane %v6519_v25, 4  ;;  %v7113_v9 = vshll.u32 %v6973_v20, 16  ;;  %v7117_v21 = vshrl.u32 %v6973_v20, 16  ;;  %v7106_v18 = vrot.slane %v7104_v11, 4 }
 0x46e   : > { %v6538_v32 = vshll.u32 %v6393_v5, 16  ;;  %v7109_v10 = vrot.slane %v7107_v12, 5  ;;  %v6610_v55 = vpack.c.b16 %v6599_v52, %v6598_v48  ;;  %v6535_v51 = vor.u32 %v6534_v46, %v6530_v29  ;;  %v6977_v5 = vld [vmem:[#allocation3 + $0x5c] sm:$0x1] }
 0x46f   : > { %v6525_v43 = vor.u32 %v6524_v27, %v6521_v59  ;;  %v7115_v60 = vrot.slane %v7113_v9, 5  ;;  %v7119_v7 = vrot.slane %v7117_v21, 4  ;;  %v7195_v6 = vpack.c.b16 %v7184_v53, %v7183_v50  ;;  %v6385_v9 = vld [vmem:[#allocation3 + $0x54] sm:$0xf] }
 0x470   : > { %v6540_v22 = vrot.slane %v6538_v32, 5  ;;  %v7110_v37 = vor.u32 %v7109_v10, %v7106_v18  ;;  %v7123_v33 = vshll.u32 %v6974_v26, 16  ;;  %v6536_v49 = vrot.slane %v6535_v51, 4 }
 0x471   : > { %v6526_v35 = vrot.slane %v6525_v43, 4  ;;  %v7120_v31 = vor.u32 %v7119_v7, %v7115_v60  ;;  %v6543_v8 = vshrl.u32 %v6383_v58, 16  ;;  %v6546_v54 = vshll.u32 %v6383_v58, 16  ;;  %v10454_v43 = vld [vmem:[#allocation3 + $0x48] sm:$0xff]  ;;  %v6978_v58 = vld [vmem:[#allocation3 + $0x60] sm:$0xf] }
 0x472   : > { %v6552_v45 = vshll.u32 %v6384_v39, 16  ;;  %v7111_v3 = vrot.slane %v7110_v37, 4  ;;  %v7125_v0 = vrot.slane %v7123_v33, 5  ;;  %v6541_v28 = vsel %vm11340_vm14, %v6536_v49, %v6540_v22  ;;  %v6979_v22 = vld [vmem:[#allocation3 + $0x64] sm:$0xf] }
 0x473   : > { %v6531_v15 = vsel %vm11340_vm14, %v6526_v35, %v6530_v29  ;;  %v7121_v44 = vrot.slane %v7120_v31, 4  ;;  %v6545_v56 = vrot.slane %v6543_v8, 4  ;;  %v6548_v17 = vrot.slane %v6546_v54, 5  ;;  %v7442_v33 = vld [vmem:[#allocation3 + $0x18] sm:$0xf] }
 0x474   : > { %v6600_v4 = vunpack.c.l.b16 %v6531_v15  ;;  %v6601_v24 = vunpack.c.l.b16 %v6541_v28  ;;  %v7116_v23 = vsel %vm11340_vm14, %v7111_v3, %v7115_v60  ;;  %v6562_v34 = vshll.u32 %v6394_v30, 16  ;;  %v10462_v60 = vld [vmem:[#allocation3 + $0x54] sm:$0xff]  ;;  %v7443_v49 = vld [vmem:[#allocation3 + $0x1c] sm:$0xf] }
 0x475   : > { %v7126_v41 = vsel %vm11340_vm14, %v7121_v44, %v7125_v0  ;;  %v6549_v13 = vor.u32 %v6548_v17, %v6545_v56  ;;  %v7185_v52 = vunpack.c.l.b16 %v7116_v23  ;;  %v7147_v21 = vshll.u32 %v6977_v5, 16  ;;  %v6395_v30 = vld [vmem:[#allocation3 + $0x5c] sm:$0x1] }
 0x476   : > { %v6611_v48 = vpack.c.b16 %v6601_v24, %v6600_v4  ;;  %v7186_v63 = vunpack.c.l.b16 %v7126_v41  ;;  %v6564_v12 = vrot.slane %v6562_v34, 5  ;;  %v6567_v51 = vshrl.u32 %v6385_v9, 16 }
 0x477   : > { %10173 = vmatmul.msk.bf16.gmra.mxu2 %vm803_vm1, %v6609_v14  ;;  %v6556_v14 = vshrl.u32 %v6384_v39, 16  ;;  %v6550_v47 = vrot.slane %v6549_v13, 4  ;;  %v6570_v26 = vshll.u32 %v6385_v9, 16  ;;  %v7149_v7 = vrot.slane %v7147_v21, 5  ;;  %v6980_v13 = vld [vmem:[#allocation3 + $0x68] sm:$0x1] }
 0x478   : > { %v7196_v50 = vpack.c.b16 %v7186_v63, %v7185_v52  ;;  %v6569_v54 = vrot.slane %v6567_v51, 4  ;;  %v7165_v15 = vshrl.u32 %v6979_v22, 16  ;;  %v7469_v3 = vshrl.u32 %v7442_v33, 16  ;;  %v7444_v63 = vld [vmem:[#allocation3 + $0x20] sm:$0x1] }
 0x479   : > { %v6558_v19 = vrot.slane %v6556_v14, 4  ;;  %v7155_v14 = vshll.u32 %v6978_v58, 16  ;;  %v7472_v0 = vshll.u32 %v7442_v33, 16  ;;  %v7478_v28 = vshll.u32 %v7443_v49, 16  ;;  %v10353_v33 = vld [vmem:[%s14046_s10 + $0x24] sm:$0xf] }
 0x47a   : > { %v7482_v44 = vshrl.u32 %v7443_v49, 16  ;;  %v7167_v41 = vrot.slane %v7165_v15, 4  ;;  %v6586_v52 = vshll.u32 %v6395_v30, 16 }
 0x47b   : > { %10263 = vmatmul.msk.bf16.gmra.mxu1 %vm803_vm1, %v7194_v40  ;;  %v6554_v40 = vrot.slane %v6552_v45, 5  ;;  %v7152_v45 = vshrl.u32 %v6978_v58, 16  ;;  %v7157_v24 = vrot.slane %v7155_v14, 5 }
 0x47c   : > { %10214 = vmatmul.msk.bf16.gmra.mxu3 %vm803_vm1, %v10452_v38  ;;  %v6975_v38 = vld [vmem:[#allocation3 + $0x54] sm:$0xf]  ;;  %v7484_v34 = vrot.slane %v7482_v44, 4  ;;  %v6588_v21 = vrot.slane %v6586_v52, 5 }
 0x47d   : > { %10255 = vmatmul.msk.bf16.gmra.mxu0 %vm803_vm1, %v10460_v57  ;;  %v6976_v57 = vld [vmem:[#allocation3 + $0x58] sm:$0xf]  ;;  %v7128_v25 = vshrl.u32 %v6975_v38, 16  ;;  %v7131_v1 = vshll.u32 %v6975_v38, 16  ;;  %v6559_v61 = vor.u32 %v6558_v19, %v6554_v40  ;;  %v6555_v32 = vsel %vm11340_vm14, %v6550_v47, %v6554_v40 }
 0x47e   : > { %v7137_v36 = vshll.u32 %v6976_v57, 16  ;;  %v7141_v20 = vshrl.u32 %v6976_v57, 16  ;;  %v6602_v39 = vunpack.c.l.b16 %v6555_v32  ;;  %v7154_v4 = vrot.slane %v7152_v45, 4  ;;  %v10455_v32 = vld [vmem:[#allocation3 + $0x54] sm:$0xff]  ;;  %v7445_v45 = vld [vmem:[#allocation3 + $0x24] sm:$0xf] }
 0x47f   : > { %v7130_v59 = vrot.slane %v7128_v25, 4  ;;  %v7133_v27 = vrot.slane %v7131_v1, 5  ;;  %v6560_v11 = vrot.slane %v6559_v61, 4  ;;  %v7471_v25 = vrot.slane %v7469_v3, 4 }
 0x480   : > { %v7139_v29 = vrot.slane %v7137_v36, 5  ;;  %v7143_v46 = vrot.slane %v7141_v20, 4  ;;  %v7474_v1 = vrot.slane %v7472_v0, 5  ;;  %v13012_v61 = vrot.slane %v7478_v28, 5  ;;  %v7446_v0 = vld [vmem:[#allocation3 + $0x28] sm:$0xf] }
 0x481   : > { %v7134_v53 = vor.u32 %v7133_v27, %v7130_v59  ;;  %v6565_v18 = vsel %vm11340_vm14, %v6560_v11, %v6564_v12  ;;  %v7158_v5 = vor.u32 %v7157_v24, %v7154_v4  ;;  %v7171_v59 = vshll.u32 %v6980_v13, 16 }
 0x482   : > { %v7144_v10 = vor.u32 %v7143_v46, %v7139_v29  ;;  %v7475_v11 = vor.u32 %v7474_v1, %v7471_v25  ;;  %v7485_v12 = vor.u32 %v7484_v34, %v13012_v61  ;;  %v7493_v30 = vshrl.u32 %v7445_v45, 16 }
 0x483   : > { %v7135_v31 = vrot.slane %v7134_v53, 4  ;;  %v10344_v53 = vld [vmem:[%s14046_s10 + $0x20] sm:$0xf]  ;;  %v7173_v51 = vrot.slane %v7171_v59, 5  ;;  %v7496_v4 = vshll.u32 %v7445_v45, 16  ;;  %v7502_v24 = vshll.u32 %v7446_v0, 16 }
 0x484   : > { %v7145_v8 = vrot.slane %v7144_v10, 4  ;;  %v10463_v10 = vld [vmem:[#allocation3 + $0x60] sm:$0xff]  ;;  %v7476_v58 = vrot.slane %v7475_v11, 4  ;;  %v7495_v59 = vrot.slane %v7493_v30, 4  ;;  %v7448_v45 = vld [vmem:[#allocation3 + $0x30] sm:$0xf] }
 0x485   : > { %v7140_v19 = vsel %vm11340_vm14, %v7135_v31, %v7139_v29  ;;  %v7488_v29 = vshll.u32 %v7444_v63, 16  ;;  %v7504_v11 = vrot.slane %v7502_v24, 5  ;;  %v7520_v30 = vshll.u32 %v7448_v45, 16 }
 0x486   : > { %v7150_v38 = vsel %vm11340_vm14, %v7145_v8, %v7149_v7  ;;  %v7187_v36 = vunpack.c.l.b16 %v7140_v19  ;;  %v7481_v44 = vsel %vm11340_vm14, %v7476_v58, %v13012_v61 }
 0x487   : > { %10174 = vmatmul.msk.bf16.gmra.mxu2 %vm803_vm1, %v6610_v55  ;;  %v6386_v55 = vld [vmem:[#allocation3 + $0x58] sm:$0xf]  ;;  %v7188_v20 = vunpack.c.l.b16 %v7150_v38 }
 0x488   : > { %v6576_v35 = vshll.u32 %v6386_v55, 16  ;;  %v6580_v37 = vshrl.u32 %v6386_v55, 16  ;;  %v7159_v55 = vrot.slane %v7158_v5, 4  ;;  %v7447_v5 = vld [vmem:[#allocation3 + $0x2c] sm:$0x1] }
 0x489   : > { %v7197_v46 = vpack.c.b16 %v7188_v20, %v7187_v36  ;;  %v7660_v36 = vunpack.c.l.b16 %v7481_v44 }
 0x48a   : > { %v6578_v56 = vrot.slane %v6576_v35, 5  ;;  %v6582_v17 = vrot.slane %v6580_v37, 4  ;;  %v13026_v35 = vld [vmem:[#allocation3 + $0x8] sm:$0x1]  ;;  %v7829_v37 = vld [vmem:[#allocation3] sm:$0xf] }
 0x48b   : > { %10264 = vmatmul.msk.bf16.gmra.mxu1 %vm803_vm1, %v7195_v6  ;;  %v6603_v6 = vunpack.c.l.b16 %v6565_v18  ;;  %v7894_v8 = vrot.slane %v13026_v35, 5  ;;  %v8046_v15 = vshrl.u32 %v7829_v37, 16  ;;  %v8049_v3 = vshll.u32 %v7829_v37, 16 }
 0x48c   : > { %10215 = vmatmul.msk.bf16.gmra.mxu3 %vm803_vm1, %v10453_v42  ;;  %v6572_v42 = vrot.slane %v6570_v26, 5  ;;  %v8604_v26 = vsel %vm822_vm0, %v10344_v53, 0  ;;  %v8065_v53 = vshll.u32 %v13026_v35, 16 }
 0x48d   : > { %10256 = vmatmul.msk.bf16.gmra.mxu0 %vm803_vm1, %v10461_v62  ;;  %v7161_v62 = vshll.u32 %v6979_v22, 16  ;;  %v6612_v40 = vpack.c.b16 %v6603_v6, %v6602_v39  ;;  %v7486_v22 = vrot.slane %v7485_v12, 4  ;;  %v7490_v39 = vrot.slane %v7488_v29, 5  ;;  %8613 = vmatpush.bf16.msra.mxu2 %v8604_v26  ;;  %v10379_v29 = vld [vmem:[%s14046_s10 + $0x2c] sm:$0xf] }
 0x48e   : > { %v6573_v57 = vor.u32 %v6572_v42, %v6569_v54  ;;  %v8810_v54 = vsel %vm822_vm0, %v10353_v33, 0  ;;  %v8048_v25 = vrot.slane %v8046_v15, 4  ;;  %v8051_v1 = vrot.slane %v8049_v3, 5 }
 0x48f   : > { %v13010_v23 = vrot.slane %v7161_v62, 5  ;;  %8819 = vmatpush.bf16.msra.mxu3 %v8810_v54 }
 0x490   : > { %v6574_v47 = vrot.slane %v6573_v57, 4  ;;  %v10370_v57 = vld [vmem:[%s14046_s10 + $0x28] sm:$0xf] }
 0x491   : > { %v7168_v27 = vor.u32 %v7167_v41, %v13010_v23  ;;  %v7164_v62 = vsel %vm11340_vm14, %v7159_v55, %v13010_v23  ;;  %v7506_v23 = vshrl.u32 %v7446_v0, 16  ;;  %v9144_v41 = vsel %vm822_vm0, %v10370_v57, 0  ;;  %v7449_v0 = vld [vmem:[#allocation3 + $0x34] sm:$0xf] }
 0x492   : > { %v6579_v18 = vsel %vm11340_vm14, %v6574_v47, %v6578_v56  ;;  %9153 = vmatpush.bf16.msra.mxu0 %v9144_v41  ;;  %v7189_v61 = vunpack.c.l.b16 %v7164_v62  ;;  %v7526_v24 = vshll.u32 %v7449_v0, 16 }
 0x493   : > { %v7169_v7 = vrot.slane %v7168_v27, 4  ;;  %v6604_v42 = vunpack.c.l.b16 %v6579_v18  ;;  %v7498_v27 = vrot.slane %v7496_v4, 5  ;;  %v7508_v12 = vrot.slane %v7506_v23, 4  ;;  %v7833_v18 = vld [vmem:[#allocation3 + $0x10] sm:$0xf] }
 0x494   : > { %v7898_v58 = vrot.slane %v7833_v18, 5  ;;  %v8079_v37 = vshll.u32 %v7833_v18, 16  ;;  %v8083_v33 = vshrl.u32 %v7833_v18, 16  ;;  %v7530_v23 = vshrl.u32 %v7449_v0, 16 }
 0x495   : > { %v7174_v28 = vsel %vm11340_vm14, %v7169_v7, %v7173_v51  ;;  %v7499_v51 = vor.u32 %v7498_v27, %v7495_v59  ;;  %v7509_v26 = vor.u32 %v7508_v12, %v7504_v11  ;;  %v13081_v12 = vrot.slane %v7526_v24, 5 }
 0x496   : > { %v7190_v34 = vunpack.c.l.b16 %v7174_v28  ;;  %v7900_v15 = vrot.slane %v7898_v58, 4 }
 0x497   : > { %10175 = vmatmul.msk.bf16.gmra.mxu2 %vm803_vm1, %v6611_v48  ;;  %v6583_v48 = vor.u32 %v6582_v17, %v6578_v56  ;;  %v7491_v56 = vsel %vm11340_vm14, %v7486_v22, %v7490_v39  ;;  %v7856_v22 = vld [vmem:[#allocation3 + $0xc] sm:$0xe]  ;;  %v7510_v54 = vrot.slane %v7509_v26, 4  ;;  %v7836_v26 = vld [vmem:[#allocation3 + $0x1c] sm:$0xf] }
 0x498   : > { %v7661_v20 = vunpack.c.l.b16 %v7491_v56  ;;  %v10321_v62 = vrot.slane %v7856_v22, 9  ;;  %v8107_v0 = vshrl.u32 %v7836_v26, 16 }
 0x499   : > { %v6584_v9 = vrot.slane %v6583_v48, 4 }
 0x49b   : > { %10265 = vmatmul.msk.bf16.gmra.mxu1 %vm803_vm1, %v7196_v50  ;;  %v7830_v50 = vld [vmem:[#allocation3 + $0x4] sm:$0xf]  ;;  %v6589_v6 = vsel %vm11340_vm14, %v6584_v9, %v6588_v21  ;;  %v9350_v9 = vsel %vm822_vm0, %v10379_v29, 0  ;;  %v7198_v21 = vpack.c.b16 %v7190_v34, %v7189_v61  ;;  %v10464_v61 = vld [vmem:[#allocation3 + $0x18] sm:$0xff]  ;;  %v7532_v29 = vrot.slane %v7530_v23, 4 }
 0x49c   : > { %10216 = vmatmul.msk.bf16.gmra.mxu3 %vm803_vm1, %v10454_v43  ;;  %v7891_v43 = vrot.slane %v7830_v50, 5  ;;  %v6605_v14 = vunpack.c.l.b16 %v6589_v6  ;;  %v8055_v17 = vshll.u32 %v7830_v50, 16  ;;  %v8059_v38 = vshrl.u32 %v7830_v50, 16  ;;  %9359 = vmatpush.bf16.msra.mxu1 %v9350_v9 }
 0x49d   : > { %10257 = vmatmul.msk.bf16.gmra.mxu0 %vm803_vm1, %v10462_v60  ;;  %v7855_v60 = vld [vmem:[#allocation3] sm:$0xe]  ;;  %v7676_v50 = vpack.c.b16 %v7661_v20, %v7660_v36  ;;  %vm7812_vm0 = vcmask 31744  }
 0x49e   : > { %v10320_v49 = vrot.slane %v7855_v60, 9  ;;  %v7893_v31 = vrot.slane %v7891_v43, 4  ;;  %v6613_v13 = vpack.c.b16 %v6605_v14, %v6604_v42  ;;  %v8057_v63 = vrot.slane %v8055_v17, 5  ;;  %v7834_v42 = vld [vmem:[#allocation3 + $0x14] sm:$0x1] }
 0x49f   : > { %v8061_v47 = vrot.slane %v8059_v38, 4  ;;  %v7901_v3 = vrot.slane %v7834_v42, 5  ;;  %v13066_v17 = vrot.slane %v8079_v37, 5  ;;  %v7517_v38 = vshrl.u32 %v7448_v45, 16  ;;  %v7452_v45 = vld [vmem:[#allocation3 + $0x40] sm:$0xf] }
 0x4a0   : > { %v7895_v19 = vsel %vm11491_vm7, %v7893_v31, %v7894_v8  ;;  %v7500_v8 = vrot.slane %v7499_v51, 4  ;;  %v7533_v51 = vor.u32 %v7532_v29, %v13081_v12 }
 0x4a1   : > { %v7946_v52 = vunpack.c.l.b16 %v7895_v19 }
 0x4a2   : > { %v7505_v57 = vsel %vm11340_vm14, %v7500_v8, %v7504_v11  ;;  %v7450_v11 = vld [vmem:[#allocation3 + $0x38] sm:$0x1] }
 0x4a7   : > { %10176 = vmatmul.msk.bf16.gmra.mxu2 %vm803_vm1, %v6612_v40  ;;  %v7892_v40 = vsel %vm11491_vm7, %v10320_v49, %v7891_v43  ;;  %v7512_v43 = vshll.u32 %v7447_v5, 16  ;;  %v8067_v49 = vrot.slane %v8065_v53, 5  ;;  %v7522_v5 = vrot.slane %v7520_v30, 5 }
 0x4a8   : > { %v7945_v48 = vunpack.c.l.b16 %v7892_v40  ;;  %v8085_v40 = vrot.slane %v8083_v33, 4  ;;  %v7554_v30 = vshrl.u32 %v7452_v45, 16 }
 0x4a9   : > { %v7514_v31 = vrot.slane %v7512_v43, 5 }
 0x4aa   : > { %v7961_v55 = vpack.c.b16 %v7946_v52, %v7945_v48  ;;  %v8086_v20 = vor.u32 %v8085_v40, %v13066_v17  ;;  %v8089_v48 = vshll.u32 %v7834_v42, 16  ;;  %v7662_v52 = vunpack.c.l.b16 %v7505_v57 }
 0x4ab   : > { %10266 = vmatmul.msk.bf16.gmra.mxu1 %vm803_vm1, %v7197_v46  ;;  %v8052_v46 = vor.u32 %v8051_v1, %v8048_v25  ;;  %v7515_v4 = vsel %vm11340_vm14, %v7510_v54, %v7514_v31  ;;  %v7899_v25 = vsel %vm11491_vm7, %v10321_v62, %v7898_v58  ;;  %v7902_v1 = vsel %vm11491_vm7, %v7900_v15, %v7901_v3  ;;  %v7837_v15 = vld [vmem:[#allocation3 + $0x20] sm:$0x1] }
 0x4ac   : > { %10217 = vmatmul.msk.bf16.gmra.mxu3 %vm803_vm1, %v10455_v32  ;;  %v8062_v32 = vor.u32 %v8061_v47, %v8057_v63  ;;  %v7519_v47 = vrot.slane %v7517_v38, 4  ;;  %v7947_v59 = vunpack.c.l.b16 %v7899_v25  ;;  %v7948_v27 = vunpack.c.l.b16 %v7902_v1 }
 0x4ad   : > { %10258 = vmatmul.msk.bf16.gmra.mxu0 %vm803_vm1, %v10463_v10  ;;  %v7832_v10 = vld [vmem:[#allocation3 + $0xc] sm:$0xf]  ;;  %v8053_v7 = vrot.slane %v8052_v46, 4  ;;  %v7534_v62 = vrot.slane %v7533_v51, 4  ;;  %v8103_v3 = vshll.u32 %v7836_v26, 16  ;;  %v7550_v38 = vshll.u32 %v7452_v45, 16 }
 0x4ae   : > { %v8070_v39 = vshrl.u32 %v7832_v10, 16  ;;  %v8073_v6 = vshll.u32 %v7832_v10, 16  ;;  %v8063_v35 = vrot.slane %v8062_v32, 4  ;;  %v8091_v32 = vrot.slane %v8089_v48, 5 }
 0x4af   : > { %v8058_v14 = vsel %vm11340_vm14, %v8053_v7, %v8057_v63  ;;  %v7663_v63 = vunpack.c.l.b16 %v7515_v4  ;;  %v7523_v18 = vor.u32 %v7522_v5, %v7519_v47  ;;  %v7536_v10 = vshll.u32 %v7450_v11, 16  ;;  %v7835_v7 = vld [vmem:[#allocation3 + $0x18] sm:$0xf]  ;;  %v10465_v5 = vld [vmem:[#allocation3 + $0x24] sm:$0xff] }
 0x4b0   : > { %v8072_v44 = vrot.slane %v8070_v39, 4  ;;  %v8075_v56 = vrot.slane %v8073_v6, 5  ;;  %v8068_v19 = vsel %vm11340_vm14, %v8063_v35, %v8067_v49  ;;  %v8237_v41 = vunpack.c.l.b16 %v8058_v14  ;;  %v7857_v35 = vld [vmem:[#allocation3 + $0x18] sm:$0xe]  ;;  %v7451_v49 = vld [vmem:[#allocation3 + $0x3c] sm:$0xf] }
 0x4b1   : > { %v8238_v34 = vunpack.c.l.b16 %v8068_v19  ;;  %v7677_v43 = vpack.c.b16 %v7663_v63, %v7662_v52  ;;  %v7905_v39 = vrot.slane %v7836_v26, 5  ;;  %v7524_v31 = vrot.slane %v7523_v18, 4 }
 0x4b2   : > { %v8076_v36 = vor.u32 %v8075_v56, %v8072_v44  ;;  %v7538_v8 = vrot.slane %v7536_v10, 5  ;;  %v8094_v54 = vshrl.u32 %v7835_v7, 16  ;;  %v8097_v42 = vshll.u32 %v7835_v7, 16 }
 0x4b3   : > { %v8253_v46 = vpack.c.b16 %v8238_v34, %v8237_v41  ;;  %v7907_v44 = vrot.slane %v7905_v39, 4  ;;  %v7908_v56 = vrot.slane %v7837_v15, 5  ;;  %v7544_v19 = vshll.u32 %v7451_v49, 16 }
 0x4b4   : > { %v8096_v23 = vrot.slane %v8094_v54, 4  ;;  %v7529_v25 = vsel %vm11340_vm14, %v7524_v31, %v13081_v12  ;;  %v7539_v1 = vsel %vm11340_vm14, %v7534_v62, %v7538_v8  ;;  %v8109_v52 = vrot.slane %v8107_v0, 4  ;;  %v7454_v31 = vld [vmem:[#allocation3 + $0x48] sm:$0xf] }
 0x4b5   : > { %v7909_v48 = vsel %vm11491_vm7, %v7907_v44, %v7908_v56  ;;  %v7556_v11 = vrot.slane %v7554_v30, 4  ;;  %v7664_v12 = vunpack.c.l.b16 %v7529_v25  ;;  %v7665_v29 = vunpack.c.l.b16 %v7539_v1  ;;  %v7858_v56 = vld [vmem:[#allocation3 + $0x24] sm:$0xe] }
 0x4b6   : > { %v8113_v10 = vshll.u32 %v7837_v15, 16 }
 0x4b7   : > { %10177 = vmatmul.msk.bf16.gmra.mxu2 %vm803_vm1, %v6613_v13 }
 0x4ba   : > { %v13059_v60 = vpop.f32.mrf.mxu0 }
 0x4bb   : > { %10267 = vmatmul.msk.bf16.gmra.mxu1 %vm803_vm1, %v7198_v21  ;;  %v8077_v21 = vrot.slane %v8076_v36, 4 }
 0x4bc   : > { %10310 = vmatmul.msk.bf16.vlgmr.msrb.gmra.mxu3 %vm803_vm1, %v7676_v50  ;;  %v8087_v50 = vrot.slane %v8086_v20, 4 }
 0x4bd   : > { %10328 = vmatmul.msk.bf16.vlgmr.msrb.gmra.mxu0 %vm803_vm1, %v7961_v55  ;;  %v7962_v55 = vpack.c.b16 %v7948_v27, %v7947_v59  ;;  %v8082_v37 = vsel %vm11340_vm14, %v8077_v21, %v13066_v17  ;;  %v7541_v17 = vshrl.u32 %v7451_v49, 16  ;;  %v7546_v59 = vrot.slane %v7544_v19, 5  ;;  %v7453_v21 = vld [vmem:[#allocation3 + $0x44] sm:$0x1] }
 0x4be   : > { %v8092_v33 = vsel %vm11340_vm14, %v8087_v50, %v8091_v32  ;;  %v8239_v24 = vunpack.c.l.b16 %v8082_v37  ;;  %v13111_v27 = vrot.slane %v7550_v38, 5  ;;  %v7565_v19 = vshrl.u32 %v7454_v31, 16 }
 0x4bf   : > { %v6766_v28 = vpop.f32.mrf.mxu3  ;;  %v8240_v41 = vunpack.c.l.b16 %v8092_v33  ;;  %v7543_v63 = vrot.slane %v7541_v17, 4  ;;  %v7568_v38 = vshll.u32 %v7454_v31, 16 }
 0x4c0   : > { %v7557_v7 = vor.u32 %v7556_v11, %v13111_v27 }
 0x4c1   : > { %v7547_v26 = vor.u32 %v7546_v59, %v7543_v63 }
 0x4c2   : > { %v13074_v13 = vpop.f32.mrf.mxu0 }
 0x4c3   : > { %v7548_v0 = vrot.slane %v7547_v26, 4 }
 0x4c7   : > { %10301 = vmatmul.msk.bf16.vlgmr.msrb.gmra.mxu2 %vm803_vm1, %v10464_v61  ;;  %v6768_v9 = vpop.f32.mrf.mxu3  ;;  %v13103_v61 = vrot.slane %v8103_v3, 5 }
 0x4c8   : > { %v7235_v53 = vpop.f32.mrf.mxu1 }
 0x4c9   : > { %v8110_v18 = vor.u32 %v8109_v52, %v13103_v61 }
 0x4ca   : > { %v6650_v58 = vpop.f32.mrf.mxu2  ;;  %v13085_v22 = vpop.f32.mrf.mxu0 }
 0x4cb   : > { %10336 = vmatmul.msk.bf16.vlgmr.msrb.gmra.mxu1 %vm803_vm1, %v8253_v46  ;;  %v6767_v6 = vadd.f32 %v6766_v28, %v6650_v58  ;;  %v10322_v28 = vrot.slane %v7857_v35, 9  ;;  %v7560_v58 = vshll.u32 %v7453_v21, 16  ;;  %v8111_v45 = vrot.slane %v8110_v18, 4  ;;  %v10466_v18 = vld [vmem:[#allocation3 + $0x30] sm:$0xff] }
 0x4cc   : > { %10311 = vmatmul.msk.bf16.gmra.mxu3 %vm803_vm1, %v7677_v43  ;;  %v7838_v43 = vld [vmem:[#allocation3 + $0x24] sm:$0xf] }
 0x4cd   : > { %v6941_v14 = vadd.f32 %v13059_v60, %v6767_v6  ;;  %10329 = vmatmul.msk.bf16.gmra.mxu0 %vm803_vm1, %v7962_v55  ;;  %v8099_v60 = vrot.slane %v8097_v42, 5  ;;  %v7906_v20 = vsel %vm11491_vm7, %v10322_v28, %v7905_v39  ;;  %v7839_v55 = vld [vmem:[#allocation3 + $0x28] sm:$0xf]  ;;  %v7678_v6 = vpack.c.b16 %v7665_v29, %v7664_v12 }
 0x4ce   : > { %v7949_v32 = vunpack.c.l.b16 %v7906_v20  ;;  %v8118_v33 = vshrl.u32 %v7838_v43, 16  ;;  %v8121_v35 = vshll.u32 %v7838_v43, 16  ;;  %v8127_v49 = vshll.u32 %v7839_v55, 16 }
 0x4cf   : > { %v6771_v40 = vpop.f32.mrf.mxu3  ;;  %v13096_v57 = vadd.f32 %v7235_v53, %v6941_v14  ;;  %v8100_v46 = vor.u32 %v8099_v60, %v8096_v23  ;;  %v7950_v53 = vunpack.c.l.b16 %v7909_v48  ;;  %v8115_v14 = vrot.slane %v8113_v10, 5  ;;  %v7455_v60 = vld [vmem:[#allocation3 + $0x4c] sm:$0xf] }
 0x4d0   : > { %v7237_v4 = vpop.f32.mrf.mxu1  ;;  %v7912_v62 = vrot.slane %v7839_v55, 5  ;;  %v8131_v15 = vshrl.u32 %v7839_v55, 16  ;;  %v7558_v28 = vrot.slane %v7557_v7, 4  ;;  %v7562_v44 = vrot.slane %v7560_v58, 5 }
 0x4d1   : > { %v8101_v37 = vrot.slane %v8100_v46, 4  ;;  %v8120_v17 = vrot.slane %v8118_v33, 4  ;;  %v8123_v23 = vrot.slane %v8121_v35, 5  ;;  %v8116_v48 = vsel %vm11340_vm14, %v8111_v45, %v8115_v14  ;;  %v7456_v33 = vld [vmem:[#allocation3 + $0x50] sm:$0x1] }
 0x4d2   : > { %v6652_v34 = vpop.f32.mrf.mxu2  ;;  %v13105_v36 = vpop.f32.mrf.mxu0  ;;  %v7914_v25 = vrot.slane %v7912_v62, 4  ;;  %v7574_v59 = vshll.u32 %v7455_v60, 16  ;;  %v7578_v11 = vshrl.u32 %v7455_v60, 16  ;;  %v8242_v10 = vunpack.c.l.b16 %v8116_v48 }
 0x4d3   : > { %v6769_v47 = vadd.f32 %v6768_v9, %v6652_v34  ;;  %v8254_v9 = vpack.c.b16 %v8240_v41, %v8239_v24  ;;  %v7840_v24 = vld [vmem:[#allocation3 + $0x2c] sm:$0x1]  ;;  %v10323_v41 = vrot.slane %v7858_v56, 9  ;;  %v8133_v34 = vrot.slane %v8131_v15, 4 }
 0x4d4   : > { %v7915_v1 = vrot.slane %v7840_v24, 5  ;;  %v8124_v29 = vor.u32 %v8123_v23, %v8120_v17  ;;  %v7576_v7 = vrot.slane %v7574_v59, 5  ;;  %v7580_v58 = vrot.slane %v7578_v11, 4 }
 0x4d5   : > { %v6942_v50 = vadd.f32 %v13074_v13, %v6769_v47  ;;  %v7963_v13 = vpack.c.b16 %v7950_v53, %v7949_v32  ;;  %v7567_v47 = vrot.slane %v7565_v19, 4  ;;  %v8137_v53 = vshll.u32 %v7840_v24, 16  ;;  %v7457_v24 = vld [vmem:[#allocation3 + $0x54] sm:$0xf] }
 0x4d6   : > { %v8125_v35 = vrot.slane %v8124_v29, 4  ;;  %v7581_v15 = vor.u32 %v7580_v58, %v7576_v7 }
 0x4d7   : > { %10302 = vmatmul.msk.bf16.gmra.mxu2 %vm803_vm1, %v10465_v5  ;;  %v6773_v51 = vpop.f32.mrf.mxu3  ;;  %v13117_v8 = vadd.f32 %v7237_v4, %v6942_v50  ;;  %v8106_v4 = vsel %vm11340_vm14, %v8101_v37, %v13103_v61  ;;  %v7563_v61 = vsel %vm11340_vm14, %v7558_v28, %v7562_v44  ;;  %v7570_v5 = vrot.slane %v7568_v38, 5 }
 0x4d8   : > { %v7240_v39 = vpop.f32.mrf.mxu1  ;;  %v8241_v12 = vunpack.c.l.b16 %v8106_v4  ;;  %v7913_v50 = vsel %vm11491_vm7, %v10323_v41, %v7912_v62  ;;  %v8139_v31 = vrot.slane %v8137_v53, 5  ;;  %v7582_v48 = vrot.slane %v7581_v15, 4 }
 0x4d9   : > { %v7571_v26 = vor.u32 %v7570_v5, %v7567_v47  ;;  %v7589_v5 = vshrl.u32 %v7457_v24, 16 }
 0x4da   : > { %v6655_v54 = vpop.f32.mrf.mxu2  ;;  %v13119_v42 = vpop.f32.mrf.mxu0 }
 0x4db   : > { %10337 = vmatmul.msk.bf16.gmra.mxu1 %vm803_vm1, %v8254_v9  ;;  %v6772_v3 = vadd.f32 %v6771_v40, %v6655_v54  ;;  %v13128_v40 = vrot.slane %v8127_v49, 5  ;;  %v7667_v9 = vunpack.c.l.b16 %v7563_v61  ;;  %v8255_v54 = vpack.c.b16 %v8242_v10, %v8241_v12 }
 0x4dc   : > { %10312 = vmatmul.msk.bf16.gmra.mxu3 %vm803_vm1, %v7678_v6  ;;  %v7951_v6 = vunpack.c.l.b16 %v7913_v50  ;;  %v7572_v62 = vrot.slane %v7571_v26, 4 }
 0x4dd   : > { %v6943_v30 = vadd.f32 %v13085_v22, %v6772_v3  ;;  %10330 = vmatmul.msk.bf16.gmra.mxu0 %vm803_vm1, %v7963_v13  ;;  %v7553_v22 = vsel %vm11340_vm14, %v7548_v0, %v13111_v27  ;;  %v7916_v27 = vsel %vm11491_vm7, %v7914_v25, %v7915_v1  ;;  %v8134_v32 = vor.u32 %v8133_v34, %v13128_v40  ;;  %v7841_v13 = vld [vmem:[#allocation3 + $0x30] sm:$0xf]  ;;  %v7842_v0 = vld [vmem:[#allocation3 + $0x34] sm:$0xf]  ;;  %v7458_v1 = vld [vmem:[#allocation3 + $0x58] sm:$0xf] }
 0x4de   : > { %v7666_v55 = vunpack.c.l.b16 %v7553_v22  ;;  %v7952_v37 = vunpack.c.l.b16 %v7916_v27  ;;  %v7584_v3 = vshll.u32 %v7456_v33, 16  ;;  %v8142_v28 = vshrl.u32 %v7841_v13, 16 }
 0x4df   : > { %v6776_v20 = vpop.f32.mrf.mxu3  ;;  %v13137_v52 = vadd.f32 %v7240_v39, %v6943_v30  ;;  %v8135_v49 = vrot.slane %v8134_v32, 4  ;;  %v8130_v19 = vsel %vm11340_vm14, %v8125_v35, %v13128_v40  ;;  %v7859_v30 = vld [vmem:[#allocation3 + $0x30] sm:$0xe]  ;;  %v7919_v4 = vrot.slane %v7842_v0, 5  ;;  %v10467_v35 = vld [vmem:[#allocation3 + $0x3c] sm:$0xff] }
 0x4e0   : > { %v7242_v63 = vpop.f32.mrf.mxu1  ;;  %v7679_v45 = vpack.c.b16 %v7667_v9, %v7666_v55  ;;  %v7964_v44 = vpack.c.b16 %v7952_v37, %v7951_v6  ;;  %v8145_v60 = vshll.u32 %v7841_v13, 16  ;;  %v8151_v41 = vshll.u32 %v7842_v0, 16 }
 0x4e1   : > { %v8140_v38 = vsel %vm11340_vm14, %v8135_v49, %v8139_v31  ;;  %v8155_v25 = vshrl.u32 %v7842_v0, 16  ;;  %v7577_v34 = vsel %vm11340_vm14, %v7572_v62, %v7576_v7  ;;  %v7586_v40 = vrot.slane %v7584_v3, 5 }
 0x4e2   : > { %v6657_v46 = vpop.f32.mrf.mxu2  ;;  %v13139_v21 = vpop.f32.mrf.mxu0  ;;  %v8144_v22 = vrot.slane %v8142_v28, 4  ;;  %v10324_v47 = vrot.slane %v7859_v30, 9  ;;  %v7921_v59 = vrot.slane %v7919_v4, 4  ;;  %v7598_v12 = vshll.u32 %v7458_v1, 16  ;;  %v7845_v28 = vld [vmem:[#allocation3 + $0x40] sm:$0xf] }
 0x4e3   : > { %v6774_v43 = vadd.f32 %v6773_v51, %v6657_v46  ;;  %v7602_v29 = vshrl.u32 %v7458_v1, 16  ;;  %v8147_v50 = vrot.slane %v8145_v60, 5  ;;  %v13163_v27 = vrot.slane %v8151_v41, 5  ;;  %v7860_v41 = vld [vmem:[#allocation3 + $0x3c] sm:$0xe] }
 0x4e4   : > { %v8157_v32 = vrot.slane %v8155_v25, 4  ;;  %v8244_v10 = vunpack.c.l.b16 %v8140_v38  ;;  %v7668_v55 = vunpack.c.l.b16 %v7577_v34  ;;  %v7591_v9 = vrot.slane %v7589_v5, 4 }
 0x4e5   : > { %v6944_v39 = vadd.f32 %v13105_v36, %v6774_v43  ;;  %v13175_v37 = vrot.slane %v7598_v12, 5  ;;  %v7604_v33 = vrot.slane %v7602_v29, 4  ;;  %v8148_v31 = vor.u32 %v8147_v50, %v8144_v22 }
 0x4e6   : > { %v8175_v1 = vshll.u32 %v7845_v28, 16  ;;  %v7926_v5 = vrot.slane %v7845_v28, 5  ;;  %v10325_v12 = vrot.slane %v7860_v41, 9 }
 0x4e7   : > { %10303 = vmatmul.msk.bf16.gmra.mxu2 %vm803_vm1, %v10466_v18  ;;  %v6778_v51 = vpop.f32.mrf.mxu3  ;;  %v13148_v36 = vadd.f32 %v7242_v63, %v6944_v39  ;;  %v7843_v63 = vld [vmem:[#allocation3 + $0x38] sm:$0x1]  ;;  %v8243_v18 = vunpack.c.l.b16 %v8130_v19  ;;  %v7920_v39 = vsel %vm11491_vm7, %v10324_v47, %v7919_v4  ;;  %v8149_v4 = vrot.slane %v8148_v31, 4 }
 0x4e8   : > { %v7245_v14 = vpop.f32.mrf.mxu1  ;;  %v7922_v11 = vrot.slane %v7843_v63, 5  ;;  %v7953_v15 = vunpack.c.l.b16 %v7920_v39  ;;  %v7847_v39 = vld [vmem:[#allocation3 + $0x48] sm:$0xf] }
 0x4ea   : > { %v6660_v56 = vpop.f32.mrf.mxu2  ;;  %v13150_v17 = vpop.f32.mrf.mxu0  ;;  %v7923_v6 = vsel %vm11491_vm7, %v7921_v59, %v7922_v11  ;;  %v8154_v11 = vsel %vm11340_vm14, %v8149_v4, %v13163_v27 }
 0x4eb   : > { %10338 = vmatmul.msk.bf16.gmra.mxu1 %vm803_vm1, %v8255_v54  ;;  %v6777_v23 = vadd.f32 %v6776_v20, %v6660_v56  ;;  %v7592_v20 = vshll.u32 %v7457_v24, 16  ;;  %v8158_v54 = vor.u32 %v8157_v32, %v13163_v27  ;;  %v7954_v3 = vunpack.c.l.b16 %v7923_v6  ;;  %v7460_v27 = vld [vmem:[#allocation3 + $0x60] sm:$0xf] }
 0x4ec   : > { %10313 = vmatmul.msk.bf16.gmra.mxu3 %vm803_vm1, %v7679_v45  ;;  %v7459_v45 = vld [vmem:[#allocation3 + $0x5c] sm:$0x1]  ;;  %v7605_v56 = vor.u32 %v7604_v33, %v13175_v37  ;;  %v8245_v33 = vunpack.c.l.b16 %v8154_v11  ;;  %v7616_v31 = vshll.u32 %v7460_v27, 16 }
 0x4ed   : > { %v6945_v61 = vadd.f32 %v13119_v42, %v6777_v23  ;;  %10331 = vmatmul.msk.bf16.gmra.mxu0 %vm803_vm1, %v7964_v44  ;;  %v7587_v42 = vsel %vm11340_vm14, %v7582_v48, %v7586_v40  ;;  %v7594_v26 = vrot.slane %v7592_v20, 5  ;;  %v7844_v44 = vld [vmem:[#allocation3 + $0x3c] sm:$0xf]  ;;  %v7608_v19 = vshll.u32 %v7459_v45, 16 }
 0x4ee   : > { %v7669_v49 = vunpack.c.l.b16 %v7587_v42  ;;  %v8159_v24 = vrot.slane %v8158_v54, 4  ;;  %v8166_v25 = vshrl.u32 %v7844_v44, 16  ;;  %v7965_v34 = vpack.c.b16 %v7954_v3, %v7953_v15  ;;  %v7846_v42 = vld [vmem:[#allocation3 + $0x44] sm:$0x1] }
 0x4ef   : > { %v6781_v46 = vpop.f32.mrf.mxu3  ;;  %v13165_v53 = vadd.f32 %v7245_v14, %v6945_v61  ;;  %v8161_v14 = vshll.u32 %v7843_v63, 16  ;;  %v7595_v0 = vor.u32 %v7594_v26, %v7591_v9  ;;  %v7606_v63 = vrot.slane %v7605_v56, 4 }
 0x4f0   : > { %v7247_v43 = vpop.f32.mrf.mxu1  ;;  %v7680_v30 = vpack.c.b16 %v7669_v49, %v7668_v55  ;;  %v7610_v47 = vrot.slane %v7608_v19, 5  ;;  %v8179_v20 = vshrl.u32 %v7845_v28, 16  ;;  %v8168_v50 = vrot.slane %v8166_v25, 4 }
 0x4f1   : > { %v8163_v60 = vrot.slane %v8161_v14, 5  ;;  %v7596_v48 = vrot.slane %v7595_v0, 4  ;;  %v7928_v9 = vrot.slane %v7926_v5, 4  ;;  %v7929_v26 = vrot.slane %v7846_v42, 5  ;;  %v13205_v14 = vld [vmem:[#allocation3 + $0x4c] sm:$0xf] }
 0x4f2   : > { %v6662_v7 = vpop.f32.mrf.mxu2  ;;  %v13169_v58 = vpop.f32.mrf.mxu0  ;;  %v7611_v55 = vsel %vm11340_vm14, %v7606_v63, %v7610_v47  ;;  %v8190_v3 = vshrl.u32 %v7847_v39, 16  ;;  %v8193_v0 = vshll.u32 %v7847_v39, 16  ;;  %v8203_v41 = vshrl.u32 %v13205_v14, 16  ;;  %v7462_v63 = vld [vmem:[#allocation3 + $0x68] sm:$0x1] }
 0x4f3   : > { %v6779_v13 = vadd.f32 %v6778_v51, %v6662_v7  ;;  %v8256_v51 = vpack.c.b16 %v8244_v10, %v8243_v18  ;;  %v8164_v29 = vsel %vm11340_vm14, %v8159_v24, %v8163_v60  ;;  %v7461_v10 = vld [vmem:[#allocation3 + $0x64] sm:$0xf]  ;;  %v8181_v7 = vrot.slane %v8179_v20, 4  ;;  %v10468_v24 = vld [vmem:[#allocation3 + $0x48] sm:$0xff] }
 0x4f4   : > { %v7622_v54 = vshll.u32 %v7461_v10, 16  ;;  %v7626_v45 = vshrl.u32 %v7461_v10, 16  ;;  %v7671_v15 = vunpack.c.l.b16 %v7611_v55  ;;  %v7930_v56 = vsel %vm11491_vm7, %v7928_v9, %v7929_v26  ;;  %v7849_v10 = vld [vmem:[#allocation3 + $0x50] sm:$0x1]  ;;  %v7861_v9 = vld [vmem:[#allocation3 + $0x48] sm:$0xe] }
 0x4f5   : > { %v6946_v62 = vadd.f32 %v13139_v21, %v6779_v13  ;;  %v8169_v21 = vshll.u32 %v7844_v44, 16  ;;  %v8246_v13 = vunpack.c.l.b16 %v8164_v29  ;;  %v8199_v60 = vshll.u32 %v13205_v14, 16 }
 0x4f6   : > { %v8192_v47 = vrot.slane %v8190_v3, 4  ;;  %v7933_v26 = vrot.slane %v13205_v14, 5 }
 0x4f7   : > { %10304 = vmatmul.msk.bf16.gmra.mxu2 %vm803_vm1, %v10467_v35  ;;  %v6783_v38 = vpop.f32.mrf.mxu3  ;;  %v13181_v40 = vadd.f32 %v7247_v43, %v6946_v62  ;;  %v8171_v32 = vrot.slane %v8169_v21, 5  ;;  %v13192_v43 = vrot.slane %v8175_v1, 5  ;;  %v7618_v21 = vrot.slane %v7616_v31, 5 }
 0x4f8   : > { %v7250_v23 = vpop.f32.mrf.mxu1  ;;  %v13214_v1 = vrot.slane %v7622_v54, 5  ;;  %v8257_v20 = vpack.c.b16 %v8246_v13, %v8245_v33  ;;  %v13220_v29 = vrot.slane %v8199_v60, 5 }
 0x4f9   : > { %v8172_v19 = vor.u32 %v8171_v32, %v8168_v50  ;;  %v8205_v50 = vrot.slane %v8203_v41, 4  ;;  %v7463_v32 = vld [vmem:[#allocation3 + $0x6c] sm:$0xf] }
 0x4fa   : > { %v6665_v22 = vpop.f32.mrf.mxu2  ;;  %v13183_v61 = vpop.f32.mrf.mxu0  ;;  %v7640_v31 = vshll.u32 %v7463_v32, 16 }
 0x4fb   : > { %10339 = vmatmul.msk.bf16.gmra.mxu1 %vm803_vm1, %v8256_v51  ;;  %v6782_v59 = vadd.f32 %v6781_v46, %v6665_v22  ;;  %v7601_v46 = vsel %vm11340_vm14, %v7596_v48, %v13175_v37  ;;  %v7613_v37 = vshrl.u32 %v7460_v27, 16  ;;  %v8182_v51 = vor.u32 %v8181_v7, %v13192_v43 }
 0x4fc   : > { %10314 = vmatmul.msk.bf16.gmra.mxu3 %vm803_vm1, %v7680_v30  ;;  %v7670_v62 = vunpack.c.l.b16 %v7601_v46  ;;  %v8185_v30 = vshll.u32 %v7846_v42, 16  ;;  %v7956_v22 = vunpack.c.l.b16 %v7930_v56  ;;  %v7632_v27 = vshll.u32 %v7462_v63, 16  ;;  %v13240_v63 = vld [vmem:[#allocation3 + $0x58] sm:$0xf] }
 0x4fd   : > { %v6947_v18 = vadd.f32 %v13150_v17, %v6782_v59  ;;  %10332 = vmatmul.msk.bf16.gmra.mxu0 %vm803_vm1, %v7965_v34  ;;  %v7927_v17 = vsel %vm11491_vm7, %v10325_v12, %v7926_v5  ;;  %v7615_v25 = vrot.slane %v7613_v37, 4  ;;  %v7628_v34 = vrot.slane %v7626_v45, 4 }
 0x4fe   : > { %v8195_v5 = vrot.slane %v8193_v0, 5  ;;  %v8173_v59 = vrot.slane %v8172_v19, 4  ;;  %v8183_v11 = vrot.slane %v8182_v51, 4  ;;  %v8187_v12 = vrot.slane %v8185_v30, 5  ;;  %v7850_v51 = vld [vmem:[#allocation3 + $0x54] sm:$0xf] }
 0x4ff   : > { %v6786_v6 = vpop.f32.mrf.mxu3  ;;  %v13203_v35 = vadd.f32 %v7250_v23, %v6947_v18  ;;  %v7955_v23 = vunpack.c.l.b16 %v7927_v17  ;;  %v7681_v46 = vpack.c.b16 %v7671_v15, %v7670_v62  ;;  %v7619_v42 = vor.u32 %v7618_v21, %v7615_v25 }
 0x500   : > { %v7252_v49 = vpop.f32.mrf.mxu1  ;;  %v8196_v7 = vor.u32 %v8195_v5, %v8192_v47  ;;  %v8178_v17 = vsel %vm11340_vm14, %v8173_v59, %v13192_v43  ;;  %v7637_v37 = vshrl.u32 %v7463_v32, 16  ;;  %v8188_v45 = vsel %vm11340_vm14, %v8183_v11, %v8187_v12 }
 0x501   : > { %v7966_v55 = vpack.c.b16 %v7956_v22, %v7955_v23  ;;  %v8206_v14 = vor.u32 %v8205_v50, %v13220_v29  ;;  %v8209_v62 = vshll.u32 %v7849_v10, 16  ;;  %v7620_v15 = vrot.slane %v7619_v42, 4 }
 0x502   : > { %v6667_v28 = vpop.f32.mrf.mxu2  ;;  %v13207_v44 = vpop.f32.mrf.mxu0  ;;  %v7634_v0 = vrot.slane %v7632_v27, 5  ;;  %v7935_v56 = vrot.slane %v7933_v26, 4  ;;  %v7936_v19 = vrot.slane %v7849_v10, 5  ;;  %v7639_v30 = vrot.slane %v7637_v37, 4  ;;  %v7465_v10 = vld [vmem:[#allocation3 + $0x74] sm:$0x1] }
 0x503   : > { %v6784_v4 = vadd.f32 %v6783_v38, %v6667_v28  ;;  %v10326_v28 = vrot.slane %v7861_v9, 9  ;;  %v8207_v41 = vrot.slane %v8206_v14, 4  ;;  %v8211_v25 = vrot.slane %v8209_v62, 5 }
 0x504   : > { %v8248_v22 = vunpack.c.l.b16 %v8188_v45  ;;  %v8217_v47 = vshll.u32 %v7850_v51, 16  ;;  %v7625_v5 = vsel %vm11340_vm14, %v7620_v15, %v13214_v1  ;;  %v7937_v11 = vsel %vm11491_vm7, %v7935_v56, %v7936_v19  ;;  %v7862_v56 = vld [vmem:[#allocation3 + $0x54] sm:$0xe] }
 0x505   : > { %v6948_v48 = vadd.f32 %v13169_v58, %v6784_v4  ;;  %v7629_v58 = vor.u32 %v7628_v34, %v13214_v1  ;;  %v7642_v4 = vrot.slane %v7640_v31, 5  ;;  %v7934_v59 = vsel %vm11491_vm7, %v10326_v28, %v7933_v26 }
 0x506   : > { %v8212_v27 = vsel %vm11340_vm14, %v8207_v41, %v8211_v25  ;;  %v8227_v9 = vshrl.u32 %v13240_v63, 16  ;;  %v7672_v26 = vunpack.c.l.b16 %v7625_v5  ;;  %v7957_v37 = vunpack.c.l.b16 %v7934_v59  ;;  %v8337_v5 = vld [vmem:[#allocation3 + $0xc] sm:$0xf] }
 0x507   : > { %10305 = vmatmul.msk.bf16.gmra.mxu2 %vm803_vm1, %v10468_v24  ;;  %v13218_v38 = vpop.f32.mrf.mxu3  ;;  %v13224_v39 = vadd.f32 %v7252_v49, %v6948_v48  ;;  %v7464_v49 = vld [vmem:[#allocation3 + $0x70] sm:$0xf]  ;;  %v7630_v3 = vrot.slane %v7629_v58, 4  ;;  %v8247_v48 = vunpack.c.l.b16 %v8178_v17  ;;  %v10469_v58 = vld [vmem:[#allocation3 + $0x54] sm:$0xff]  ;;  %v8219_v17 = vrot.slane %v8217_v47, 5 }
 0x508   : > { %v7255_v18 = vpop.f32.mrf.mxu1  ;;  %v7646_v24 = vshll.u32 %v7464_v49, 16  ;;  %v7650_v23 = vshrl.u32 %v7464_v49, 16  ;;  %v7958_v31 = vunpack.c.l.b16 %v7937_v11  ;;  %v7656_v62 = vshll.u32 %v7465_v10, 16  ;;  %v8338_v47 = vld [vmem:[#allocation3 + $0x10] sm:$0xf] }
 0x509   : > { %v8258_v49 = vpack.c.b16 %v8248_v22, %v8247_v48  ;;  %v7940_v19 = vrot.slane %v13240_v63, 5  ;;  %v8707_v10 = vrot.slane %v8338_v47, 5 }
 0x50a   : > { %v6670_v33 = vpop.f32.mrf.mxu2  ;;  %v13226_v13 = vpop.f32.mrf.mxu0  ;;  %v7652_v42 = vrot.slane %v7650_v23, 4  ;;  %v7658_v48 = vrot.slane %v7656_v62, 5 }
 0x50b   : > { %10340 = vmatmul.msk.bf16.gmra.mxu1 %vm803_vm1, %v8257_v20  ;;  %v6787_v54 = vadd.f32 %v6786_v6, %v6670_v33  ;;  %v8197_v6 = vrot.slane %v8196_v7, 4  ;;  %v7635_v20 = vsel %vm11340_vm14, %v7630_v3, %v7634_v0  ;;  %v8229_v0 = vrot.slane %v8227_v9, 4  ;;  %v13291_v9 = vld [vmem:[#allocation3 + $0x1c] sm:$0xf] }
 0x50c   : > { %10315 = vmatmul.msk.bf16.gmra.mxu3 %vm803_vm1, %v7681_v46  ;;  %v7648_v46 = vrot.slane %v7646_v24, 5  ;;  %v7673_v7 = vunpack.c.l.b16 %v7635_v20  ;;  %v7942_v20 = vrot.slane %v7940_v19, 4 }
 0x50d   : > { %v6949_v43 = vadd.f32 %v13183_v61, %v6787_v54  ;;  %10333 = vmatmul.msk.bf16.gmra.mxu0 %vm803_vm1, %v7966_v55  ;;  %v8214_v61 = vshrl.u32 %v7850_v51, 16  ;;  %v8202_v32 = vsel %vm11340_vm14, %v8197_v6, %v13220_v29  ;;  %v8223_v55 = vshll.u32 %v13240_v63, 16 }
 0x50e   : > { %v13262_v54 = vunpack.c.l.b16 %v8202_v32  ;;  %v7653_v14 = vor.u32 %v7652_v42, %v7648_v46  ;;  %v8877_v42 = vld [vmem:[#allocation3 + $0x18] sm:$0xf] }
 0x50f   : > { %v6791_v60 = vpop.f32.mrf.mxu3  ;;  %v13238_v21 = vadd.f32 %v7255_v18, %v6949_v43  ;;  %v7643_v18 = vor.u32 %v7642_v4, %v7639_v30  ;;  %v8216_v33 = vrot.slane %v8214_v61, 4  ;;  %v13267_v3 = vrot.slane %v8223_v55, 5 }
 0x510   : > { %v7257_v34 = vpop.f32.mrf.mxu1  ;;  %v7682_v43 = vpack.c.b16 %v7673_v7, %v7672_v26  ;;  %v7967_v30 = vpack.c.b16 %v7958_v31, %v7957_v37  ;;  %v7654_v25 = vrot.slane %v7653_v14, 4  ;;  %v10327_v61 = vrot.slane %v7862_v56, 9 }
 0x511   : > { %v7644_v45 = vrot.slane %v7643_v18, 4  ;;  %v8220_v6 = vor.u32 %v8219_v17, %v8216_v33  ;;  %v8230_v63 = vor.u32 %v8229_v0, %v13267_v3  ;;  %v8367_v18 = vshll.u32 %v8337_v5, 16  ;;  %v8339_v33 = vld [vmem:[#allocation3 + $0x14] sm:$0x1] }
 0x512   : > { %v6672_v12 = vpop.f32.mrf.mxu2  ;;  %v13251_v50 = vpop.f32.mrf.mxu0  ;;  %v7941_v31 = vsel %vm11491_vm7, %v10327_v61, %v7940_v19  ;;  %v8907_v62 = vshll.u32 %v8877_v42, 16  ;;  %v10470_v19 = vld [vmem:[#allocation3 + $0x60] sm:$0xff] }
 0x513   : > { %v6789_v1 = vadd.f32 %v13218_v38, %v6672_v12  ;;  %v13264_v38 = vunpack.c.l.b16 %v8212_v27  ;;  %v7649_v41 = vsel %vm11340_vm14, %v7644_v45, %v7648_v46  ;;  %v13283_v11 = vrot.slane %v8220_v6, 4  ;;  %v8671_v27 = vld [vmem:[#allocation3 + $0xc] sm:$0xe]  ;;  %v13304_v61 = vld [vmem:[#allocation3 + $0x20] sm:$0x1] }
 0x514   : > { %v8364_v12 = vshrl.u32 %v8337_v5, 16  ;;  %v8373_v46 = vshll.u32 %v8338_v47, 16  ;;  %v8231_v7 = vrot.slane %v8230_v63, 4  ;;  %v10354_v0 = vrot.slane %v8671_v27, 9 }
 0x515   : > { %v6950_v29 = vadd.f32 %v13207_v44, %v6789_v1  ;;  %v7852_v44 = vld [vmem:[#allocation3 + $0x5c] sm:$0x1]  ;;  %v8259_v23 = vpack.c.b16 %v13264_v38, %v13262_v54  ;;  %v7659_v1 = vsel %vm11340_vm14, %v7654_v25, %v7658_v48  ;;  %v8383_v25 = vshll.u32 %v8339_v33, 16 }
 0x516   : > { %v7943_v59 = vrot.slane %v7852_v44, 5  ;;  %v8366_v55 = vrot.slane %v8364_v12, 4  ;;  %v13293_v17 = vrot.slane %v8373_v46, 5  ;;  %v7959_v5 = vunpack.c.l.b16 %v7941_v31 }
 0x517   : > { %10306 = vmatmul.msk.bf16.gmra.mxu2 %vm803_vm1, %v10469_v58  ;;  %v6793_v15 = vpop.f32.mrf.mxu3  ;;  %v13272_v51 = vadd.f32 %v7257_v34, %v6950_v29  ;;  %v8233_v34 = vshll.u32 %v7852_v44, 16  ;;  %v13289_v58 = vunpack.c.l.b16 %v7649_v41  ;;  %v8904_v29 = vshrl.u32 %v8877_v42, 16 }
 0x518   : > { %v13269_v28 = vpop.f32.mrf.mxu1  ;;  %v8917_v44 = vshrl.u32 %v13291_v9, 16  ;;  %v13320_v42 = vsel %vm11491_vm7, %v10354_v0, %v8707_v10  ;;  %v8923_v27 = vshll.u32 %v13304_v61, 16 }
 0x519   : > { %v8235_v45 = vrot.slane %v8233_v34, 5  ;;  %v8906_v63 = vrot.slane %v8904_v29, 4  ;;  %v8909_v34 = vrot.slane %v8907_v62, 5  ;;  %v8341_v62 = vld [vmem:[#allocation3 + $0x1c] sm:$0xf] }
 0x51a   : > { %v6675_v4 = vpop.f32.mrf.mxu2  ;;  %v13274_v24 = vpop.f32.mrf.mxu0 }
 0x51b   : > { %10341 = vmatmul.msk.bf16.gmra.mxu1 %vm803_vm1, %v8258_v49  ;;  %v6792_v22 = vadd.f32 %v6791_v60, %v6675_v4  ;;  %v8377_v60 = vshrl.u32 %v8338_v47, 16  ;;  %v7944_v49 = vsel %vm11491_vm7, %v7942_v20, %v7943_v59  ;;  %v8710_v4 = vrot.slane %v8339_v33, 5 }
 0x51c   : > { %10316 = vmatmul.msk.bf16.gmra.mxu3 %vm803_vm1, %v7682_v43  ;;  %v8913_v43 = vshll.u32 %v13291_v9, 16  ;;  %v7675_v47 = vunpack.c.l.b16 %v7659_v1  ;;  %v8919_v59 = vrot.slane %v8917_v44, 4  ;;  %v9247_v33 = vrot.slane %v13291_v9, 5 }
 0x51d   : > { %v6951_v32 = vadd.f32 %v13226_v13, %v6792_v22  ;;  %10334 = vmatmul.msk.bf16.gmra.mxu0 %vm803_vm1, %v7967_v30  ;;  %v8369_v13 = vrot.slane %v8367_v18, 5  ;;  %v8379_v14 = vrot.slane %v8377_v60, 4  ;;  %v8709_v30 = vrot.slane %v8707_v10, 4 }
 0x51e   : > { %v13306_v20 = vrot.slane %v8913_v43, 5  ;;  %v7960_v18 = vunpack.c.l.b16 %v7944_v49  ;;  %v8236_v60 = vsel %vm11340_vm14, %v8231_v7, %v8235_v45  ;;  %v7683_v7 = vpack.c.b16 %v7675_v47, %v13289_v58 }
 0x51f   : > { %v6796_v26 = vpop.f32.mrf.mxu3  ;;  %v8370_v41 = vor.u32 %v8369_v13, %v8366_v55  ;;  %v8380_v22 = vor.u32 %v8379_v14, %v13293_v17  ;;  %v13314_v46 = vadd.f32 %v13269_v28, %v6951_v32  ;;  %v8910_v32 = vor.u32 %v8909_v34, %v8906_v63  ;;  %v9211_v14 = vld [vmem:[#allocation3 + $0x18] sm:$0xe]  ;;  %v8342_v63 = vld [vmem:[#allocation3 + $0x20] sm:$0x1] }
 0x520   : > { %v7262_v37 = vpop.f32.mrf.mxu1  ;;  %v8920_v10 = vor.u32 %v8919_v59, %v13306_v20  ;;  %v7968_v29 = vpack.c.b16 %v7960_v18, %v7959_v5  ;;  %v13339_v45 = vunpack.c.l.b16 %v8236_v60  ;;  %v8761_v43 = vunpack.c.l.b16 %v13320_v42  ;;  %v13362_v18 = vld [vmem:[#allocation3 + $0x28] sm:$0xf] }
 0x521   : > { %v8371_v1 = vrot.slane %v8370_v41, 4  ;;  %v8381_v28 = vrot.slane %v8380_v22, 4  ;;  %v8714_v41 = vrot.slane %v8341_v62, 5  ;;  %v9249_v22 = vrot.slane %v9247_v33, 4 }
 0x522   : > { %v6677_v56 = vpop.f32.mrf.mxu2  ;;  %v13301_v6 = vpop.f32.mrf.mxu0  ;;  %v8397_v5 = vshll.u32 %v8341_v62, 16  ;;  %v8401_v59 = vshrl.u32 %v8341_v62, 16  ;;  %v8937_v62 = vshll.u32 %v13362_v18, 16 }
 0x523   : > { %v6794_v48 = vadd.f32 %v6793_v15, %v6677_v56  ;;  %v8226_v15 = vsel %vm11340_vm14, %v13283_v11, %v13267_v3  ;;  %v13328_v3 = vsel %vm11491_vm7, %v8709_v30, %v8710_v4  ;;  %v8385_v11 = vrot.slane %v8383_v25, 5  ;;  %v8672_v4 = vld [vmem:[#allocation3 + $0x18] sm:$0xe] }
 0x524   : > { %v13337_v31 = vunpack.c.l.b16 %v8226_v15  ;;  %v8762_v58 = vunpack.c.l.b16 %v13328_v3  ;;  %v8376_v9 = vsel %vm11340_vm14, %v8371_v1, %v13293_v17  ;;  %v8911_v30 = vrot.slane %v8910_v32, 4  ;;  %v8340_v25 = vld [vmem:[#allocation3 + $0x18] sm:$0xf] }
 0x525   : > { %v6952_v12 = vadd.f32 %v13251_v50, %v6794_v48  ;;  %v8386_v56 = vsel %vm11340_vm14, %v8381_v28, %v8385_v11  ;;  %v8921_v48 = vrot.slane %v8920_v10, 4  ;;  %v9250_v17 = vrot.slane %v13304_v61, 5 }
 0x526   : > { %v10355_v38 = vrot.slane %v8672_v4, 9  ;;  %v13358_v34 = vunpack.c.l.b16 %v8376_v9  ;;  %v13360_v47 = vunpack.c.l.b16 %v8386_v56  ;;  %v8716_v60 = vrot.slane %v8714_v41, 4  ;;  %v10471_v4 = vld [vmem:[#allocation3 + $0x6c] sm:$0xff] }
 0x527   : > { %10307 = vmatmul.msk.bf16.gmra.mxu2 %vm803_vm1, %v10470_v19  ;;  %v13324_v50 = vpop.f32.mrf.mxu3  ;;  %v13335_v13 = vadd.f32 %v7262_v37, %v6952_v12  ;;  %v8925_v37 = vrot.slane %v8923_v27, 5  ;;  %v10380_v19 = vrot.slane %v9211_v14, 9  ;;  %v8880_v12 = vld [vmem:[#allocation3 + $0x24] sm:$0xf]  ;;  %v8717_v61 = vrot.slane %v8342_v63, 5 }
 0x528   : > { %v13330_v55 = vpop.f32.mrf.mxu1  ;;  %v8916_v28 = vsel %vm11340_vm14, %v8911_v30, %v13306_v20  ;;  %v8399_v32 = vrot.slane %v8397_v5, 5  ;;  %v8931_v14 = vshll.u32 %v8880_v12, 16  ;;  %v9251_v56 = vsel %vm11491_vm7, %v9249_v22, %v9250_v17 }
 0x529   : > { %v8926_v11 = vsel %vm11340_vm14, %v8921_v48, %v8925_v37  ;;  %v8715_v20 = vsel %vm11491_vm7, %v10355_v38, %v8714_v41  ;;  %v8941_v37 = vshrl.u32 %v13362_v18, 16  ;;  %v13385_v41 = vrot.slane %v8937_v62, 5 }
 0x52a   : > { %v6680_v49 = vpop.f32.mrf.mxu2  ;;  %v13341_v0 = vpop.f32.mrf.mxu0  ;;  %v9096_v5 = vunpack.c.l.b16 %v8926_v11 }
 0x52b   : > { %10342 = vmatmul.msk.bf16.gmra.mxu1 %vm803_vm1, %v8259_v23  ;;  %v6797_v44 = vadd.f32 %v6796_v26, %v6680_v49  ;;  %v8388_v23 = vshrl.u32 %v8340_v25, 16  ;;  %v8391_v26 = vshll.u32 %v8340_v25, 16  ;;  %v8718_v25 = vsel %vm11491_vm7, %v8716_v60, %v8717_v61 }
 0x52c   : > { %10317 = vmatmul.msk.bf16.gmra.mxu3 %vm803_vm1, %v7683_v7  ;;  %v8403_v7 = vrot.slane %v8401_v59, 4  ;;  %v8943_v38 = vrot.slane %v8941_v37, 4  ;;  %v8260_v60 = vpack.c.b16 %v13339_v45, %v13337_v31 }
 0x52d   : > { %v6953_v54 = vadd.f32 %v13274_v24, %v6797_v44  ;;  %10335 = vmatmul.msk.bf16.gmra.mxu0 %vm803_vm1, %v7968_v29  ;;  %v8390_v1 = vrot.slane %v8388_v23, 4  ;;  %v8393_v27 = vrot.slane %v8391_v26, 5  ;;  %v8928_v29 = vshrl.u32 %v8880_v12, 16 }
 0x52e   : > { %v9248_v44 = vsel %vm11491_vm7, %v10380_v19, %v9247_v33  ;;  %v8933_v23 = vrot.slane %v8931_v14, 5  ;;  %v9095_v26 = vunpack.c.l.b16 %v8916_v28  ;;  %v8404_v59 = vor.u32 %v8403_v7, %v8399_v32  ;;  %v13382_v19 = vld [vmem:[#allocation3 + $0x2c] sm:$0x1] }
 0x52f   : > { %v6801_v15 = vpop.f32.mrf.mxu3  ;;  %v8394_v10 = vor.u32 %v8393_v27, %v8390_v1  ;;  %v8930_v48 = vrot.slane %v8928_v29, 4  ;;  %v8407_v33 = vshll.u32 %v8342_v63, 16  ;;  %v9301_v12 = vunpack.c.l.b16 %v9248_v44 }
 0x530   : > { %v7267_v24 = vpop.f32.mrf.mxu1  ;;  %v8763_v1 = vunpack.c.l.b16 %v8715_v20  ;;  %v8764_v27 = vunpack.c.l.b16 %v8718_v25  ;;  %v8947_v28 = vshll.u32 %v13382_v19, 16  ;;  %v13399_v7 = vrot.slane %v8404_v59, 4  ;;  %v8345_v20 = vld [vmem:[#allocation3 + $0x2c] sm:$0x1]  ;;  %v8343_v25 = vld [vmem:[#allocation3 + $0x24] sm:$0xf] }
 0x531   : > { %v8395_v17 = vrot.slane %v8394_v10, 4  ;;  %v8934_v63 = vor.u32 %v8933_v23, %v8930_v48  ;;  %v13401_v10 = vrot.slane %v8407_v33, 5  ;;  %v13404_v29 = vadd.f32 %v13330_v55, %v6953_v54  ;;  %v9212_v54 = vld [vmem:[#allocation3 + $0x24] sm:$0xe]  ;;  %v8883_v33 = vld [vmem:[#allocation3 + $0x30] sm:$0xf] }
 0x532   : > { %v6682_v49 = vpop.f32.mrf.mxu2  ;;  %v13370_v9 = vpop.f32.mrf.mxu0  ;;  %v9111_v45 = vpack.c.b16 %v9096_v5, %v9095_v26  ;;  %v8944_v3 = vor.u32 %v8943_v38, %v13385_v41  ;;  %v13418_v55 = vpack.c.b16 %v8764_v27, %v8763_v1  ;;  %v10381_v5 = vrot.slane %v9212_v54, 9 }
 0x533   : > { %v6799_v30 = vadd.f32 %v13324_v50, %v6682_v49  ;;  %v9302_v50 = vunpack.c.l.b16 %v9251_v56  ;;  %v8400_v42 = vsel %vm11340_vm14, %v8395_v17, %v8399_v32  ;;  %v8571_v49 = vpack.c.b16 %v13360_v47, %v13358_v34 }
 0x534   : > { %v8935_v32 = vrot.slane %v8934_v63, 4  ;;  %v8949_v56 = vrot.slane %v8947_v28, 5  ;;  %v8412_v17 = vshrl.u32 %v8343_v25, 16  ;;  %v8415_v38 = vshll.u32 %v8343_v25, 16 }
 0x535   : > { %v6954_v22 = vadd.f32 %v13301_v6, %v6799_v30  ;;  %v8777_v6 = vpack.c.b16 %v8762_v58, %v8761_v43  ;;  %v9254_v43 = vrot.slane %v13362_v18, 5  ;;  %v8344_v58 = vld [vmem:[#allocation3 + $0x28] sm:$0xf]  ;;  %v13416_v44 = vpack.c.b16 %v9302_v50, %v9301_v12  ;;  %v13433_v50 = vld [vmem:[#allocation3 + $0x34] sm:$0xf] }
 0x536   : > { %v8721_v37 = vrot.slane %v8344_v58, 5  ;;  %v8410_v18 = vsel %vm11340_vm14, %v13399_v7, %v13401_v10  ;;  %v13426_v30 = vunpack.c.l.b16 %v8400_v42  ;;  %v8421_v48 = vshll.u32 %v8344_v58, 16 }
 0x537   : > { %10308 = vmatmul.msk.bf16.gmra.mxu2 %vm803_vm1, %v10471_v4  ;;  %v13390_v61 = vpop.f32.mrf.mxu3  ;;  %v13406_v31 = vadd.f32 %v7267_v24, %v6954_v22  ;;  %v8673_v4 = vld [vmem:[#allocation3 + $0x24] sm:$0xe]  ;;  %v8425_v23 = vshrl.u32 %v8344_v58, 16  ;;  %v9256_v59 = vrot.slane %v9254_v43, 4  ;;  %v9257_v22 = vrot.slane %v13382_v19, 5 }
 0x538   : > { %v13397_v11 = vpop.f32.mrf.mxu1  ;;  %v13431_v12 = vrot.slane %v8421_v48, 5  ;;  %v10356_v27 = vrot.slane %v8673_v4, 9  ;;  %v8940_v28 = vsel %vm11340_vm14, %v8935_v32, %v13385_v41  ;;  %v8414_v7 = vrot.slane %v8412_v17, 4 }
 0x539   : > { %v8417_v10 = vrot.slane %v8415_v38, 5  ;;  %v8952_v19 = vshrl.u32 %v8883_v33, 16  ;;  %v9255_v42 = vsel %vm11491_vm7, %v10381_v5, %v9254_v43  ;;  %v8961_v58 = vshll.u32 %v13433_v50, 16 }
 0x53a   : > { %v6685_v14 = vpop.f32.mrf.mxu2  ;;  %v13412_v62 = vpop.f32.mrf.mxu0  ;;  %v8431_v25 = vshll.u32 %v8345_v20, 16  ;;  %v8965_v41 = vshrl.u32 %v13433_v50, 16  ;;  %v8722_v43 = vsel %vm11491_vm7, %v10356_v27, %v8721_v37  ;;  %v9097_v17 = vunpack.c.l.b16 %v8940_v28 }
 0x53b   : > { %10343 = vmatmul.msk.bf16.gmra.mxu1 %vm803_vm1, %v8260_v60  ;;  %v6802_v24 = vadd.f32 %v6801_v15, %v6685_v14  ;;  %v8945_v15 = vrot.slane %v8944_v3, 4  ;;  %v8723_v60 = vrot.slane %v8721_v37, 4  ;;  %v8955_v3 = vshll.u32 %v8883_v33, 16 }
 0x53c   : > { %10362 = vmatmul.msk.bf16.vlgmr.msra.gmra.mxu3 %vm803_vm1, %v8777_v6  ;;  %v8724_v6 = vrot.slane %v8345_v20, 5  ;;  %v13456_v5 = vrot.slane %v8961_v58, 5  ;;  %v8967_v33 = vrot.slane %v8965_v41, 4  ;;  %v8433_v27 = vrot.slane %v8431_v25, 5  ;;  %v9213_v58 = vld [vmem:[#allocation3 + $0x30] sm:$0xe] }
 0x53d   : > { %v6955_v26 = vadd.f32 %v13341_v0, %v6802_v24  ;;  %10371 = vmatmul.msk.bf16.vlgmr.msra.gmra.mxu0 %vm803_vm1, %v9111_v45  ;;  %v8427_v0 = vrot.slane %v8425_v23, 4  ;;  %v8950_v45 = vsel %vm11340_vm14, %v8945_v15, %v8949_v56  ;;  %v8418_v24 = vor.u32 %v8417_v10, %v8414_v7 }
 0x53e   : > { %v9258_v56 = vsel %vm11491_vm7, %v9256_v59, %v9257_v22  ;;  %v8725_v48 = vsel %vm11491_vm7, %v8723_v60, %v8724_v6  ;;  %v8954_v23 = vrot.slane %v8952_v19, 4  ;;  %v8957_v15 = vrot.slane %v8955_v3, 5 }
 0x53f   : > { %v13435_v1 = vpop.f32.mrf.mxu3  ;;  %v8428_v4 = vor.u32 %v8427_v0, %v13431_v12  ;;  %v9098_v38 = vunpack.c.l.b16 %v8950_v45  ;;  %v13459_v0 = vld [vmem:[#allocation3 + $0x38] sm:$0x1]  ;;  %v13464_v59 = vunpack.c.l.b16 %v8410_v18  ;;  %v8419_v37 = vrot.slane %v8418_v24, 4 }
 0x540   : > { %v7272_v63 = vpop.f32.mrf.mxu1  ;;  %v9304_v6 = vunpack.c.l.b16 %v9258_v56  ;;  %v8765_v28 = vunpack.c.l.b16 %v8722_v43  ;;  %v8766_v7 = vunpack.c.l.b16 %v8725_v48  ;;  %v8958_v19 = vor.u32 %v8957_v15, %v8954_v23  ;;  %v13511_v48 = vld [vmem:[#allocation3 + $0x38] sm:$0x1]  ;;  %v8674_v23 = vld [vmem:[#allocation3 + $0x30] sm:$0xe] }
 0x541   : > { %v8429_v22 = vrot.slane %v8428_v4, 4  ;;  %v8971_v18 = vshll.u32 %v13459_v0, 16  ;;  %v9112_v34 = vpack.c.b16 %v9098_v38, %v9097_v17  ;;  %v8572_v24 = vpack.c.b16 %v13464_v59, %v13426_v30  ;;  %v13499_v4 = vld [vmem:[#allocation3 + $0x34] sm:$0xf]  ;;  %v8886_v17 = vld [vmem:[#allocation3 + $0x3c] sm:$0xf] }
 0x542   : > { %v6687_v14 = vpop.f32.mrf.mxu2  ;;  %v13445_v54 = vpop.f32.mrf.mxu0  ;;  %v10382_v43 = vrot.slane %v9213_v58, 9  ;;  %v9264_v59 = vrot.slane %v13459_v0, 5  ;;  %v8731_v0 = vrot.slane %v13511_v48, 5 }
 0x543   : > { %v6804_v32 = vadd.f32 %v13390_v61, %v6687_v14  ;;  %v13462_v61 = vadd.f32 %v13397_v11, %v6955_v26  ;;  %v8968_v11 = vor.u32 %v8967_v33, %v13456_v5  ;;  %v8434_v3 = vsel %vm11340_vm14, %v8429_v22, %v8433_v27 }
 0x544   : > { %v9261_v14 = vrot.slane %v13433_v50, 5  ;;  %v13503_v50 = vpack.c.b16 %v8766_v7, %v8765_v28  ;;  %v8973_v41 = vrot.slane %v8971_v18, 5  ;;  %v13509_v30 = vunpack.c.l.b16 %v8434_v3  ;;  %v13525_v7 = vld [vmem:[#allocation3 + $0x40] sm:$0xf] }
 0x545   : > { %v6956_v20 = vadd.f32 %v13370_v9, %v6804_v32  ;;  %v9303_v9 = vunpack.c.l.b16 %v9255_v42  ;;  %v8424_v42 = vsel %vm11340_vm14, %v8419_v37, %v13431_v12  ;;  %v8969_v25 = vrot.slane %v8968_v11, 4  ;;  %v8346_v32 = vld [vmem:[#allocation3 + $0x30] sm:$0xf] }
 0x546   : > { %v9263_v15 = vrot.slane %v9261_v14, 4  ;;  %v8445_v33 = vshll.u32 %v13499_v4, 16  ;;  %v8436_v37 = vshrl.u32 %v8346_v32, 16  ;;  %v8439_v22 = vshll.u32 %v8346_v32, 16 }
 0x547   : > { %10345 = vmatmul.msk.bf16.vlgmr.msra.gmra.mxu2 %vm803_vm1, %v8571_v49  ;;  %v13470_v60 = vpop.f32.mrf.mxu3  ;;  %v13474_v26 = vadd.f32 %v7272_v63, %v6956_v20  ;;  %v13497_v12 = vpack.c.b16 %v9304_v6, %v9303_v9  ;;  %v8449_v20 = vshrl.u32 %v13499_v4, 16  ;;  %v8974_v6 = vsel %vm11340_vm14, %v8969_v25, %v8973_v41 }
 0x548   : > { %v8297_v10 = vpop.f32.mrf.mxu1  ;;  %v10357_v28 = vrot.slane %v8674_v23, 9  ;;  %v8976_v11 = vshrl.u32 %v8886_v17, 16  ;;  %v8979_v3 = vshll.u32 %v8886_v17, 16  ;;  %v8989_v32 = vshrl.u32 %v13525_v7, 16 }
 0x549   : > { %v13477_v45 = vadd.f32 %v8297_v10, %v13412_v62  ;;  %v13491_v62 = vld [vmem:[%s14047_s11] ss:$0 sm:$0xff]  ;;  %v9265_v17 = vsel %vm11491_vm7, %v9263_v15, %v9264_v59 }
 0x54a   : > { %v7386_v47 = vpop.f32.mrf.mxu2  ;;  %v13479_v49 = vpop.f32.mrf.mxu0  ;;  %v8978_v25 = vrot.slane %v8976_v11, 4  ;;  %v8981_v41 = vrot.slane %v8979_v3, 5 }
 0x54b   : > { %v7426_v63 = vadd.f32 %v7386_v47, %v13096_v57  ;;  %10388 = vmatmul.msk.bf16.vlgmr.msra.gmra.mxu1 %vm803_vm1, %v13416_v44  ;;  %v8959_v57 = vrot.slane %v8958_v19, 4  ;;  %v13507_v44 = vunpack.c.l.b16 %v8424_v42  ;;  %v8451_v42 = vrot.slane %v8449_v20, 4  ;;  %v13543_v20 = vld [vmem:[#allocation3 + $0x44] sm:$0x1] }
 0x54c   : > { %10363 = vmatmul.msk.bf16.gmra.mxu3 %vm803_vm1, %v13418_v55  ;;  %v8728_v55 = vrot.slane %v13499_v4, 5  ;;  %v8441_v4 = vrot.slane %v8439_v22, 5  ;;  %v8982_v59 = vor.u32 %v8981_v41, %v8978_v25 }
 0x54d   : > { %v7760_v56 = vadd.f32 %v13435_v1, %v7426_v63  ;;  %10372 = vmatmul.msk.bf16.gmra.mxu0 %vm803_vm1, %v9112_v34  ;;  %v8964_v9 = vsel %vm11340_vm14, %v8959_v57, %v13456_v5  ;;  %v13533_v5 = vrot.slane %v8445_v33, 5  ;;  %v8438_v63 = vrot.slane %v8436_v37, 4 }
 0x54e   : > { %v8730_v47 = vrot.slane %v8728_v55, 4  ;;  %v8985_v57 = vshll.u32 %v13525_v7, 16  ;;  %v9099_v23 = vunpack.c.l.b16 %v8964_v9  ;;  %v9100_v33 = vunpack.c.l.b16 %v8974_v6 }
 0x54f   : > { %v7780_v1 = vadd.f32 %v13491_v62, %v7760_v56  ;;  %v13517_v38 = vpop.f32.mrf.mxu3  ;;  %v8455_v37 = vshll.u32 %v13511_v48, 16  ;;  %v8442_v9 = vor.u32 %v8441_v4, %v8438_v63  ;;  %v8995_v48 = vshll.u32 %v13543_v20, 16 }
 0x550   : > { %v8299_v27 = vpop.f32.mrf.mxu1 }
 0x551   : > { %v7796_v10 = vmax.f32 %v7780_v1, 0.0  ;;  %v13528_v19 = vadd.f32 %v8299_v27, %v13445_v54  ;;  %v9262_v54 = vsel %vm11491_vm7, %v10382_v43, %v9261_v14  ;;  %v8452_v1 = vor.u32 %v8451_v42, %v13533_v5 }
 0x552   : > { %v7388_v18 = vpop.f32.mrf.mxu2  ;;  %v13531_v34 = vpop.f32.mrf.mxu0  ;;  %v8991_v14 = vrot.slane %v8989_v32, 4  ;;  %v8732_v27 = vsel %vm11491_vm7, %v8730_v47, %v8731_v0  ;;  %v9305_v15 = vunpack.c.l.b16 %v9262_v54  ;;  %v13573_v4 = vrot.slane %v8442_v9, 4  ;;  %v9214_v32 = vld [vmem:[#allocation3 + $0x3c] sm:$0xe] }
 0x553   : > { %v7427_v58 = vadd.f32 %v7388_v18, %v13117_v8  ;;  %7813 = vst.msk [vmem:[%s10720_s15] sm:$0xff] %vm7812_vm0, %v7796_v10  ;;  %v13545_v8 = vrot.slane %v8985_v57, 5  ;;  %v9306_v18 = vunpack.c.l.b16 %v9265_v17  ;;  %v8768_v0 = vunpack.c.l.b16 %v8732_v27  ;;  %v8350_v57 = vld [vmem:[#allocation3 + $0x40] sm:$0xf] }
 0x554   : > { %v13566_v47 = vrot.slane %v8452_v1, 4  ;;  %v8983_v54 = vrot.slane %v8982_v59, 4  ;;  %v8997_v41 = vrot.slane %v8995_v48, 5  ;;  %v8735_v17 = vrot.slane %v8350_v57, 5  ;;  %v8889_v1 = vld [vmem:[#allocation3 + $0x48] sm:$0xf] }
 0x555   : > { %v7761_v56 = vadd.f32 %v13470_v60, %v7427_v58  ;;  %v8729_v60 = vsel %vm11491_vm7, %v10357_v28, %v8728_v55  ;;  %v8992_v10 = vor.u32 %v8991_v14, %v13545_v8  ;;  %v13568_v58 = vrot.slane %v8455_v37, 5  ;;  %v13607_v59 = vld [vmem:[#allocation3 + $0x4c] sm:$0xf] }
 0x556   : > { %v8767_v28 = vunpack.c.l.b16 %v8729_v60  ;;  %v8988_v27 = vsel %vm11340_vm14, %v8983_v54, %v13545_v8  ;;  %v8737_v8 = vrot.slane %v8735_v17, 4 }
 0x557   : > { %v7781_v43 = vadd.f32 %v13491_v62, %v7761_v56  ;;  %10346 = vmatmul.msk.bf16.gmra.mxu2 %vm803_vm1, %v8572_v24  ;;  %v13553_v22 = vpop.f32.mrf.mxu3  ;;  %v9113_v24 = vpack.c.b16 %v9100_v33, %v9099_v23  ;;  %v8993_v25 = vrot.slane %v8992_v10, 4  ;;  %v13584_v23 = vpack.c.b16 %v9306_v18, %v9305_v15  ;;  %v13592_v33 = vld [vmem:[#allocation3 + $0x44] sm:$0x1] }
 0x558   : > { %v8302_v6 = vpop.f32.mrf.mxu1  ;;  %v8738_v48 = vrot.slane %v13592_v33, 5 }
 0x559   : > { %v13562_v11 = vadd.f32 %v8302_v6, %v13479_v49  ;;  %v7797_v42 = vmax.f32 %v7781_v43, 0.0  ;;  %v9268_v49 = vrot.slane %v13525_v7, 5  ;;  %v13586_v7 = vpack.c.b16 %v8768_v0, %v8767_v28  ;;  %v8349_v43 = vld [vmem:[#allocation3 + $0x3c] sm:$0xf] }
 0x55a   : > { %v7391_v3 = vpop.f32.mrf.mxu2  ;;  %v13564_v55 = vpop.f32.mrf.mxu0  ;;  %v8998_v9 = vsel %vm11340_vm14, %v8993_v25, %v8997_v41  ;;  %v9271_v6 = vrot.slane %v13543_v20, 5  ;;  %v8469_v28 = vshll.u32 %v8350_v57, 16  ;;  %v9003_v0 = vshll.u32 %v8889_v1, 16 }
 0x55b   : > { %v7428_v63 = vadd.f32 %v7391_v3, %v13137_v52  ;;  %10389 = vmatmul.msk.bf16.gmra.mxu1 %vm803_vm1, %v13497_v12  ;;  %7814 = vst.msk [vmem:[%s10720_s15 + $0x8] sm:$0xff] %vm7812_vm0, %v7797_v42  ;;  %v8573_v52 = vpack.c.b16 %v13509_v30, %v13507_v44  ;;  %v8675_v12 = vld [vmem:[#allocation3 + $0x3c] sm:$0xe]  ;;  %v8448_v44 = vsel %vm11340_vm14, %v13573_v4, %v13533_v5  ;;  %v10383_v30 = vrot.slane %v9214_v32, 9 }
 0x55c   : > { %10364 = vmatmul.msk.bf16.gmra.mxu3 %vm803_vm1, %v13503_v50  ;;  %v8458_v50 = vsel %vm11340_vm14, %v13566_v47, %v13568_v58  ;;  %v9270_v14 = vrot.slane %v9268_v49, 4  ;;  %v10358_v15 = vrot.slane %v8675_v12, 9  ;;  %v8460_v3 = vshrl.u32 %v8349_v43, 16 }
 0x55d   : > { %v7762_v56 = vadd.f32 %v13517_v38, %v7428_v63  ;;  %10373 = vmatmul.msk.bf16.gmra.mxu0 %vm803_vm1, %v9113_v24  ;;  %v9000_v24 = vshrl.u32 %v8889_v1, 16  ;;  %v8463_v47 = vshll.u32 %v8349_v43, 16  ;;  %v8473_v20 = vshrl.u32 %v8350_v57, 16 }
 0x55e   : > { %v9009_v63 = vshll.u32 %v13607_v59, 16  ;;  %v9272_v4 = vsel %vm11491_vm7, %v9270_v14, %v9271_v6  ;;  %v9005_v54 = vrot.slane %v9003_v0, 5  ;;  %v9013_v25 = vshrl.u32 %v13607_v59, 16 }
 0x55f   : > { %v7782_v38 = vadd.f32 %v13491_v62, %v7762_v56  ;;  %v13595_v37 = vpop.f32.mrf.mxu3  ;;  %v9002_v58 = vrot.slane %v9000_v24, 4  ;;  %v9101_v41 = vunpack.c.l.b16 %v8988_v27  ;;  %v9102_v32 = vunpack.c.l.b16 %v8998_v9 }
 0x560   : > { %v8304_v60 = vpop.f32.mrf.mxu1  ;;  %v8736_v56 = vsel %vm11491_vm7, %v10358_v15, %v8735_v17  ;;  %v9011_v57 = vrot.slane %v9009_v63, 5  ;;  %v8739_v12 = vsel %vm11491_vm7, %v8737_v8, %v8738_v48  ;;  %v13627_v1 = vrot.slane %v8469_v28, 5 }
 0x561   : > { %v7798_v10 = vmax.f32 %v7782_v38, 0.0  ;;  %v13610_v5 = vadd.f32 %v8304_v60, %v13531_v34  ;;  %v9269_v34 = vsel %vm11491_vm7, %v10383_v30, %v9268_v49  ;;  %v13629_v38 = vld [vmem:[#allocation3 + $0x50] sm:$0x1]  ;;  %v9006_v49 = vor.u32 %v9005_v54, %v9002_v58  ;;  %v13658_v54 = vld [vmem:[#allocation3 + $0x4c] sm:$0xf] }
 0x562   : > { %v7393_v18 = vpop.f32.mrf.mxu2  ;;  %v13613_v42 = vpop.f32.mrf.mxu0  ;;  %v9015_v30 = vrot.slane %v9013_v25, 4  ;;  %v8462_v60 = vrot.slane %v8460_v3, 4  ;;  %v8465_v27 = vrot.slane %v8463_v47, 5  ;;  %v8475_v9 = vrot.slane %v8473_v20, 4 }
 0x563   : > { %7815 = vst.msk [vmem:[%s10720_s15 + $0x10] sm:$0xff] %vm7812_vm0, %v7798_v10  ;;  %v7429_v14 = vadd.f32 %v7393_v18, %v13148_v36  ;;  %v13635_v6 = vunpack.c.l.b16 %v8448_v44  ;;  %v13637_v15 = vunpack.c.l.b16 %v8458_v50  ;;  %v9307_v10 = vunpack.c.l.b16 %v9269_v34 }
 0x564   : > { %v9308_v48 = vunpack.c.l.b16 %v9272_v4  ;;  %v9114_v8 = vpack.c.b16 %v9102_v32, %v9101_v41  ;;  %v9016_v28 = vor.u32 %v9015_v30, %v9011_v57  ;;  %v9019_v36 = vshll.u32 %v13629_v38, 16  ;;  %v9215_v4 = vld [vmem:[#allocation3 + $0x48] sm:$0xe] }
 0x565   : > { %v8769_v3 = vunpack.c.l.b16 %v8736_v56  ;;  %v8770_v0 = vunpack.c.l.b16 %v8739_v12  ;;  %v8479_v47 = vshll.u32 %v13592_v33, 16  ;;  %v9007_v44 = vrot.slane %v9006_v49, 4  ;;  %v8352_v30 = vld [vmem:[#allocation3 + $0x48] sm:$0xf] }
 0x566   : > { %v7763_v50 = vadd.f32 %v13553_v22, %v7429_v14  ;;  %v8476_v58 = vor.u32 %v8475_v9, %v13627_v1  ;;  %v9275_v63 = vrot.slane %v13607_v59, 5  ;;  %v8574_v33 = vpack.c.b16 %v13637_v15, %v13635_v6  ;;  %v8892_v14 = vld [vmem:[#allocation3 + $0x54] sm:$0xf]  ;;  %v13680_v6 = vld [vmem:[#allocation3 + $0x58] sm:$0xf] }
 0x567   : > { %10347 = vmatmul.msk.bf16.gmra.mxu2 %vm803_vm1, %v8573_v52  ;;  %v13633_v43 = vpop.f32.mrf.mxu3  ;;  %v9017_v22 = vrot.slane %v9016_v28, 4  ;;  %v13662_v25 = vpack.c.b16 %v8770_v0, %v8769_v3  ;;  %v13664_v41 = vrot.slane %v8479_v47, 5  ;;  %v8676_v28 = vld [vmem:[#allocation3 + $0x48] sm:$0xe]  ;;  %v13689_v3 = vld [vmem:[#allocation3 + $0x50] sm:$0x1] }
 0x568   : > { %v8307_v17 = vpop.f32.mrf.mxu1  ;;  %v13674_v49 = vrot.slane %v8476_v58, 4  ;;  %v9277_v9 = vrot.slane %v9275_v63, 4  ;;  %v8487_v0 = vshll.u32 %v8352_v30, 16  ;;  %v9024_v47 = vshrl.u32 %v8892_v14, 16 }
 0x569   : > { %v13640_v24 = vadd.f32 %v8307_v17, %v13564_v55  ;;  %v8466_v55 = vor.u32 %v8465_v27, %v8462_v60  ;;  %v10384_v27 = vrot.slane %v9215_v4, 9  ;;  %v9278_v17 = vrot.slane %v13629_v38, 5 }
 0x56a   : > { %v7396_v52 = vpop.f32.mrf.mxu2  ;;  %v13643_v18 = vpop.f32.mrf.mxu0  ;;  %v8484_v38 = vshrl.u32 %v8352_v30, 16 }
 0x56b   : > { %v7430_v20 = vadd.f32 %v7396_v52, %v13165_v53  ;;  %10390 = vmatmul.msk.bf16.gmra.mxu1 %vm803_vm1, %v13584_v23  ;;  %v9021_v53 = vrot.slane %v9019_v36, 5  ;;  %v13660_v23 = vpack.c.b16 %v9308_v48, %v9307_v10  ;;  %v13672_v12 = vrot.slane %v8466_v55, 4 }
 0x56c   : > { %10365 = vmatmul.msk.bf16.gmra.mxu3 %vm803_vm1, %v13586_v7  ;;  %v9012_v7 = vsel %vm11340_vm14, %v9007_v44, %v9011_v57  ;;  %v8742_v57 = vrot.slane %v13658_v54, 5  ;;  %v9027_v44 = vshll.u32 %v8892_v14, 16  ;;  %v9033_v55 = vshll.u32 %v13680_v6, 16 }
 0x56d   : > { %v7764_v34 = vadd.f32 %v13595_v37, %v7430_v20  ;;  %10374 = vmatmul.msk.bf16.gmra.mxu0 %vm803_vm1, %v9114_v8  ;;  %v7783_v37 = vadd.f32 %v13491_v62, %v7763_v50  ;;  %v9022_v48 = vsel %vm11340_vm14, %v9017_v22, %v9021_v53  ;;  %v9103_v8 = vunpack.c.l.b16 %v9012_v7 }
 0x56e   : > { %v8493_v20 = vshll.u32 %v13658_v54, 16  ;;  %v9104_v58 = vunpack.c.l.b16 %v9022_v48  ;;  %v8744_v22 = vrot.slane %v8742_v57, 4  ;;  %v9037_v53 = vshrl.u32 %v13680_v6, 16 }
 0x56f   : > { %v7784_v32 = vadd.f32 %v13491_v62, %v7764_v34  ;;  %v13670_v56 = vpop.f32.mrf.mxu3  ;;  %v10359_v34 = vrot.slane %v8676_v28, 9  ;;  %v8745_v7 = vrot.slane %v13689_v3, 5  ;;  %v9029_v30 = vrot.slane %v9027_v44, 5 }
 0x570   : > { %v8309_v60 = vpop.f32.mrf.mxu1  ;;  %v13700_v14 = vrot.slane %v9033_v55, 5  ;;  %v8489_v48 = vrot.slane %v8487_v0, 5  ;;  %v13706_v28 = vrot.slane %v8493_v20, 5  ;;  %v9279_v0 = vsel %vm11491_vm7, %v9277_v9, %v9278_v17 }
 0x571   : > { %v7800_v15 = vmax.f32 %v7784_v32, 0.0  ;;  %v13683_v10 = vadd.f32 %v8309_v60, %v13613_v42  ;;  %v8497_v42 = vshrl.u32 %v13658_v54, 16  ;;  %v9026_v32 = vrot.slane %v9024_v47, 4 }
 0x572   : > { %v7398_v36 = vpop.f32.mrf.mxu2  ;;  %v13687_v52 = vpop.f32.mrf.mxu0  ;;  %v9039_v54 = vrot.slane %v9037_v53, 4  ;;  %v7799_v60 = vmax.f32 %v7783_v37, 0.0  ;;  %v8482_v37 = vsel %vm11340_vm14, %v13674_v49, %v13664_v41  ;;  %v8743_v59 = vsel %vm11491_vm7, %v10359_v34, %v8742_v57 }
 0x573   : > { %v7431_v50 = vadd.f32 %v7398_v36, %v13181_v40  ;;  %7817 = vst.msk [vmem:[%s10720_s15 + $0x20] sm:$0xff] %vm7812_vm0, %v7800_v15  ;;  %v8486_v40 = vrot.slane %v8484_v38, 4  ;;  %v8472_v38 = vsel %vm11340_vm14, %v13672_v12, %v13627_v1  ;;  %v9115_v1 = vpack.c.b16 %v9104_v58, %v9103_v8 }
 0x574   : > { %7816 = vst.msk [vmem:[%s10720_s15 + $0x18] sm:$0xff] %vm7812_vm0, %v7799_v60  ;;  %v9030_v12 = vor.u32 %v9029_v30, %v9026_v32  ;;  %v9040_v41 = vor.u32 %v9039_v54, %v13700_v14  ;;  %v8503_v17 = vshll.u32 %v13689_v3, 16  ;;  %v8563_v57 = vunpack.c.l.b16 %v8472_v38  ;;  %v13757_v54 = vld [vmem:[#allocation3 + $0x54] sm:$0xe] }
 0x575   : > { %v7765_v4 = vadd.f32 %v13633_v43, %v7431_v50  ;;  %v8499_v43 = vrot.slane %v8497_v42, 4  ;;  %v13708_v50 = vld [vmem:[#allocation3 + $0x5c] sm:$0x1]  ;;  %v8564_v8 = vunpack.c.l.b16 %v8482_v37  ;;  %v9310_v34 = vunpack.c.l.b16 %v9279_v0 }
 0x576   : > { %v9043_v49 = vshll.u32 %v13708_v50, 16  ;;  %v9282_v60 = vrot.slane %v13680_v6, 5 }
 0x577   : > { %v7785_v36 = vadd.f32 %v13491_v62, %v7765_v4  ;;  %10348 = vmatmul.msk.bf16.gmra.mxu2 %vm803_vm1, %v8574_v33  ;;  %v13704_v15 = vpop.f32.mrf.mxu3  ;;  %v9276_v33 = vsel %vm11491_vm7, %v10384_v27, %v9275_v63  ;;  %v8746_v63 = vsel %vm11491_vm7, %v8744_v22, %v8745_v7  ;;  %v8500_v9 = vor.u32 %v8499_v43, %v13706_v28 }
 0x578   : > { %v8312_v47 = vpop.f32.mrf.mxu1  ;;  %v9031_v22 = vrot.slane %v9030_v12, 4  ;;  %v8772_v53 = vunpack.c.l.b16 %v8746_v63  ;;  %v9041_v4 = vrot.slane %v9040_v41, 4  ;;  %v9045_v7 = vrot.slane %v9043_v49, 5  ;;  %v8356_v63 = vld [vmem:[#allocation3 + $0x58] sm:$0xf] }
 0x579   : > { %v13727_v44 = vadd.f32 %v8312_v47, %v13643_v18  ;;  %v7801_v20 = vmax.f32 %v7785_v36, 0.0  ;;  %v8490_v18 = vor.u32 %v8489_v48, %v8486_v40  ;;  %v13755_v40 = vrot.slane %v8503_v17, 5  ;;  %v8355_v47 = vld [vmem:[#allocation3 + $0x54] sm:$0xf]  ;;  %v13780_v41 = vld [vmem:[#allocation3 + $0x64] sm:$0xf] }
 0x57a   : > { %v7401_v42 = vpop.f32.mrf.mxu2  ;;  %v13729_v55 = vpop.f32.mrf.mxu0  ;;  %v9036_v43 = vsel %vm11340_vm14, %v9031_v22, %v13700_v14  ;;  %v8575_v37 = vpack.c.b16 %v8564_v8, %v8563_v57  ;;  %v9046_v12 = vsel %vm11340_vm14, %v9041_v4, %v9045_v7  ;;  %v8677_v8 = vld [vmem:[#allocation3 + $0x54] sm:$0xe]  ;;  %v9057_v22 = vshll.u32 %v13780_v41, 16  ;;  %v13792_v4 = vld [vmem:[#allocation3 + $0x68] sm:$0x1] }
 0x57b   : > { %v7432_v27 = vadd.f32 %v7401_v42, %v13203_v35  ;;  %10391 = vmatmul.msk.bf16.gmra.mxu1 %vm803_vm1, %v13660_v23  ;;  %7818 = vst.msk [vmem:[%s10720_s15 + $0x28] sm:$0xff] %vm7812_vm0, %v7801_v20  ;;  %v9309_v35 = vunpack.c.l.b16 %v9276_v33  ;;  %v8771_v23 = vunpack.c.l.b16 %v8743_v59  ;;  %v13751_v30 = vrot.slane %v8490_v18, 4  ;;  %v8895_v20 = vld [vmem:[#allocation3 + $0x60] sm:$0xf] }
 0x57c   : > { %10366 = vmatmul.msk.bf16.gmra.mxu3 %vm803_vm1, %v13662_v25  ;;  %v13753_v25 = vrot.slane %v8500_v9, 4  ;;  %v10385_v59 = vrot.slane %v13757_v54, 9  ;;  %v9105_v49 = vunpack.c.l.b16 %v9036_v43  ;;  %v8511_v18 = vshll.u32 %v8355_v47, 16 }
 0x57d   : > { %v7766_v58 = vadd.f32 %v13670_v56, %v7432_v27  ;;  %10375 = vmatmul.msk.bf16.gmra.mxu0 %vm803_vm1, %v9115_v1  ;;  %v9321_v33 = vpack.c.b16 %v9310_v34, %v9309_v35  ;;  %v8782_v1 = vpack.c.b16 %v8772_v53, %v8771_v23  ;;  %v8508_v27 = vshrl.u32 %v8355_v47, 16 }
 0x57e   : > { %v8506_v14 = vsel %vm11340_vm14, %v13753_v25, %v13755_v40  ;;  %v9106_v9 = vunpack.c.l.b16 %v9046_v12  ;;  %v9048_v17 = vshrl.u32 %v8895_v20, 16  ;;  %v9051_v57 = vshll.u32 %v8895_v20, 16  ;;  %v8357_v40 = vld [vmem:[#allocation3 + $0x5c] sm:$0x1] }
 0x57f   : > { %v7786_v3 = vadd.f32 %v13491_v62, %v7766_v58  ;;  %v13749_v32 = vpop.f32.mrf.mxu3  ;;  %v8749_v58 = vrot.slane %v8356_v63, 5  ;;  %v8517_v35 = vshll.u32 %v8356_v63, 16  ;;  %v8521_v34 = vshrl.u32 %v8356_v63, 16 }
 0x580   : > { %v8314_v56 = vpop.f32.mrf.mxu1  ;;  %v9050_v7 = vrot.slane %v9048_v17, 4  ;;  %v9285_v25 = vrot.slane %v13708_v50, 5  ;;  %v8513_v54 = vrot.slane %v8511_v18, 5  ;;  %v9116_v47 = vpack.c.b16 %v9106_v9, %v9105_v49 }
 0x581   : > { %v7802_v36 = vmax.f32 %v7786_v3, 0.0  ;;  %v13761_v48 = vadd.f32 %v8314_v56, %v13687_v52  ;;  %v8496_v52 = vsel %vm11340_vm14, %v13751_v30, %v13706_v28  ;;  %v9053_v3 = vrot.slane %v9051_v57, 5 }
 0x582   : > { %v7403_v38 = vpop.f32.mrf.mxu2  ;;  %v13766_v0 = vpop.f32.mrf.mxu0  ;;  %v8510_v56 = vrot.slane %v8508_v27, 4  ;;  %v8751_v63 = vrot.slane %v8749_v58, 4  ;;  %v9067_v17 = vshll.u32 %v13792_v4, 16  ;;  %v8752_v27 = vrot.slane %v8357_v40, 5 }
 0x583   : > { %v7433_v42 = vadd.f32 %v7403_v38, %v13224_v39  ;;  %7819 = vst.msk [vmem:[%s10720_s15 + $0x30] sm:$0xff] %vm7812_vm0, %v7802_v36  ;;  %v9284_v39 = vrot.slane %v9282_v60, 4  ;;  %v9059_v36 = vrot.slane %v9057_v22, 5  ;;  %v8519_v18 = vrot.slane %v8517_v35, 5 }
 0x584   : > { %v8523_v57 = vrot.slane %v8521_v34, 4  ;;  %v8514_v49 = vor.u32 %v8513_v54, %v8510_v56  ;;  %v8566_v22 = vunpack.c.l.b16 %v8506_v14  ;;  %v9069_v34 = vrot.slane %v9067_v17, 5  ;;  %v8898_v17 = vld [vmem:[#allocation3 + $0x6c] sm:$0xf] }
 0x585   : > { %v7767_v28 = vadd.f32 %v13704_v15, %v7433_v42  ;;  %v9061_v15 = vshrl.u32 %v13780_v41, 16  ;;  %v10360_v42 = vrot.slane %v8677_v8, 9  ;;  %v8753_v14 = vsel %vm11491_vm7, %v8751_v63, %v8752_v27  ;;  %v9217_v63 = vld [vmem:[#allocation3 + $0x60] sm:$0xe] }
 0x586   : > { %v8524_v6 = vor.u32 %v8523_v57, %v8519_v18  ;;  %v8774_v54 = vunpack.c.l.b16 %v8753_v14  ;;  %v13838_v57 = vld [vmem:[#allocation3 + $0x70] sm:$0xf] }
 0x587   : > { %v7787_v23 = vadd.f32 %v13491_v62, %v7767_v28  ;;  %10349 = vmatmul.msk.bf16.gmra.mxu2 %vm803_vm1, %v8575_v37  ;;  %v13790_v53 = vpop.f32.mrf.mxu3  ;;  %v9063_v38 = vrot.slane %v9061_v15, 4  ;;  %v9054_v28 = vor.u32 %v9053_v3, %v9050_v7  ;;  %v8750_v35 = vsel %vm11491_vm7, %v10360_v42, %v8749_v58 }
 0x588   : > { %v8317_v30 = vpop.f32.mrf.mxu1  ;;  %v8527_v7 = vshll.u32 %v8357_v40, 16  ;;  %v8773_v56 = vunpack.c.l.b16 %v8750_v35 }
 0x589   : > { %v13797_v43 = vadd.f32 %v8317_v30, %v13729_v55  ;;  %v7803_v37 = vmax.f32 %v7787_v23, 0.0  ;;  %v8565_v55 = vunpack.c.l.b16 %v8496_v52  ;;  %v9064_v9 = vor.u32 %v9063_v38, %v9059_v36 }
 0x58a   : > { %v7406_v12 = vpop.f32.mrf.mxu2  ;;  %v13799_v20 = vpop.f32.mrf.mxu0  ;;  %v8529_v42 = vrot.slane %v8527_v7, 5 }
 0x58b   : > { %v7434_v50 = vadd.f32 %v7406_v12, %v13238_v21  ;;  %10392 = vmatmul.msk.bf16.gmra.mxu1 %vm803_vm1, %v9321_v33  ;;  %7820 = vst.msk [vmem:[%s10720_s15 + $0x38] sm:$0xff] %vm7812_vm0, %v7803_v37  ;;  %v9283_v21 = vsel %vm11491_vm7, %v10385_v59, %v9282_v60  ;;  %v9286_v33 = vsel %vm11491_vm7, %v9284_v39, %v9285_v25  ;;  %v9065_v52 = vrot.slane %v9064_v9, 4 }
 0x58c   : > { %10367 = vmatmul.msk.bf16.gmra.mxu3 %vm803_vm1, %v8782_v1  ;;  %v9055_v1 = vrot.slane %v9054_v28, 4  ;;  %v8515_v60 = vrot.slane %v8514_v49, 4  ;;  %v9311_v58 = vunpack.c.l.b16 %v9283_v21  ;;  %v9312_v15 = vunpack.c.l.b16 %v9286_v33  ;;  %v8358_v21 = vld [vmem:[#allocation3 + $0x60] sm:$0xf] }
 0x58d   : > { %v7768_v8 = vadd.f32 %v13749_v32, %v7434_v50  ;;  %10376 = vmatmul.msk.bf16.gmra.mxu0 %vm803_vm1, %v9116_v47  ;;  %v9070_v40 = vsel %vm11340_vm14, %v9065_v52, %v9069_v34  ;;  %v8576_v37 = vpack.c.b16 %v8566_v22, %v8565_v55  ;;  %v8525_v12 = vrot.slane %v8524_v6, 4  ;;  %v8359_v55 = vld [vmem:[#allocation3 + $0x64] sm:$0xf] }
 0x58e   : > { %v9060_v47 = vsel %vm11340_vm14, %v9055_v1, %v9059_v36  ;;  %v9289_v28 = vrot.slane %v13780_v41, 5  ;;  %v9108_v27 = vunpack.c.l.b16 %v9070_v40  ;;  %v9322_v49 = vpack.c.b16 %v9312_v15, %v9311_v58  ;;  %v13848_v1 = vld [vmem:[#allocation3 + $0x74] sm:$0x1] }
 0x58f   : > { %v7788_v23 = vadd.f32 %v13491_v62, %v7768_v8  ;;  %v13818_v32 = vpop.f32.mrf.mxu3  ;;  %v9107_v36 = vunpack.c.l.b16 %v9060_v47  ;;  %v9072_v9 = vshrl.u32 %v8898_v17, 16  ;;  %v8530_v41 = vsel %vm11340_vm14, %v8525_v12, %v8529_v42 }
 0x590   : > { %v8319_v3 = vpop.f32.mrf.mxu1  ;;  %v9291_v35 = vrot.slane %v9289_v28, 4  ;;  %v9075_v34 = vshll.u32 %v8898_v17, 16  ;;  %v9292_v15 = vrot.slane %v13792_v4, 5  ;;  %v8541_v4 = vshll.u32 %v8359_v55, 16 }
 0x591   : > { %v7804_v59 = vmax.f32 %v7788_v23, 0.0  ;;  %v13823_v39 = vadd.f32 %v8319_v3, %v13766_v0  ;;  %v8520_v0 = vsel %vm11340_vm14, %v8515_v60, %v8519_v18  ;;  %v9074_v52 = vrot.slane %v9072_v9, 4  ;;  %v8678_v3 = vld [vmem:[#allocation3 + $0x60] sm:$0xe] }
 0x592   : > { %v7408_v30 = vpop.f32.mrf.mxu2  ;;  %v13825_v25 = vpop.f32.mrf.mxu0  ;;  %v13846_v18 = vunpack.c.l.b16 %v8520_v0  ;;  %v9081_v23 = vshll.u32 %v13838_v57, 16  ;;  %v9117_v7 = vpack.c.b16 %v9108_v27, %v9107_v36  ;;  %v8756_v60 = vrot.slane %v8359_v55, 5 }
 0x593   : > { %v7435_v38 = vadd.f32 %v7408_v30, %v13272_v51  ;;  %7821 = vst.msk [vmem:[%s10720_s15 + $0x40] sm:$0xff] %vm7812_vm0, %v7804_v59  ;;  %v8783_v51 = vpack.c.b16 %v8774_v54, %v8773_v56  ;;  %v13857_v30 = vld [vmem:[#allocation3 + $0x68] sm:$0x1]  ;;  %v8532_v56 = vshrl.u32 %v8358_v21, 16  ;;  %v8535_v54 = vshll.u32 %v8358_v21, 16 }
 0x594   : > { %v9077_v47 = vrot.slane %v9075_v34, 5  ;;  %v10361_v12 = vrot.slane %v8678_v3, 9  ;;  %v8545_v42 = vshrl.u32 %v8359_v55, 16  ;;  %v8759_v17 = vrot.slane %v13857_v30, 5 }
 0x595   : > { %v7769_v50 = vadd.f32 %v13790_v53, %v7435_v38  ;;  %v10386_v53 = vrot.slane %v9217_v63, 9  ;;  %v9085_v38 = vshrl.u32 %v13838_v57, 16  ;;  %v8568_v36 = vunpack.c.l.b16 %v8530_v41 }
 0x596   : > { %v9078_v0 = vor.u32 %v9077_v47, %v9074_v52  ;;  %v8537_v21 = vrot.slane %v8535_v54, 5  ;;  %v8757_v34 = vsel %vm11491_vm7, %v10361_v12, %v8756_v60  ;;  %v8543_v41 = vrot.slane %v8541_v4, 5 }
 0x597   : > { %v7789_v8 = vadd.f32 %v13491_v62, %v7769_v50  ;;  %10350 = vmatmul.msk.bf16.gmra.mxu2 %vm803_vm1, %v8576_v37  ;;  %v13842_v22 = vpop.f32.mrf.mxu3  ;;  %v9091_v37 = vshll.u32 %v13848_v1, 16  ;;  %v9087_v50 = vrot.slane %v9085_v38, 4  ;;  %v9290_v27 = vsel %vm11491_vm7, %v10386_v53, %v9289_v28 }
 0x598   : > { %v8322_v33 = vpop.f32.mrf.mxu1  ;;  %v9079_v9 = vrot.slane %v9078_v0, 4  ;;  %v8551_v12 = vshll.u32 %v13857_v30, 16 }
 0x599   : > { %v7805_v14 = vmax.f32 %v7789_v8, 0.0  ;;  %v13852_v6 = vadd.f32 %v8322_v33, %v13799_v20  ;;  %v9083_v20 = vrot.slane %v9081_v23, 5  ;;  %v9093_v33 = vrot.slane %v9091_v37, 5 }
 0x59a   : > { %v7411_v59 = vpop.f32.mrf.mxu2  ;;  %v13854_v58 = vpop.f32.mrf.mxu0  ;;  %v8547_v23 = vrot.slane %v8545_v42, 4 }
 0x59b   : > { %v7436_v40 = vadd.f32 %v7411_v59, %v13314_v46  ;;  %10393 = vmatmul.msk.bf16.gmra.mxu1 %vm803_vm1, %v9322_v49  ;;  %7822 = vst.msk [vmem:[%s10720_s15 + $0x48] sm:$0xff] %vm7812_vm0, %v7805_v14  ;;  %v8758_v46 = vrot.slane %v8756_v60, 4  ;;  %v8534_v49 = vrot.slane %v8532_v56, 4  ;;  %v9088_v55 = vor.u32 %v9087_v50, %v9083_v20 }
 0x59c   : > { %10368 = vmatmul.msk.bf16.gmra.mxu3 %vm803_vm1, %v8783_v51  ;;  %v8577_v59 = vpack.c.b16 %v8568_v36, %v13846_v18  ;;  %v9313_v56 = vunpack.c.l.b16 %v9290_v27  ;;  %v8548_v37 = vor.u32 %v8547_v23, %v8543_v41  ;;  %v8553_v36 = vrot.slane %v8551_v12, 5 }
 0x59d   : > { %v7770_v63 = vadd.f32 %v13818_v32, %v7436_v40  ;;  %10377 = vmatmul.msk.bf16.gmra.mxu0 %vm803_vm1, %v9117_v7  ;;  %v9293_v32 = vsel %vm11491_vm7, %v9291_v35, %v9292_v15  ;;  %v8760_v53 = vsel %vm11491_vm7, %v8758_v46, %v8759_v17  ;;  %v9089_v7 = vrot.slane %v9088_v55, 4 }
 0x59e   : > { %v9084_v35 = vsel %vm11340_vm14, %v9079_v9, %v9083_v20  ;;  %v9314_v15 = vunpack.c.l.b16 %v9293_v32  ;;  %v8538_v47 = vor.u32 %v8537_v21, %v8534_v49  ;;  %v8775_v40 = vunpack.c.l.b16 %v8757_v34  ;;  %v9218_v9 = vld [vmem:[#allocation3 + $0x6c] sm:$0xe] }
 0x59f   : > { %v7790_v51 = vadd.f32 %v13491_v62, %v7770_v63  ;;  %v7750_v8 = vpop.f32.mrf.mxu3  ;;  %v8776_v38 = vunpack.c.l.b16 %v8760_v53  ;;  %v9109_v4 = vunpack.c.l.b16 %v9084_v35  ;;  %v8549_v50 = vrot.slane %v8548_v37, 4 }
 0x5a0   : > { %v8324_v52 = vpop.f32.mrf.mxu1  ;;  %v8539_v63 = vrot.slane %v8538_v47, 4  ;;  %v9296_v27 = vrot.slane %v13838_v57, 5  ;;  %v9299_v32 = vrot.slane %v13848_v1, 5 }
 0x5a1   : > { %v7806_v14 = vmax.f32 %v7790_v51, 0.0  ;;  %v13877_v28 = vadd.f32 %v8324_v52, %v13825_v25  ;;  %v9094_v25 = vsel %vm11340_vm14, %v9089_v7, %v9093_v33  ;;  %v8784_v17 = vpack.c.b16 %v8776_v38, %v8775_v40 }
 0x5a2   : > { %v7413_v3 = vpop.f32.mrf.mxu2  ;;  %v8037_v54 = vpop.f32.mrf.mxu0  ;;  %v9110_v42 = vunpack.c.l.b16 %v9094_v25  ;;  %v8544_v33 = vsel %vm11340_vm14, %v8539_v63, %v8543_v41  ;;  %v8554_v57 = vsel %vm11340_vm14, %v8549_v50, %v8553_v36  ;;  %v9298_v52 = vrot.slane %v9296_v27, 4 }
 0x5a3   : > { %v7437_v60 = vadd.f32 %v7413_v3, %v13335_v13  ;;  %7823 = vst.msk [vmem:[%s10720_s15 + $0x50] sm:$0xff] %vm7812_vm0, %v7806_v14  ;;  %v9323_v13 = vpack.c.b16 %v9314_v15, %v9313_v56  ;;  %v8569_v14 = vunpack.c.l.b16 %v8544_v33  ;;  %v8570_v41 = vunpack.c.l.b16 %v8554_v57 }
 0x5a4   : > { %v9300_v16 = vsel %vm11491_vm7, %v9298_v52, %v9299_v32 }
 0x5a5   : > { %v7771_v18 = vadd.f32 %v13842_v22, %v7437_v60  ;;  %v9118_v22 = vpack.c.b16 %v9110_v42, %v9109_v4  ;;  %v8578_v35 = vpack.c.b16 %v8570_v41, %v8569_v14  ;;  %v9316_v15 = vunpack.c.l.b16 %v9300_v16 }
 0x5a7   : > { %v7791_v20 = vadd.f32 %v13491_v62, %v7771_v18  ;;  %10351 = vmatmul.msk.bf16.gmra.mxu2 %vm803_vm1, %v8577_v59  ;;  %v7752_v0 = vpop.f32.mrf.mxu3 }
 0x5a8   : > { %v8327_v46 = vpop.f32.mrf.mxu1 }
 0x5a9   : > { %v7807_v49 = vmax.f32 %v7791_v20, 0.0  ;;  %v13895_v30 = vadd.f32 %v8327_v46, %v13854_v58  ;;  %v10387_v58 = vrot.slane %v9218_v9, 9 }
 0x5aa   : > { %v7416_v51 = vpop.f32.mrf.mxu2  ;;  %v8040_v21 = vpop.f32.mrf.mxu0 }
 0x5ab   : > { %v7438_v55 = vadd.f32 %v7416_v51, %v13404_v29  ;;  %10394 = vmatmul.msk.bf16.gmra.mxu1 %vm803_vm1, %v9323_v13  ;;  %7824 = vst.msk [vmem:[%s10720_s15 + $0x58] sm:$0xff] %vm7812_vm0, %v7807_v49  ;;  %v9297_v7 = vsel %vm11491_vm7, %v10387_v58, %v9296_v27 }
 0x5ac   : > { %10369 = vmatmul.msk.bf16.gmra.mxu3 %vm803_vm1, %v8784_v17  ;;  %v9315_v60 = vunpack.c.l.b16 %v9297_v7 }
 0x5ad   : > { %v7772_v34 = vadd.f32 %v7750_v8, %v7438_v55  ;;  %10378 = vmatmul.msk.bf16.gmra.mxu0 %vm803_vm1, %v9118_v22 }
 0x5ae   : > { %v9324_v2 = vpack.c.b16 %v9316_v15, %v9315_v60 }
 0x5af   : > { %v7792_v29 = vadd.f32 %v13491_v62, %v7772_v34  ;;  %v7755_v23 = vpop.f32.mrf.mxu3 }
 0x5b0   : > { %v8329_v53 = vpop.f32.mrf.mxu1 }
 0x5b1   : > { %v7808_v3 = vmax.f32 %v7792_v29, 0.0  ;;  %v13913_v59 = vadd.f32 %v8329_v53, %v8037_v54 }
 0x5b2   : > { %v7418_v1 = vpop.f32.mrf.mxu2  ;;  %v8042_v8 = vpop.f32.mrf.mxu0 }
 0x5b3   : > { %v7439_v56 = vadd.f32 %v7418_v1, %v13406_v31  ;;  %7825 = vst.msk [vmem:[%s10720_s15 + $0x60] sm:$0xff] %vm7812_vm0, %v7808_v3 }
 0x5b5   : > { %v7773_v47 = vadd.f32 %v7752_v0, %v7439_v56 }
 0x5b7   : > { %v7793_v25 = vadd.f32 %v13491_v62, %v7773_v47  ;;  %10352 = vmatmul.msk.bf16.gmra.mxu2 %vm803_vm1, %v8578_v35  ;;  %v7757_v40 = vpop.f32.mrf.mxu3  ;;  %v10530_v62 = vld [vmem:[%s14047_s11] ss:$0 sm:$0xff] }
 0x5b8   : > { %v8332_v38 = vpop.f32.mrf.mxu1 }
 0x5b9   : > { %v7809_v54 = vmax.f32 %v7793_v25, 0.0  ;;  %v13920_v37 = vadd.f32 %v8332_v38, %v8040_v21 }
 0x5ba   : > { %v7421_v12 = vpop.f32.mrf.mxu2  ;;  %v9155_v31 = vpop.f32.mrf.mxu0 }
 0x5bb   : > { %v7440_v18 = vadd.f32 %v7421_v12, %v13462_v61  ;;  %10395 = vmatmul.msk.bf16.gmra.mxu1 %vm803_vm1, %v9324_v2  ;;  %7826 = vst.msk [vmem:[%s10720_s15 + $0x68] sm:$0xff] %vm7812_vm0, %v7809_v54  ;;  %vm9517_vm1 = vcmask 64544  }
 0x5bd   : > { %v7774_v4 = vadd.f32 %v7755_v23, %v7440_v18 }
 0x5bf   : > { %v7794_v42 = vadd.f32 %v10530_v62, %v7774_v4  ;;  %v8821_v20 = vpop.f32.mrf.mxu3 }
 0x5c0   : > { %v8334_v13 = vpop.f32.mrf.mxu1 }
 0x5c1   : > { %v7810_v0 = vmax.f32 %v7794_v42, 0.0  ;;  %v13929_v63 = vadd.f32 %v8334_v13, %v8042_v8 }
 0x5c2   : > { %v7423_v46 = vpop.f32.mrf.mxu2  ;;  %v9157_v17 = vpop.f32.mrf.mxu0 }
 0x5c3   : > { %v7441_v61 = vadd.f32 %v7423_v46, %v13474_v26  ;;  %7827 = vst.msk [vmem:[%s10720_s15 + $0x70] sm:$0xff] %vm7812_vm0, %v7810_v0  ;;  %v13940_v26 = vld [vmem:[%s14047_s11] ss:$0 sm:$0xff] }
 0x5c5   : > { %v7775_v50 = vadd.f32 %v7757_v40, %v7441_v61 }
 0x5c7   : > { %v7795_v36 = vadd.f32 %v10530_v62, %v7775_v50  ;;  %v8823_v27 = vpop.f32.mrf.mxu3 }
 0x5c8   : > { %v9361_v49 = vpop.f32.mrf.mxu1 }
 0x5c9   : > { %v7811_v22 = vmax.f32 %v7795_v36, 0.0 }
 0x5ca   : > { %v8615_v9 = vpop.f32.mrf.mxu2  ;;  %v9160_v51 = vpop.f32.mrf.mxu0 }
 0x5cb   : > { %v8655_v21 = vadd.f32 %v8615_v9, %v13477_v45  ;;  %7828 = vst.msk [vmem:[%s10720_s15 + $0x78] sm:$0xff] %vm7812_vm0, %v7811_v22 }
 0x5cd   : > { %v8861_v55 = vadd.f32 %v8821_v20, %v8655_v21 }
 0x5cf   : > { %v8826_v33 = vpop.f32.mrf.mxu3  ;;  %v9195_v57 = vadd.f32 %v9155_v31, %v8861_v55 }
 0x5d0   : > { %v9363_v58 = vpop.f32.mrf.mxu1 }
 0x5d1   : > { %v9401_v52 = vadd.f32 %v9361_v49, %v9195_v57 }
 0x5d2   : > { %v8617_v32 = vpop.f32.mrf.mxu2  ;;  %v9162_v34 = vpop.f32.mrf.mxu0 }
 0x5d3   : > { %v8656_v29 = vadd.f32 %v8617_v32, %v13528_v19  ;;  %v9421_v23 = vadd.f32 %v13940_v26, %v9401_v52 }
 0x5d5   : > { %v8862_v14 = vadd.f32 %v8823_v27, %v8656_v29  ;;  %v9437_v45 = vmax.f32 %v9421_v23, 0.0 }
 0x5d7   : > { %v9196_v41 = vadd.f32 %v9157_v17, %v8862_v14  ;;  %9469 = vrot.lane.b32.xlu0 %v9437_v45, %s10574_s24  ;;  %v8828_v53 = vpop.f32.mrf.mxu3 }
 0x5d8   : > { %v9366_v7 = vpop.f32.mrf.mxu1 }
 0x5d9   : > { %v9402_v16 = vadd.f32 %v9363_v58, %v9196_v41 }
 0x5da   : > { %v8620_v3 = vpop.f32.mrf.mxu2  ;;  %v9165_v1 = vpop.f32.mrf.mxu0 }
 0x5db   : > { %v8657_v8 = vadd.f32 %v8620_v3, %v13562_v11  ;;  %v9422_v56 = vadd.f32 %v13940_v26, %v9402_v16 }
 0x5dd   : > { %v8863_v35 = vadd.f32 %v8826_v33, %v8657_v8  ;;  %v9438_v60 = vmax.f32 %v9422_v56, 0.0 }
 0x5df   : > { %9471 = vrot.lane.b32.xlu0 %v9438_v60, %s10574_s24  ;;  %v8831_v19 = vpop.f32.mrf.mxu3  ;;  %v9197_v15 = vadd.f32 %v9160_v51, %v8863_v35 }
 0x5e0   : > { %v9368_v47 = vpop.f32.mrf.mxu1 }
 0x5e1   : > { %v9403_v25 = vadd.f32 %v9366_v7, %v9197_v15 }
 0x5e2   : > { %v8622_v2 = vpop.f32.mrf.mxu2  ;;  %v9167_v40 = vpop.f32.mrf.mxu0 }
 0x5e3   : > { %v8658_v38 = vadd.f32 %v8622_v2, %v13610_v5  ;;  %v9423_v54 = vadd.f32 %v13940_v26, %v9403_v25 }
 0x5e5   : > { %v8864_v12 = vadd.f32 %v8828_v53, %v8658_v38  ;;  %v9439_v31 = vmax.f32 %v9423_v54, 0.0 }
 0x5e7   : > { %v9198_v18 = vadd.f32 %v9162_v34, %v8864_v12  ;;  %9473 = vrot.lane.b32.xlu1 %v9439_v31, %s10574_s24  ;;  %v8833_v11 = vpop.f32.mrf.mxu3 }
 0x5e8   : > { %v9371_v4 = vpop.f32.mrf.mxu1 }
 0x5e9   : > { %v9404_v62 = vadd.f32 %v9368_v47, %v9198_v18 }
 0x5ea   : > { %v8625_v42 = vpop.f32.mrf.mxu2  ;;  %v9170_v0 = vpop.f32.mrf.mxu0 }
 0x5eb   : > { %v8659_v20 = vadd.f32 %v8625_v42, %v13640_v24  ;;  %v9424_v13 = vadd.f32 %v13940_v26, %v9404_v62 }
 0x5ed   : > { %v8865_v46 = vadd.f32 %v8831_v19, %v8659_v20  ;;  %v9440_v17 = vmax.f32 %v9424_v13, 0.0 }
 0x5ef   : > { %9475 = vrot.lane.b32.xlu1 %v9440_v17, %s10574_s24  ;;  %v8836_v5 = vpop.f32.mrf.mxu3  ;;  %v9199_v61 = vadd.f32 %v9165_v1, %v8865_v46 }
 0x5f0   : > { %v9373_v50 = vpop.f32.mrf.mxu1 }
 0x5f1   : > { %v9405_v36 = vadd.f32 %v9371_v4, %v9199_v61 }
 0x5f2   : > { %v8627_v27 = vpop.f32.mrf.mxu2  ;;  %v9172_v21 = vpop.f32.mrf.mxu0 }
 0x5f3   : > { %v8660_v49 = vadd.f32 %v8627_v27, %v13683_v10  ;;  %v9425_v22 = vadd.f32 %v13940_v26, %v9405_v36 }
 0x5f5   : > { %v8866_v9 = vadd.f32 %v8833_v11, %v8660_v49  ;;  %v9441_v51 = vmax.f32 %v9425_v22, 0.0 }
 0x5f7   : > { %v9200_v24 = vadd.f32 %v9167_v40, %v8866_v9  ;;  %9477 = vrot.lane.b32.xlu2 %v9441_v51, %s10574_s24  ;;  %v8838_v55 = vpop.f32.mrf.mxu3 }
 0x5f8   : > { %v9376_v33 = vpop.f32.mrf.mxu1 }
 0x5f9   : > { %v9406_v57 = vadd.f32 %v9373_v50, %v9200_v24 }
 0x5fa   : > { %v8630_v58 = vpop.f32.mrf.mxu2  ;;  %v9175_v45 = vpop.f32.mrf.mxu0 }
 0x5fb   : > { %v8661_v52 = vadd.f32 %v8630_v58, %v13727_v44  ;;  %v9426_v32 = vadd.f32 %v13940_v26, %v9406_v57 }
 0x5fd   : > { %v8867_v34 = vadd.f32 %v8836_v5, %v8661_v52  ;;  %v9442_v29 = vmax.f32 %v9426_v32, 0.0 }
 0x5ff   : > { %v9201_v23 = vadd.f32 %v9170_v0, %v8867_v34  ;;  %9479 = vrot.lane.b32.xlu2 %v9442_v29, %s10574_s24  ;;  %v8841_v10 = vpop.f32.mrf.mxu3 }
 0x600   : > { %v9378_v14 = vpop.f32.mrf.mxu1 }
 0x601   : > { %v9407_v41 = vadd.f32 %v9376_v33, %v9201_v23 }
 0x602   : > { %v8632_v53 = vpop.f32.mrf.mxu2  ;;  %v9177_v19 = vpop.f32.mrf.mxu0 }
 0x603   : > { %v8662_v7 = vadd.f32 %v8632_v53, %v13761_v48  ;;  %v9427_v16 = vadd.f32 %v13940_v26, %v9407_v41 }
 0x605   : > { %v8868_v3 = vadd.f32 %v8838_v55, %v8662_v7  ;;  %v9443_v1 = vmax.f32 %v9427_v16, 0.0 }
 0x607   : > { %v9202_v8 = vadd.f32 %v9172_v21, %v8868_v3  ;;  %9481 = vrot.lane.b32.xlu0 %v9443_v1, %s10574_s24  ;;  %v8843_v56 = vpop.f32.mrf.mxu3 }
 0x608   : > { %v9381_v44 = vpop.f32.mrf.mxu1 }
 0x609   : > { %v9408_v35 = vadd.f32 %v9378_v14, %v9202_v8 }
 0x60a   : > { %v8635_v60 = vpop.f32.mrf.mxu2  ;;  %v9180_v11 = vpop.f32.mrf.mxu0 }
 0x60b   : > { %v8663_v15 = vadd.f32 %v8635_v60, %v13797_v43  ;;  %v9428_v47 = vadd.f32 %v13940_v26, %v9408_v35 }
 0x60d   : > { %v8869_v25 = vadd.f32 %v8841_v10, %v8663_v15  ;;  %v9444_v2 = vmax.f32 %v9428_v47, 0.0 }
 0x60f   : > { %v9203_v40 = vadd.f32 %v9175_v45, %v8869_v25  ;;  %9483 = vrot.lane.b32.xlu1 %v9444_v2, %s10574_s24  ;;  %v8846_v12 = vpop.f32.mrf.mxu3 }
 0x610   : > { %v9383_v48 = vpop.f32.mrf.mxu1 }
 0x611   : > { %v9409_v38 = vadd.f32 %v9381_v44, %v9203_v40 }
 0x612   : > { %v8637_v54 = vpop.f32.mrf.mxu2  ;;  %v9182_v50 = vpop.f32.mrf.mxu0 }
 0x613   : > { %v8664_v31 = vadd.f32 %v8637_v54, %v13823_v39  ;;  %v9429_v18 = vadd.f32 %v13940_v26, %v9409_v38 }
 0x615   : > { %v8870_v4 = vadd.f32 %v8843_v56, %v8664_v31  ;;  %v9445_v62 = vmax.f32 %v9429_v18, 0.0 }
 0x617   : > { %v9204_v42 = vadd.f32 %v9177_v19, %v8870_v4  ;;  %9485 = vrot.lane.b32.xlu2 %v9445_v62, %s10574_s24  ;;  %v8848_v17 = vpop.f32.mrf.mxu3 }
 0x618   : > { %v9386_v43 = vpop.f32.mrf.mxu1 }
 0x619   : > { %v9410_v20 = vadd.f32 %v9383_v48, %v9204_v42 }
 0x61a   : > { %v8640_v13 = vpop.f32.mrf.mxu2  ;;  %v9185_v55 = vpop.f32.mrf.mxu0 }
 0x61b   : > { %v8665_v0 = vadd.f32 %v8640_v13, %v13852_v6  ;;  %v9430_v46 = vadd.f32 %v13940_v26, %v9410_v20 }
 0x61d   : > { %v8871_v5 = vadd.f32 %v8846_v12, %v8665_v0  ;;  %v9446_v61 = vmax.f32 %v9430_v46, 0.0 }
 0x61f   : > { %v9205_v39 = vadd.f32 %v9180_v11, %v8871_v5  ;;  %9487 = vrot.lane.b32.xlu0 %v9446_v61, %s10574_s24  ;;  %v8851_v24 = vpop.f32.mrf.mxu3 }
 0x620   : > { %v9388_v36 = vpop.f32.mrf.mxu1 }
 0x621   : > { %v9411_v27 = vadd.f32 %v9386_v43, %v9205_v39 }
 0x622   : > { %v8642_v49 = vpop.f32.mrf.mxu2  ;;  %v9187_v14 = vpop.f32.mrf.mxu0 }
 0x623   : > { %v8666_v22 = vadd.f32 %v8642_v49, %v13877_v28  ;;  %v9431_v9 = vadd.f32 %v13940_v26, %v9411_v27 }
 0x625   : > { %v8872_v51 = vadd.f32 %v8848_v17, %v8666_v22  ;;  %v9447_v21 = vmax.f32 %v9431_v9, 0.0 }
 0x627   : > { %v9206_v6 = vadd.f32 %v9182_v50, %v8872_v51  ;;  %9489 = vrot.lane.b32.xlu1 %v9447_v21, %s10574_s24  ;;  %v8853_v28 = vpop.f32.mrf.mxu3 }
 0x628   : > { %v9391_v57 = vpop.f32.mrf.mxu1 }
 0x629   : > { %v9412_v33 = vadd.f32 %v9388_v36, %v9206_v6 }
 0x62a   : > { %v8645_v58 = vpop.f32.mrf.mxu2  ;;  %v9190_v60 = vpop.f32.mrf.mxu0 }
 0x62b   : > { %v8667_v52 = vadd.f32 %v8645_v58, %v13895_v30  ;;  %v9432_v32 = vadd.f32 %v13940_v26, %v9412_v33 }
 0x62d   : > { %v8873_v34 = vadd.f32 %v8851_v24, %v8667_v52  ;;  %v9448_v29 = vmax.f32 %v9432_v32, 0.0 }
 0x62f   : > { %v9207_v23 = vadd.f32 %v9185_v55, %v8873_v34  ;;  %9491 = vrot.lane.b32.xlu2 %v9448_v29, %s10574_s24  ;;  %v8856_v8 = vpop.f32.mrf.mxu3 }
 0x630   : > { %v9393_v7 = vpop.f32.mrf.mxu1 }
 0x631   : > { %v9413_v10 = vadd.f32 %v9391_v57, %v9207_v23 }
 0x632   : > { %v8647_v45 = vpop.f32.mrf.mxu2  ;;  %v9192_v12 = vpop.f32.mrf.mxu0 }
 0x633   : > { %v8668_v41 = vadd.f32 %v8647_v45, %v13913_v59  ;;  %v9433_v53 = vadd.f32 %v13940_v26, %v9413_v10 }
 0x635   : > { %v8874_v16 = vadd.f32 %v8853_v28, %v8668_v41  ;;  %v9449_v3 = vmax.f32 %v9433_v53, 0.0 }
 0x637   : > { %v9208_v1 = vadd.f32 %v9187_v14, %v8874_v16  ;;  %9493 = vrot.lane.b32.xlu0 %v9449_v3, %s10574_s24  ;;  %v8858_v38 = vpop.f32.mrf.mxu3 }
 0x638   : > { %v9396_v47 = vpop.f32.mrf.mxu1 }
 0x639   : > { %v9414_v30 = vadd.f32 %v9393_v7, %v9208_v1 }
 0x63a   : > { %v8650_v44 = vpop.f32.mrf.mxu2 }
 0x63b   : > { %v8669_v56 = vadd.f32 %v8650_v44, %v13920_v37  ;;  %v9434_v35 = vadd.f32 %v13940_v26, %v9414_v30 }
 0x63d   : > { %v8875_v19 = vadd.f32 %v8856_v8, %v8669_v56  ;;  %v9450_v15 = vmax.f32 %v9434_v35, 0.0 }
 0x63f   : > { %v9209_v59 = vadd.f32 %v9190_v60, %v8875_v19  ;;  %9495 = vrot.lane.b32.xlu1 %v9450_v15, %s10574_s24 }
 0x640   : > { %v9398_v18 = vpop.f32.mrf.mxu1 }
 0x641   : > { %v9415_v25 = vadd.f32 %v9396_v47, %v9209_v59 }
 0x642   : > { %v8652_v2 = vpop.f32.mrf.mxu2 }
 0x643   : > { %v8670_v40 = vadd.f32 %v8652_v2, %v13929_v63  ;;  %v9435_v48 = vadd.f32 %v13940_v26, %v9415_v25 }
 0x645   : > { %v8876_v54 = vadd.f32 %v8858_v38, %v8670_v40  ;;  %v9451_v37 = vmax.f32 %v9435_v48, 0.0 }
 0x647   : > { %v9210_v31 = vadd.f32 %v9192_v12, %v8876_v54  ;;  %9497 = vrot.lane.b32.xlu2 %v9451_v37, %s10574_s24 }
 0x649   : > { %v9470_v11 = vpop.permute.xlu0 %9469  ;;  %v9416_v4 = vadd.f32 %v9398_v18, %v9210_v31 }
 0x64a   : > { %9518 = vst.msk [vmem:[%s10720_s15] sm:$0xff] %vm9517_vm1, %v9470_v11 }
 0x64b   : > { %v9436_v63 = vadd.f32 %v13940_v26, %v9416_v4 }
 0x64d   : > { %v9452_v62 = vmax.f32 %v9436_v63, 0.0 }
 0x64f   : > { %9499 = vrot.lane.b32.xlu0 %v9452_v62, %s10574_s24 }
 0x651   : > { %v9472_v42 = vpop.permute.xlu0 %9471  ;;  %v9478_v43 = vpop.permute.xlu2 %9477 }
 0x652   : > { %9519 = vst.msk [vmem:[%s10720_s15 + $0x8] sm:$0xff] %vm9517_vm1, %v9472_v42 }
 0x653   : > { %9522 = vst.msk [vmem:[%s10720_s15 + $0x20] sm:$0xff] %vm9517_vm1, %v9478_v43 }
 0x659   : > { %v9474_v20 = vpop.permute.xlu1 %9473  ;;  %v9480_v13 = vpop.permute.xlu2 %9479 }
 0x65a   : > { %9520 = vst.msk [vmem:[%s10720_s15 + $0x10] sm:$0xff] %vm9517_vm1, %v9474_v20 }
 0x65b   : > { %9523 = vst.msk [vmem:[%s10720_s15 + $0x28] sm:$0xff] %vm9517_vm1, %v9480_v13 }
 0x661   : > { %v9476_v26 = vpop.permute.xlu1 %9475 }
 0x662   : > { %9521 = vst.msk [vmem:[%s10720_s15 + $0x18] sm:$0xff] %vm9517_vm1, %v9476_v26 }
 0x671   : > { %v9486_v0 = vpop.permute.xlu2 %9485 }
 0x672   : > { %9526 = vst.msk [vmem:[%s10720_s15 + $0x40] sm:$0xff] %vm9517_vm1, %v9486_v0 }
 0x679   : > { %v9482_v46 = vpop.permute.xlu0 %9481 }
 0x67a   : > { %9524 = vst.msk [vmem:[%s10720_s15 + $0x30] sm:$0xff] %vm9517_vm1, %v9482_v46 }
 0x681   : > { %v9484_v17 = vpop.permute.xlu1 %9483 }
 0x682   : > { %9525 = vst.msk [vmem:[%s10720_s15 + $0x38] sm:$0xff] %vm9517_vm1, %v9484_v17 }
 0x689   : > { %v9492_v5 = vpop.permute.xlu2 %9491 }
 0x68a   : > { %9529 = vst.msk [vmem:[%s10720_s15 + $0x58] sm:$0xff] %vm9517_vm1, %v9492_v5 }
 0x691   : > { %v9488_v61 = vpop.permute.xlu0 %9487 }
 0x692   : > { %9527 = vst.msk [vmem:[%s10720_s15 + $0x48] sm:$0xff] %vm9517_vm1, %v9488_v61 }
 0x699   : > { %v9490_v50 = vpop.permute.xlu1 %9489 }
 0x69a   : > { %9528 = vst.msk [vmem:[%s10720_s15 + $0x50] sm:$0xff] %vm9517_vm1, %v9490_v50 }
 0x6a1   : > { %v9498_v39 = vpop.permute.xlu2 %9497 }
 0x6a2   : > { %9532 = vst.msk [vmem:[%s10720_s15 + $0x70] sm:$0xff] %vm9517_vm1, %v9498_v39 }
 0x6a9   : > { %v9494_v36 = vpop.permute.xlu0 %9493 }
 0x6aa   : > { %9530 = vst.msk [vmem:[%s10720_s15 + $0x60] sm:$0xff] %vm9517_vm1, %v9494_v36 }
 0x6b1   : > { %v9496_v27 = vpop.permute.xlu1 %9495 }
 0x6b2   : > { %9531 = vst.msk [vmem:[%s10720_s15 + $0x68] sm:$0xff] %vm9517_vm1, %v9496_v27 }
 0x6c1   : > { %v9500_v49 = vpop.permute.xlu0 %9499 }
 0x6c2   : > { %9533 = vst.msk [vmem:[%s10720_s15 + $0x78] sm:$0xff] %vm9517_vm1, %v9500_v49 }
 0x6c3 PF: > { %s22_s25 = sadd.s32 1, %s10569_s25   ;;  %s14144_s21 = sld [smem:[#allocation4_spill]] }
 0x6c4   : > { %p19_p1 = scmp.ge.s32.totalorder %s22_s25, 8   ;;  %s14145_s22 = sld [smem:[#allocation5_spill]] }
 0x6c5   : > { %s14146_s23 = sld [smem:[#allocation6_spill]] }
 0x6c6   : > { %s14147_s24 = sld [smem:[#allocation7_spill]]  ;;  %21 = sbr.rel (!%p19_p1) target bundleno = 4 (0x4), region = 166 }

</bundles_post_ra>
